<compile_context>
chip_gen: v6e
topology: v6e:2x2x1
jax: 0.10.0
libtpu: 0.0.40
codegen_flags: <defaults>
</compile_context>

<pallas_src>
import functools

import jax
import jax.numpy as jnp
from jax.experimental import pallas as pl
from jax.experimental.pallas import tpu as pltpu

# ---------------------------------------------------------------------------
# Static network configuration (cfg = [16, 'M', 32, 'M'] => flatten size = 512)
# ---------------------------------------------------------------------------
H = W = 16            # input spatial size
CIN = 3               # input channels
C1 = 16               # conv1 output channels
C2 = 32               # conv2 output channels
NUM_CLASSES = 10
EPS = 1e-5

LANES = 128           # pad every channel-like dim to the 128-lane width
CIN_P = LANES
C1_P = LANES
C2_P = LANES
CLS_P = LANES

H1, W1 = H, W                     # conv1 output spatial (16, 16)
HP1, WP1 = H1 // 2, W1 // 2       # after pool1 (8, 8)
HP2, WP2 = HP1 // 2, WP1 // 2     # after pool2 (4, 4)


# ---------------------------------------------------------------------------
# Fused kernel: one batch element per grid step, everything VMEM-resident
# ---------------------------------------------------------------------------
def _vgg_fused_kernel(x_ref, w1_ref, b1_ref, w2_ref, b2_ref, wc_ref, bc_ref,
                      o_ref, p1pad_ref, *, apply_softmax):
    """x_ref   : (1, 2, H+2, (W+2)//2, CIN_P) bf16  padded input, split by column parity
       w1_ref  : (9, CIN_P, C1_P) bf16              conv1 (BN scale folded), k = kh*3+kw
       b1_ref  : (1, C1_P) f32                      folded BN bias
       w2_ref  : (9, C1_P, C2_P) bf16
       b2_ref  : (1, C2_P) f32
       wc_ref  : (HP2*WP2, C2_P, CLS_P) bf16        classifier reordered (spatial, chan, class)
       bc_ref  : (1, CLS_P) f32
       o_ref   : (1, 1, CLS_P) f32                  probs / logits, classes on lanes
       p1pad_ref : VMEM (HP1+2, WP1+2, C1_P) f32    zero-padded pool1 output (conv2 input)
    """
    f32 = jnp.float32

    # ---- conv1 + BN + ReLU, split by output-column parity (makes pool1 strided-free) ----
    y_par = []
    for wo in range(2):                             # parity of conv1 output column
        acc = jnp.zeros((H1 * WP1, C1_P), f32)
        for kh in range(3):
            for kw in range(3):
                t = wo + kw                         # padded input column = 2*j + t
                xs = x_ref[0, t % 2, kh:kh + H1, t // 2:t // 2 + WP1, :]   # (16, 8, CIN_P)
                xm = xs.reshape(H1 * WP1, CIN_P)                           # rows = h*8 + j
                acc = acc + jnp.dot(xm, w1_ref[kh * 3 + kw],
                                    preferred_element_type=f32)
        y_par.append(jnp.maximum(acc + b1_ref[...], 0.0))

    # ---- 2x2 max-pool #1: W-pool = parity max, H-pool = leading-dim reshape + max ----
    pw = jnp.maximum(y_par[0], y_par[1])                        # (128, C1_P), rows = h*8 + j
    p1 = pw.reshape(HP1, 2, WP1, C1_P).max(axis=1)              # (8, 8, C1_P)

    # stage pool1 output (with zero border) in VMEM scratch for conv2's shifted reads
    p1pad_ref[...] = jnp.zeros_like(p1pad_ref)
    p1pad_ref[1:1 + HP1, 1:1 + WP1, :] = p1

    # ---- conv2 + BN + ReLU: 9 shifted matmuls over the VMEM-resident padded map ----
    acc2 = jnp.zeros((HP1 * WP1, C2_P), f32)
    for kh in range(3):
        for kw in range(3):
            ps = p1pad_ref[kh:kh + HP1, kw:kw + WP1, :]         # (8, 8, C1_P) f32
            pm = ps.reshape(HP1 * WP1, C1_P).astype(jnp.bfloat16)
            acc2 = acc2 + jnp.dot(pm, w2_ref[kh * 3 + kw],
                                  preferred_element_type=f32)
    y2 = jnp.maximum(acc2 + b2_ref[...], 0.0)                   # (64, C2_P), rows = i2*8 + j2

    # ---- 2x2 max-pool #2 fused with the classifier (Linear 512 -> num_classes) ----
    logits = bc_ref[...].astype(f32)                            # (1, CLS_P)
    for hp in range(HP2):
        for wp in range(WP2):
            r0 = 2 * hp * WP1 + 2 * wp
            feat = jnp.maximum(
                jnp.maximum(y2[r0:r0 + 1, :], y2[r0 + 1:r0 + 2, :]),
                jnp.maximum(y2[r0 + WP1:r0 + WP1 + 1, :],
                            y2[r0 + WP1 + 1:r0 + WP1 + 2, :]))              # (1, C2_P)
            logits = logits + jnp.dot(feat.astype(jnp.bfloat16),
                                      wc_ref[hp * WP2 + wp],
                                      preferred_element_type=f32)

    # ---- softmax over the real classes only (padded lanes masked out) ----
    if apply_softmax:
        lane = jax.lax.broadcasted_iota(jnp.int32, (1, CLS_P), 1)
        logits = jnp.where(lane < NUM_CLASSES, logits, -1e30)
        m = jnp.max(logits, axis=1, keepdims=True)
        e = jnp.exp(logits - m)
        s = jnp.sum(e, axis=1, keepdims=True)
        out = e * pl.reciprocal(s, approx=True)
    else:
        out = logits
    o_ref[0] = out.astype(o_ref.dtype)


# ---------------------------------------------------------------------------
# Wrapper: constant weight transforms (fold BN, pad to lanes, reorder classifier)
# ---------------------------------------------------------------------------
def _fold_conv_bn(w_oihw, conv_b, gamma, beta, rmean, rvar, cin_p, cout_p):
    """(O,I,3,3) conv weight + inference BN -> bf16 (9, cin_p, cout_p) with BN scale folded,
    plus an f32 bias row (1, cout_p)."""
    cout, cin = w_oihw.shape[0], w_oihw.shape[1]
    scale = gamma / jnp.sqrt(rvar + EPS)
    w_mat = jnp.transpose(w_oihw, (2, 3, 1, 0)).reshape(9, cin, cout) * scale
    w_pad = jnp.zeros((9, cin_p, cout_p), jnp.float32).at[:, :cin, :cout].set(w_mat)
    bias = beta + (conv_b - rmean) * scale
    b_pad = jnp.zeros((1, cout_p), jnp.float32).at[0, :cout].set(bias)
    return w_pad.astype(jnp.bfloat16), b_pad


def pack_params(feat_params, cls_params):
    w1p, b1p = _fold_conv_bn(*feat_params[0][1], CIN_P, C1_P)
    w2p, b2p = _fold_conv_bn(*feat_params[2][1], C1_P, C2_P)
    lw, lb = cls_params                                    # (nc, 512), (nc,)
    # PyTorch flatten order is (c, h, w); reorder to (spatial, channel, class) for the kernel.
    wc = jnp.transpose(lw.reshape(NUM_CLASSES, C2, HP2, WP2), (2, 3, 1, 0))
    wc = wc.reshape(HP2 * WP2, C2, NUM_CLASSES)
    wcp = (jnp.zeros((HP2 * WP2, C2_P, CLS_P), jnp.float32)
           .at[:, :C2, :NUM_CLASSES].set(wc).astype(jnp.bfloat16))
    bcp = jnp.zeros((1, CLS_P), jnp.float32).at[0, :NUM_CLASSES].set(lb)
    return w1p, b1p, w2p, b2p, wcp, bcp


def _prep_input(x_nchw):
    """NCHW -> lane-padded NHWC, spatially zero-padded, split by padded-column parity:
    (N, 2, H+2, (W+2)//2, CIN_P) bf16 with x_r[n, o, ph, j, :] = x_pad[n, ph, 2*j + o, :]."""
    n = x_nchw.shape[0]
    x = jnp.transpose(x_nchw, (0, 2, 3, 1))                                 # NHWC
    xp = jnp.pad(x, ((0, 0), (1, 1), (1, 1), (0, CIN_P - CIN)))             # (N, 18, 18, 128)
    xr = xp.reshape(n, H + 2, (W + 2) // 2, 2, CIN_P)
    xr = jnp.transpose(xr, (0, 3, 1, 2, 4))                                 # (N, 2, 18, 9, 128)
    return xr.astype(jnp.bfloat16)


@functools.partial(jax.jit, static_argnames=("softmax",))
def _vgg_fused_forward(x_nchw, w1p, b1p, w2p, b2p, wcp, bcp, softmax=True):
    n = x_nchw.shape[0]
    xr = _prep_input(x_nchw)
    out = pl.pallas_call(
        functools.partial(_vgg_fused_kernel, apply_softmax=softmax),
        out_shape=jax.ShapeDtypeStruct((n, 1, CLS_P), jnp.float32),
        grid=(n,),
        in_specs=[
            pl.BlockSpec((1, 2, H + 2, (W + 2) // 2, CIN_P),
                         lambda i: (i, 0, 0, 0, 0)),
            pl.BlockSpec((9, CIN_P, C1_P), lambda i: (0, 0, 0)),
            pl.BlockSpec((1, C1_P), lambda i: (0, 0)),
            pl.BlockSpec((9, C1_P, C2_P), lambda i: (0, 0, 0)),
            pl.BlockSpec((1, C2_P), lambda i: (0, 0)),
            pl.BlockSpec((HP2 * WP2, C2_P, CLS_P), lambda i: (0, 0, 0)),
            pl.BlockSpec((1, CLS_P), lambda i: (0, 0)),
        ],
        out_specs=pl.BlockSpec((1, 1, CLS_P), lambda i: (i, 0, 0)),
        scratch_shapes=[pltpu.VMEM((HP1 + 2, WP1 + 2, C1_P), jnp.float32)],
        compiler_params=pltpu.CompilerParams(
            dimension_semantics=("parallel",),          # batch across TCs (2x on v7x)
            vmem_limit_bytes=32 * 1024 * 1024),         # ~2.5 MiB used; safe on v7x's 64 MiB
    )(xr, w1p, b1p, w2p, b2p, wcp, bcp)
    return out.reshape(n, CLS_P)[:, :NUM_CLASSES]


def vgg_forward(x_nchw, feat_params, cls_params, softmax=True):
    return _vgg_fused_forward(x_nchw, *pack_params(feat_params, cls_params),
                              softmax=softmax)


# ---------------------------------------------------------------------------
# Parameter init (mirrors VGG._initialize_weights) + plain-JAX reference
# ---------------------------------------------------------------------------
def init_params(key, num_classes=NUM_CLASSES):
    feat_params = []
    c = CIN
    for v in (C1, 'M', C2, 'M'):
        if v == 'M':
            feat_params.append(('M', None))
            continue
        key, k1 = jax.random.split(key)
        fan_in = c * 9
        w = jax.random.normal(k1, (v, c, 3, 3), jnp.float32) * jnp.sqrt(2.0 / fan_in)
        feat_params.append(('C', (w,
                                  jnp.zeros((v,), jnp.float32),   # conv bias -> 0
                                  jnp.ones((v,), jnp.float32),    # BN gamma  -> 1
                                  jnp.zeros((v,), jnp.float32),   # BN beta   -> 0
                                  jnp.zeros((v,), jnp.float32),   # running mean
                                  jnp.ones((v,), jnp.float32))))  # running var
        c = v
    key, k2 = jax.random.split(key)
    lin_w = jax.random.normal(k2, (num_classes, C2 * HP2 * WP2), jnp.float32) * 0.01
    lin_b = jnp.zeros((num_classes,), jnp.float32)
    return feat_params, (lin_w, lin_b)


def vgg_reference(x_nchw, feat_params, cls_params, softmax=True):
    """Plain-JAX reference with the same numerical recipe (BN folded, bf16 matmul
    operands, f32 accumulation, exact softmax)."""
    x = jnp.transpose(x_nchw, (0, 2, 3, 1)).astype(jnp.float32)
    for kind, p in feat_params:
        if kind == 'M':
            n, h, w, c = x.shape
            x = jnp.max(x.reshape(n, h // 2, 2, w // 2, 2, c), axis=(2, 4))
        else:
            wt, cb, g, b, rm, rv = p
            scale = g / jnp.sqrt(rv + EPS)
            w_hwio = (jnp.transpose(wt, (2, 3, 1, 0)) * scale).astype(jnp.bfloat16)
            bias = b + (cb - rm) * scale
            y = jax.lax.conv_general_dilated(
                x.astype(jnp.bfloat16), w_hwio, (1, 1), 'SAME',
                dimension_numbers=('NHWC', 'HWIO', 'NHWC'),
                preferred_element_type=jnp.float32)
            x = jnp.maximum(y + bias, 0.0)
    n = x.shape[0]
    feats = jnp.transpose(x, (0, 3, 1, 2)).reshape(n, -1)       # NCHW flatten order
    lw, lb = cls_params
    logits = jnp.dot(feats.astype(jnp.bfloat16), lw.T.astype(jnp.bfloat16),
                     preferred_element_type=jnp.float32) + lb
    return jax.nn.softmax(logits, axis=1) if softmax else logits


if __name__ == "__main__":
    key = jax.random.PRNGKey(0)
    key, kx, kp = jax.random.split(key, 3)
    x = jax.random.normal(kx, (2, CIN, H, W), jnp.float32)      # NCHW like PyTorch

    feat_params, cls_params = init_params(kp)

    out = vgg_forward(x, feat_params, cls_params, softmax=True)
    out = jax.block_until_ready(out)
    ref = vgg_reference(x, feat_params, cls_params, softmax=True)

    assert out.shape == (2, NUM_CLASSES)
    assert jnp.allclose(jnp.sum(out, axis=1), 1.0, atol=1e-2)
    assert jnp.allclose(out, ref, atol=1e-2), float(jnp.max(jnp.abs(out - ref)))

    logits = vgg_forward(x, feat_params, cls_params, softmax=False)
    logits_ref = vgg_reference(x, feat_params, cls_params, softmax=False)
    assert jnp.allclose(logits, logits_ref, atol=1e-2, rtol=1e-2), \
        float(jnp.max(jnp.abs(logits - logits_ref)))

    print("KERNEL_OK")
</pallas_src>

<mosaic_0001>
module attributes {stable_mosaic.version = 11 : i64} {
  func.func @_vgg_fused_kernel(%arg0: i32, %arg1: memref<1x2x18x9x128xbf16, #tpu.memory_space<vmem>>, %arg2: memref<9x128x128xbf16, #tpu.memory_space<vmem>>, %arg3: memref<1x128xf32, #tpu.memory_space<vmem>>, %arg4: memref<9x128x128xbf16, #tpu.memory_space<vmem>>, %arg5: memref<1x128xf32, #tpu.memory_space<vmem>>, %arg6: memref<16x128x128xbf16, #tpu.memory_space<vmem>>, %arg7: memref<1x128xf32, #tpu.memory_space<vmem>>, %arg8: memref<1x1x128xf32, #tpu.memory_space<vmem>>, %arg9: memref<10x10x128xf32, #tpu.memory_space<vmem>>) attributes {dimension_semantics = [#tpu.dimension_semantics<parallel>], iteration_bounds = array<i64: 2>, scalar_prefetch = 0 : i64, scratch_operands = 1 : i64, tpu.core_type = #tpu.core_type<tc>, window_params = [{transform_indices = @transform_0, window_bounds = array<i64: 1, 2, 18, 9, 128>}, {pipeline_mode = #tpu.pipeline_mode<synchronous>, transform_indices = @transform_1, window_bounds = array<i64: 9, 128, 128>}, {pipeline_mode = #tpu.pipeline_mode<synchronous>, transform_indices = @transform_2, window_bounds = array<i64: 1, 128>}, {pipeline_mode = #tpu.pipeline_mode<synchronous>, transform_indices = @transform_3, window_bounds = array<i64: 9, 128, 128>}, {pipeline_mode = #tpu.pipeline_mode<synchronous>, transform_indices = @transform_4, window_bounds = array<i64: 1, 128>}, {pipeline_mode = #tpu.pipeline_mode<synchronous>, transform_indices = @transform_5, window_bounds = array<i64: 16, 128, 128>}, {pipeline_mode = #tpu.pipeline_mode<synchronous>, transform_indices = @transform_6, window_bounds = array<i64: 1, 128>}, {transform_indices = @transform_7, window_bounds = array<i64: 1, 1, 128>}]} {
    %cst = arith.constant 0.000000e+00 : f32
    %0 = vector.broadcast %cst : f32 to vector<128x128xf32>
    %c0 = arith.constant 0 : index
    %c0_0 = arith.constant 0 : index
    %c0_1 = arith.constant 0 : index
    %c0_2 = arith.constant 0 : index
    %c0_3 = arith.constant 0 : index
    %1 = vector.load %arg1[%c0, %c0_0, %c0_1, %c0_2, %c0_3] : memref<1x2x18x9x128xbf16, #tpu.memory_space<vmem>>, vector<1x1x16x8x128xbf16>
    %2 = vector.shape_cast %1 : vector<1x1x16x8x128xbf16> to vector<16x8x128xbf16>
    %3 = vector.shape_cast %2 : vector<16x8x128xbf16> to vector<128x128xbf16>
    %c0_4 = arith.constant 0 : index
    %c0_5 = arith.constant 0 : index
    %c0_6 = arith.constant 0 : index
    %4 = vector.load %arg2[%c0_4, %c0_5, %c0_6] : memref<9x128x128xbf16, #tpu.memory_space<vmem>>, vector<1x128x128xbf16>
    %5 = vector.shape_cast %4 : vector<1x128x128xbf16> to vector<128x128xbf16>
    %cst_7 = arith.constant dense<0.000000e+00> : vector<128x128xf32>
    %6 = tpu.matmul %3, %5, %cst_7 {dimension_numbers = #tpu.dot_dimension_numbers<[1], [0], [0], [1], [0, 0, 1, 1], [], []>} : vector<128x128xbf16>, vector<128x128xbf16>, vector<128x128xf32> -> vector<128x128xf32>
    %7 = arith.addf %0, %6 : vector<128x128xf32>
    %c0_8 = arith.constant 0 : index
    %c1 = arith.constant 1 : index
    %c0_9 = arith.constant 0 : index
    %c0_10 = arith.constant 0 : index
    %c0_11 = arith.constant 0 : index
    %8 = vector.load %arg1[%c0_8, %c1, %c0_9, %c0_10, %c0_11] : memref<1x2x18x9x128xbf16, #tpu.memory_space<vmem>>, vector<1x1x16x8x128xbf16>
    %9 = vector.shape_cast %8 : vector<1x1x16x8x128xbf16> to vector<16x8x128xbf16>
    %10 = vector.shape_cast %9 : vector<16x8x128xbf16> to vector<128x128xbf16>
    %c1_12 = arith.constant 1 : index
    %c0_13 = arith.constant 0 : index
    %c0_14 = arith.constant 0 : index
    %11 = vector.load %arg2[%c1_12, %c0_13, %c0_14] : memref<9x128x128xbf16, #tpu.memory_space<vmem>>, vector<1x128x128xbf16>
    %12 = vector.shape_cast %11 : vector<1x128x128xbf16> to vector<128x128xbf16>
    %cst_15 = arith.constant dense<0.000000e+00> : vector<128x128xf32>
    %13 = tpu.matmul %10, %12, %cst_15 {dimension_numbers = #tpu.dot_dimension_numbers<[1], [0], [0], [1], [0, 0, 1, 1], [], []>} : vector<128x128xbf16>, vector<128x128xbf16>, vector<128x128xf32> -> vector<128x128xf32>
    %14 = arith.addf %7, %13 : vector<128x128xf32>
    %c0_16 = arith.constant 0 : index
    %c0_17 = arith.constant 0 : index
    %c0_18 = arith.constant 0 : index
    %c1_19 = arith.constant 1 : index
    %c0_20 = arith.constant 0 : index
    %15 = vector.load %arg1[%c0_16, %c0_17, %c0_18, %c1_19, %c0_20] : memref<1x2x18x9x128xbf16, #tpu.memory_space<vmem>>, vector<1x1x16x8x128xbf16>
    %16 = vector.shape_cast %15 : vector<1x1x16x8x128xbf16> to vector<16x8x128xbf16>
    %17 = vector.shape_cast %16 : vector<16x8x128xbf16> to vector<128x128xbf16>
    %c2 = arith.constant 2 : index
    %c0_21 = arith.constant 0 : index
    %c0_22 = arith.constant 0 : index
    %18 = vector.load %arg2[%c2, %c0_21, %c0_22] : memref<9x128x128xbf16, #tpu.memory_space<vmem>>, vector<1x128x128xbf16>
    %19 = vector.shape_cast %18 : vector<1x128x128xbf16> to vector<128x128xbf16>
    %cst_23 = arith.constant dense<0.000000e+00> : vector<128x128xf32>
    %20 = tpu.matmul %17, %19, %cst_23 {dimension_numbers = #tpu.dot_dimension_numbers<[1], [0], [0], [1], [0, 0, 1, 1], [], []>} : vector<128x128xbf16>, vector<128x128xbf16>, vector<128x128xf32> -> vector<128x128xf32>
    %21 = arith.addf %14, %20 : vector<128x128xf32>
    %c0_24 = arith.constant 0 : index
    %c0_25 = arith.constant 0 : index
    %c1_26 = arith.constant 1 : index
    %c0_27 = arith.constant 0 : index
    %c0_28 = arith.constant 0 : index
    %22 = vector.load %arg1[%c0_24, %c0_25, %c1_26, %c0_27, %c0_28] : memref<1x2x18x9x128xbf16, #tpu.memory_space<vmem>>, vector<1x1x16x8x128xbf16>
    %23 = vector.shape_cast %22 : vector<1x1x16x8x128xbf16> to vector<16x8x128xbf16>
    %24 = vector.shape_cast %23 : vector<16x8x128xbf16> to vector<128x128xbf16>
    %c3 = arith.constant 3 : index
    %c0_29 = arith.constant 0 : index
    %c0_30 = arith.constant 0 : index
    %25 = vector.load %arg2[%c3, %c0_29, %c0_30] : memref<9x128x128xbf16, #tpu.memory_space<vmem>>, vector<1x128x128xbf16>
    %26 = vector.shape_cast %25 : vector<1x128x128xbf16> to vector<128x128xbf16>
    %cst_31 = arith.constant dense<0.000000e+00> : vector<128x128xf32>
    %27 = tpu.matmul %24, %26, %cst_31 {dimension_numbers = #tpu.dot_dimension_numbers<[1], [0], [0], [1], [0, 0, 1, 1], [], []>} : vector<128x128xbf16>, vector<128x128xbf16>, vector<128x128xf32> -> vector<128x128xf32>
    %28 = arith.addf %21, %27 : vector<128x128xf32>
    %c0_32 = arith.constant 0 : index
    %c1_33 = arith.constant 1 : index
    %c1_34 = arith.constant 1 : index
    %c0_35 = arith.constant 0 : index
    %c0_36 = arith.constant 0 : index
    %29 = vector.load %arg1[%c0_32, %c1_33, %c1_34, %c0_35, %c0_36] : memref<1x2x18x9x128xbf16, #tpu.memory_space<vmem>>, vector<1x1x16x8x128xbf16>
    %30 = vector.shape_cast %29 : vector<1x1x16x8x128xbf16> to vector<16x8x128xbf16>
    %31 = vector.shape_cast %30 : vector<16x8x128xbf16> to vector<128x128xbf16>
    %c4 = arith.constant 4 : index
    %c0_37 = arith.constant 0 : index
    %c0_38 = arith.constant 0 : index
    %32 = vector.load %arg2[%c4, %c0_37, %c0_38] : memref<9x128x128xbf16, #tpu.memory_space<vmem>>, vector<1x128x128xbf16>
    %33 = vector.shape_cast %32 : vector<1x128x128xbf16> to vector<128x128xbf16>
    %cst_39 = arith.constant dense<0.000000e+00> : vector<128x128xf32>
    %34 = tpu.matmul %31, %33, %cst_39 {dimension_numbers = #tpu.dot_dimension_numbers<[1], [0], [0], [1], [0, 0, 1, 1], [], []>} : vector<128x128xbf16>, vector<128x128xbf16>, vector<128x128xf32> -> vector<128x128xf32>
    %35 = arith.addf %28, %34 : vector<128x128xf32>
    %c0_40 = arith.constant 0 : index
    %c0_41 = arith.constant 0 : index
    %c1_42 = arith.constant 1 : index
    %c1_43 = arith.constant 1 : index
    %c0_44 = arith.constant 0 : index
    %36 = vector.load %arg1[%c0_40, %c0_41, %c1_42, %c1_43, %c0_44] : memref<1x2x18x9x128xbf16, #tpu.memory_space<vmem>>, vector<1x1x16x8x128xbf16>
    %37 = vector.shape_cast %36 : vector<1x1x16x8x128xbf16> to vector<16x8x128xbf16>
    %38 = vector.shape_cast %37 : vector<16x8x128xbf16> to vector<128x128xbf16>
    %c5 = arith.constant 5 : index
    %c0_45 = arith.constant 0 : index
    %c0_46 = arith.constant 0 : index
    %39 = vector.load %arg2[%c5, %c0_45, %c0_46] : memref<9x128x128xbf16, #tpu.memory_space<vmem>>, vector<1x128x128xbf16>
    %40 = vector.shape_cast %39 : vector<1x128x128xbf16> to vector<128x128xbf16>
    %cst_47 = arith.constant dense<0.000000e+00> : vector<128x128xf32>
    %41 = tpu.matmul %38, %40, %cst_47 {dimension_numbers = #tpu.dot_dimension_numbers<[1], [0], [0], [1], [0, 0, 1, 1], [], []>} : vector<128x128xbf16>, vector<128x128xbf16>, vector<128x128xf32> -> vector<128x128xf32>
    %42 = arith.addf %35, %41 : vector<128x128xf32>
    %c0_48 = arith.constant 0 : index
    %c0_49 = arith.constant 0 : index
    %c2_50 = arith.constant 2 : index
    %c0_51 = arith.constant 0 : index
    %c0_52 = arith.constant 0 : index
    %43 = vector.load %arg1[%c0_48, %c0_49, %c2_50, %c0_51, %c0_52] : memref<1x2x18x9x128xbf16, #tpu.memory_space<vmem>>, vector<1x1x16x8x128xbf16>
    %44 = vector.shape_cast %43 : vector<1x1x16x8x128xbf16> to vector<16x8x128xbf16>
    %45 = vector.shape_cast %44 : vector<16x8x128xbf16> to vector<128x128xbf16>
    %c6 = arith.constant 6 : index
    %c0_53 = arith.constant 0 : index
    %c0_54 = arith.constant 0 : index
    %46 = vector.load %arg2[%c6, %c0_53, %c0_54] : memref<9x128x128xbf16, #tpu.memory_space<vmem>>, vector<1x128x128xbf16>
    %47 = vector.shape_cast %46 : vector<1x128x128xbf16> to vector<128x128xbf16>
    %cst_55 = arith.constant dense<0.000000e+00> : vector<128x128xf32>
    %48 = tpu.matmul %45, %47, %cst_55 {dimension_numbers = #tpu.dot_dimension_numbers<[1], [0], [0], [1], [0, 0, 1, 1], [], []>} : vector<128x128xbf16>, vector<128x128xbf16>, vector<128x128xf32> -> vector<128x128xf32>
    %49 = arith.addf %42, %48 : vector<128x128xf32>
    %c0_56 = arith.constant 0 : index
    %c1_57 = arith.constant 1 : index
    %c2_58 = arith.constant 2 : index
    %c0_59 = arith.constant 0 : index
    %c0_60 = arith.constant 0 : index
    %50 = vector.load %arg1[%c0_56, %c1_57, %c2_58, %c0_59, %c0_60] : memref<1x2x18x9x128xbf16, #tpu.memory_space<vmem>>, vector<1x1x16x8x128xbf16>
    %51 = vector.shape_cast %50 : vector<1x1x16x8x128xbf16> to vector<16x8x128xbf16>
    %52 = vector.shape_cast %51 : vector<16x8x128xbf16> to vector<128x128xbf16>
    %c7 = arith.constant 7 : index
    %c0_61 = arith.constant 0 : index
    %c0_62 = arith.constant 0 : index
    %53 = vector.load %arg2[%c7, %c0_61, %c0_62] : memref<9x128x128xbf16, #tpu.memory_space<vmem>>, vector<1x128x128xbf16>
    %54 = vector.shape_cast %53 : vector<1x128x128xbf16> to vector<128x128xbf16>
    %cst_63 = arith.constant dense<0.000000e+00> : vector<128x128xf32>
    %55 = tpu.matmul %52, %54, %cst_63 {dimension_numbers = #tpu.dot_dimension_numbers<[1], [0], [0], [1], [0, 0, 1, 1], [], []>} : vector<128x128xbf16>, vector<128x128xbf16>, vector<128x128xf32> -> vector<128x128xf32>
    %56 = arith.addf %49, %55 : vector<128x128xf32>
    %c0_64 = arith.constant 0 : index
    %c0_65 = arith.constant 0 : index
    %c2_66 = arith.constant 2 : index
    %c1_67 = arith.constant 1 : index
    %c0_68 = arith.constant 0 : index
    %57 = vector.load %arg1[%c0_64, %c0_65, %c2_66, %c1_67, %c0_68] : memref<1x2x18x9x128xbf16, #tpu.memory_space<vmem>>, vector<1x1x16x8x128xbf16>
    %58 = vector.shape_cast %57 : vector<1x1x16x8x128xbf16> to vector<16x8x128xbf16>
    %59 = vector.shape_cast %58 : vector<16x8x128xbf16> to vector<128x128xbf16>
    %c8 = arith.constant 8 : index
    %c0_69 = arith.constant 0 : index
    %c0_70 = arith.constant 0 : index
    %60 = vector.load %arg2[%c8, %c0_69, %c0_70] : memref<9x128x128xbf16, #tpu.memory_space<vmem>>, vector<1x128x128xbf16>
    %61 = vector.shape_cast %60 : vector<1x128x128xbf16> to vector<128x128xbf16>
    %cst_71 = arith.constant dense<0.000000e+00> : vector<128x128xf32>
    %62 = tpu.matmul %59, %61, %cst_71 {dimension_numbers = #tpu.dot_dimension_numbers<[1], [0], [0], [1], [0, 0, 1, 1], [], []>} : vector<128x128xbf16>, vector<128x128xbf16>, vector<128x128xf32> -> vector<128x128xf32>
    %63 = arith.addf %56, %62 : vector<128x128xf32>
    %c0_72 = arith.constant 0 : index
    %c0_73 = arith.constant 0 : index
    %64 = vector.load %arg3[%c0_72, %c0_73] : memref<1x128xf32, #tpu.memory_space<vmem>>, vector<1x128xf32>
    %65 = vector.broadcast %64 : vector<1x128xf32> to vector<128x128xf32>
    %66 = arith.addf %63, %65 : vector<128x128xf32>
    %cst_74 = arith.constant 0.000000e+00 : f32
    %67 = vector.broadcast %cst_74 : f32 to vector<128x128xf32>
    %68 = arith.maximumf %66, %67 : vector<128x128xf32>
    %cst_75 = arith.constant 0.000000e+00 : f32
    %69 = vector.broadcast %cst_75 : f32 to vector<128x128xf32>
    %c0_76 = arith.constant 0 : index
    %c1_77 = arith.constant 1 : index
    %c0_78 = arith.constant 0 : index
    %c0_79 = arith.constant 0 : index
    %c0_80 = arith.constant 0 : index
    %70 = vector.load %arg1[%c0_76, %c1_77, %c0_78, %c0_79, %c0_80] : memref<1x2x18x9x128xbf16, #tpu.memory_space<vmem>>, vector<1x1x16x8x128xbf16>
    %71 = vector.shape_cast %70 : vector<1x1x16x8x128xbf16> to vector<16x8x128xbf16>
    %72 = vector.shape_cast %71 : vector<16x8x128xbf16> to vector<128x128xbf16>
    %c0_81 = arith.constant 0 : index
    %c0_82 = arith.constant 0 : index
    %c0_83 = arith.constant 0 : index
    %73 = vector.load %arg2[%c0_81, %c0_82, %c0_83] : memref<9x128x128xbf16, #tpu.memory_space<vmem>>, vector<1x128x128xbf16>
    %74 = vector.shape_cast %73 : vector<1x128x128xbf16> to vector<128x128xbf16>
    %cst_84 = arith.constant dense<0.000000e+00> : vector<128x128xf32>
    %75 = tpu.matmul %72, %74, %cst_84 {dimension_numbers = #tpu.dot_dimension_numbers<[1], [0], [0], [1], [0, 0, 1, 1], [], []>} : vector<128x128xbf16>, vector<128x128xbf16>, vector<128x128xf32> -> vector<128x128xf32>
    %76 = arith.addf %69, %75 : vector<128x128xf32>
    %c0_85 = arith.constant 0 : index
    %c0_86 = arith.constant 0 : index
    %c0_87 = arith.constant 0 : index
    %c1_88 = arith.constant 1 : index
    %c0_89 = arith.constant 0 : index
    %77 = vector.load %arg1[%c0_85, %c0_86, %c0_87, %c1_88, %c0_89] : memref<1x2x18x9x128xbf16, #tpu.memory_space<vmem>>, vector<1x1x16x8x128xbf16>
    %78 = vector.shape_cast %77 : vector<1x1x16x8x128xbf16> to vector<16x8x128xbf16>
    %79 = vector.shape_cast %78 : vector<16x8x128xbf16> to vector<128x128xbf16>
    %c1_90 = arith.constant 1 : index
    %c0_91 = arith.constant 0 : index
    %c0_92 = arith.constant 0 : index
    %80 = vector.load %arg2[%c1_90, %c0_91, %c0_92] : memref<9x128x128xbf16, #tpu.memory_space<vmem>>, vector<1x128x128xbf16>
    %81 = vector.shape_cast %80 : vector<1x128x128xbf16> to vector<128x128xbf16>
    %cst_93 = arith.constant dense<0.000000e+00> : vector<128x128xf32>
    %82 = tpu.matmul %79, %81, %cst_93 {dimension_numbers = #tpu.dot_dimension_numbers<[1], [0], [0], [1], [0, 0, 1, 1], [], []>} : vector<128x128xbf16>, vector<128x128xbf16>, vector<128x128xf32> -> vector<128x128xf32>
    %83 = arith.addf %76, %82 : vector<128x128xf32>
    %c0_94 = arith.constant 0 : index
    %c1_95 = arith.constant 1 : index
    %c0_96 = arith.constant 0 : index
    %c1_97 = arith.constant 1 : index
    %c0_98 = arith.constant 0 : index
    %84 = vector.load %arg1[%c0_94, %c1_95, %c0_96, %c1_97, %c0_98] : memref<1x2x18x9x128xbf16, #tpu.memory_space<vmem>>, vector<1x1x16x8x128xbf16>
    %85 = vector.shape_cast %84 : vector<1x1x16x8x128xbf16> to vector<16x8x128xbf16>
    %86 = vector.shape_cast %85 : vector<16x8x128xbf16> to vector<128x128xbf16>
    %c2_99 = arith.constant 2 : index
    %c0_100 = arith.constant 0 : index
    %c0_101 = arith.constant 0 : index
    %87 = vector.load %arg2[%c2_99, %c0_100, %c0_101] : memref<9x128x128xbf16, #tpu.memory_space<vmem>>, vector<1x128x128xbf16>
    %88 = vector.shape_cast %87 : vector<1x128x128xbf16> to vector<128x128xbf16>
    %cst_102 = arith.constant dense<0.000000e+00> : vector<128x128xf32>
    %89 = tpu.matmul %86, %88, %cst_102 {dimension_numbers = #tpu.dot_dimension_numbers<[1], [0], [0], [1], [0, 0, 1, 1], [], []>} : vector<128x128xbf16>, vector<128x128xbf16>, vector<128x128xf32> -> vector<128x128xf32>
    %90 = arith.addf %83, %89 : vector<128x128xf32>
    %c0_103 = arith.constant 0 : index
    %c1_104 = arith.constant 1 : index
    %c1_105 = arith.constant 1 : index
    %c0_106 = arith.constant 0 : index
    %c0_107 = arith.constant 0 : index
    %91 = vector.load %arg1[%c0_103, %c1_104, %c1_105, %c0_106, %c0_107] : memref<1x2x18x9x128xbf16, #tpu.memory_space<vmem>>, vector<1x1x16x8x128xbf16>
    %92 = vector.shape_cast %91 : vector<1x1x16x8x128xbf16> to vector<16x8x128xbf16>
    %93 = vector.shape_cast %92 : vector<16x8x128xbf16> to vector<128x128xbf16>
    %c3_108 = arith.constant 3 : index
    %c0_109 = arith.constant 0 : index
    %c0_110 = arith.constant 0 : index
    %94 = vector.load %arg2[%c3_108, %c0_109, %c0_110] : memref<9x128x128xbf16, #tpu.memory_space<vmem>>, vector<1x128x128xbf16>
    %95 = vector.shape_cast %94 : vector<1x128x128xbf16> to vector<128x128xbf16>
    %cst_111 = arith.constant dense<0.000000e+00> : vector<128x128xf32>
    %96 = tpu.matmul %93, %95, %cst_111 {dimension_numbers = #tpu.dot_dimension_numbers<[1], [0], [0], [1], [0, 0, 1, 1], [], []>} : vector<128x128xbf16>, vector<128x128xbf16>, vector<128x128xf32> -> vector<128x128xf32>
    %97 = arith.addf %90, %96 : vector<128x128xf32>
    %c0_112 = arith.constant 0 : index
    %c0_113 = arith.constant 0 : index
    %c1_114 = arith.constant 1 : index
    %c1_115 = arith.constant 1 : index
    %c0_116 = arith.constant 0 : index
    %98 = vector.load %arg1[%c0_112, %c0_113, %c1_114, %c1_115, %c0_116] : memref<1x2x18x9x128xbf16, #tpu.memory_space<vmem>>, vector<1x1x16x8x128xbf16>
    %99 = vector.shape_cast %98 : vector<1x1x16x8x128xbf16> to vector<16x8x128xbf16>
    %100 = vector.shape_cast %99 : vector<16x8x128xbf16> to vector<128x128xbf16>
    %c4_117 = arith.constant 4 : index
    %c0_118 = arith.constant 0 : index
    %c0_119 = arith.constant 0 : index
    %101 = vector.load %arg2[%c4_117, %c0_118, %c0_119] : memref<9x128x128xbf16, #tpu.memory_space<vmem>>, vector<1x128x128xbf16>
    %102 = vector.shape_cast %101 : vector<1x128x128xbf16> to vector<128x128xbf16>
    %cst_120 = arith.constant dense<0.000000e+00> : vector<128x128xf32>
    %103 = tpu.matmul %100, %102, %cst_120 {dimension_numbers = #tpu.dot_dimension_numbers<[1], [0], [0], [1], [0, 0, 1, 1], [], []>} : vector<128x128xbf16>, vector<128x128xbf16>, vector<128x128xf32> -> vector<128x128xf32>
    %104 = arith.addf %97, %103 : vector<128x128xf32>
    %c0_121 = arith.constant 0 : index
    %c1_122 = arith.constant 1 : index
    %c1_123 = arith.constant 1 : index
    %c1_124 = arith.constant 1 : index
    %c0_125 = arith.constant 0 : index
    %105 = vector.load %arg1[%c0_121, %c1_122, %c1_123, %c1_124, %c0_125] : memref<1x2x18x9x128xbf16, #tpu.memory_space<vmem>>, vector<1x1x16x8x128xbf16>
    %106 = vector.shape_cast %105 : vector<1x1x16x8x128xbf16> to vector<16x8x128xbf16>
    %107 = vector.shape_cast %106 : vector<16x8x128xbf16> to vector<128x128xbf16>
    %c5_126 = arith.constant 5 : index
    %c0_127 = arith.constant 0 : index
    %c0_128 = arith.constant 0 : index
    %108 = vector.load %arg2[%c5_126, %c0_127, %c0_128] : memref<9x128x128xbf16, #tpu.memory_space<vmem>>, vector<1x128x128xbf16>
    %109 = vector.shape_cast %108 : vector<1x128x128xbf16> to vector<128x128xbf16>
    %cst_129 = arith.constant dense<0.000000e+00> : vector<128x128xf32>
    %110 = tpu.matmul %107, %109, %cst_129 {dimension_numbers = #tpu.dot_dimension_numbers<[1], [0], [0], [1], [0, 0, 1, 1], [], []>} : vector<128x128xbf16>, vector<128x128xbf16>, vector<128x128xf32> -> vector<128x128xf32>
    %111 = arith.addf %104, %110 : vector<128x128xf32>
    %c0_130 = arith.constant 0 : index
    %c1_131 = arith.constant 1 : index
    %c2_132 = arith.constant 2 : index
    %c0_133 = arith.constant 0 : index
    %c0_134 = arith.constant 0 : index
    %112 = vector.load %arg1[%c0_130, %c1_131, %c2_132, %c0_133, %c0_134] : memref<1x2x18x9x128xbf16, #tpu.memory_space<vmem>>, vector<1x1x16x8x128xbf16>
    %113 = vector.shape_cast %112 : vector<1x1x16x8x128xbf16> to vector<16x8x128xbf16>
    %114 = vector.shape_cast %113 : vector<16x8x128xbf16> to vector<128x128xbf16>
    %c6_135 = arith.constant 6 : index
    %c0_136 = arith.constant 0 : index
    %c0_137 = arith.constant 0 : index
    %115 = vector.load %arg2[%c6_135, %c0_136, %c0_137] : memref<9x128x128xbf16, #tpu.memory_space<vmem>>, vector<1x128x128xbf16>
    %116 = vector.shape_cast %115 : vector<1x128x128xbf16> to vector<128x128xbf16>
    %cst_138 = arith.constant dense<0.000000e+00> : vector<128x128xf32>
    %117 = tpu.matmul %114, %116, %cst_138 {dimension_numbers = #tpu.dot_dimension_numbers<[1], [0], [0], [1], [0, 0, 1, 1], [], []>} : vector<128x128xbf16>, vector<128x128xbf16>, vector<128x128xf32> -> vector<128x128xf32>
    %118 = arith.addf %111, %117 : vector<128x128xf32>
    %c0_139 = arith.constant 0 : index
    %c0_140 = arith.constant 0 : index
    %c2_141 = arith.constant 2 : index
    %c1_142 = arith.constant 1 : index
    %c0_143 = arith.constant 0 : index
    %119 = vector.load %arg1[%c0_139, %c0_140, %c2_141, %c1_142, %c0_143] : memref<1x2x18x9x128xbf16, #tpu.memory_space<vmem>>, vector<1x1x16x8x128xbf16>
    %120 = vector.shape_cast %119 : vector<1x1x16x8x128xbf16> to vector<16x8x128xbf16>
    %121 = vector.shape_cast %120 : vector<16x8x128xbf16> to vector<128x128xbf16>
    %c7_144 = arith.constant 7 : index
    %c0_145 = arith.constant 0 : index
    %c0_146 = arith.constant 0 : index
    %122 = vector.load %arg2[%c7_144, %c0_145, %c0_146] : memref<9x128x128xbf16, #tpu.memory_space<vmem>>, vector<1x128x128xbf16>
    %123 = vector.shape_cast %122 : vector<1x128x128xbf16> to vector<128x128xbf16>
    %cst_147 = arith.constant dense<0.000000e+00> : vector<128x128xf32>
    %124 = tpu.matmul %121, %123, %cst_147 {dimension_numbers = #tpu.dot_dimension_numbers<[1], [0], [0], [1], [0, 0, 1, 1], [], []>} : vector<128x128xbf16>, vector<128x128xbf16>, vector<128x128xf32> -> vector<128x128xf32>
    %125 = arith.addf %118, %124 : vector<128x128xf32>
    %c0_148 = arith.constant 0 : index
    %c1_149 = arith.constant 1 : index
    %c2_150 = arith.constant 2 : index
    %c1_151 = arith.constant 1 : index
    %c0_152 = arith.constant 0 : index
    %126 = vector.load %arg1[%c0_148, %c1_149, %c2_150, %c1_151, %c0_152] : memref<1x2x18x9x128xbf16, #tpu.memory_space<vmem>>, vector<1x1x16x8x128xbf16>
    %127 = vector.shape_cast %126 : vector<1x1x16x8x128xbf16> to vector<16x8x128xbf16>
    %128 = vector.shape_cast %127 : vector<16x8x128xbf16> to vector<128x128xbf16>
    %c8_153 = arith.constant 8 : index
    %c0_154 = arith.constant 0 : index
    %c0_155 = arith.constant 0 : index
    %129 = vector.load %arg2[%c8_153, %c0_154, %c0_155] : memref<9x128x128xbf16, #tpu.memory_space<vmem>>, vector<1x128x128xbf16>
    %130 = vector.shape_cast %129 : vector<1x128x128xbf16> to vector<128x128xbf16>
    %cst_156 = arith.constant dense<0.000000e+00> : vector<128x128xf32>
    %131 = tpu.matmul %128, %130, %cst_156 {dimension_numbers = #tpu.dot_dimension_numbers<[1], [0], [0], [1], [0, 0, 1, 1], [], []>} : vector<128x128xbf16>, vector<128x128xbf16>, vector<128x128xf32> -> vector<128x128xf32>
    %132 = arith.addf %125, %131 : vector<128x128xf32>
    %c0_157 = arith.constant 0 : index
    %c0_158 = arith.constant 0 : index
    %133 = vector.load %arg3[%c0_157, %c0_158] : memref<1x128xf32, #tpu.memory_space<vmem>>, vector<1x128xf32>
    %134 = vector.broadcast %133 : vector<1x128xf32> to vector<128x128xf32>
    %135 = arith.addf %132, %134 : vector<128x128xf32>
    %cst_159 = arith.constant 0.000000e+00 : f32
    %136 = vector.broadcast %cst_159 : f32 to vector<128x128xf32>
    %137 = arith.maximumf %135, %136 : vector<128x128xf32>
    %138 = arith.maximumf %68, %137 : vector<128x128xf32>
    %139 = vector.shape_cast %138 : vector<128x128xf32> to vector<8x2x8x128xf32>
    %cst_160 = arith.constant dense<0xFF800000> : vector<8x8x128xf32>
    %140 = vector.multi_reduction <maximumf>, %139, %cst_160 [1] : vector<8x2x8x128xf32> to vector<8x8x128xf32>
    %cst_161 = arith.constant 0.000000e+00 : f32
    %141 = vector.broadcast %cst_161 : f32 to vector<10x10x128xf32>
    %c0_162 = arith.constant 0 : index
    %c0_163 = arith.constant 0 : index
    %c0_164 = arith.constant 0 : index
    %142 = vector.load %arg9[%c0_162, %c0_163, %c0_164] : memref<10x10x128xf32, #tpu.memory_space<vmem>>, vector<10x10x128xf32>
    tpu.vector_store %arg9[%c0_162, %c0_163, %c0_164], %141 {strides = array<i32>} : memref<10x10x128xf32, #tpu.memory_space<vmem>>, vector<10x10x128xf32>,
    %c1_165 = arith.constant 1 : index
    %c1_166 = arith.constant 1 : index
    %c0_167 = arith.constant 0 : index
    %143 = vector.load %arg9[%c1_165, %c1_166, %c0_167] : memref<10x10x128xf32, #tpu.memory_space<vmem>>, vector<8x8x128xf32>
    tpu.vector_store %arg9[%c1_165, %c1_166, %c0_167], %140 {strides = array<i32>} : memref<10x10x128xf32, #tpu.memory_space<vmem>>, vector<8x8x128xf32>,
    %cst_168 = arith.constant 0.000000e+00 : f32
    %144 = vector.broadcast %cst_168 : f32 to vector<64x128xf32>
    %c0_169 = arith.constant 0 : index
    %c0_170 = arith.constant 0 : index
    %c0_171 = arith.constant 0 : index
    %145 = vector.load %arg9[%c0_169, %c0_170, %c0_171] : memref<10x10x128xf32, #tpu.memory_space<vmem>>, vector<8x8x128xf32>
    %146 = vector.shape_cast %145 : vector<8x8x128xf32> to vector<64x128xf32>
    %147 = arith.truncf %146 : vector<64x128xf32> to vector<64x128xbf16>
    %c0_172 = arith.constant 0 : index
    %c0_173 = arith.constant 0 : index
    %c0_174 = arith.constant 0 : index
    %148 = vector.load %arg4[%c0_172, %c0_173, %c0_174] : memref<9x128x128xbf16, #tpu.memory_space<vmem>>, vector<1x128x128xbf16>
    %149 = vector.shape_cast %148 : vector<1x128x128xbf16> to vector<128x128xbf16>
    %cst_175 = arith.constant dense<0.000000e+00> : vector<64x128xf32>
    %150 = tpu.matmul %147, %149, %cst_175 {dimension_numbers = #tpu.dot_dimension_numbers<[1], [0], [0], [1], [0, 0, 1, 1], [], []>} : vector<64x128xbf16>, vector<128x128xbf16>, vector<64x128xf32> -> vector<64x128xf32>
    %151 = arith.addf %144, %150 : vector<64x128xf32>
    %c0_176 = arith.constant 0 : index
    %c1_177 = arith.constant 1 : index
    %c0_178 = arith.constant 0 : index
    %152 = vector.load %arg9[%c0_176, %c1_177, %c0_178] : memref<10x10x128xf32, #tpu.memory_space<vmem>>, vector<8x8x128xf32>
    %153 = vector.shape_cast %152 : vector<8x8x128xf32> to vector<64x128xf32>
    %154 = arith.truncf %153 : vector<64x128xf32> to vector<64x128xbf16>
    %c1_179 = arith.constant 1 : index
    %c0_180 = arith.constant 0 : index
    %c0_181 = arith.constant 0 : index
    %155 = vector.load %arg4[%c1_179, %c0_180, %c0_181] : memref<9x128x128xbf16, #tpu.memory_space<vmem>>, vector<1x128x128xbf16>
    %156 = vector.shape_cast %155 : vector<1x128x128xbf16> to vector<128x128xbf16>
    %cst_182 = arith.constant dense<0.000000e+00> : vector<64x128xf32>
    %157 = tpu.matmul %154, %156, %cst_182 {dimension_numbers = #tpu.dot_dimension_numbers<[1], [0], [0], [1], [0, 0, 1, 1], [], []>} : vector<64x128xbf16>, vector<128x128xbf16>, vector<64x128xf32> -> vector<64x128xf32>
    %158 = arith.addf %151, %157 : vector<64x128xf32>
    %c0_183 = arith.constant 0 : index
    %c2_184 = arith.constant 2 : index
    %c0_185 = arith.constant 0 : index
    %159 = vector.load %arg9[%c0_183, %c2_184, %c0_185] : memref<10x10x128xf32, #tpu.memory_space<vmem>>, vector<8x8x128xf32>
    %160 = vector.shape_cast %159 : vector<8x8x128xf32> to vector<64x128xf32>
    %161 = arith.truncf %160 : vector<64x128xf32> to vector<64x128xbf16>
    %c2_186 = arith.constant 2 : index
    %c0_187 = arith.constant 0 : index
    %c0_188 = arith.constant 0 : index
    %162 = vector.load %arg4[%c2_186, %c0_187, %c0_188] : memref<9x128x128xbf16, #tpu.memory_space<vmem>>, vector<1x128x128xbf16>
    %163 = vector.shape_cast %162 : vector<1x128x128xbf16> to vector<128x128xbf16>
    %cst_189 = arith.constant dense<0.000000e+00> : vector<64x128xf32>
    %164 = tpu.matmul %161, %163, %cst_189 {dimension_numbers = #tpu.dot_dimension_numbers<[1], [0], [0], [1], [0, 0, 1, 1], [], []>} : vector<64x128xbf16>, vector<128x128xbf16>, vector<64x128xf32> -> vector<64x128xf32>
    %165 = arith.addf %158, %164 : vector<64x128xf32>
    %c1_190 = arith.constant 1 : index
    %c0_191 = arith.constant 0 : index
    %c0_192 = arith.constant 0 : index
    %166 = vector.load %arg9[%c1_190, %c0_191, %c0_192] : memref<10x10x128xf32, #tpu.memory_space<vmem>>, vector<8x8x128xf32>
    %167 = vector.shape_cast %166 : vector<8x8x128xf32> to vector<64x128xf32>
    %168 = arith.truncf %167 : vector<64x128xf32> to vector<64x128xbf16>
    %c3_193 = arith.constant 3 : index
    %c0_194 = arith.constant 0 : index
    %c0_195 = arith.constant 0 : index
    %169 = vector.load %arg4[%c3_193, %c0_194, %c0_195] : memref<9x128x128xbf16, #tpu.memory_space<vmem>>, vector<1x128x128xbf16>
    %170 = vector.shape_cast %169 : vector<1x128x128xbf16> to vector<128x128xbf16>
    %cst_196 = arith.constant dense<0.000000e+00> : vector<64x128xf32>
    %171 = tpu.matmul %168, %170, %cst_196 {dimension_numbers = #tpu.dot_dimension_numbers<[1], [0], [0], [1], [0, 0, 1, 1], [], []>} : vector<64x128xbf16>, vector<128x128xbf16>, vector<64x128xf32> -> vector<64x128xf32>
    %172 = arith.addf %165, %171 : vector<64x128xf32>
    %c1_197 = arith.constant 1 : index
    %c1_198 = arith.constant 1 : index
    %c0_199 = arith.constant 0 : index
    %173 = vector.load %arg9[%c1_197, %c1_198, %c0_199] : memref<10x10x128xf32, #tpu.memory_space<vmem>>, vector<8x8x128xf32>
    %174 = vector.shape_cast %173 : vector<8x8x128xf32> to vector<64x128xf32>
    %175 = arith.truncf %174 : vector<64x128xf32> to vector<64x128xbf16>
    %c4_200 = arith.constant 4 : index
    %c0_201 = arith.constant 0 : index
    %c0_202 = arith.constant 0 : index
    %176 = vector.load %arg4[%c4_200, %c0_201, %c0_202] : memref<9x128x128xbf16, #tpu.memory_space<vmem>>, vector<1x128x128xbf16>
    %177 = vector.shape_cast %176 : vector<1x128x128xbf16> to vector<128x128xbf16>
    %cst_203 = arith.constant dense<0.000000e+00> : vector<64x128xf32>
    %178 = tpu.matmul %175, %177, %cst_203 {dimension_numbers = #tpu.dot_dimension_numbers<[1], [0], [0], [1], [0, 0, 1, 1], [], []>} : vector<64x128xbf16>, vector<128x128xbf16>, vector<64x128xf32> -> vector<64x128xf32>
    %179 = arith.addf %172, %178 : vector<64x128xf32>
    %c1_204 = arith.constant 1 : index
    %c2_205 = arith.constant 2 : index
    %c0_206 = arith.constant 0 : index
    %180 = vector.load %arg9[%c1_204, %c2_205, %c0_206] : memref<10x10x128xf32, #tpu.memory_space<vmem>>, vector<8x8x128xf32>
    %181 = vector.shape_cast %180 : vector<8x8x128xf32> to vector<64x128xf32>
    %182 = arith.truncf %181 : vector<64x128xf32> to vector<64x128xbf16>
    %c5_207 = arith.constant 5 : index
    %c0_208 = arith.constant 0 : index
    %c0_209 = arith.constant 0 : index
    %183 = vector.load %arg4[%c5_207, %c0_208, %c0_209] : memref<9x128x128xbf16, #tpu.memory_space<vmem>>, vector<1x128x128xbf16>
    %184 = vector.shape_cast %183 : vector<1x128x128xbf16> to vector<128x128xbf16>
    %cst_210 = arith.constant dense<0.000000e+00> : vector<64x128xf32>
    %185 = tpu.matmul %182, %184, %cst_210 {dimension_numbers = #tpu.dot_dimension_numbers<[1], [0], [0], [1], [0, 0, 1, 1], [], []>} : vector<64x128xbf16>, vector<128x128xbf16>, vector<64x128xf32> -> vector<64x128xf32>
    %186 = arith.addf %179, %185 : vector<64x128xf32>
    %c2_211 = arith.constant 2 : index
    %c0_212 = arith.constant 0 : index
    %c0_213 = arith.constant 0 : index
    %187 = vector.load %arg9[%c2_211, %c0_212, %c0_213] : memref<10x10x128xf32, #tpu.memory_space<vmem>>, vector<8x8x128xf32>
    %188 = vector.shape_cast %187 : vector<8x8x128xf32> to vector<64x128xf32>
    %189 = arith.truncf %188 : vector<64x128xf32> to vector<64x128xbf16>
    %c6_214 = arith.constant 6 : index
    %c0_215 = arith.constant 0 : index
    %c0_216 = arith.constant 0 : index
    %190 = vector.load %arg4[%c6_214, %c0_215, %c0_216] : memref<9x128x128xbf16, #tpu.memory_space<vmem>>, vector<1x128x128xbf16>
    %191 = vector.shape_cast %190 : vector<1x128x128xbf16> to vector<128x128xbf16>
    %cst_217 = arith.constant dense<0.000000e+00> : vector<64x128xf32>
    %192 = tpu.matmul %189, %191, %cst_217 {dimension_numbers = #tpu.dot_dimension_numbers<[1], [0], [0], [1], [0, 0, 1, 1], [], []>} : vector<64x128xbf16>, vector<128x128xbf16>, vector<64x128xf32> -> vector<64x128xf32>
    %193 = arith.addf %186, %192 : vector<64x128xf32>
    %c2_218 = arith.constant 2 : index
    %c1_219 = arith.constant 1 : index
    %c0_220 = arith.constant 0 : index
    %194 = vector.load %arg9[%c2_218, %c1_219, %c0_220] : memref<10x10x128xf32, #tpu.memory_space<vmem>>, vector<8x8x128xf32>
    %195 = vector.shape_cast %194 : vector<8x8x128xf32> to vector<64x128xf32>
    %196 = arith.truncf %195 : vector<64x128xf32> to vector<64x128xbf16>
    %c7_221 = arith.constant 7 : index
    %c0_222 = arith.constant 0 : index
    %c0_223 = arith.constant 0 : index
    %197 = vector.load %arg4[%c7_221, %c0_222, %c0_223] : memref<9x128x128xbf16, #tpu.memory_space<vmem>>, vector<1x128x128xbf16>
    %198 = vector.shape_cast %197 : vector<1x128x128xbf16> to vector<128x128xbf16>
    %cst_224 = arith.constant dense<0.000000e+00> : vector<64x128xf32>
    %199 = tpu.matmul %196, %198, %cst_224 {dimension_numbers = #tpu.dot_dimension_numbers<[1], [0], [0], [1], [0, 0, 1, 1], [], []>} : vector<64x128xbf16>, vector<128x128xbf16>, vector<64x128xf32> -> vector<64x128xf32>
    %200 = arith.addf %193, %199 : vector<64x128xf32>
    %c2_225 = arith.constant 2 : index
    %c2_226 = arith.constant 2 : index
    %c0_227 = arith.constant 0 : index
    %201 = vector.load %arg9[%c2_225, %c2_226, %c0_227] : memref<10x10x128xf32, #tpu.memory_space<vmem>>, vector<8x8x128xf32>
    %202 = vector.shape_cast %201 : vector<8x8x128xf32> to vector<64x128xf32>
    %203 = arith.truncf %202 : vector<64x128xf32> to vector<64x128xbf16>
    %c8_228 = arith.constant 8 : index
    %c0_229 = arith.constant 0 : index
    %c0_230 = arith.constant 0 : index
    %204 = vector.load %arg4[%c8_228, %c0_229, %c0_230] : memref<9x128x128xbf16, #tpu.memory_space<vmem>>, vector<1x128x128xbf16>
    %205 = vector.shape_cast %204 : vector<1x128x128xbf16> to vector<128x128xbf16>
    %cst_231 = arith.constant dense<0.000000e+00> : vector<64x128xf32>
    %206 = tpu.matmul %203, %205, %cst_231 {dimension_numbers = #tpu.dot_dimension_numbers<[1], [0], [0], [1], [0, 0, 1, 1], [], []>} : vector<64x128xbf16>, vector<128x128xbf16>, vector<64x128xf32> -> vector<64x128xf32>
    %207 = arith.addf %200, %206 : vector<64x128xf32>
    %c0_232 = arith.constant 0 : index
    %c0_233 = arith.constant 0 : index
    %208 = vector.load %arg5[%c0_232, %c0_233] : memref<1x128xf32, #tpu.memory_space<vmem>>, vector<1x128xf32>
    %209 = vector.broadcast %208 : vector<1x128xf32> to vector<64x128xf32>
    %210 = arith.addf %207, %209 : vector<64x128xf32>
    %cst_234 = arith.constant 0.000000e+00 : f32
    %211 = vector.broadcast %cst_234 : f32 to vector<64x128xf32>
    %212 = arith.maximumf %210, %211 : vector<64x128xf32>
    %c0_235 = arith.constant 0 : index
    %c0_236 = arith.constant 0 : index
    %213 = vector.load %arg7[%c0_235, %c0_236] : memref<1x128xf32, #tpu.memory_space<vmem>>, vector<1x128xf32>
    %214 = vector.extract_strided_slice %212 {offsets = [0, 0], sizes = [1, 128], strides = [1, 1]} : vector<64x128xf32> to vector<1x128xf32>
    %215 = vector.extract_strided_slice %212 {offsets = [1, 0], sizes = [1, 128], strides = [1, 1]} : vector<64x128xf32> to vector<1x128xf32>
    %216 = arith.maximumf %214, %215 : vector<1x128xf32>
    %217 = vector.extract_strided_slice %212 {offsets = [8, 0], sizes = [1, 128], strides = [1, 1]} : vector<64x128xf32> to vector<1x128xf32>
    %218 = vector.extract_strided_slice %212 {offsets = [9, 0], sizes = [1, 128], strides = [1, 1]} : vector<64x128xf32> to vector<1x128xf32>
    %219 = arith.maximumf %217, %218 : vector<1x128xf32>
    %220 = arith.maximumf %216, %219 : vector<1x128xf32>
    %221 = arith.truncf %220 : vector<1x128xf32> to vector<1x128xbf16>
    %c0_237 = arith.constant 0 : index
    %c0_238 = arith.constant 0 : index
    %c0_239 = arith.constant 0 : index
    %222 = vector.load %arg6[%c0_237, %c0_238, %c0_239] : memref<16x128x128xbf16, #tpu.memory_space<vmem>>, vector<1x128x128xbf16>
    %223 = vector.shape_cast %222 : vector<1x128x128xbf16> to vector<128x128xbf16>
    %cst_240 = arith.constant dense<0.000000e+00> : vector<1x128xf32>
    %224 = tpu.matmul %221, %223, %cst_240 {dimension_numbers = #tpu.dot_dimension_numbers<[1], [0], [0], [1], [0, 0, 1, 1], [], []>} : vector<1x128xbf16>, vector<128x128xbf16>, vector<1x128xf32> -> vector<1x128xf32>
    %225 = arith.addf %213, %224 : vector<1x128xf32>
    %226 = vector.extract_strided_slice %212 {offsets = [2, 0], sizes = [1, 128], strides = [1, 1]} : vector<64x128xf32> to vector<1x128xf32>
    %227 = vector.extract_strided_slice %212 {offsets = [3, 0], sizes = [1, 128], strides = [1, 1]} : vector<64x128xf32> to vector<1x128xf32>
    %228 = arith.maximumf %226, %227 : vector<1x128xf32>
    %229 = vector.extract_strided_slice %212 {offsets = [10, 0], sizes = [1, 128], strides = [1, 1]} : vector<64x128xf32> to vector<1x128xf32>
    %230 = vector.extract_strided_slice %212 {offsets = [11, 0], sizes = [1, 128], strides = [1, 1]} : vector<64x128xf32> to vector<1x128xf32>
    %231 = arith.maximumf %229, %230 : vector<1x128xf32>
    %232 = arith.maximumf %228, %231 : vector<1x128xf32>
    %233 = arith.truncf %232 : vector<1x128xf32> to vector<1x128xbf16>
    %c1_241 = arith.constant 1 : index
    %c0_242 = arith.constant 0 : index
    %c0_243 = arith.constant 0 : index
    %234 = vector.load %arg6[%c1_241, %c0_242, %c0_243] : memref<16x128x128xbf16, #tpu.memory_space<vmem>>, vector<1x128x128xbf16>
    %235 = vector.shape_cast %234 : vector<1x128x128xbf16> to vector<128x128xbf16>
    %cst_244 = arith.constant dense<0.000000e+00> : vector<1x128xf32>
    %236 = tpu.matmul %233, %235, %cst_244 {dimension_numbers = #tpu.dot_dimension_numbers<[1], [0], [0], [1], [0, 0, 1, 1], [], []>} : vector<1x128xbf16>, vector<128x128xbf16>, vector<1x128xf32> -> vector<1x128xf32>
    %237 = arith.addf %225, %236 : vector<1x128xf32>
    %238 = vector.extract_strided_slice %212 {offsets = [4, 0], sizes = [1, 128], strides = [1, 1]} : vector<64x128xf32> to vector<1x128xf32>
    %239 = vector.extract_strided_slice %212 {offsets = [5, 0], sizes = [1, 128], strides = [1, 1]} : vector<64x128xf32> to vector<1x128xf32>
    %240 = arith.maximumf %238, %239 : vector<1x128xf32>
    %241 = vector.extract_strided_slice %212 {offsets = [12, 0], sizes = [1, 128], strides = [1, 1]} : vector<64x128xf32> to vector<1x128xf32>
    %242 = vector.extract_strided_slice %212 {offsets = [13, 0], sizes = [1, 128], strides = [1, 1]} : vector<64x128xf32> to vector<1x128xf32>
    %243 = arith.maximumf %241, %242 : vector<1x128xf32>
    %244 = arith.maximumf %240, %243 : vector<1x128xf32>
    %245 = arith.truncf %244 : vector<1x128xf32> to vector<1x128xbf16>
    %c2_245 = arith.constant 2 : index
    %c0_246 = arith.constant 0 : index
    %c0_247 = arith.constant 0 : index
    %246 = vector.load %arg6[%c2_245, %c0_246, %c0_247] : memref<16x128x128xbf16, #tpu.memory_space<vmem>>, vector<1x128x128xbf16>
    %247 = vector.shape_cast %246 : vector<1x128x128xbf16> to vector<128x128xbf16>
    %cst_248 = arith.constant dense<0.000000e+00> : vector<1x128xf32>
    %248 = tpu.matmul %245, %247, %cst_248 {dimension_numbers = #tpu.dot_dimension_numbers<[1], [0], [0], [1], [0, 0, 1, 1], [], []>} : vector<1x128xbf16>, vector<128x128xbf16>, vector<1x128xf32> -> vector<1x128xf32>
    %249 = arith.addf %237, %248 : vector<1x128xf32>
    %250 = vector.extract_strided_slice %212 {offsets = [6, 0], sizes = [1, 128], strides = [1, 1]} : vector<64x128xf32> to vector<1x128xf32>
    %251 = vector.extract_strided_slice %212 {offsets = [7, 0], sizes = [1, 128], strides = [1, 1]} : vector<64x128xf32> to vector<1x128xf32>
    %252 = arith.maximumf %250, %251 : vector<1x128xf32>
    %253 = vector.extract_strided_slice %212 {offsets = [14, 0], sizes = [1, 128], strides = [1, 1]} : vector<64x128xf32> to vector<1x128xf32>
    %254 = vector.extract_strided_slice %212 {offsets = [15, 0], sizes = [1, 128], strides = [1, 1]} : vector<64x128xf32> to vector<1x128xf32>
    %255 = arith.maximumf %253, %254 : vector<1x128xf32>
    %256 = arith.maximumf %252, %255 : vector<1x128xf32>
    %257 = arith.truncf %256 : vector<1x128xf32> to vector<1x128xbf16>
    %c3_249 = arith.constant 3 : index
    %c0_250 = arith.constant 0 : index
    %c0_251 = arith.constant 0 : index
    %258 = vector.load %arg6[%c3_249, %c0_250, %c0_251] : memref<16x128x128xbf16, #tpu.memory_space<vmem>>, vector<1x128x128xbf16>
    %259 = vector.shape_cast %258 : vector<1x128x128xbf16> to vector<128x128xbf16>
    %cst_252 = arith.constant dense<0.000000e+00> : vector<1x128xf32>
    %260 = tpu.matmul %257, %259, %cst_252 {dimension_numbers = #tpu.dot_dimension_numbers<[1], [0], [0], [1], [0, 0, 1, 1], [], []>} : vector<1x128xbf16>, vector<128x128xbf16>, vector<1x128xf32> -> vector<1x128xf32>
    %261 = arith.addf %249, %260 : vector<1x128xf32>
    %262 = vector.extract_strided_slice %212 {offsets = [16, 0], sizes = [1, 128], strides = [1, 1]} : vector<64x128xf32> to vector<1x128xf32>
    %263 = vector.extract_strided_slice %212 {offsets = [17, 0], sizes = [1, 128], strides = [1, 1]} : vector<64x128xf32> to vector<1x128xf32>
    %264 = arith.maximumf %262, %263 : vector<1x128xf32>
    %265 = vector.extract_strided_slice %212 {offsets = [24, 0], sizes = [1, 128], strides = [1, 1]} : vector<64x128xf32> to vector<1x128xf32>
    %266 = vector.extract_strided_slice %212 {offsets = [25, 0], sizes = [1, 128], strides = [1, 1]} : vector<64x128xf32> to vector<1x128xf32>
    %267 = arith.maximumf %265, %266 : vector<1x128xf32>
    %268 = arith.maximumf %264, %267 : vector<1x128xf32>
    %269 = arith.truncf %268 : vector<1x128xf32> to vector<1x128xbf16>
    %c4_253 = arith.constant 4 : index
    %c0_254 = arith.constant 0 : index
    %c0_255 = arith.constant 0 : index
    %270 = vector.load %arg6[%c4_253, %c0_254, %c0_255] : memref<16x128x128xbf16, #tpu.memory_space<vmem>>, vector<1x128x128xbf16>
    %271 = vector.shape_cast %270 : vector<1x128x128xbf16> to vector<128x128xbf16>
    %cst_256 = arith.constant dense<0.000000e+00> : vector<1x128xf32>
    %272 = tpu.matmul %269, %271, %cst_256 {dimension_numbers = #tpu.dot_dimension_numbers<[1], [0], [0], [1], [0, 0, 1, 1], [], []>} : vector<1x128xbf16>, vector<128x128xbf16>, vector<1x128xf32> -> vector<1x128xf32>
    %273 = arith.addf %261, %272 : vector<1x128xf32>
    %274 = vector.extract_strided_slice %212 {offsets = [18, 0], sizes = [1, 128], strides = [1, 1]} : vector<64x128xf32> to vector<1x128xf32>
    %275 = vector.extract_strided_slice %212 {offsets = [19, 0], sizes = [1, 128], strides = [1, 1]} : vector<64x128xf32> to vector<1x128xf32>
    %276 = arith.maximumf %274, %275 : vector<1x128xf32>
    %277 = vector.extract_strided_slice %212 {offsets = [26, 0], sizes = [1, 128], strides = [1, 1]} : vector<64x128xf32> to vector<1x128xf32>
    %278 = vector.extract_strided_slice %212 {offsets = [27, 0], sizes = [1, 128], strides = [1, 1]} : vector<64x128xf32> to vector<1x128xf32>
    %279 = arith.maximumf %277, %278 : vector<1x128xf32>
    %280 = arith.maximumf %276, %279 : vector<1x128xf32>
    %281 = arith.truncf %280 : vector<1x128xf32> to vector<1x128xbf16>
    %c5_257 = arith.constant 5 : index
    %c0_258 = arith.constant 0 : index
    %c0_259 = arith.constant 0 : index
    %282 = vector.load %arg6[%c5_257, %c0_258, %c0_259] : memref<16x128x128xbf16, #tpu.memory_space<vmem>>, vector<1x128x128xbf16>
    %283 = vector.shape_cast %282 : vector<1x128x128xbf16> to vector<128x128xbf16>
    %cst_260 = arith.constant dense<0.000000e+00> : vector<1x128xf32>
    %284 = tpu.matmul %281, %283, %cst_260 {dimension_numbers = #tpu.dot_dimension_numbers<[1], [0], [0], [1], [0, 0, 1, 1], [], []>} : vector<1x128xbf16>, vector<128x128xbf16>, vector<1x128xf32> -> vector<1x128xf32>
    %285 = arith.addf %273, %284 : vector<1x128xf32>
    %286 = vector.extract_strided_slice %212 {offsets = [20, 0], sizes = [1, 128], strides = [1, 1]} : vector<64x128xf32> to vector<1x128xf32>
    %287 = vector.extract_strided_slice %212 {offsets = [21, 0], sizes = [1, 128], strides = [1, 1]} : vector<64x128xf32> to vector<1x128xf32>
    %288 = arith.maximumf %286, %287 : vector<1x128xf32>
    %289 = vector.extract_strided_slice %212 {offsets = [28, 0], sizes = [1, 128], strides = [1, 1]} : vector<64x128xf32> to vector<1x128xf32>
    %290 = vector.extract_strided_slice %212 {offsets = [29, 0], sizes = [1, 128], strides = [1, 1]} : vector<64x128xf32> to vector<1x128xf32>
    %291 = arith.maximumf %289, %290 : vector<1x128xf32>
    %292 = arith.maximumf %288, %291 : vector<1x128xf32>
    %293 = arith.truncf %292 : vector<1x128xf32> to vector<1x128xbf16>
    %c6_261 = arith.constant 6 : index
    %c0_262 = arith.constant 0 : index
    %c0_263 = arith.constant 0 : index
    %294 = vector.load %arg6[%c6_261, %c0_262, %c0_263] : memref<16x128x128xbf16, #tpu.memory_space<vmem>>, vector<1x128x128xbf16>
    %295 = vector.shape_cast %294 : vector<1x128x128xbf16> to vector<128x128xbf16>
    %cst_264 = arith.constant dense<0.000000e+00> : vector<1x128xf32>
    %296 = tpu.matmul %293, %295, %cst_264 {dimension_numbers = #tpu.dot_dimension_numbers<[1], [0], [0], [1], [0, 0, 1, 1], [], []>} : vector<1x128xbf16>, vector<128x128xbf16>, vector<1x128xf32> -> vector<1x128xf32>
    %297 = arith.addf %285, %296 : vector<1x128xf32>
    %298 = vector.extract_strided_slice %212 {offsets = [22, 0], sizes = [1, 128], strides = [1, 1]} : vector<64x128xf32> to vector<1x128xf32>
    %299 = vector.extract_strided_slice %212 {offsets = [23, 0], sizes = [1, 128], strides = [1, 1]} : vector<64x128xf32> to vector<1x128xf32>
    %300 = arith.maximumf %298, %299 : vector<1x128xf32>
    %301 = vector.extract_strided_slice %212 {offsets = [30, 0], sizes = [1, 128], strides = [1, 1]} : vector<64x128xf32> to vector<1x128xf32>
    %302 = vector.extract_strided_slice %212 {offsets = [31, 0], sizes = [1, 128], strides = [1, 1]} : vector<64x128xf32> to vector<1x128xf32>
    %303 = arith.maximumf %301, %302 : vector<1x128xf32>
    %304 = arith.maximumf %300, %303 : vector<1x128xf32>
    %305 = arith.truncf %304 : vector<1x128xf32> to vector<1x128xbf16>
    %c7_265 = arith.constant 7 : index
    %c0_266 = arith.constant 0 : index
    %c0_267 = arith.constant 0 : index
    %306 = vector.load %arg6[%c7_265, %c0_266, %c0_267] : memref<16x128x128xbf16, #tpu.memory_space<vmem>>, vector<1x128x128xbf16>
    %307 = vector.shape_cast %306 : vector<1x128x128xbf16> to vector<128x128xbf16>
    %cst_268 = arith.constant dense<0.000000e+00> : vector<1x128xf32>
    %308 = tpu.matmul %305, %307, %cst_268 {dimension_numbers = #tpu.dot_dimension_numbers<[1], [0], [0], [1], [0, 0, 1, 1], [], []>} : vector<1x128xbf16>, vector<128x128xbf16>, vector<1x128xf32> -> vector<1x128xf32>
    %309 = arith.addf %297, %308 : vector<1x128xf32>
    %310 = vector.extract_strided_slice %212 {offsets = [32, 0], sizes = [1, 128], strides = [1, 1]} : vector<64x128xf32> to vector<1x128xf32>
    %311 = vector.extract_strided_slice %212 {offsets = [33, 0], sizes = [1, 128], strides = [1, 1]} : vector<64x128xf32> to vector<1x128xf32>
    %312 = arith.maximumf %310, %311 : vector<1x128xf32>
    %313 = vector.extract_strided_slice %212 {offsets = [40, 0], sizes = [1, 128], strides = [1, 1]} : vector<64x128xf32> to vector<1x128xf32>
    %314 = vector.extract_strided_slice %212 {offsets = [41, 0], sizes = [1, 128], strides = [1, 1]} : vector<64x128xf32> to vector<1x128xf32>
    %315 = arith.maximumf %313, %314 : vector<1x128xf32>
    %316 = arith.maximumf %312, %315 : vector<1x128xf32>
    %317 = arith.truncf %316 : vector<1x128xf32> to vector<1x128xbf16>
    %c8_269 = arith.constant 8 : index
    %c0_270 = arith.constant 0 : index
    %c0_271 = arith.constant 0 : index
    %318 = vector.load %arg6[%c8_269, %c0_270, %c0_271] : memref<16x128x128xbf16, #tpu.memory_space<vmem>>, vector<1x128x128xbf16>
    %319 = vector.shape_cast %318 : vector<1x128x128xbf16> to vector<128x128xbf16>
    %cst_272 = arith.constant dense<0.000000e+00> : vector<1x128xf32>
    %320 = tpu.matmul %317, %319, %cst_272 {dimension_numbers = #tpu.dot_dimension_numbers<[1], [0], [0], [1], [0, 0, 1, 1], [], []>} : vector<1x128xbf16>, vector<128x128xbf16>, vector<1x128xf32> -> vector<1x128xf32>
    %321 = arith.addf %309, %320 : vector<1x128xf32>
    %322 = vector.extract_strided_slice %212 {offsets = [34, 0], sizes = [1, 128], strides = [1, 1]} : vector<64x128xf32> to vector<1x128xf32>
    %323 = vector.extract_strided_slice %212 {offsets = [35, 0], sizes = [1, 128], strides = [1, 1]} : vector<64x128xf32> to vector<1x128xf32>
    %324 = arith.maximumf %322, %323 : vector<1x128xf32>
    %325 = vector.extract_strided_slice %212 {offsets = [42, 0], sizes = [1, 128], strides = [1, 1]} : vector<64x128xf32> to vector<1x128xf32>
    %326 = vector.extract_strided_slice %212 {offsets = [43, 0], sizes = [1, 128], strides = [1, 1]} : vector<64x128xf32> to vector<1x128xf32>
    %327 = arith.maximumf %325, %326 : vector<1x128xf32>
    %328 = arith.maximumf %324, %327 : vector<1x128xf32>
    %329 = arith.truncf %328 : vector<1x128xf32> to vector<1x128xbf16>
    %c9 = arith.constant 9 : index
    %c0_273 = arith.constant 0 : index
    %c0_274 = arith.constant 0 : index
    %330 = vector.load %arg6[%c9, %c0_273, %c0_274] : memref<16x128x128xbf16, #tpu.memory_space<vmem>>, vector<1x128x128xbf16>
    %331 = vector.shape_cast %330 : vector<1x128x128xbf16> to vector<128x128xbf16>
    %cst_275 = arith.constant dense<0.000000e+00> : vector<1x128xf32>
    %332 = tpu.matmul %329, %331, %cst_275 {dimension_numbers = #tpu.dot_dimension_numbers<[1], [0], [0], [1], [0, 0, 1, 1], [], []>} : vector<1x128xbf16>, vector<128x128xbf16>, vector<1x128xf32> -> vector<1x128xf32>
    %333 = arith.addf %321, %332 : vector<1x128xf32>
    %334 = vector.extract_strided_slice %212 {offsets = [36, 0], sizes = [1, 128], strides = [1, 1]} : vector<64x128xf32> to vector<1x128xf32>
    %335 = vector.extract_strided_slice %212 {offsets = [37, 0], sizes = [1, 128], strides = [1, 1]} : vector<64x128xf32> to vector<1x128xf32>
    %336 = arith.maximumf %334, %335 : vector<1x128xf32>
    %337 = vector.extract_strided_slice %212 {offsets = [44, 0], sizes = [1, 128], strides = [1, 1]} : vector<64x128xf32> to vector<1x128xf32>
    %338 = vector.extract_strided_slice %212 {offsets = [45, 0], sizes = [1, 128], strides = [1, 1]} : vector<64x128xf32> to vector<1x128xf32>
    %339 = arith.maximumf %337, %338 : vector<1x128xf32>
    %340 = arith.maximumf %336, %339 : vector<1x128xf32>
    %341 = arith.truncf %340 : vector<1x128xf32> to vector<1x128xbf16>
    %c10 = arith.constant 10 : index
    %c0_276 = arith.constant 0 : index
    %c0_277 = arith.constant 0 : index
    %342 = vector.load %arg6[%c10, %c0_276, %c0_277] : memref<16x128x128xbf16, #tpu.memory_space<vmem>>, vector<1x128x128xbf16>
    %343 = vector.shape_cast %342 : vector<1x128x128xbf16> to vector<128x128xbf16>
    %cst_278 = arith.constant dense<0.000000e+00> : vector<1x128xf32>
    %344 = tpu.matmul %341, %343, %cst_278 {dimension_numbers = #tpu.dot_dimension_numbers<[1], [0], [0], [1], [0, 0, 1, 1], [], []>} : vector<1x128xbf16>, vector<128x128xbf16>, vector<1x128xf32> -> vector<1x128xf32>
    %345 = arith.addf %333, %344 : vector<1x128xf32>
    %346 = vector.extract_strided_slice %212 {offsets = [38, 0], sizes = [1, 128], strides = [1, 1]} : vector<64x128xf32> to vector<1x128xf32>
    %347 = vector.extract_strided_slice %212 {offsets = [39, 0], sizes = [1, 128], strides = [1, 1]} : vector<64x128xf32> to vector<1x128xf32>
    %348 = arith.maximumf %346, %347 : vector<1x128xf32>
    %349 = vector.extract_strided_slice %212 {offsets = [46, 0], sizes = [1, 128], strides = [1, 1]} : vector<64x128xf32> to vector<1x128xf32>
    %350 = vector.extract_strided_slice %212 {offsets = [47, 0], sizes = [1, 128], strides = [1, 1]} : vector<64x128xf32> to vector<1x128xf32>
    %351 = arith.maximumf %349, %350 : vector<1x128xf32>
    %352 = arith.maximumf %348, %351 : vector<1x128xf32>
    %353 = arith.truncf %352 : vector<1x128xf32> to vector<1x128xbf16>
    %c11 = arith.constant 11 : index
    %c0_279 = arith.constant 0 : index
    %c0_280 = arith.constant 0 : index
    %354 = vector.load %arg6[%c11, %c0_279, %c0_280] : memref<16x128x128xbf16, #tpu.memory_space<vmem>>, vector<1x128x128xbf16>
    %355 = vector.shape_cast %354 : vector<1x128x128xbf16> to vector<128x128xbf16>
    %cst_281 = arith.constant dense<0.000000e+00> : vector<1x128xf32>
    %356 = tpu.matmul %353, %355, %cst_281 {dimension_numbers = #tpu.dot_dimension_numbers<[1], [0], [0], [1], [0, 0, 1, 1], [], []>} : vector<1x128xbf16>, vector<128x128xbf16>, vector<1x128xf32> -> vector<1x128xf32>
    %357 = arith.addf %345, %356 : vector<1x128xf32>
    %358 = vector.extract_strided_slice %212 {offsets = [48, 0], sizes = [1, 128], strides = [1, 1]} : vector<64x128xf32> to vector<1x128xf32>
    %359 = vector.extract_strided_slice %212 {offsets = [49, 0], sizes = [1, 128], strides = [1, 1]} : vector<64x128xf32> to vector<1x128xf32>
    %360 = arith.maximumf %358, %359 : vector<1x128xf32>
    %361 = vector.extract_strided_slice %212 {offsets = [56, 0], sizes = [1, 128], strides = [1, 1]} : vector<64x128xf32> to vector<1x128xf32>
    %362 = vector.extract_strided_slice %212 {offsets = [57, 0], sizes = [1, 128], strides = [1, 1]} : vector<64x128xf32> to vector<1x128xf32>
    %363 = arith.maximumf %361, %362 : vector<1x128xf32>
    %364 = arith.maximumf %360, %363 : vector<1x128xf32>
    %365 = arith.truncf %364 : vector<1x128xf32> to vector<1x128xbf16>
    %c12 = arith.constant 12 : index
    %c0_282 = arith.constant 0 : index
    %c0_283 = arith.constant 0 : index
    %366 = vector.load %arg6[%c12, %c0_282, %c0_283] : memref<16x128x128xbf16, #tpu.memory_space<vmem>>, vector<1x128x128xbf16>
    %367 = vector.shape_cast %366 : vector<1x128x128xbf16> to vector<128x128xbf16>
    %cst_284 = arith.constant dense<0.000000e+00> : vector<1x128xf32>
    %368 = tpu.matmul %365, %367, %cst_284 {dimension_numbers = #tpu.dot_dimension_numbers<[1], [0], [0], [1], [0, 0, 1, 1], [], []>} : vector<1x128xbf16>, vector<128x128xbf16>, vector<1x128xf32> -> vector<1x128xf32>
    %369 = arith.addf %357, %368 : vector<1x128xf32>
    %370 = vector.extract_strided_slice %212 {offsets = [50, 0], sizes = [1, 128], strides = [1, 1]} : vector<64x128xf32> to vector<1x128xf32>
    %371 = vector.extract_strided_slice %212 {offsets = [51, 0], sizes = [1, 128], strides = [1, 1]} : vector<64x128xf32> to vector<1x128xf32>
    %372 = arith.maximumf %370, %371 : vector<1x128xf32>
    %373 = vector.extract_strided_slice %212 {offsets = [58, 0], sizes = [1, 128], strides = [1, 1]} : vector<64x128xf32> to vector<1x128xf32>
    %374 = vector.extract_strided_slice %212 {offsets = [59, 0], sizes = [1, 128], strides = [1, 1]} : vector<64x128xf32> to vector<1x128xf32>
    %375 = arith.maximumf %373, %374 : vector<1x128xf32>
    %376 = arith.maximumf %372, %375 : vector<1x128xf32>
    %377 = arith.truncf %376 : vector<1x128xf32> to vector<1x128xbf16>
    %c13 = arith.constant 13 : index
    %c0_285 = arith.constant 0 : index
    %c0_286 = arith.constant 0 : index
    %378 = vector.load %arg6[%c13, %c0_285, %c0_286] : memref<16x128x128xbf16, #tpu.memory_space<vmem>>, vector<1x128x128xbf16>
    %379 = vector.shape_cast %378 : vector<1x128x128xbf16> to vector<128x128xbf16>
    %cst_287 = arith.constant dense<0.000000e+00> : vector<1x128xf32>
    %380 = tpu.matmul %377, %379, %cst_287 {dimension_numbers = #tpu.dot_dimension_numbers<[1], [0], [0], [1], [0, 0, 1, 1], [], []>} : vector<1x128xbf16>, vector<128x128xbf16>, vector<1x128xf32> -> vector<1x128xf32>
    %381 = arith.addf %369, %380 : vector<1x128xf32>
    %382 = vector.extract_strided_slice %212 {offsets = [52, 0], sizes = [1, 128], strides = [1, 1]} : vector<64x128xf32> to vector<1x128xf32>
    %383 = vector.extract_strided_slice %212 {offsets = [53, 0], sizes = [1, 128], strides = [1, 1]} : vector<64x128xf32> to vector<1x128xf32>
    %384 = arith.maximumf %382, %383 : vector<1x128xf32>
    %385 = vector.extract_strided_slice %212 {offsets = [60, 0], sizes = [1, 128], strides = [1, 1]} : vector<64x128xf32> to vector<1x128xf32>
    %386 = vector.extract_strided_slice %212 {offsets = [61, 0], sizes = [1, 128], strides = [1, 1]} : vector<64x128xf32> to vector<1x128xf32>
    %387 = arith.maximumf %385, %386 : vector<1x128xf32>
    %388 = arith.maximumf %384, %387 : vector<1x128xf32>
    %389 = arith.truncf %388 : vector<1x128xf32> to vector<1x128xbf16>
    %c14 = arith.constant 14 : index
    %c0_288 = arith.constant 0 : index
    %c0_289 = arith.constant 0 : index
    %390 = vector.load %arg6[%c14, %c0_288, %c0_289] : memref<16x128x128xbf16, #tpu.memory_space<vmem>>, vector<1x128x128xbf16>
    %391 = vector.shape_cast %390 : vector<1x128x128xbf16> to vector<128x128xbf16>
    %cst_290 = arith.constant dense<0.000000e+00> : vector<1x128xf32>
    %392 = tpu.matmul %389, %391, %cst_290 {dimension_numbers = #tpu.dot_dimension_numbers<[1], [0], [0], [1], [0, 0, 1, 1], [], []>} : vector<1x128xbf16>, vector<128x128xbf16>, vector<1x128xf32> -> vector<1x128xf32>
    %393 = arith.addf %381, %392 : vector<1x128xf32>
    %394 = vector.extract_strided_slice %212 {offsets = [54, 0], sizes = [1, 128], strides = [1, 1]} : vector<64x128xf32> to vector<1x128xf32>
    %395 = vector.extract_strided_slice %212 {offsets = [55, 0], sizes = [1, 128], strides = [1, 1]} : vector<64x128xf32> to vector<1x128xf32>
    %396 = arith.maximumf %394, %395 : vector<1x128xf32>
    %397 = vector.extract_strided_slice %212 {offsets = [62, 0], sizes = [1, 128], strides = [1, 1]} : vector<64x128xf32> to vector<1x128xf32>
    %398 = vector.extract_strided_slice %212 {offsets = [63, 0], sizes = [1, 128], strides = [1, 1]} : vector<64x128xf32> to vector<1x128xf32>
    %399 = arith.maximumf %397, %398 : vector<1x128xf32>
    %400 = arith.maximumf %396, %399 : vector<1x128xf32>
    %401 = arith.truncf %400 : vector<1x128xf32> to vector<1x128xbf16>
    %c15 = arith.constant 15 : index
    %c0_291 = arith.constant 0 : index
    %c0_292 = arith.constant 0 : index
    %402 = vector.load %arg6[%c15, %c0_291, %c0_292] : memref<16x128x128xbf16, #tpu.memory_space<vmem>>, vector<1x128x128xbf16>
    %403 = vector.shape_cast %402 : vector<1x128x128xbf16> to vector<128x128xbf16>
    %cst_293 = arith.constant dense<0.000000e+00> : vector<1x128xf32>
    %404 = tpu.matmul %401, %403, %cst_293 {dimension_numbers = #tpu.dot_dimension_numbers<[1], [0], [0], [1], [0, 0, 1, 1], [], []>} : vector<1x128xbf16>, vector<128x128xbf16>, vector<1x128xf32> -> vector<1x128xf32>
    %405 = arith.addf %393, %404 : vector<1x128xf32>
    %406 = tpu.iota {dimensions = array<i32: 1>} : vector<1x128xi32>
    %c10_i32 = arith.constant 10 : i32
    %407 = vector.broadcast %c10_i32 : i32 to vector<1x128xi32>
    %408 = arith.cmpi slt, %406, %407 : vector<1x128xi32>
    %cst_294 = arith.constant -1.000000e+30 : f32
    %409 = vector.broadcast %cst_294 : f32 to vector<1x128xf32>
    %410 = arith.select %408, %405, %409 : vector<1x128xi1>, vector<1x128xf32>
    %cst_295 = arith.constant dense<0xFF800000> : vector<1xf32>
    %411 = vector.multi_reduction <maximumf>, %410, %cst_295 [1] : vector<1x128xf32> to vector<1xf32>
    %412 = vector.shape_cast %411 : vector<1xf32> to vector<1x1xf32>
    %413 = vector.broadcast %412 : vector<1x1xf32> to vector<1x128xf32>
    %414 = arith.subf %410, %413 : vector<1x128xf32>
    %415 = math.exp %414 : vector<1x128xf32>
    %cst_296 = arith.constant dense<0.000000e+00> : vector<1xf32>
    %416 = vector.multi_reduction <add>, %415, %cst_296 [1] : vector<1x128xf32> to vector<1xf32>
    %417 = vector.shape_cast %416 : vector<1xf32> to vector<1x1xf32>
    %418 = tpu.reciprocal %417 {approx = true} : vector<1x1xf32> -> vector<1x1xf32>
    %419 = vector.broadcast %418 : vector<1x1xf32> to vector<1x128xf32>
    %420 = arith.mulf %415, %419 : vector<1x128xf32>
    %c0_297 = arith.constant 0 : index
    %c0_298 = arith.constant 0 : index
    %c0_299 = arith.constant 0 : index
    %421 = vector.load %arg8[%c0_297, %c0_298, %c0_299] : memref<1x1x128xf32, #tpu.memory_space<vmem>>, vector<1x1x128xf32>
    %422 = vector.shape_cast %421 : vector<1x1x128xf32> to vector<1x128xf32>
    %423 = vector.shape_cast %420 : vector<1x128xf32> to vector<1x1x128xf32>
    tpu.vector_store %arg8[%c0_297, %c0_298, %c0_299], %423 {strides = array<i32>} : memref<1x1x128xf32, #tpu.memory_space<vmem>>, vector<1x1x128xf32>,
    return
  }
  func.func @transform_0(%arg0: i32) -> (i32, i32, i32, i32, i32) {
    %c0_i32 = arith.constant 0 : i32
    %c0_i32_0 = arith.constant 0 : i32
    %c0_i32_1 = arith.constant 0 : i32
    %c0_i32_2 = arith.constant 0 : i32
    %c0_i32_3 = arith.constant 0 : i32
    return %arg0, %c0_i32, %c0_i32_0, %c0_i32_1, %c0_i32_2 : i32, i32, i32, i32, i32
  }
  func.func @transform_1(%arg0: i32) -> (i32, i32, i32) {
    %c0_i32 = arith.constant 0 : i32
    %c0_i32_0 = arith.constant 0 : i32
    %c0_i32_1 = arith.constant 0 : i32
    %c0_i32_2 = arith.constant 0 : i32
    return %c0_i32, %c0_i32_0, %c0_i32_1 : i32, i32, i32
  }
  func.func @transform_2(%arg0: i32) -> (i32, i32) {
    %c0_i32 = arith.constant 0 : i32
    %c0_i32_0 = arith.constant 0 : i32
    %c0_i32_1 = arith.constant 0 : i32
    return %c0_i32, %c0_i32_0 : i32, i32
  }
  func.func @transform_3(%arg0: i32) -> (i32, i32, i32) {
    %c0_i32 = arith.constant 0 : i32
    %c0_i32_0 = arith.constant 0 : i32
    %c0_i32_1 = arith.constant 0 : i32
    %c0_i32_2 = arith.constant 0 : i32
    return %c0_i32, %c0_i32_0, %c0_i32_1 : i32, i32, i32
  }
  func.func @transform_4(%arg0: i32) -> (i32, i32) {
    %c0_i32 = arith.constant 0 : i32
    %c0_i32_0 = arith.constant 0 : i32
    %c0_i32_1 = arith.constant 0 : i32
    return %c0_i32, %c0_i32_0 : i32, i32
  }
  func.func @transform_5(%arg0: i32) -> (i32, i32, i32) {
    %c0_i32 = arith.constant 0 : i32
    %c0_i32_0 = arith.constant 0 : i32
    %c0_i32_1 = arith.constant 0 : i32
    %c0_i32_2 = arith.constant 0 : i32
    return %c0_i32, %c0_i32_0, %c0_i32_1 : i32, i32, i32
  }
  func.func @transform_6(%arg0: i32) -> (i32, i32) {
    %c0_i32 = arith.constant 0 : i32
    %c0_i32_0 = arith.constant 0 : i32
    %c0_i32_1 = arith.constant 0 : i32
    return %c0_i32, %c0_i32_0 : i32, i32
  }
  func.func @transform_7(%arg0: i32) -> (i32, i32, i32) {
    %c0_i32 = arith.constant 0 : i32
    %c0_i32_0 = arith.constant 0 : i32
    %c0_i32_1 = arith.constant 0 : i32
    return %arg0, %c0_i32, %c0_i32_0 : i32, i32, i32
  }
}

</mosaic_0001>

<bundles_post_ra>
// kernel: _vgg_fused_forward.1
= control target key start
LH: loop header
LB: loop body
LE: loop exit
PB: predicated region body
PF: predicated region fallthrough
CT: control target
= control target key end

     0   :  { %12 = vsyncpa [#allocation4], 0  ;;  %s14391_s0 = inlined_call_operand.vmem [shape: bf16[2,2,18,9,128], index: 0, kind: input, shape index: {}]   ;;  %s14392_s1 = inlined_call_operand.vmem [shape: bf16[9,128,128], index: 1, kind: input, shape index: {}]   ;;  %s14393_s2 = inlined_call_operand.vmem [shape: f32[1,128], index: 2, kind: input, shape index: {}]   ;;  %s14394_s3 = inlined_call_operand.hbm [shape: bf16[9,128,128], index: 3, kind: input, shape index: {}]   ;;  %s14395_s4 = inlined_call_operand.vmem [shape: f32[1,128], index: 4, kind: input, shape index: {}]   ;;  %s14396_s5 = inlined_call_operand.vmem [shape: bf16[16,128,128], index: 5, kind: input, shape index: {}]   ;;  %s14397_s6 = inlined_call_operand.vmem [shape: f32[1,128], index: 6, kind: input, shape index: {}]   ;;  %s14398_s7 = inlined_call_operand.hbm [shape: f32[2,1,128], index: 7, kind: output, shape index: {}]  }
   0x1   :  { %13 = vsyncpa [#allocation5], 0 }
   0x2   :  { %15 = vsyncpa [#allocation5 + $0x1], 0  ;;  %s11563_s24 = smov 0   ;;  %s11565_s25 = smov 0  }
   0x3   :  { %s11567_s26 = smov 0   ;;  %s11569_s27 = smov 0  }
   0x4 LB: > { %s11584_s28 = sadd.s32 4294967295, %s11515_s27   ;;  %s8308_s29 = sadd.s32 4294967294, %s11515_s27   ;;  %s11515_s27 = sphi %s11569_s27, %s14538_s27   ;;  %s11511_s26 = sphi %s11567_s26, %s14537_s26   ;;  %s11507_s25 = sphi %s11565_s25, %s14536_s25   ;;  %s11503_s24 = sphi %s11563_s24, %s14535_s24  }
   0x5   : > { %s11588_s30 = sadd.s32 1, %s11515_s27   ;;  %s180_s8 = sadd.s32 1, %s11511_s26 }
   0x6   : > { %s177_s9 = ssub.s32 %s11515_s27, %s11588_s30  ;;  %p190_p0 = scmp.ne.s32.totalorder %s11511_s26, %s11507_s25 }
   0x7   : > { %p178_p1 = scmp.eq.s32.totalorder %s177_s9, 0  ;;  %p191_p2 = scmp.eq.s32.totalorder %s11584_s28, 1 }
   0x8   : > { %p196_p3 = scmp.ne.s32.totalorder %s11507_s25, %s11503_s24  ;;  %p197_p4 = scmp.eq.s32.totalorder %s8308_s29, 1 }
   0x9   : > { %s11599_s10 = scalar_select %p178_p1, %s11511_s26, %s180_s8  }
   0xa   : > { %p11601_p5 = por %p191_p2, %p190_p0  ;;  %p11605_p6 = por %p197_p4, %p196_p3 }
   0xb   : > { %p8309_p7 = scmp.ge.s32.totalorder %s11515_s27, 1  ;;  %p204_p8 = scmp.lt.s32.totalorder %s11515_s27, 3 }
   0xc   : > { %s14407_s12 = scalar_select %p11605_p6, 1, 0 }
   0xd   : > { %p10963_p9 = scmp.eq.s32.totalorder %s11584_s28, 0  ;;  %p11612_p10 = pnand %p8309_p7, %p204_p8 }
   0xe   : > { %s11517_s14 = smov [#allocation3]  }
   0xf   : > { %s222_s15 = sshll.u32 %s11517_s14, 4  ;;  %p10955_p11 = pneg %p11612_p10  ;;  %s223_s15 = int_to_ptr.vmem [resolvable:$true] %s222_s15 }
  0x10   : > { %s11436_s16 = scalar_lea.vmem %s223_s15, 9216  ;;  %p11444_p3 = scmp.lt.s32.totalorder %s223_s15, %s223_s15 }
  0x11   : > { %p10956_p12 = pnand %p10963_p9, %p10955_p11  ;;  %p11437_p0 = scmp.ne.s32.totalorder %s223_s15, %s11436_s16 }
  0x12   : > { %p11445_p4 = scmp.lt.s32.totalorder %s11436_s16, %s11436_s16 }
  0x13   : > { %p11427_p13 = pneg %p10956_p12 }
  0x14   : > { %p11446_p6 = por %p11445_p4, %p11444_p3 }
  0x15   : > { %p11439_p1 = pnand %p11437_p0, %p11427_p13 }
  0x17   : > { %p11440_p2 = pneg %p11439_p1 }
  0x19   : > { %p11447_p7 = pnand %p11446_p6, %p11440_p2 }
  0x1b   : > { %11450 = shalt.err (!%p11447_p7)
}
  0x1c   : > { %s11518_s17 = smov 64   ;;  %s11519_s18 = smov 4  }
  0x1d   : > { %10958 = dma.hbm_to_vmem [thread:$0]  (!%p10956_p12), %s14394_s3, 9216, %s223_s15, [#allocation4], %s11518_s17, %s11518_s17, %s11519_s18  }
  0x1e   : > { %255 = sbr.rel (%p11612_p10) target bundleno = 1671 (0x687), region = 48 }
  0x23   : > { %11494 = dma.done.wait (%p10963_p9), [#allocation4], 9216  }
  0x24   : > { %11496 = vsyncadd (%p10963_p9), [#allocation4], 4294958080  ;;  %v11003_v0 = vld [vmem:[%s14392_s1 + $0x78] sm:$0xff]   ;;  %p286_p6 = scmp.lt.s32.totalorder %s11584_s28, 1  ;;  %v11005_v2 = vld [vmem:[%s14392_s1 + $0x70] sm:$0xff]   ;;  %vm11521_vm3 = vmmov 0  }
  0x25   : > { %v11004_v1 = vld [vmem:[%s14392_s1 + $0x38] sm:$0xff]   ;;  %9836 = vmatprep.subr.bf16.mxu0 %v11003_v0  ;;  %v11006_v3 = vld [vmem:[%s14392_s1 + $0x30] sm:$0xff]   ;;  %v11007_v4 = vld [vmem:[%s14392_s1 + $0x68] sm:$0xff]   ;;  %vm776_vm0 = vsmask.f32 3328  ;;  %vm8215_vm5 = vcmask 1040384  }
  0x26   : > { %9868 = vmatprep.subr.bf16.mxu1 %v11004_v1  ;;  %9837 = vmatpush3.bf16.msra.mxu0 %v11003_v0  ;;  %v11008_v5 = vld [vmem:[%s14392_s1 + $0x28] sm:$0xff]   ;;  %s287_s19 = scalar_select %p286_p6, %s11584_s28, 1  ;;  %v11009_v6 = vld [vmem:[%s14392_s1 + $0x60] sm:$0xff]   ;;  %v11011_v8 = vld [vmem:[%s14392_s1 + $0x58] sm:$0xff]   ;;  %vm777_vm1 = vsmask.f32 7440 }
  0x27   : > { %9869 = vmatpush3.bf16.msra.mxu1 %v11004_v1  ;;  %9838 = vmatprep.subr.bf16.mxu0 %v11005_v2  ;;  %v11010_v7 = vld [vmem:[%s14392_s1 + $0x20] sm:$0xff]   ;;  %v11012_v9 = vld [vmem:[%s14392_s1 + $0x18] sm:$0xff]   ;;  %v11013_v10 = vld [vmem:[%s14392_s1 + $0x50] sm:$0xff]   ;;  %s284_s22 = sand.u32 1, %s11507_s25   ;;  %s9293_s23 = sshll.u32 %s11584_s28, 4 }
  0x28   : > { %9870 = vmatprep.subr.bf16.mxu1 %v11006_v3  ;;  %s10948_s29 = smul.u32 288, %s287_s19  ;;  %v11014_v11 = vld [vmem:[%s14392_s1 + $0x10] sm:$0xff]   ;;  %v11015_v14 = vld [vmem:[%s14392_s1 + $0x48] sm:$0xff]   ;;  %v11017_v16 = vld [vmem:[%s14392_s1 + $0x40] sm:$0xff]   ;;  %s8239_s13 = scalar_lea.hbm %s14398_s7, %s9293_s23 }
  0x29   : > { %v11016_v15 = vld [vmem:[%s14392_s1 + $0x8] sm:$0xff]   ;;  %v11018_v17 = vld [vmem:[%s14392_s1] sm:$0xff]   ;;  %v11023_v19 = vld [vmem:[%s14392_s1 + $0xb8] sm:$0xff]   ;;  %s8229_s14 = scalar_lea.sflag [#allocation5], %s284_s22  ;;  %s11522_s16 = smov [#allocation6]  }
  0x2a   : > { %9839 = vmatpush3.bf16.msra.mxu0 %v11005_v2  ;;  %s11664_s17 = scalar_lea.vmem %s14391_s0, %s10948_s29  ;;  %v11024_v20 = vld [vmem:[%s14392_s1 + $0xf8] sm:$0xff]   ;;  %v11025_v22 = vld [vmem:[%s14392_s1 + $0xb0] sm:$0xff]   ;;  %v11031_v27 = vld [vmem:[%s14392_s1 + $0xa8] sm:$0xff]   ;;  %s285_s29 = scalar_lea.vmem [#allocation6], %s284_s22 }
  0x2b   : > { %9871 = vmatpush3.bf16.msra.mxu1 %v11006_v3  ;;  %9840 = vmatprep.subr.bf16.mxu0 %v11007_v4  ;;  %v11019_v12 = vld [vmem:[%s11664_s17 + $0x90] ss:$8 sps:$4 sm:$0xff]   ;;  %v11020_v13 = vld [vmem:[%s11664_s17] ss:$8 sps:$4 sm:$0xff]   ;;  %v745_v43 = vld [vmem:[%s11664_s17 + $0x4] sm:$0x1] }
  0x2c   : > { %9872 = vmatprep.subr.bf16.mxu1 %v11008_v5  ;;  %9852 = vmatprep.mubr.bf16.mxu0 %v11019_v12  ;;  %v11021_v18 = vld [vmem:[%s11664_s17 + $0xa0] ss:$8 sps:$4 sm:$0xff]   ;;  %v11022_v21 = vld [vmem:[%s11664_s17 + $0x10] ss:$8 sps:$4 sm:$0xff]   ;;  %v747_v45 = vld [vmem:[%s11664_s17 + $0xc] sm:$0x1] }
  0x2d   : > { %9884 = vmatprep.mubr.bf16.mxu1 %v11020_v13  ;;  %v11026_v23 = vld [vmem:[%s14392_s1 + $0xf0] sm:$0xff]   ;;  %v11028_v25 = vld [vmem:[%s11664_s17 + $0x20] ss:$8 sps:$4 sm:$0xff]   ;;  %v11039_v35 = vld [vmem:[%s14392_s1 + $0x98] sm:$0xff]   ;;  %v789_v48 = vshll.u32 %v745_v43, 16  ;;  %v803_v51 = vshll.u32 %v747_v45, 16 }
  0x2e   : > { %9841 = vmatpush3.bf16.msra.mxu0 %v11007_v4  ;;  %v11027_v24 = vld [vmem:[%s11664_s17 + $0xb0] ss:$8 sps:$4 sm:$0xff]   ;;  %v11029_v26 = vld [vmem:[%s11664_s17 + $0xc0] ss:$8 sps:$4 sm:$0xff]   ;;  %v749_v62 = vld [vmem:[%s11664_s17 + $0x14] sm:$0x1] }
  0x2f   : > { %9873 = vmatpush3.bf16.msra.mxu1 %v11008_v5  ;;  %9842 = vmatprep.subr.bf16.mxu0 %v11009_v6  ;;  %v11032_v28 = vld [vmem:[%s14392_s1 + $0xe8] sm:$0xff]   ;;  %v11030_v29 = vld [vmem:[%s11664_s17 + $0x30] ss:$8 sps:$4 sm:$0xff]   ;;  %v11033_v30 = vld [vmem:[%s14392_s1 + $0xa0] sm:$0xff]   ;;  %v791_v56 = vrot.slane %v789_v48, 5  ;;  %v805_v60 = vrot.slane %v803_v51, 5 }
  0x30   : > { %9874 = vmatprep.subr.bf16.mxu1 %v11010_v7  ;;  %v11034_v31 = vld [vmem:[%s14392_s1 + $0xe0] sm:$0xff]   ;;  %v11035_v32 = vld [vmem:[%s11664_s17 + $0xd0] ss:$8 sps:$4 sm:$0xff]   ;;  %v746_v44 = vld [vmem:[%s11664_s17 + $0x8] sm:$0xf]  ;;  %s8241_s8 = sshll.u32 %s285_s29, 4  ;;  %s8242_s8 = int_to_ptr.vmem [resolvable:$true] %s8241_s8 }
  0x31   : > { %v11036_v33 = vld [vmem:[%s11664_s17 + $0x40] ss:$8 sps:$4 sm:$0xff]   ;;  %v11038_v36 = vld [vmem:[%s11664_s17 + $0x50] ss:$8 sps:$4 sm:$0xff]   ;;  %v794_v49 = vshrl.u32 %v746_v44, 16  ;;  %v797_v50 = vshll.u32 %v746_v44, 16  ;;  %vm11755_vm2 = vmor %vm776_vm0, %vm777_vm1 }
  0x32   : > { %9843 = vmatpush3.bf16.msra.mxu0 %v11009_v6  ;;  %v11037_v34 = vld [vmem:[%s11664_s17 + $0xe0] ss:$8 sps:$4 sm:$0xff]   ;;  %v11040_v37 = vld [vmem:[%s14392_s1 + $0xd8] sm:$0xff]   ;;  %v11041_v38 = vld [vmem:[%s14392_s1 + $0x90] sm:$0xff]   ;;  %s11451_s15 = scalar_lea.vmem %s8242_s8, 16  ;;  %s11455_s18 = sshll.u32 %s11522_s16, 4  ;;  %s11456_s18 = int_to_ptr.vmem [resolvable:$false] %s11455_s18 }
  0x33   : > { %9875 = vmatpush3.bf16.msra.mxu1 %v11010_v7  ;;  %9844 = vmatprep.subr.bf16.mxu0 %v11011_v8  ;;  %v11042_v39 = vld [vmem:[%s14392_s1 + $0xd0] sm:$0xff]   ;;  %v11044_v41 = vld [vmem:[%s11664_s17 + $0x60] ss:$8 sps:$4 sm:$0xff]   ;;  %v796_v57 = vrot.slane %v794_v49, 4  ;;  %v799_v59 = vrot.slane %v797_v50, 5  ;;  %p11452_p8 = scmp.ne.s32.totalorder %s8242_s8, %s11451_s15  ;;  %s11457_s28 = scalar_lea.vmem %s11456_s18, 32 }
  0x34   : > { %9876 = vmatprep.subr.bf16.mxu1 %v11012_v9  ;;  %v11043_v40 = vld [vmem:[%s11664_s17 + $0xf0] ss:$8 sps:$4 sm:$0xff]   ;;  %v744_v42 = vld [vmem:[%s11664_s17] sm:$0xf]  ;;  %v11047_v52 = vld [vmem:[%s14392_s1 + $0x88] sm:$0xff]   ;;  %p11458_p11 = scmp.lt.s32.totalorder %s8242_s8, %s11456_s18  ;;  %p11459_p12 = scmp.lt.s32.totalorder %s11457_s28, %s11451_s15 }
  0x35   : > { %v780_v46 = vshrl.u32 %v744_v42, 16  ;;  %v783_v47 = vshll.u32 %v744_v42, 16  ;;  %v11048_v53 = vld [vmem:[%s14392_s1 + $0xc8] sm:$0xff]   ;;  %v748_v61 = vld [vmem:[%s11664_s17 + $0x10] sm:$0xf]  ;;  %v11049_v5 = vld [vmem:[%s14392_s1 + $0x80] sm:$0xff]   ;;  %v800_v7 = vor.u32 %v799_v59, %v796_v57  ;;  %p11453_p9 = pnand %p11452_p8, %p11601_p5 }
  0x36   : > { %9845 = vmatpush3.bf16.msra.mxu0 %v11011_v8  ;;  %v11045_v58 = vld [vmem:[%s11664_s17 + $0x100] ss:$8 sps:$4 sm:$0xff]   ;;  %v11046_v63 = vld [vmem:[%s11664_s17 + $0x70] ss:$8 sps:$4 sm:$0xff]   ;;  %v751_v2 = vld [vmem:[%s11664_s17 + $0x1c] sm:$0x1]  ;;  %p11460_p13 = por %p11459_p12, %p11458_p11 }
  0x37   : > { %9877 = vmatpush3.bf16.msra.mxu1 %v11012_v9  ;;  %9846 = vmatprep.subr.bf16.mxu0 %v11013_v10  ;;  %v782_v54 = vrot.slane %v780_v46, 4  ;;  %v785_v55 = vrot.slane %v783_v47, 5  ;;  %v750_v1 = vld [vmem:[%s11664_s17 + $0x18] sm:$0xf]  ;;  %v808_v3 = vshrl.u32 %v748_v61, 16  ;;  %v811_v4 = vshll.u32 %v748_v61, 16  ;;  %p11454_p10 = pneg %p11453_p9 }
  0x38   : > { %9878 = vmatprep.subr.bf16.mxu1 %v11014_v11  ;;  %v817_v8 = vshll.u32 %v749_v62, 16  ;;  %v822_v9 = vshrl.u32 %v750_v1, 16  ;;  %v11055_v45 = vld [vmem:[%s14392_s1 + $0x130] sm:$0xff]   ;;  %v758_v57 = vld [vmem:[%s11664_s17 + $0x38] sm:$0xf]  ;;  %v11059_v59 = vld [vmem:[%s14392_s1 + $0x128] sm:$0xff]  }
  0x39   : > { %v786_v0 = vor.u32 %v785_v55, %v782_v54  ;;  %v810_v12 = vrot.slane %v808_v3, 4  ;;  %v813_v13 = vrot.slane %v811_v4, 5  ;;  %v11056_v46 = vld [vmem:[%s14392_s1 + $0x170] sm:$0xff]   ;;  %v881_v3 = vshll.u32 %v758_v57, 16  ;;  %p11461_p0 = pnand %p11460_p13, %p11454_p10 }
  0x3a   : > { %9847 = vmatpush3.bf16.msra.mxu0 %v11013_v10  ;;  %v825_v10 = vshll.u32 %v750_v1, 16  ;;  %v11057_v49 = vld [vmem:[%s11664_s17 + $0x28] ss:$8 sps:$4 sm:$0xff]  }
  0x3b   : > { %9879 = vmatpush3.bf16.msra.mxu1 %v11014_v11  ;;  %9848 = vmatprep.subr.bf16.mxu0 %v11015_v14  ;;  %v787_v11 = vrot.slane %v786_v0, 4  ;;  %v756_v54 = vld [vmem:[%s11664_s17 + $0x30] sm:$0xf]  ;;  %v11060_v0 = vld [vmem:[%s14392_s1 + $0x168] sm:$0xff]  }
  0x3c   : > { %9880 = vmatprep.subr.bf16.mxu1 %v11016_v15  ;;  %v864_v61 = vshrl.u32 %v756_v54, 16  ;;  %v867_v62 = vshll.u32 %v756_v54, 16 }
  0x3e   : > { %9849 = vmatpush3.bf16.msra.mxu0 %v11015_v14  ;;  %v831_v14 = vshll.u32 %v751_v2, 16  ;;  %v878_v2 = vshrl.u32 %v758_v57, 16  ;;  %v11068_v57 = vld [vmem:[%s14392_s1 + $0x150] sm:$0xff]  }
  0x3f   : > { %9881 = vmatpush3.bf16.msra.mxu1 %v11016_v15  ;;  %9850 = vmatprep.subr.bf16.mxu0 %v11017_v16  ;;  %v11050_v15 = vld [vmem:[%s14392_s1 + $0xc0] sm:$0xff]  }
  0x40   : > { %9882 = vmatprep.subr.bf16.mxu1 %v11018_v17 }
  0x42   : > { %9851 = vmatpush3.bf16.msra.mxu0 %v11017_v16  ;;  %v801_v16 = vrot.slane %v800_v7, 4  ;;  %v866_v7 = vrot.slane %v864_v61, 4 }
  0x43   : > { %9883 = vmatpush3.bf16.msra.mxu1 %v11018_v17  ;;  %9900 = vmatprep.subr.bf16.mxu0 %v11023_v19  ;;  %v11051_v17 = vld [vmem:[%s11664_s17 + $0x8] ss:$8 sps:$4 sm:$0xff]  }
  0x44   : > { %9932 = vmatprep.subr.bf16.mxu1 %v11024_v20 }
  0x45   : > { %9853 = vmatmul.mubr.bf16.vlgmr.msra.gmra.mxu0 %v11021_v18  ;;  %v824_v18 = vrot.slane %v822_v9, 4 }
  0x46   : > { %9885 = vmatmul.mubr.bf16.vlgmr.msra.gmra.mxu1 %v11022_v21  ;;  %9901 = vmatpush3.bf16.msra.mxu0 %v11023_v19  ;;  %v827_v19 = vrot.slane %v825_v10, 5  ;;  %v814_v21 = vor.u32 %v813_v13, %v810_v12  ;;  %v11058_v10 = vld [vmem:[%s11664_s17 + $0x38] ss:$8 sps:$4 sm:$0xff]   ;;  %v880_v12 = vrot.slane %v878_v2, 4  ;;  %v883_v13 = vrot.slane %v881_v3, 5 }
  0x47   : > { %9933 = vmatpush3.bf16.msra.mxu1 %v11024_v20  ;;  %9902 = vmatprep.subr.bf16.mxu0 %v11025_v22  ;;  %v792_v20 = vsel %vm11755_vm2, %v787_v11, %v791_v56  ;;  %v757_v56 = vld [vmem:[%s11664_s17 + $0x34] sm:$0x1]  ;;  %v11064_v2 = vld [vmem:[%s11664_s17 + $0x58] ss:$8 sps:$4 sm:$0xff]  }
  0x48   : > { %9934 = vmatprep.subr.bf16.mxu1 %v11026_v23  ;;  %9856 = vmatprep.mubr.bf16.mxu0 %v11027_v24  ;;  %v806_v24 = vsel %vm11755_vm2, %v801_v16, %v805_v60 }
  0x49   : > { %9888 = vmatprep.mubr.bf16.mxu1 %v11028_v25  ;;  %v828_v25 = vor.u32 %v827_v19, %v824_v18  ;;  %v884_v19 = vor.u32 %v883_v13, %v880_v12 }
  0x4a   : > { %9903 = vmatpush3.bf16.msra.mxu0 %v11025_v22  ;;  %v819_v22 = vrot.slane %v817_v8, 5  ;;  %v869_v8 = vrot.slane %v867_v62, 5 }
  0x4b   : > { %9935 = vmatpush3.bf16.msra.mxu1 %v11026_v23  ;;  %9904 = vmatprep.subr.bf16.mxu0 %v11031_v27  ;;  %v833_v23 = vrot.slane %v831_v14, 5 }
  0x4c   : > { %9936 = vmatprep.subr.bf16.mxu1 %v11032_v28 }
  0x4d   : > { %9857 = vmatmul.mubr.bf16.gmra.mxu0 %v11029_v26  ;;  %v11767_v26 = vcombine.low %v792_v20, %v806_v24  ;;  %v761_v24 = vld [vmem:[%s11664_s17 + $0x44] sm:$0x1] }
  0x4e   : > { %9889 = vmatmul.mubr.bf16.gmra.mxu1 %v11030_v29  ;;  %9905 = vmatpush3.bf16.msra.mxu0 %v11031_v27  ;;  %v815_v27 = vrot.slane %v814_v21, 4  ;;  %v829_v29 = vrot.slane %v828_v25, 4  ;;  %v11062_v21 = vld [vmem:[%s14392_s1 + $0x160] sm:$0xff]   ;;  %v762_v25 = vld [vmem:[%s11664_s17 + $0x48] sm:$0xf] }
  0x4f   : > { %9937 = vmatpush3.bf16.msra.mxu1 %v11032_v28  ;;  %9906 = vmatprep.subr.bf16.mxu0 %v11033_v30  ;;  %v11053_v28 = vld [vmem:[%s14392_s1 + $0x138] sm:$0xff]  }
  0x50   : > { %9938 = vmatprep.subr.bf16.mxu1 %v11034_v31  ;;  %9860 = vmatprep.mubr.bf16.mxu0 %v11035_v32  ;;  %v820_v32 = vsel %vm11755_vm2, %v815_v27, %v819_v22  ;;  %v760_v22 = vld [vmem:[%s11664_s17 + $0x40] sm:$0xf] }
  0x51   : > { %9892 = vmatprep.mubr.bf16.mxu1 %v11036_v33  ;;  %v11052_v33 = vld [vmem:[%s11664_s17 + $0x18] ss:$8 sps:$4 sm:$0xff]   ;;  %v892_v27 = vshrl.u32 %v760_v22, 16 }
  0x52   : > { %9907 = vmatpush3.bf16.msra.mxu0 %v11033_v30  ;;  %v11054_v30 = vld [vmem:[%s14392_s1 + $0x178] sm:$0xff]  }
  0x53   : > { %9939 = vmatpush3.bf16.msra.mxu1 %v11034_v31  ;;  %9908 = vmatprep.subr.bf16.mxu0 %v11039_v35  ;;  %v752_v31 = vld [vmem:[%s11664_s17 + $0x20] sm:$0xf] }
  0x54   : > { %9940 = vmatprep.subr.bf16.mxu1 %v11040_v37 }
  0x55   : > { %9861 = vmatmul.mubr.bf16.gmra.mxu0 %v11037_v34  ;;  %v753_v34 = vld [vmem:[%s11664_s17 + $0x24] sm:$0x1] }
  0x56   : > { %9893 = vmatmul.mubr.bf16.gmra.mxu1 %v11038_v36  ;;  %9909 = vmatpush3.bf16.msra.mxu0 %v11039_v35  ;;  %v754_v35 = vld [vmem:[%s11664_s17 + $0x28] sm:$0xf]  ;;  %v755_v36 = vld [vmem:[%s11664_s17 + $0x2c] sm:$0x1] }
  0x57   : > { %9941 = vmatpush3.bf16.msra.mxu1 %v11040_v37  ;;  %9910 = vmatprep.subr.bf16.mxu0 %v11041_v38  ;;  %v834_v37 = vsel %vm11755_vm2, %v829_v29, %v833_v23  ;;  %v850_v42 = vshrl.u32 %v754_v35, 16  ;;  %v853_v43 = vshll.u32 %v754_v35, 16  ;;  %v859_v44 = vshll.u32 %v755_v36, 16  ;;  %v763_v29 = vld [vmem:[%s11664_s17 + $0x4c] sm:$0x1] }
  0x58   : > { %9942 = vmatprep.subr.bf16.mxu1 %v11042_v39  ;;  %9864 = vmatprep.mubr.bf16.mxu0 %v11043_v40  ;;  %v845_v40 = vshll.u32 %v753_v34, 16  ;;  %v885_v23 = vrot.slane %v884_v19, 4  ;;  %v894_v34 = vrot.slane %v892_v27, 4  ;;  %v909_v35 = vshll.u32 %v762_v25, 16  ;;  %v770_v19 = vld [vmem:[%s11664_s17 + $0x68] sm:$0xf] }
  0x59   : > { %9896 = vmatprep.mubr.bf16.mxu1 %v11044_v41  ;;  %v11785_v41 = vcombine.low %v820_v32, %v834_v37  ;;  %v852_v51 = vrot.slane %v850_v42, 4  ;;  %v906_v32 = vshrl.u32 %v762_v25, 16  ;;  %v915_v36 = vshll.u32 %v763_v29, 16  ;;  %v11065_v37 = vld [vmem:[%s14392_s1 + $0x118] sm:$0xff]  }
  0x5a   : > { %9911 = vmatpush3.bf16.msra.mxu0 %v11041_v38  ;;  %v836_v38 = vshrl.u32 %v752_v31, 16  ;;  %v847_v50 = vrot.slane %v845_v40, 5  ;;  %v962_v25 = vshrl.u32 %v770_v19, 16  ;;  %v965_v29 = vshll.u32 %v770_v19, 16 }
  0x5b   : > { %9943 = vmatpush3.bf16.msra.mxu1 %v11042_v39  ;;  %9912 = vmatprep.subr.bf16.mxu0 %v11047_v52  ;;  %v839_v39 = vshll.u32 %v752_v31, 16  ;;  %v901_v31 = vshll.u32 %v761_v24, 16  ;;  %v908_v42 = vrot.slane %v906_v32, 4 }
  0x5c   : > { %9944 = vmatprep.subr.bf16.mxu1 %v11048_v53  ;;  %v838_v47 = vrot.slane %v836_v38, 4 }
  0x5d   : > { %9865 = vmatmul.mubr.bf16.gmra.mxu0 %v11045_v58  ;;  %v841_v48 = vrot.slane %v839_v39, 5  ;;  %v759_v58 = vld [vmem:[%s11664_s17 + $0x3c] sm:$0x1]  ;;  %v903_v40 = vrot.slane %v901_v31, 5  ;;  %v11073_v31 = vld [vmem:[%s14392_s1 + $0x100] sm:$0xff]  }
  0x5e   : > { %9897 = vmatmul.mubr.bf16.gmra.mxu1 %v11046_v63  ;;  %9913 = vmatpush3.bf16.msra.mxu0 %v11047_v52  ;;  %v855_v52 = vrot.slane %v853_v43, 5  ;;  %v873_v63 = vshll.u32 %v757_v56, 16  ;;  %v887_v4 = vshll.u32 %v759_v58, 16  ;;  %v11066_v43 = vld [vmem:[%s14392_s1 + $0x158] sm:$0xff]  }
  0x5f   : > { %9945 = vmatpush3.bf16.msra.mxu1 %v11048_v53  ;;  %9914 = vmatprep.subr.bf16.mxu0 %v11049_v5  ;;  %v861_v53 = vrot.slane %v859_v44, 5  ;;  %v842_v55 = vor.u32 %v841_v48, %v838_v47  ;;  %v911_v44 = vrot.slane %v909_v35, 5  ;;  %v764_v47 = vld [vmem:[%s11664_s17 + $0x50] sm:$0xf]  ;;  %v964_v35 = vrot.slane %v962_v25, 4 }
  0x60   : > { %9946 = vmatprep.subr.bf16.mxu1 %v11050_v15  ;;  %9916 = vmatprep.mubr.bf16.mxu0 %v11767_v26  ;;  %v856_v60 = vor.u32 %v855_v52, %v852_v51  ;;  %v875_v9 = vrot.slane %v873_v63, 5  ;;  %v889_v14 = vrot.slane %v887_v4, 5  ;;  %v767_v51 = vld [vmem:[%s11664_s17 + $0x5c] sm:$0x1]  ;;  %v11067_v52 = vld [vmem:[%s14392_s1 + $0x110] sm:$0xff]   ;;  %v920_v54 = vshrl.u32 %v764_v47, 16 }
  0x61   : > { %9948 = vmatprep.mubr.bf16.mxu1 %v11051_v17  ;;  %v843_v1 = vrot.slane %v842_v55, 4  ;;  %v870_v17 = vor.u32 %v869_v8, %v866_v7  ;;  %v923_v55 = vshll.u32 %v764_v47, 16  ;;  %v943_v61 = vshll.u32 %v767_v51, 16  ;;  %v11071_v8 = vld [vmem:[%s14392_s1 + $0x108] sm:$0xff]   ;;  %v11886_v47 = vld [vmem:[%s14392_s1 + $0x1b8] sm:$0xff]  }
  0x62   : > { %9915 = vmatpush3.bf16.msra.mxu0 %v11049_v5  ;;  %v857_v5 = vrot.slane %v856_v60, 4  ;;  %v922_v63 = vrot.slane %v920_v54, 4 }
  0x63   : > { %9947 = vmatpush3.bf16.msra.mxu1 %v11050_v15  ;;  %9964 = vmatprep.subr.bf16.mxu0 %v11053_v28  ;;  %v848_v11 = vsel %vm11755_vm2, %v843_v1, %v847_v50  ;;  %v11061_v15 = vld [vmem:[%s14392_s1 + $0x120] sm:$0xff]   ;;  %v871_v20 = vrot.slane %v870_v17, 4  ;;  %v766_v50 = vld [vmem:[%s11664_s17 + $0x58] sm:$0xf]  ;;  %v945_v7 = vrot.slane %v943_v61, 5 }
  0x64   : > { %9996 = vmatprep.subr.bf16.mxu1 %v11054_v30  ;;  %v862_v16 = vsel %vm11755_vm2, %v857_v5, %v861_v53  ;;  %v912_v53 = vor.u32 %v911_v44, %v908_v42  ;;  %v937_v60 = vshll.u32 %v766_v50, 16  ;;  %v769_v17 = vld [vmem:[%s11664_s17 + $0x64] sm:$0x1]  ;;  %v772_v42 = vld [vmem:[%s11664_s17 + $0x70] sm:$0xf] }
  0x65   : > { %9917 = vmatmul.mubr.bf16.vlgmr.msra.gmra.mxu0 %v11785_v41  ;;  %v11813_v18 = vcombine.low %v848_v11, %v862_v16  ;;  %v957_v24 = vshll.u32 %v769_v17, 16  ;;  %v773_v44 = vld [vmem:[%s11664_s17 + $0x74] sm:$0x1]  ;;  %v11070_v61 = vld [vmem:[%s11664_s17 + $0x78] ss:$8 sps:$4 sm:$0xff]  }
  0x66   : > { %9949 = vmatmul.mubr.bf16.vlgmr.msra.gmra.mxu1 %v11052_v33  ;;  %9965 = vmatpush3.bf16.msra.mxu0 %v11053_v28  ;;  %v876_v28 = vsel %vm11755_vm2, %v871_v20, %v875_v9  ;;  %v890_v33 = vsel %vm11755_vm2, %v885_v23, %v889_v14  ;;  %v913_v62 = vrot.slane %v912_v53, 4  ;;  %v939_v5 = vrot.slane %v937_v60, 5  ;;  %v768_v14 = vld [vmem:[%s11664_s17 + $0x60] sm:$0xf] }
  0x67   : > { %9997 = vmatpush3.bf16.msra.mxu1 %v11054_v30  ;;  %9966 = vmatprep.subr.bf16.mxu0 %v11055_v45  ;;  %v895_v30 = vshll.u32 %v760_v22, 16  ;;  %v11830_v38 = vcombine.low %v876_v28, %v890_v33  ;;  %v948_v20 = vshrl.u32 %v768_v14, 16  ;;  %v771_v22 = vld [vmem:[%s11664_s17 + $0x6c] sm:$0x1]  ;;  %v951_v23 = vshll.u32 %v768_v14, 16 }
  0x68   : > { %9998 = vmatprep.subr.bf16.mxu1 %v11056_v46  ;;  %9952 = vmatprep.mubr.bf16.mxu1 %v11057_v49  ;;  %v765_v49 = vld [vmem:[%s11664_s17 + $0x54] sm:$0x1]  ;;  %v985_v51 = vshll.u32 %v773_v44, 16  ;;  %v8509_v14 = vld [vmem:[%s11664_s17 + $0x10] sm:$0xf] }
  0x69   : > { %9920 = vmatprep.mubr.bf16.mxu0 %v11813_v18  ;;  %v897_v39 = vrot.slane %v895_v30, 5  ;;  %v929_v56 = vshll.u32 %v765_v49, 16  ;;  %v950_v28 = vrot.slane %v948_v20, 4  ;;  %v971_v30 = vshll.u32 %v771_v22, 16 }
  0x6a   : > { %9967 = vmatpush3.bf16.msra.mxu0 %v11055_v45  ;;  %v917_v45 = vrot.slane %v915_v36, 5  ;;  %v953_v33 = vrot.slane %v951_v23, 5  ;;  %v11074_v36 = vld [vmem:[%s14392_s1 + $0x140] sm:$0xff]   ;;  %v976_v49 = vshrl.u32 %v772_v42, 16  ;;  %v987_v60 = vrot.slane %v985_v51, 5 }
  0x6b   : > { %9999 = vmatpush3.bf16.msra.mxu1 %v11056_v46  ;;  %9968 = vmatprep.subr.bf16.mxu0 %v11059_v59  ;;  %v11063_v46 = vld [vmem:[%s11664_s17 + $0x48] ss:$8 sps:$4 sm:$0xff]   ;;  %v898_v48 = vor.u32 %v897_v39, %v894_v34  ;;  %v931_v1 = vrot.slane %v929_v56, 5  ;;  %v959_v34 = vrot.slane %v957_v24, 5  ;;  %v973_v39 = vrot.slane %v971_v30, 5 }
  0x6c   : > { %10000 = vmatprep.subr.bf16.mxu1 %v11060_v0  ;;  %v918_v9 = vsel %vm11755_vm2, %v913_v62, %v917_v45  ;;  %v774_v45 = vld [vmem:[%s11664_s17 + $0x78] sm:$0xf]  ;;  %v1746_v22 = vshrl.u32 %v8509_v14, 16  ;;  %v1749_v23 = vshll.u32 %v8509_v14, 16 }
  0x6d   : > { %9921 = vmatmul.mubr.bf16.gmra.mxu0 %v11830_v38  ;;  %v899_v58 = vrot.slane %v898_v48, 4  ;;  %v990_v54 = vshrl.u32 %v774_v45, 16 }
  0x6e   : > { %9953 = vmatmul.mubr.bf16.gmra.mxu1 %v11058_v10  ;;  %9969 = vmatpush3.bf16.msra.mxu0 %v11059_v59  ;;  %v934_v59 = vshrl.u32 %v766_v50, 16  ;;  %v979_v50 = vshll.u32 %v772_v42, 16  ;;  %v1751_v30 = vrot.slane %v1749_v23, 5 }
  0x6f   : > { %10001 = vmatpush3.bf16.msra.mxu1 %v11060_v0  ;;  %9970 = vmatprep.subr.bf16.mxu0 %v11061_v15  ;;  %v925_v0 = vrot.slane %v923_v55, 5  ;;  %v904_v3 = vsel %vm11755_vm2, %v899_v58, %v903_v40  ;;  %v11069_v40 = vld [vmem:[%s11664_s17 + $0x68] ss:$8 sps:$4 sm:$0xff]   ;;  %v993_v55 = vshll.u32 %v774_v45, 16  ;;  %v978_v58 = vrot.slane %v976_v49, 4 }
  0x70   : > { %10002 = vmatprep.subr.bf16.mxu1 %v11062_v21  ;;  %9956 = vmatprep.mubr.bf16.mxu1 %v11063_v46  ;;  %v936_v4 = vrot.slane %v934_v59, 4  ;;  %v11855_v11 = vcombine.low %v904_v3, %v918_v9  ;;  %v775_v46 = vld [vmem:[%s11664_s17 + $0x7c] sm:$0x1]  ;;  %v981_v59 = vrot.slane %v979_v50, 5  ;;  %v11075_v9 = vld [vmem:[%s11664_s17 + $0x98] ss:$8 sps:$4 sm:$0xff]  }
  0x71   : > { %v926_v10 = vor.u32 %v925_v0, %v922_v63  ;;  %v999_v56 = vshll.u32 %v775_v46, 16  ;;  %v992_v63 = vrot.slane %v990_v54, 4  ;;  %v995_v0 = vrot.slane %v993_v55, 5 }
  0x72   : > { %9971 = vmatpush3.bf16.msra.mxu0 %v11061_v15  ;;  %v940_v12 = vor.u32 %v939_v5, %v936_v4  ;;  %v11072_v15 = vld [vmem:[%s14392_s1 + $0x148] sm:$0xff]   ;;  %9924 = vmatprep.mubr.bf16.mxu0 %v11855_v11  ;;  %v982_v3 = vor.u32 %v981_v59, %v978_v58  ;;  %v11079_v59 = vld [vmem:[%s14392_s1 + $0x1b0] sm:$0xff]  }
  0x73   : > { %10003 = vmatpush3.bf16.msra.mxu1 %v11062_v21  ;;  %9972 = vmatprep.subr.bf16.mxu0 %v11065_v37  ;;  %v927_v13 = vrot.slane %v926_v10, 4  ;;  %v996_v5 = vor.u32 %v995_v0, %v992_v63 }
  0x74   : > { %10004 = vmatprep.subr.bf16.mxu1 %v11066_v43  ;;  %v941_v16 = vrot.slane %v940_v12, 4  ;;  %v8507_v12 = vld [vmem:[%s11664_s17 + $0x8] sm:$0xf] }
  0x75   : > { %v932_v21 = vsel %vm11755_vm2, %v927_v13, %v931_v1  ;;  %v1001_v1 = vrot.slane %v999_v56, 5  ;;  %v8508_v13 = vld [vmem:[%s11664_s17 + $0xc] sm:$0x1]  ;;  %v1732_v17 = vshrl.u32 %v8507_v12, 16  ;;  %v1735_v19 = vshll.u32 %v8507_v12, 16 }
  0x76   : > { %9957 = vmatmul.mubr.bf16.gmra.mxu1 %v11064_v2  ;;  %9973 = vmatpush3.bf16.msra.mxu0 %v11065_v37  ;;  %v946_v27 = vsel %vm11755_vm2, %v941_v16, %v945_v7  ;;  %v967_v37 = vrot.slane %v965_v29, 5  ;;  %v983_v7 = vrot.slane %v982_v3, 4  ;;  %v8510_v16 = vld [vmem:[%s11664_s17 + $0x14] sm:$0x1]  ;;  %v1741_v20 = vshll.u32 %v8508_v13, 16 }
  0x77   : > { %10005 = vmatpush3.bf16.msra.mxu1 %v11066_v43  ;;  %9974 = vmatprep.subr.bf16.mxu0 %v11067_v52  ;;  %v11872_v32 = vcombine.low %v932_v21, %v946_v27  ;;  %v954_v43 = vor.u32 %v953_v33, %v950_v28  ;;  %v1755_v24 = vshll.u32 %v8510_v16, 16  ;;  %v1734_v25 = vrot.slane %v1732_v17, 4  ;;  %v8515_v3 = vld [vmem:[%s11664_s17 + $0x28] sm:$0xf] }
  0x78   : > { %10006 = vmatprep.subr.bf16.mxu1 %v11068_v57  ;;  %v968_v48 = vor.u32 %v967_v37, %v964_v35  ;;  %9960 = vmatprep.mubr.bf16.mxu1 %v11069_v40  ;;  %v988_v10 = vsel %vm11755_vm2, %v983_v7, %v987_v60  ;;  %v1737_v27 = vrot.slane %v1735_v19, 5  ;;  %v1743_v28 = vrot.slane %v1741_v20, 5  ;;  %v8512_v35 = vld [vmem:[%s11664_s17 + $0x1c] sm:$0x1]  ;;  %v8514_v40 = vld [vmem:[%s11664_s17 + $0x24] sm:$0x1] }
  0x79   : > { %9925 = vmatmul.mubr.bf16.gmra.mxu0 %v11872_v32  ;;  %v955_v53 = vrot.slane %v954_v43, 4  ;;  %v1748_v29 = vrot.slane %v1746_v22, 4  ;;  %v1769_v44 = vshll.u32 %v8512_v35, 16  ;;  %v1783_v49 = vshll.u32 %v8514_v40, 16  ;;  %v11083_v7 = vld [vmem:[%s14392_s1 + $0x1a8] sm:$0xff]   ;;  %v11080_v19 = vld [vmem:[%s14392_s1 + $0x1f0] sm:$0xff]  }
  0x7a   : > { %9975 = vmatpush3.bf16.msra.mxu0 %v11067_v52  ;;  %v11891_v52 = vld [vmem:[%s14392_s1 + $0x1f8] sm:$0xff]   ;;  %v1738_v33 = vor.u32 %v1737_v27, %v1734_v25  ;;  %v1788_v12 = vshrl.u32 %v8515_v3, 16  ;;  %v1791_v13 = vshll.u32 %v8515_v3, 16  ;;  %v11082_v27 = vld [vmem:[%s11664_s17 + $0xc8] ss:$8 sps:$4 sm:$0xff]  }
  0x7b   : > { %10007 = vmatpush3.bf16.msra.mxu1 %v11068_v57  ;;  %9976 = vmatprep.subr.bf16.mxu0 %v11071_v8  ;;  %v969_v57 = vrot.slane %v968_v48, 4  ;;  %v960_v62 = vsel %vm11755_vm2, %v955_v53, %v959_v34  ;;  %v8511_v34 = vld [vmem:[%s11664_s17 + $0x18] sm:$0xf]  ;;  %v1752_v37 = vor.u32 %v1751_v30, %v1748_v29  ;;  %v1771_v54 = vrot.slane %v1769_v44, 5  ;;  %v11084_v35 = vld [vmem:[%s14392_s1 + $0x1e8] sm:$0xff]  }
  0x7c   : > { %10008 = vmatprep.subr.bf16.mxu1 %v11072_v15  ;;  %v1760_v42 = vshrl.u32 %v8511_v34, 16  ;;  %v1763_v43 = vshll.u32 %v8511_v34, 16  ;;  %v1739_v45 = vrot.slane %v1738_v33, 4  ;;  %v1785_v58 = vrot.slane %v1783_v49, 5  ;;  %v8519_v33 = vld [vmem:[%s11664_s17 + $0x38] sm:$0xf] }
  0x7d   : > { %v974_v2 = vsel %vm11755_vm2, %v969_v57, %v973_v39  ;;  %v11076_v39 = vld [vmem:[%s11664_s17 + $0xa8] ss:$8 sps:$4 sm:$0xff]   ;;  %v1753_v50 = vrot.slane %v1752_v37, 4  ;;  %v1790_v20 = vrot.slane %v1788_v12, 4  ;;  %v1793_v22 = vrot.slane %v1791_v13, 5 }
  0x7e   : > { %9977 = vmatpush3.bf16.msra.mxu0 %v11071_v8  ;;  %9961 = vmatmul.mubr.bf16.gmra.mxu1 %v11070_v61  ;;  %v11898_v4 = vcombine.low %v960_v62, %v974_v2  ;;  %v997_v8 = vrot.slane %v996_v5, 4  ;;  %v1762_v51 = vrot.slane %v1760_v42, 4  ;;  %v1765_v53 = vrot.slane %v1763_v43, 5  ;;  %v8516_v5 = vld [vmem:[%s11664_s17 + $0x2c] sm:$0x1] }
  0x7f   : > { %10009 = vmatpush3.bf16.msra.mxu1 %v11072_v15  ;;  %9978 = vmatprep.subr.bf16.mxu0 %v11073_v31  ;;  %v1744_v55 = vsel %vm11755_vm2, %v1739_v45, %v1743_v28  ;;  %v11085_v28 = vld [vmem:[%s14392_s1 + $0x1a0] sm:$0xff]   ;;  %v1794_v29 = vor.u32 %v1793_v22, %v1790_v20  ;;  %v8520_v34 = vld [vmem:[%s11664_s17 + $0x3c] sm:$0x1]  ;;  %v1816_v40 = vshrl.u32 %v8519_v33, 16  ;;  %v1819_v42 = vshll.u32 %v8519_v33, 16 }
  0x80   : > { %10010 = vmatprep.subr.bf16.mxu1 %v11074_v36  ;;  %9928 = vmatprep.mubr.bf16.mxu0 %v11898_v4  ;;  %v1002_v15 = vsel %vm11755_vm2, %v997_v8, %v1001_v1  ;;  %v1766_v61 = vor.u32 %v1765_v53, %v1762_v51  ;;  %v11081_v1 = vld [vmem:[%s11664_s17 + $0xb8] ss:$8 sps:$4 sm:$0xff]   ;;  %v1825_v44 = vshll.u32 %v8520_v34, 16  ;;  %v8523_v3 = vld [vmem:[%s11664_s17 + $0x48] sm:$0xf]  ;;  %v11092_v34 = vld [vmem:[%s14392_s1 + $0x1d0] sm:$0xff]  }
  0x81   : > { %v11912_v21 = vcombine.low %v988_v10, %v1002_v15  ;;  %v8518_v10 = vld [vmem:[%s11664_s17 + $0x34] sm:$0x1]  ;;  %v8521_v37 = vld [vmem:[%s11664_s17 + $0x40] sm:$0xf]  ;;  %v1795_v43 = vrot.slane %v1794_v29, 4  ;;  %v1818_v49 = vrot.slane %v1816_v40, 4 }
  0x82   : > { %9979 = vmatpush3.bf16.msra.mxu0 %v11073_v31  ;;  %v1757_v31 = vrot.slane %v1755_v24, 5  ;;  %v1767_v0 = vrot.slane %v1766_v61, 4  ;;  %v1811_v23 = vshll.u32 %v8518_v10, 16  ;;  %v1830_v45 = vshrl.u32 %v8521_v37, 16  ;;  %v8526_v10 = vld [vmem:[%s11664_s17 + $0x54] sm:$0x1] }
  0x83   : > { %10011 = vmatpush3.bf16.msra.mxu1 %v11074_v36  ;;  %10028 = vmatprep.subr.bf16.mxu0 %v11886_v47  ;;  %v8513_v36 = vld [vmem:[%s11664_s17 + $0x20] sm:$0xf]  ;;  %v1844_v13 = vshrl.u32 %v8523_v3, 16  ;;  %v1867_v20 = vshll.u32 %v8526_v10, 16  ;;  %v11090_v22 = vld [vmem:[%s14392_s1 + $0x1d8] sm:$0xff]  }
  0x84   : > { %10060 = vmatprep.subr.bf16.mxu1 %v11891_v52  ;;  %9929 = vmatmul.mubr.bf16.gmra.mxu0 %v11912_v21  ;;  %v1774_v46 = vshrl.u32 %v8513_v36, 16  ;;  %v1777_v48 = vshll.u32 %v8513_v36, 16  ;;  %v1758_v60 = vsel %vm11755_vm2, %v1753_v50, %v1757_v31  ;;  %v1772_v8 = vsel %vm11755_vm2, %v1767_v0, %v1771_v54  ;;  %v8527_v33 = vld [vmem:[%s11664_s17 + $0x58] sm:$0xf]  ;;  %v8533_v10 = vld [vmem:[%s11664_s17 + $0x70] sm:$0xf] }
  0x85   : > { %9980 = vmatprep.mubr.bf16.mxu0 %v11075_v9  ;;  %v11927_v62 = vcombine.low %v1744_v55, %v1758_v60  ;;  %v8517_v9 = vld [vmem:[%s11664_s17 + $0x30] sm:$0xf]  ;;  %v1813_v31 = vrot.slane %v1811_v23, 5  ;;  %v1821_v50 = vrot.slane %v1819_v42, 5  ;;  %v11086_v55 = vld [vmem:[%s14392_s1 + $0x1e0] sm:$0xff]   ;;  %v1846_v23 = vrot.slane %v1844_v13, 4 }
  0x86   : > { %v1776_v56 = vrot.slane %v1774_v46, 4  ;;  %v1779_v57 = vrot.slane %v1777_v48, 5  ;;  %v1802_v15 = vshrl.u32 %v8517_v9, 16  ;;  %v1805_v16 = vshll.u32 %v8517_v9, 16  ;;  %v8525_v9 = vld [vmem:[%s11664_s17 + $0x50] sm:$0xf] }
  0x87   : > { %10012 = vmatprep.mubr.bf16.mxu1 %v11927_v62  ;;  %v1833_v46 = vshll.u32 %v8521_v37, 16  ;;  %v8529_v37 = vld [vmem:[%s11664_s17 + $0x60] sm:$0xf]  ;;  %v1872_v42 = vshrl.u32 %v8527_v33, 16 }
  0x88   : > { %v1780_v63 = vor.u32 %v1779_v57, %v1776_v56  ;;  %v1804_v24 = vrot.slane %v1802_v15, 4  ;;  %v1807_v25 = vrot.slane %v1805_v16, 5  ;;  %v11089_v56 = vld [vmem:[%s14392_s1 + $0x198] sm:$0xff]   ;;  %v1858_v16 = vshrl.u32 %v8525_v9, 16 }
  0x89   : > { %v1835_v54 = vrot.slane %v1833_v46, 5 }
  0x8a   : > { %v1781_v2 = vrot.slane %v1780_v63, 4  ;;  %v1808_v36 = vor.u32 %v1807_v25, %v1804_v24  ;;  %v11088_v25 = vld [vmem:[%s11664_s17 + $0xe8] ss:$8 sps:$4 sm:$0xff]   ;;  %v1860_v29 = vrot.slane %v1858_v16, 4 }
  0x8c   : > { %9981 = vmatmul.mubr.bf16.vlgmr.msra.gmra.mxu0 %v11076_v39  ;;  %v1786_v14 = vsel %vm11755_vm2, %v1781_v2, %v1785_v58  ;;  %v8522_v39 = vld [vmem:[%s11664_s17 + $0x44] sm:$0x1]  ;;  %v1809_v48 = vrot.slane %v1808_v36, 4  ;;  %v1822_v58 = vor.u32 %v1821_v50, %v1818_v49  ;;  %v11087_v2 = vld [vmem:[%s11664_s17 + $0xd8] ss:$8 sps:$4 sm:$0xff]   ;;  %v1889_v49 = vshll.u32 %v8529_v37, 16 }
  0x8d   : > { %10029 = vmatpush3.bf16.msra.mxu0 %v11886_v47  ;;  %9984 = vmatprep.mubr.bf16.mxu0 %v11081_v1  ;;  %v1797_v47 = vshll.u32 %v8516_v5, 16  ;;  %v11943_v17 = vcombine.low %v1772_v8, %v1786_v14  ;;  %v1839_v51 = vshll.u32 %v8522_v39, 16  ;;  %v11091_v5 = vld [vmem:[%s14392_s1 + $0x190] sm:$0xff]   ;;  %v8524_v8 = vld [vmem:[%s11664_s17 + $0x4c] sm:$0x1]  ;;  %v1847_v14 = vshll.u32 %v8523_v3, 16 }
  0x8e   : > { %10030 = vmatprep.subr.bf16.mxu0 %v11079_v59  ;;  %v1814_v57 = vsel %vm11755_vm2, %v1809_v48, %v1813_v31  ;;  %v1823_v0 = vrot.slane %v1822_v58, 4  ;;  %v1869_v31 = vrot.slane %v1867_v20, 5  ;;  %v8528_v36 = vld [vmem:[%s11664_s17 + $0x5c] sm:$0x1]  ;;  %v8530_v39 = vld [vmem:[%s11664_s17 + $0x64] sm:$0x1] }
  0x8f   : > { %10013 = vmatmul.mubr.bf16.vlgmr.msra.gmra.mxu1 %v11943_v17  ;;  %v1799_v30 = vrot.slane %v1797_v47, 5  ;;  %v1841_v60 = vrot.slane %v1839_v51, 5  ;;  %v1853_v47 = vshll.u32 %v8524_v8, 16  ;;  %v1849_v24 = vrot.slane %v1847_v14, 5  ;;  %v11093_v3 = vld [vmem:[%s11664_s17 + $0xf8] ss:$8 sps:$4 sm:$0xff]  }
  0x90   : > { %10061 = vmatpush3.bf16.msra.mxu1 %v11891_v52  ;;  %v1832_v52 = vrot.slane %v1830_v45, 4  ;;  %v11097_v45 = vld [vmem:[%s14392_s1 + $0x180] sm:$0xff]   ;;  %v1886_v48 = vshrl.u32 %v8529_v37, 16  ;;  %v1895_v50 = vshll.u32 %v8530_v39, 16  ;;  %v8534_v14 = vld [vmem:[%s11664_s17 + $0x74] sm:$0x1] }
  0x91   : > { %10031 = vmatpush3.bf16.msra.mxu0 %v11079_v59  ;;  %10062 = vmatprep.subr.bf16.mxu1 %v11080_v19  ;;  %v1800_v53 = vsel %vm11755_vm2, %v1795_v43, %v1799_v30  ;;  %v1827_v59 = vrot.slane %v1825_v44, 5  ;;  %v1875_v43 = vshll.u32 %v8527_v33, 16  ;;  %v1881_v44 = vshll.u32 %v8528_v36, 16  ;;  %v11098_v20 = vld [vmem:[%s14392_s1 + $0x1c0] sm:$0xff]   ;;  %v8536_v37 = vld [vmem:[%s11664_s17 + $0x7c] sm:$0x1] }
  0x92   : > { %10032 = vmatprep.subr.bf16.mxu0 %v11083_v7  ;;  %v11971_v61 = vcombine.low %v1800_v53, %v1814_v57  ;;  %v1836_v63 = vor.u32 %v1835_v54, %v1832_v52  ;;  %v1874_v53 = vrot.slane %v1872_v42, 4  ;;  %v1891_v57 = vrot.slane %v1889_v49, 5  ;;  %v8537_v39 = vld [vmem:[%s11664_s17 + $0x80] sm:$0xf] }
  0x93   : > { %v1877_v52 = vrot.slane %v1875_v43, 5  ;;  %v1883_v54 = vrot.slane %v1881_v44, 5  ;;  %v1897_v58 = vrot.slane %v1895_v50, 5  ;;  %v1945_v49 = vshll.u32 %v8537_v39, 16 }
  0x94   : > { %9985 = vmatmul.mubr.bf16.gmra.mxu0 %v11082_v27  ;;  %10063 = vmatpush3.bf16.msra.mxu1 %v11080_v19  ;;  %v1837_v1 = vrot.slane %v1836_v63, 4  ;;  %v1861_v19 = vshll.u32 %v8525_v9, 16  ;;  %v11095_v27 = vld [vmem:[%s14392_s1 + $0x188] sm:$0xff]  }
  0x95   : > { %10033 = vmatpush3.bf16.msra.mxu0 %v11083_v7  ;;  %10064 = vmatprep.subr.bf16.mxu1 %v11084_v35  ;;  %v1828_v7 = vsel %vm11755_vm2, %v1823_v0, %v1827_v59  ;;  %v11096_v59 = vld [vmem:[%s14392_s1 + $0x1c8] sm:$0xff]   ;;  %v1878_v63 = vor.u32 %v1877_v52, %v1874_v53 }
  0x96   : > { %10034 = vmatprep.subr.bf16.mxu0 %v11085_v28  ;;  %10016 = vmatprep.mubr.bf16.mxu1 %v11971_v61  ;;  %v1842_v12 = vsel %vm11755_vm2, %v1837_v1, %v1841_v60  ;;  %v1863_v30 = vrot.slane %v1861_v19, 5  ;;  %v8532_v9 = vld [vmem:[%s11664_s17 + $0x6c] sm:$0x1]  ;;  %v1914_v19 = vshrl.u32 %v8533_v10, 16 }
  0x97   : > { %9988 = vmatprep.mubr.bf16.mxu0 %v11087_v2  ;;  %v11986_v15 = vcombine.low %v1828_v7, %v1842_v12  ;;  %v1879_v2 = vrot.slane %v1878_v63, 4  ;;  %v12020_v7 = vld [vmem:[%s14392_s1 + $0x238] sm:$0xff]   ;;  %v1909_v16 = vshll.u32 %v8532_v9, 16  ;;  %v11104_v9 = vld [vmem:[%s14392_s1 + $0x230] sm:$0xff]  }
  0x98   : > { %10065 = vmatpush3.bf16.msra.mxu1 %v11084_v35  ;;  %v1850_v35 = vor.u32 %v1849_v24, %v1846_v23  ;;  %v1864_v40 = vor.u32 %v1863_v30, %v1860_v29  ;;  %v1917_v24 = vshll.u32 %v8533_v10, 16  ;;  %v1916_v30 = vrot.slane %v1914_v19, 4  ;;  %v11105_v19 = vld [vmem:[%s11664_s17 + $0x30] ss:$8 sps:$4 sm:$0xff]  }
  0x99   : > { %10035 = vmatpush3.bf16.msra.mxu0 %v11085_v28  ;;  %10066 = vmatprep.subr.bf16.mxu1 %v11086_v55  ;;  %v1855_v28 = vrot.slane %v1853_v47, 5  ;;  %v1884_v13 = vsel %vm11755_vm2, %v1879_v2, %v1883_v54  ;;  %v1911_v29 = vrot.slane %v1909_v16, 5  ;;  %v11109_v16 = vld [vmem:[%s14392_s1 + $0x228] sm:$0xff]  }
  0x9a   : > { %10036 = vmatprep.subr.bf16.mxu0 %v11089_v56  ;;  %10017 = vmatmul.mubr.bf16.gmra.mxu1 %v11986_v15  ;;  %v1851_v46 = vrot.slane %v1850_v35, 4  ;;  %v1865_v51 = vrot.slane %v1864_v40, 4  ;;  %v8535_v35 = vld [vmem:[%s11664_s17 + $0x78] sm:$0xf]  ;;  %v8538_v40 = vld [vmem:[%s11664_s17 + $0x84] sm:$0x1] }
  0x9b   : > { %v1928_v43 = vshrl.u32 %v8535_v35, 16  ;;  %v1931_v44 = vshll.u32 %v8535_v35, 16  ;;  %v1951_v50 = vshll.u32 %v8538_v40, 16  ;;  %v11329_v35 = vld [vmem:[%s14392_s1 + $0x68] sm:$0xff]  }
  0x9c   : > { %10067 = vmatpush3.bf16.msra.mxu1 %v11086_v55  ;;  %9989 = vmatmul.mubr.bf16.gmra.mxu0 %v11088_v25  ;;  %v1856_v55 = vsel %vm11755_vm2, %v1851_v46, %v1855_v28  ;;  %v1870_v60 = vsel %vm11755_vm2, %v1865_v51, %v1869_v31  ;;  %v1923_v25 = vshll.u32 %v8534_v14, 16  ;;  %v1919_v31 = vrot.slane %v1917_v24, 5  ;;  %v11100_v14 = vld [vmem:[%s11664_s17 + $0xa0] ss:$8 sps:$4 sm:$0xff]  }
  0x9d   : > { %10037 = vmatpush3.bf16.msra.mxu0 %v11089_v56  ;;  %10068 = vmatprep.subr.bf16.mxu1 %v11090_v22  ;;  %v1888_v56 = vrot.slane %v1886_v48, 4  ;;  %v12013_v0 = vcombine.low %v1856_v55, %v1870_v60  ;;  %v1942_v48 = vshrl.u32 %v8537_v39, 16  ;;  %v1930_v53 = vrot.slane %v1928_v43, 4  ;;  %v11106_v24 = vld [vmem:[%s11664_s17 + $0xc0] ss:$8 sps:$4 sm:$0xff]  }
  0x9e   : > { %10038 = vmatprep.subr.bf16.mxu0 %v11091_v5  ;;  %9992 = vmatprep.mubr.bf16.mxu0 %v11093_v3  ;;  %v1925_v33 = vrot.slane %v1923_v25, 5  ;;  %v1920_v42 = vor.u32 %v1919_v31, %v1916_v30  ;;  %v1933_v52 = vrot.slane %v1931_v44, 5  ;;  %v11111_v25 = vld [vmem:[%s11664_s17 + $0x50] ss:$8 sps:$4 sm:$0xff]   ;;  %v8668_v39 = vld [vmem:[%s11664_s17 + $0x14] sm:$0x1] }
  0x9f   : > { %v1892_v1 = vor.u32 %v1891_v57, %v1888_v56  ;;  %10020 = vmatprep.mubr.bf16.mxu1 %v12013_v0  ;;  %v1944_v56 = vrot.slane %v1942_v48, 4  ;;  %v1947_v57 = vrot.slane %v1945_v49, 5  ;;  %v11116_v30 = vld [vmem:[%s14392_s1 + $0x210] sm:$0xff]   ;;  %v11119_v40 = vld [vmem:[%s11664_s17 + $0x80] ss:$8 sps:$4 sm:$0xff]  }
  0xa0   : > { %10069 = vmatpush3.bf16.msra.mxu1 %v11090_v22  ;;  %v1921_v51 = vrot.slane %v1920_v42, 4  ;;  %v1934_v63 = vor.u32 %v1933_v52, %v1930_v53  ;;  %v11117_v31 = vld [vmem:[%s11664_s17 + $0x70] ss:$8 sps:$4 sm:$0xff]   ;;  %v8670_v43 = vld [vmem:[%s11664_s17 + $0x1c] sm:$0x1]  ;;  %v11330_v53 = vld [vmem:[%s14392_s1 + $0x60] sm:$0xff]  }
  0xa1   : > { %10039 = vmatpush3.bf16.msra.mxu0 %v11091_v5  ;;  %10070 = vmatprep.subr.bf16.mxu1 %v11092_v34  ;;  %v8531_v5 = vld [vmem:[%s11664_s17 + $0x68] sm:$0xf]  ;;  %v1893_v8 = vrot.slane %v1892_v1, 4  ;;  %v1948_v2 = vor.u32 %v1947_v57, %v1944_v56  ;;  %v8669_v42 = vld [vmem:[%s11664_s17 + $0x18] sm:$0xf] }
  0xa2   : > { %10040 = vmatprep.subr.bf16.mxu0 %v11095_v27  ;;  %v1900_v12 = vshrl.u32 %v8531_v5, 16  ;;  %v1903_v47 = vshll.u32 %v8531_v5, 16  ;;  %v1926_v60 = vsel %vm11755_vm2, %v1921_v51, %v1925_v33  ;;  %v1935_v3 = vrot.slane %v1934_v63, 4  ;;  %v11099_v5 = vld [vmem:[%s11664_s17 + $0x10] ss:$8 sps:$4 sm:$0xff]  }
  0xa3   : > { %v1898_v22 = vsel %vm11755_vm2, %v1893_v8, %v1897_v58  ;;  %v1953_v58 = vrot.slane %v1951_v50, 5  ;;  %v1949_v8 = vrot.slane %v1948_v2, 4  ;;  %v11108_v33 = vld [vmem:[%s11664_s17 + $0xd0] ss:$8 sps:$4 sm:$0xff]   ;;  %v2698_v48 = vshrl.u32 %v8669_v42, 16 }
  0xa4   : > { %10071 = vmatpush3.bf16.msra.mxu1 %v11092_v34  ;;  %v1902_v23 = vrot.slane %v1900_v12, 4  ;;  %v1905_v28 = vrot.slane %v1903_v47, 5  ;;  %v11094_v34 = vld [vmem:[%s11664_s17 + $0x108] ss:$8 sps:$4 sm:$0xff]   ;;  %v2701_v49 = vshll.u32 %v8669_v42, 16  ;;  %v2707_v50 = vshll.u32 %v8670_v43, 16 }
  0xa5   : > { %10041 = vmatpush3.bf16.msra.mxu0 %v11095_v27  ;;  %10072 = vmatprep.subr.bf16.mxu1 %v11096_v59  ;;  %v12033_v27 = vcombine.low %v1884_v13, %v1898_v22  ;;  %v11101_v12 = vld [vmem:[%s11664_s17 + $0x20] ss:$8 sps:$4 sm:$0xff]   ;;  %v1954_v13 = vsel %vm11755_vm2, %v1949_v8, %v1953_v58  ;;  %v11114_v52 = vld [vmem:[%s11664_s17 + $0xf0] ss:$8 sps:$4 sm:$0xff]   ;;  %v8672_v56 = vld [vmem:[%s11664_s17 + $0x24] sm:$0x1] }
  0xa6   : > { %10042 = vmatprep.subr.bf16.mxu0 %v11097_v45  ;;  %v1906_v36 = vor.u32 %v1905_v28, %v1902_v23  ;;  %9993 = vmatmul.mubr.bf16.gmra.mxu0 %v11094_v34  ;;  %v11107_v22 = vld [vmem:[%s11664_s17 + $0x40] ss:$8 sps:$4 sm:$0xff]   ;;  %v11328_v28 = vld [vmem:[%s14392_s1 + $0x70] sm:$0xff]   ;;  %v2703_v63 = vrot.slane %v2701_v49, 5  ;;  %v2709_v2 = vrot.slane %v2707_v50, 5 }
  0xa7   : > { %10021 = vmatmul.mubr.bf16.gmra.mxu1 %v12033_v27  ;;  %10044 = vmatprep.mubr.bf16.mxu0 %v11099_v5  ;;  %v11110_v23 = vld [vmem:[%s14392_s1 + $0x220] sm:$0xff]   ;;  %v8673_v57 = vld [vmem:[%s11664_s17 + $0x28] sm:$0xf]  ;;  %v8678_v43 = vld [vmem:[%s11664_s17 + $0x3c] sm:$0x1] }
  0xa8   : > { %10073 = vmatpush3.bf16.msra.mxu1 %v11096_v59  ;;  %v1907_v46 = vrot.slane %v1906_v36, 4  ;;  %v11327_v59 = vld [vmem:[%s14392_s1 + $0x78] sm:$0xff]   ;;  %v11112_v34 = vld [vmem:[%s11664_s17 + $0xe0] ss:$8 sps:$4 sm:$0xff]  }
  0xa9   : > { %10043 = vmatpush3.bf16.msra.mxu0 %v11097_v45  ;;  %10074 = vmatprep.subr.bf16.mxu1 %v11098_v20  ;;  %v1937_v45 = vshll.u32 %v8536_v37, 16  ;;  %v11121_v36 = vld [vmem:[%s14392_s1 + $0x208] sm:$0xff]   ;;  %v8667_v37 = vld [vmem:[%s11664_s17 + $0x10] sm:$0xf]  ;;  %v8671_v51 = vld [vmem:[%s11664_s17 + $0x20] sm:$0xf] }
  0xaa   : > { %10092 = vmatprep.subr.bf16.mxu0 %v12020_v7  ;;  %v1912_v55 = vsel %vm11755_vm2, %v1907_v46, %v1911_v29  ;;  %v11113_v29 = vld [vmem:[%s11664_s17 + $0x60] ss:$8 sps:$4 sm:$0xff]   ;;  %v2684_v44 = vshrl.u32 %v8667_v37, 16  ;;  %v2693_v46 = vshll.u32 %v8668_v39, 16 }
  0xab   : > { %v1939_v54 = vrot.slane %v1937_v45, 5  ;;  %v12049_v1 = vcombine.low %v1912_v55, %v1926_v60  ;;  %v2687_v45 = vshll.u32 %v8667_v37, 16  ;;  %v11118_v58 = vld [vmem:[%s11664_s17 + $0x100] ss:$8 sps:$4 sm:$0xff]   ;;  %v2700_v60 = vrot.slane %v2698_v48, 4  ;;  %v11332_v48 = vld [vmem:[%s14392_s1 + $0x50] sm:$0xff]  }
  0xac   : > { %10075 = vmatpush3.bf16.msra.mxu1 %v11098_v20  ;;  %v11102_v20 = vld [vmem:[%s11664_s17 + $0xb0] ss:$8 sps:$4 sm:$0xff]   ;;  %v11122_v5 = vld [vmem:[%s14392_s1 + $0x200] sm:$0xff]  }
  0xad   : > { %10124 = vmatprep.subr.bf16.mxu1 %v11327_v59  ;;  %10024 = vmatprep.mubr.bf16.mxu1 %v12049_v1  ;;  %v1940_v10 = vsel %vm11755_vm2, %v1935_v3, %v1939_v54  ;;  %v2686_v54 = vrot.slane %v2684_v44, 4  ;;  %v2689_v55 = vrot.slane %v2687_v45, 5  ;;  %v8674_v3 = vld [vmem:[%s11664_s17 + $0x2c] sm:$0x1] }
  0xae   : > { %v12062_v47 = vcombine.low %v1940_v10, %v1954_v13  ;;  %10045 = vmatmul.mubr.bf16.vlgmr.msra.gmra.mxu0 %v11101_v12  ;;  %v2715_v10 = vshll.u32 %v8671_v51, 16  ;;  %v2721_v12 = vshll.u32 %v8672_v56, 16  ;;  %v8675_v13 = vld [vmem:[%s11664_s17 + $0x30] sm:$0xf] }
  0xaf   : > { %10093 = vmatpush3.bf16.msra.mxu0 %v12020_v7  ;;  %10048 = vmatprep.mubr.bf16.mxu0 %v11105_v19  ;;  %v11115_v7 = vld [vmem:[%s14392_s1 + $0x218] sm:$0xff]   ;;  %v2690_v8 = vor.u32 %v2689_v55, %v2686_v54  ;;  %v2729_v19 = vshll.u32 %v8673_v57, 16  ;;  %v2740_v39 = vshrl.u32 %v8675_v13, 16 }
  0xb0   : > { %10025 = vmatmul.mubr.bf16.gmra.mxu1 %v12062_v47  ;;  %10094 = vmatprep.subr.bf16.mxu0 %v11104_v9  ;;  %v11120_v54 = vld [vmem:[%s11664_s17 + $0x110] ss:$8 sps:$4 sm:$0xff]  }
  0xb1   : > { %10076 = vmatprep.mubr.bf16.mxu1 %v11100_v14  ;;  %v2704_v14 = vor.u32 %v2703_v63, %v2700_v60  ;;  %v11333_v60 = vld [vmem:[%s14392_s1 + $0x38] sm:$0xff]  }
  0xb3   : > { %10095 = vmatpush3.bf16.msra.mxu0 %v11104_v9  ;;  %v2712_v9 = vshrl.u32 %v8671_v51, 16  ;;  %v2742_v51 = vrot.slane %v2740_v39, 4 }
  0xb4   : > { %10096 = vmatprep.subr.bf16.mxu0 %v11109_v16 }
  0xb6   : > { %10049 = vmatmul.mubr.bf16.gmra.mxu0 %v11107_v22  ;;  %v8676_v22 = vld [vmem:[%s11664_s17 + $0x34] sm:$0x1] }
  0xb7   : > { %10097 = vmatpush3.bf16.msra.mxu0 %v11109_v16  ;;  %10052 = vmatprep.mubr.bf16.mxu0 %v11111_v25  ;;  %v2726_v16 = vshrl.u32 %v8673_v57, 16  ;;  %v2714_v25 = vrot.slane %v2712_v9, 4  ;;  %v2749_v44 = vshll.u32 %v8676_v22, 16 }
  0xb8   : > { %10077 = vmatmul.mubr.bf16.vlgmr.msra.gmra.mxu1 %v11102_v20  ;;  %10098 = vmatprep.subr.bf16.mxu0 %v11110_v23  ;;  %v2735_v20 = vshll.u32 %v8674_v3, 16  ;;  %v8681_v3 = vld [vmem:[%s11664_s17 + $0x48] sm:$0xf] }
  0xb9   : > { %10125 = vmatpush3.bf16.msra.mxu1 %v11327_v59  ;;  %10080 = vmatprep.mubr.bf16.mxu1 %v11106_v24  ;;  %v2695_v59 = vrot.slane %v2693_v46, 5  ;;  %v2691_v24 = vrot.slane %v2690_v8, 4  ;;  %v8679_v46 = vld [vmem:[%s11664_s17 + $0x40] sm:$0xf]  ;;  %v2751_v56 = vrot.slane %v2749_v44, 5 }
  0xba   : > { %10126 = vmatprep.subr.bf16.mxu1 %v11328_v28  ;;  %v8682_v8 = vld [vmem:[%s11664_s17 + $0x4c] sm:$0x1] }
  0xbb   : > { %10099 = vmatpush3.bf16.msra.mxu0 %v11110_v23  ;;  %v11331_v23 = vld [vmem:[%s14392_s1 + $0x58] sm:$0xff]  }
  0xbc   : > { %10100 = vmatprep.subr.bf16.mxu0 %v11115_v7 }
  0xbd   : > { %10127 = vmatpush3.bf16.msra.mxu1 %v11328_v28  ;;  %v2723_v28 = vrot.slane %v2721_v12, 5  ;;  %v2771_v12 = vshll.u32 %v8679_v46, 16 }
  0xbe   : > { %10128 = vmatprep.subr.bf16.mxu1 %v11329_v35  ;;  %10053 = vmatmul.mubr.bf16.gmra.mxu0 %v11113_v29  ;;  %v8677_v29 = vld [vmem:[%s11664_s17 + $0x38] sm:$0xf] }
  0xbf   : > { %10101 = vmatpush3.bf16.msra.mxu0 %v11115_v7  ;;  %10056 = vmatprep.mubr.bf16.mxu0 %v11117_v31  ;;  %v2717_v7 = vrot.slane %v2715_v10, 5  ;;  %v2728_v31 = vrot.slane %v2726_v16, 4  ;;  %v2754_v45 = vshrl.u32 %v8677_v29, 16  ;;  %v11334_v16 = vld [vmem:[%s14392_s1 + $0x48] sm:$0xff]  }
  0xc0   : > { %10081 = vmatmul.mubr.bf16.gmra.mxu1 %v11108_v33  ;;  %10102 = vmatprep.subr.bf16.mxu0 %v11116_v30  ;;  %v2731_v33 = vrot.slane %v2729_v19, 5 }
  0xc1   : > { %10129 = vmatpush3.bf16.msra.mxu1 %v11329_v35  ;;  %10084 = vmatprep.mubr.bf16.mxu1 %v11112_v34  ;;  %v2737_v34 = vrot.slane %v2735_v20, 5  ;;  %v2696_v35 = vsel %vm11755_vm2, %v2691_v24, %v2695_v59  ;;  %v2718_v37 = vor.u32 %v2717_v7, %v2714_v25  ;;  %v2756_v57 = vrot.slane %v2754_v45, 4  ;;  %v8686_v45 = vld [vmem:[%s11664_s17 + $0x5c] sm:$0x1] }
  0xc2   : > { %10130 = vmatprep.subr.bf16.mxu1 %v11330_v53  ;;  %v2732_v42 = vor.u32 %v2731_v33, %v2728_v31  ;;  %v2773_v25 = vrot.slane %v2771_v12, 5  ;;  %v2785_v31 = vshll.u32 %v8681_v3, 16  ;;  %v2791_v33 = vshll.u32 %v8682_v8, 16  ;;  %v8690_v12 = vld [vmem:[%s11664_s17 + $0x6c] sm:$0x1] }
  0xc3   : > { %10103 = vmatpush3.bf16.msra.mxu0 %v11116_v30  ;;  %v2705_v30 = vrot.slane %v2704_v14, 4  ;;  %v2719_v50 = vrot.slane %v2718_v37, 4  ;;  %v8683_v14 = vld [vmem:[%s11664_s17 + $0x50] sm:$0xf]  ;;  %v2819_v8 = vshll.u32 %v8686_v45, 16 }
  0xc4   : > { %10104 = vmatprep.subr.bf16.mxu0 %v11121_v36  ;;  %v2733_v55 = vrot.slane %v2732_v42, 4  ;;  %v11335_v42 = vld [vmem:[%s14392_s1 + $0x40] sm:$0xff]   ;;  %v2793_v44 = vrot.slane %v2791_v33, 5  ;;  %v8693_v33 = vld [vmem:[%s11664_s17 + $0x78] sm:$0xf] }
  0xc5   : > { %10131 = vmatpush3.bf16.msra.mxu1 %v11330_v53  ;;  %v2724_v59 = vsel %vm11755_vm2, %v2719_v50, %v2723_v28  ;;  %v2782_v28 = vshrl.u32 %v8681_v3, 16 }
  0xc6   : > { %10132 = vmatprep.subr.bf16.mxu1 %v11331_v23  ;;  %10057 = vmatmul.mubr.bf16.gmra.mxu0 %v11119_v40  ;;  %v2743_v40 = vshll.u32 %v8675_v13, 16  ;;  %v2738_v9 = vsel %vm11755_vm2, %v2733_v55, %v2737_v34  ;;  %v8685_v34 = vld [vmem:[%s11664_s17 + $0x58] sm:$0xf] }
  0xc7   : > { %10105 = vmatpush3.bf16.msra.mxu0 %v11121_v36  ;;  %v2710_v36 = vsel %vm11755_vm2, %v2705_v30, %v2709_v2  ;;  %v2763_v2 = vshll.u32 %v8678_v43, 16  ;;  %v12146_v19 = vcombine.low %v2724_v59, %v2738_v9  ;;  %v2787_v43 = vrot.slane %v2785_v31, 5  ;;  %v8688_v59 = vld [vmem:[%s11664_s17 + $0x64] sm:$0x1]  ;;  %v8692_v31 = vld [vmem:[%s11664_s17 + $0x74] sm:$0x1] }
  0xc8   : > { %10085 = vmatmul.mubr.bf16.gmra.mxu1 %v11114_v52  ;;  %10106 = vmatprep.subr.bf16.mxu0 %v11122_v5  ;;  %v12128_v49 = vcombine.low %v2696_v35, %v2710_v36  ;;  %v2745_v53 = vrot.slane %v2743_v40, 5  ;;  %v8680_v52 = vld [vmem:[%s11664_s17 + $0x44] sm:$0x1]  ;;  %v2796_v35 = vshrl.u32 %v8683_v14, 16  ;;  %v2784_v40 = vrot.slane %v2782_v28, 4 }
  0xc9   : > { %10133 = vmatpush3.bf16.msra.mxu1 %v11331_v23  ;;  %10088 = vmatprep.mubr.bf16.mxu1 %v11118_v58  ;;  %v2757_v58 = vshll.u32 %v8677_v29, 16  ;;  %v2777_v13 = vshll.u32 %v8680_v52, 16  ;;  %v2765_v22 = vrot.slane %v2763_v2, 5  ;;  %v8684_v29 = vld [vmem:[%s11664_s17 + $0x54] sm:$0x1]  ;;  %v2799_v36 = vshll.u32 %v8683_v14, 16 }
  0xca   : > { %10134 = vmatprep.subr.bf16.mxu1 %v11332_v48  ;;  %10108 = vmatprep.mubr.bf16.mxu0 %v12128_v49  ;;  %v2746_v63 = vor.u32 %v2745_v53, %v2742_v51  ;;  %v2810_v52 = vshrl.u32 %v8685_v34, 16 }
  0xcb   : > { %10107 = vmatpush3.bf16.msra.mxu0 %v11122_v5  ;;  %v2768_v5 = vshrl.u32 %v8679_v46, 16  ;;  %v2759_v10 = vrot.slane %v2757_v58, 5  ;;  %v12148_v7 = vrot.slane %v2777_v13, 5  ;;  %v2798_v46 = vrot.slane %v2796_v35, 4 }
  0xcc   : > { %10156 = vmatprep.subr.bf16.mxu0 %v11333_v60  ;;  %v2747_v20 = vrot.slane %v2746_v63, 4  ;;  %v2801_v53 = vrot.slane %v2799_v36, 5  ;;  %v2813_v58 = vshll.u32 %v8685_v34, 16  ;;  %v2812_v3 = vrot.slane %v2810_v52, 4 }
  0xcd   : > { %10135 = vmatpush3.bf16.msra.mxu1 %v11332_v48  ;;  %v2770_v23 = vrot.slane %v2768_v5, 4  ;;  %v2760_v24 = vor.u32 %v2759_v10, %v2756_v57  ;;  %v2805_v48 = vshll.u32 %v8684_v29, 16  ;;  %v11337_v5 = vld [vmem:[%s14392_s1 + $0xb8] sm:$0xff]  }
  0xce   : > { %10136 = vmatprep.subr.bf16.mxu1 %v11334_v16  ;;  %10109 = vmatmul.mubr.bf16.vlgmr.msra.gmra.mxu0 %v12146_v19  ;;  %v2752_v30 = vsel %vm11755_vm2, %v2747_v20, %v2751_v56  ;;  %v2788_v56 = vor.u32 %v2787_v43, %v2784_v40  ;;  %v2802_v2 = vor.u32 %v2801_v53, %v2798_v46  ;;  %v2815_v10 = vrot.slane %v2813_v58, 5  ;;  %v8694_v43 = vld [vmem:[%s11664_s17 + $0x7c] sm:$0x1] }
  0xcf   : > { %v2761_v37 = vrot.slane %v2760_v24, 4  ;;  %v2774_v39 = vor.u32 %v2773_v25, %v2770_v23  ;;  %10157 = vmatpush3.bf16.msra.mxu0 %v11333_v60  ;;  %v2807_v57 = vrot.slane %v2805_v48, 5  ;;  %v8689_v60 = vld [vmem:[%s11664_s17 + $0x68] sm:$0xf]  ;;  %v2833_v23 = vshll.u32 %v8688_v59, 16 }
  0xd0   : > { %10089 = vmatmul.mubr.bf16.gmra.mxu1 %v11120_v54  ;;  %v8687_v54 = vld [vmem:[%s11664_s17 + $0x60] sm:$0xf]  ;;  %v2789_v9 = vrot.slane %v2788_v56, 4  ;;  %v2803_v20 = vrot.slane %v2802_v2, 4  ;;  %v2838_v24 = vshrl.u32 %v8689_v60, 16  ;;  %v2816_v28 = vor.u32 %v2815_v10, %v2812_v3  ;;  %v11341_v2 = vld [vmem:[%s14392_s1 + $0xa8] sm:$0xff]  }
  0xd1   : > { %10137 = vmatpush3.bf16.msra.mxu1 %v11334_v16  ;;  %10140 = vmatprep.mubr.bf16.mxu1 %v11767_v26  ;;  %v11336_v26 = vld [vmem:[%s14392_s1 + $0x30] sm:$0xff]   ;;  %v2766_v50 = vsel %vm11755_vm2, %v2761_v37, %v2765_v22  ;;  %v2775_v51 = vrot.slane %v2774_v39, 4  ;;  %v2824_v13 = vshrl.u32 %v8687_v54, 16  ;;  %v2827_v14 = vshll.u32 %v8687_v54, 16  ;;  %v11338_v16 = vld [vmem:[%s14392_s1 + $0x28] sm:$0xff]   ;;  %v11342_v10 = vld [vmem:[%s14392_s1 + $0x18] sm:$0xff]  }
  0xd2   : > { %10138 = vmatprep.subr.bf16.mxu1 %v11335_v42  ;;  %10158 = vmatprep.subr.bf16.mxu0 %v11336_v26  ;;  %v12166_v55 = vcombine.low %v2752_v30, %v2766_v50  ;;  %v2821_v22 = vrot.slane %v2819_v8, 5  ;;  %v8691_v25 = vld [vmem:[%s11664_s17 + $0x70] sm:$0xf]  ;;  %v2808_v35 = vsel %vm11755_vm2, %v2803_v20, %v2807_v57  ;;  %v12192_v37 = vrot.slane %v2833_v23, 5  ;;  %v8695_v50 = vld [vmem:[%s11664_s17 + $0x80] sm:$0xf] }
  0xd3   : > { %v2780_v63 = vsel %vm11755_vm2, %v2775_v51, %v12148_v7  ;;  %10159 = vmatpush3.bf16.msra.mxu0 %v11336_v26  ;;  %v2794_v7 = vsel %vm11755_vm2, %v2789_v9, %v2793_v44  ;;  %v2826_v29 = vrot.slane %v2824_v13, 4  ;;  %v2829_v30 = vrot.slane %v2827_v14, 5  ;;  %v11339_v39 = vld [vmem:[%s14392_s1 + $0xb0] sm:$0xff]   ;;  %v11340_v44 = vld [vmem:[%s14392_s1 + $0x20] sm:$0xff]   ;;  %v8698_v23 = vld [vmem:[%s11664_s17 + $0x8c] sm:$0x1] }
  0xd4   : > { %10112 = vmatprep.mubr.bf16.mxu0 %v12166_v55  ;;  %10160 = vmatprep.subr.bf16.mxu0 %v11338_v16  ;;  %v12188_v34 = vcombine.low %v2780_v63, %v2794_v7  ;;  %v2817_v40 = vrot.slane %v2816_v28, 4  ;;  %v2852_v45 = vshrl.u32 %v8691_v25, 16  ;;  %v2855_v46 = vshll.u32 %v8691_v25, 16  ;;  %v8696_v56 = vld [vmem:[%s11664_s17 + $0x84] sm:$0x1] }
  0xd5   : > { %10139 = vmatpush3.bf16.msra.mxu1 %v11335_v42  ;;  %v2830_v36 = vor.u32 %v2829_v30, %v2826_v29  ;;  %v2841_v42 = vshll.u32 %v8689_v60, 16  ;;  %v2861_v48 = vshll.u32 %v8692_v31, 16  ;;  %v2866_v26 = vshrl.u32 %v8693_v33, 16  ;;  %v8697_v63 = vld [vmem:[%s11664_s17 + $0x88] sm:$0xf] }
  0xd6   : > { %10188 = vmatprep.subr.bf16.mxu1 %v11337_v5  ;;  %10113 = vmatmul.mubr.bf16.gmra.mxu0 %v12188_v34  ;;  %v2822_v51 = vsel %vm11755_vm2, %v2817_v40, %v2821_v22  ;;  %v2854_v58 = vrot.slane %v2852_v45, 4  ;;  %v2857_v59 = vrot.slane %v2855_v46, 5  ;;  %v2869_v9 = vshll.u32 %v8693_v33, 16  ;;  %v8732_v31 = vld [vmem:[%s11664_s17 + $0x90] sm:$0xf]  ;;  %v11343_v33 = vld [vmem:[%s14392_s1 + $0xa0] sm:$0xff]  }
  0xd7   : > { %10161 = vmatpush3.bf16.msra.mxu0 %v11338_v16  ;;  %v2831_v53 = vrot.slane %v2830_v36, 4  ;;  %v2843_v52 = vrot.slane %v2841_v42, 5  ;;  %v12206_v57 = vcombine.low %v2808_v35, %v2822_v51  ;;  %v12208_v60 = vrot.slane %v2861_v48, 5  ;;  %v11344_v36 = vld [vmem:[%s14392_s1 + $0x10] sm:$0xff]   ;;  %v8735_v46 = vld [vmem:[%s11664_s17 + $0x9c] sm:$0x1] }
  0xd8   : > { %10141 = vmatmul.mubr.bf16.vlgmr.msra.gmra.mxu1 %v11785_v41  ;;  %v2840_v41 = vrot.slane %v2838_v24, 4  ;;  %10162 = vmatprep.subr.bf16.mxu0 %v11340_v44  ;;  %v2875_v13 = vshll.u32 %v8694_v43, 16  ;;  %v2880_v14 = vshrl.u32 %v8695_v50, 16  ;;  %v2883_v16 = vshll.u32 %v8695_v50, 16 }
  0xd9   : > { %10189 = vmatpush3.bf16.msra.mxu1 %v11337_v5  ;;  %10144 = vmatprep.mubr.bf16.mxu1 %v11813_v18  ;;  %v2847_v18 = vshll.u32 %v8690_v12, 16  ;;  %v2836_v3 = vsel %vm11755_vm2, %v2831_v53, %v12192_v37  ;;  %v2868_v5 = vrot.slane %v2866_v26, 4  ;;  %v2858_v12 = vor.u32 %v2857_v59, %v2854_v58 }
  0xda   : > { %10190 = vmatprep.subr.bf16.mxu1 %v11339_v39  ;;  %v2844_v8 = vor.u32 %v2843_v52, %v2840_v41  ;;  %10116 = vmatprep.mubr.bf16.mxu0 %v12206_v57  ;;  %v2871_v22 = vrot.slane %v2869_v9, 5  ;;  %v2889_v24 = vshll.u32 %v8696_v56, 16  ;;  %v2894_v25 = vshrl.u32 %v8697_v63, 16  ;;  %v11345_v56 = vld [vmem:[%s14392_s1 + $0x98] sm:$0xff]   ;;  %v11346_v9 = vld [vmem:[%s14392_s1 + $0x8] sm:$0xff]  }
  0xdb   : > { %v2849_v54 = vrot.slane %v2847_v18, 5  ;;  %10163 = vmatpush3.bf16.msra.mxu0 %v11340_v44  ;;  %v2859_v7 = vrot.slane %v2858_v12, 4  ;;  %v2877_v28 = vrot.slane %v2875_v13, 5  ;;  %v2882_v29 = vrot.slane %v2880_v14, 4  ;;  %v8738_v12 = vld [vmem:[%s11664_s17 + $0xa8] sm:$0xf] }
  0xdc   : > { %10164 = vmatprep.subr.bf16.mxu0 %v11342_v10  ;;  %v2845_v20 = vrot.slane %v2844_v8, 4  ;;  %v2885_v30 = vrot.slane %v2883_v16, 5  ;;  %v2872_v35 = vor.u32 %v2871_v22, %v2868_v5  ;;  %v12230_v37 = vrot.slane %v2889_v24, 5  ;;  %v8739_v22 = vld [vmem:[%s11664_s17 + $0xac] sm:$0x1] }
  0xdd   : > { %10191 = vmatpush3.bf16.msra.mxu1 %v11339_v39  ;;  %v2896_v41 = vrot.slane %v2894_v25, 4  ;;  %v8734_v39 = vld [vmem:[%s11664_s17 + $0x98] sm:$0xf]  ;;  %v2864_v42 = vsel %vm11755_vm2, %v2859_v7, %v12208_v60  ;;  %v2897_v43 = vshll.u32 %v8697_v63, 16  ;;  %v2903_v45 = vshll.u32 %v8698_v23, 16 }
  0xde   : > { %10192 = vmatprep.subr.bf16.mxu1 %v11341_v2  ;;  %v2886_v18 = vor.u32 %v2885_v30, %v2882_v29  ;;  %v2873_v44 = vrot.slane %v2872_v35, 4  ;;  %v3383_v48 = vshrl.u32 %v8732_v31, 16  ;;  %v3386_v26 = vshll.u32 %v8732_v31, 16  ;;  %v11347_v29 = vld [vmem:[%s14392_s1 + $0x90] sm:$0xff]  }
  0xdf   : > { %10165 = vmatpush3.bf16.msra.mxu0 %v11342_v10  ;;  %v2899_v51 = vrot.slane %v2897_v43, 5  ;;  %v3397_v52 = vshrl.u32 %v8734_v39, 16  ;;  %v2905_v59 = vrot.slane %v2903_v45, 5  ;;  %v3400_v16 = vshll.u32 %v8734_v39, 16  ;;  %v8742_v39 = vld [vmem:[%s11664_s17 + $0xb8] sm:$0xf] }
  0xe0   : > { %10145 = vmatmul.mubr.bf16.gmra.mxu1 %v11830_v38  ;;  %v2850_v38 = vsel %vm11755_vm2, %v2845_v20, %v2849_v54  ;;  %10166 = vmatprep.subr.bf16.mxu0 %v11344_v36  ;;  %v2887_v50 = vrot.slane %v2886_v18, 4  ;;  %v8736_v54 = vld [vmem:[%s11664_s17 + $0xa0] sm:$0xf]  ;;  %v2878_v58 = vsel %vm11755_vm2, %v2873_v44, %v2877_v28  ;;  %v3385_v60 = vrot.slane %v3383_v48, 4  ;;  %v8740_v28 = vld [vmem:[%s11664_s17 + $0xb0] sm:$0xf] }
  0xe1   : > { %10193 = vmatpush3.bf16.msra.mxu1 %v11341_v2  ;;  %10148 = vmatprep.mubr.bf16.mxu1 %v11855_v11  ;;  %v8733_v11 = vld [vmem:[%s11664_s17 + $0x94] sm:$0x1]  ;;  %v12234_v40 = vcombine.low %v2836_v3, %v2850_v38  ;;  %v3388_v63 = vrot.slane %v3386_v26, 5  ;;  %v8737_v2 = vld [vmem:[%s11664_s17 + $0xa4] sm:$0x1]  ;;  %v12251_v3 = vcombine.low %v2864_v42, %v2878_v58  ;;  %v2900_v5 = vor.u32 %v2899_v51, %v2896_v41 }
  0xe2   : > { %10194 = vmatprep.subr.bf16.mxu1 %v11343_v33  ;;  %v3392_v53 = vshll.u32 %v8733_v11, 16  ;;  %v2892_v8 = vsel %vm11755_vm2, %v2887_v50, %v12230_v37  ;;  %v3399_v14 = vrot.slane %v3397_v52, 4  ;;  %v3406_v20 = vshll.u32 %v8735_v46, 16  ;;  %v8741_v38 = vld [vmem:[%s11664_s17 + $0xb4] sm:$0x1]  ;;  %v11349_v50 = vld [vmem:[%s14392_s1 + $0x88] sm:$0xff]  }
  0xe3   : > { %10117 = vmatmul.mubr.bf16.gmra.mxu0 %v12234_v40  ;;  %v3389_v13 = vor.u32 %v3388_v63, %v3385_v60  ;;  %v2901_v23 = vrot.slane %v2900_v5, 4  ;;  %v3411_v24 = vshrl.u32 %v8736_v54, 16  ;;  %v3414_v25 = vshll.u32 %v8736_v54, 16  ;;  %v8743_v48 = vld [vmem:[%s11664_s17 + $0xbc] sm:$0x1] }
  0xe4   : > { %10167 = vmatpush3.bf16.msra.mxu0 %v11344_v36  ;;  %v12259_v10 = vrot.slane %v3392_v53, 5  ;;  %10120 = vmatprep.mubr.bf16.mxu0 %v12251_v3  ;;  %v3420_v7 = vshll.u32 %v8737_v2, 16  ;;  %v3402_v30 = vrot.slane %v3400_v16, 5  ;;  %v3408_v31 = vrot.slane %v3406_v20, 5  ;;  %v11350_v58 = vld [vmem:[%s11664_s17 + $0x90] ss:$8 sps:$4 sm:$0xff]  }
  0xe5   : > { %10195 = vmatpush3.bf16.msra.mxu1 %v11343_v33  ;;  %10168 = vmatprep.subr.bf16.mxu0 %v11346_v9  ;;  %v3425_v33 = vshrl.u32 %v8738_v12, 16  ;;  %v2906_v35 = vsel %vm11755_vm2, %v2901_v23, %v2905_v59  ;;  %v3413_v37 = vrot.slane %v3411_v24, 4  ;;  %v3416_v41 = vrot.slane %v3414_v25, 5  ;;  %v11352_v23 = vld [vmem:[%s14392_s1 + $0x80] sm:$0xff]  }
  0xe6   : > { %10196 = vmatprep.subr.bf16.mxu1 %v11345_v56  ;;  %v12273_v11 = vrot.slane %v3420_v7, 5  ;;  %v12276_v36 = vcombine.low %v2892_v8, %v2906_v35  ;;  %v3403_v18 = vor.u32 %v3402_v30, %v3399_v14  ;;  %v3428_v45 = vshll.u32 %v8738_v12, 16  ;;  %v8745_v8 = vld [vmem:[%s11664_s17 + $0xc4] sm:$0x1]  ;;  %v8746_v14 = vld [vmem:[%s11664_s17 + $0xc8] sm:$0xf] }
  0xe7   : > { %v3427_v43 = vrot.slane %v3425_v33, 4  ;;  %v3417_v44 = vor.u32 %v3416_v41, %v3413_v37  ;;  %v3434_v46 = vshll.u32 %v8739_v22, 16  ;;  %v3439_v26 = vshrl.u32 %v8740_v28, 16  ;;  %v8747_v30 = vld [vmem:[%s11664_s17 + $0xcc] sm:$0x1] }
  0xe8   : > { %10149 = vmatmul.mubr.bf16.gmra.mxu1 %v11872_v32  ;;  %v3390_v32 = vrot.slane %v3389_v13, 4  ;;  %10169 = vmatpush3.bf16.msra.mxu0 %v11346_v9  ;;  %14411 = vst [vmem:[#allocation9_spill] sm:$0xff] %v12276_v36  ;;  %v3404_v51 = vrot.slane %v3403_v18, 4  ;;  %v3442_v53 = vshll.u32 %v8740_v28, 16  ;;  %v3448_v52 = vshll.u32 %v8741_v38, 16  ;;  %v11351_v9 = vld [vmem:[%s14392_s1 + $0xf8] sm:$0xff]  }
  0xe9   : > { %10197 = vmatpush3.bf16.msra.mxu1 %v11345_v56  ;;  %10152 = vmatprep.mubr.bf16.mxu1 %v11898_v4  ;;  %v11348_v4 = vld [vmem:[%s14392_s1] sm:$0xff]   ;;  %v3453_v54 = vshrl.u32 %v8742_v39, 16  ;;  %v3418_v59 = vrot.slane %v3417_v44, 4  ;;  %v3430_v60 = vrot.slane %v3428_v45, 5  ;;  %v3436_v63 = vrot.slane %v3434_v46, 5 }
  0xea   : > { %10198 = vmatprep.subr.bf16.mxu1 %v11347_v29  ;;  %10170 = vmatprep.subr.bf16.mxu0 %v11348_v4  ;;  %v3395_v42 = vsel %vm11755_vm2, %v3390_v32, %v12259_v10  ;;  %v8744_v56 = vld [vmem:[%s11664_s17 + $0xc0] sm:$0xf]  ;;  %v3441_v2 = vrot.slane %v3439_v26, 4  ;;  %v3409_v5 = vsel %vm11755_vm2, %v3404_v51, %v3408_v31  ;;  %v3444_v10 = vrot.slane %v3442_v53, 5  ;;  %v8749_v45 = vld [vmem:[%s11664_s17 + $0xd4] sm:$0x1] }
  0xeb   : > { %10121 = vmatmul.mubr.bf16.gmra.mxu0 %v12276_v36  ;;  %v12298_v12 = vrot.slane %v3448_v52, 5  ;;  %v3455_v13 = vrot.slane %v3453_v54, 4  ;;  %v8764_v16 = vcombine.low %v3395_v42, %v3409_v5  ;;  %v3431_v20 = vor.u32 %v3430_v60, %v3427_v43  ;;  %v8750_v46 = vld [vmem:[%s11664_s17 + $0xd8] sm:$0xf]  ;;  %v11353_v26 = vld [vmem:[%s11664_s17 + $0xa0] ss:$8 sps:$4 sm:$0xff]  }
  0xec   : > { %10171 = vmatpush3.bf16.msra.mxu0 %v11348_v4  ;;  %10172 = vmatprep.mubr.bf16.mxu0 %v11350_v58  ;;  %v3456_v22 = vshll.u32 %v8742_v39, 16  ;;  %v3445_v24 = vor.u32 %v3444_v10, %v3441_v2  ;;  %v3462_v25 = vshll.u32 %v8743_v48, 16  ;;  %v3467_v7 = vshrl.u32 %v8744_v56, 16  ;;  %v8748_v39 = vld [vmem:[%s11664_s17 + $0xd0] sm:$0xf]  ;;  %v11354_v51 = vld [vmem:[%s14392_s1 + $0x138] sm:$0xff]  }
  0xed   : > { %10199 = vmatpush3.bf16.msra.mxu1 %v11347_v29  ;;  %10220 = vmatprep.subr.bf16.mxu0 %v11351_v9  ;;  %v3470_v28 = vshll.u32 %v8744_v56, 16  ;;  %v3432_v29 = vrot.slane %v3431_v20, 4  ;;  %v3476_v31 = vshll.u32 %v8745_v8, 16  ;;  %v3481_v33 = vshrl.u32 %v8746_v14, 16  ;;  %v11355_v58 = vld [vmem:[%s11664_s17 + $0xb0] ss:$8 sps:$4 sm:$0xff]  }
  0xee   : > { %10200 = vmatprep.subr.bf16.mxu1 %v11349_v50  ;;  %v3458_v32 = vrot.slane %v3456_v22, 5  ;;  %v3446_v35 = vrot.slane %v3445_v24, 4  ;;  %v3464_v37 = vrot.slane %v3462_v25, 5  ;;  %v3469_v41 = vrot.slane %v3467_v7, 4  ;;  %v11356_v10 = vld [vmem:[%s14392_s1 + $0xf0] sm:$0xff]  }
  0xef   : > { %v3437_v42 = vsel %vm11755_vm2, %v3432_v29, %v3436_v63  ;;  %v12315_v43 = vrot.slane %v3476_v31, 5  ;;  %v3483_v44 = vrot.slane %v3481_v33, 4  ;;  %v3484_v54 = vshll.u32 %v8746_v14, 16  ;;  %v8751_v63 = vld [vmem:[%s11664_s17 + $0xdc] sm:$0x1] }
  0xf0   : > { %10153 = vmatmul.mubr.bf16.gmra.mxu1 %v11912_v21  ;;  %v3423_v21 = vsel %vm11755_vm2, %v3418_v59, %v12273_v11  ;;  %v3472_v11 = vrot.slane %v3470_v28, 5  ;;  %v3459_v18 = vor.u32 %v3458_v32, %v3455_v13  ;;  %v3451_v53 = vsel %vm11755_vm2, %v3446_v35, %v12298_v12  ;;  %v8753_v25 = vld [vmem:[%s11664_s17 + $0xe4] sm:$0x1]  ;;  %v11357_v28 = vld [vmem:[%s14392_s1 + $0x130] sm:$0xff]   ;;  %v8754_v33 = vld [vmem:[%s11664_s17 + $0xe8] sm:$0xf] }
  0xf1   : > { %10201 = vmatpush3.bf16.msra.mxu1 %v11349_v50  ;;  %10204 = vmatprep.mubr.bf16.mxu1 %v8764_v16  ;;  %v8765_v50 = vcombine.low %v3423_v21, %v3437_v42  ;;  %v3490_v60 = vshll.u32 %v8747_v30, 16  ;;  %v3495_v2 = vshrl.u32 %v8748_v39, 16  ;;  %v3498_v8 = vshll.u32 %v8748_v39, 16  ;;  %v8752_v16 = vld [vmem:[%s11664_s17 + $0xe0] sm:$0xf] }
  0xf2   : > { %10202 = vmatprep.subr.bf16.mxu1 %v11352_v23  ;;  %v3473_v52 = vor.u32 %v3472_v11, %v3469_v41  ;;  %v3460_v59 = vrot.slane %v3459_v18, 4  ;;  %v3486_v13 = vrot.slane %v3484_v54, 5  ;;  %v3509_v14 = vshrl.u32 %v8750_v46, 16  ;;  %v8755_v42 = vld [vmem:[%s11664_s17 + $0xec] sm:$0x1] }
  0xf3   : > { %10173 = vmatmul.mubr.bf16.vlgmr.msra.gmra.mxu0 %v11353_v26  ;;  %v3492_v22 = vrot.slane %v3490_v60, 5  ;;  %v3500_v24 = vrot.slane %v3498_v8, 5  ;;  %v3512_v11 = vshll.u32 %v8750_v46, 16  ;;  %v3518_v39 = vshll.u32 %v8751_v63, 16  ;;  %v11359_v63 = vld [vmem:[%s11664_s17 + $0xc0] ss:$8 sps:$4 sm:$0xff]  }
  0xf4   : > { %10221 = vmatpush3.bf16.msra.mxu0 %v11351_v9  ;;  %10176 = vmatprep.mubr.bf16.mxu0 %v11355_v58  ;;  %v3474_v12 = vrot.slane %v3473_v52, 4  ;;  %v3504_v9 = vshll.u32 %v8749_v45, 16  ;;  %v3465_v20 = vsel %vm11755_vm2, %v3460_v59, %v3464_v37  ;;  %v3487_v30 = vor.u32 %v3486_v13, %v3483_v44  ;;  %v8757_v59 = vld [vmem:[%s11664_s17 + $0xf4] sm:$0x1]  ;;  %v11360_v8 = vld [vmem:[%s14392_s1 + $0x128] sm:$0xff]  }
  0xf5   : > { %10203 = vmatpush3.bf16.msra.mxu1 %v11352_v23  ;;  %10222 = vmatprep.subr.bf16.mxu0 %v11356_v10  ;;  %v3497_v23 = vrot.slane %v3495_v2, 4  ;;  %v8766_v29 = vcombine.low %v3451_v53, %v3465_v20  ;;  %v3511_v41 = vrot.slane %v3509_v14, 4  ;;  %v3523_v44 = vshrl.u32 %v8752_v16, 16  ;;  %v11361_v20 = vld [vmem:[%s11664_s17 + $0xd0] ss:$8 sps:$4 sm:$0xff]  }
  0xf6   : > { %10252 = vmatprep.subr.bf16.mxu1 %v11354_v51  ;;  %v3479_v32 = vsel %vm11755_vm2, %v3474_v12, %v12315_v43  ;;  %v12351_v31 = vrot.slane %v3504_v9, 5  ;;  %v3488_v45 = vrot.slane %v3487_v30, 4  ;;  %v11358_v43 = vld [vmem:[%s14392_s1 + $0xe8] sm:$0xff]   ;;  %v3526_v26 = vshll.u32 %v8752_v16, 16  ;;  %v8758_v9 = vld [vmem:[%s11664_s17 + $0xf8] sm:$0xf] }
  0xf7   : > { %v3501_v37 = vor.u32 %v3500_v24, %v3497_v23  ;;  %v3514_v52 = vrot.slane %v3512_v11, 5  ;;  %v3520_v54 = vrot.slane %v3518_v39, 5  ;;  %v3537_v58 = vshrl.u32 %v8754_v33, 16 }
  0xf8   : > { %10205 = vmatmul.mubr.bf16.vlgmr.msra.gmra.mxu1 %v8765_v50  ;;  %10223 = vmatpush3.bf16.msra.mxu0 %v11356_v10  ;;  %v3532_v50 = vshll.u32 %v8753_v25, 16  ;;  %v3493_v2 = vsel %vm11755_vm2, %v3488_v45, %v3492_v22  ;;  %v3525_v10 = vrot.slane %v3523_v44, 4  ;;  %v3528_v12 = vrot.slane %v3526_v26, 5  ;;  %v8760_v44 = vld [vmem:[%s11664_s17 + $0x100] sm:$0xf] }
  0xf9   : > { %10253 = vmatpush3.bf16.msra.mxu1 %v11354_v51  ;;  %10208 = vmatprep.mubr.bf16.mxu1 %v8766_v29  ;;  %v8756_v51 = vld [vmem:[%s11664_s17 + $0xf0] sm:$0xf]  ;;  %v3502_v46 = vrot.slane %v3501_v37, 4  ;;  %v8767_v16 = vcombine.low %v3479_v32, %v3493_v2  ;;  %v3515_v23 = vor.u32 %v3514_v52, %v3511_v41  ;;  %v3539_v24 = vrot.slane %v3537_v58, 4  ;;  %v8759_v37 = vld [vmem:[%s11664_s17 + $0xfc] sm:$0x1] }
  0xfa   : > { %10254 = vmatprep.subr.bf16.mxu1 %v11357_v28  ;;  %10224 = vmatprep.subr.bf16.mxu0 %v11358_v43  ;;  %v12374_v13 = vrot.slane %v3532_v50, 5  ;;  %v3529_v29 = vor.u32 %v3528_v12, %v3525_v10  ;;  %v3540_v30 = vshll.u32 %v8754_v33, 16  ;;  %v3546_v32 = vshll.u32 %v8755_v42, 16  ;;  %v8761_v42 = vld [vmem:[%s11664_s17 + $0x104] sm:$0x1] }
  0xfb   : > { %10177 = vmatmul.mubr.bf16.gmra.mxu0 %v11359_v63  ;;  %v3507_v22 = vsel %vm11755_vm2, %v3502_v46, %v12351_v31  ;;  %v3551_v11 = vshrl.u32 %v8756_v51, 16  ;;  %v3516_v31 = vrot.slane %v3515_v23, 4  ;;  %v3554_v41 = vshll.u32 %v8756_v51, 16  ;;  %v11363_v63 = vld [vmem:[%s14392_s1 + $0x120] sm:$0xff]   ;;  %v8762_v10 = vld [vmem:[%s11664_s17 + $0x108] sm:$0xf] }
  0xfc   : > { %10225 = vmatpush3.bf16.msra.mxu0 %v11358_v43  ;;  %10180 = vmatprep.mubr.bf16.mxu0 %v11361_v20  ;;  %v3560_v45 = vshll.u32 %v8757_v59, 16  ;;  %v3565_v43 = vshrl.u32 %v8758_v9, 16  ;;  %v3530_v50 = vrot.slane %v3529_v29, 4  ;;  %v3542_v46 = vrot.slane %v3540_v30, 5 }
  0xfd   : > { %10255 = vmatpush3.bf16.msra.mxu1 %v11357_v28  ;;  %v11362_v28 = vld [vmem:[%s14392_s1 + $0xe0] sm:$0xff]   ;;  %v3548_v52 = vrot.slane %v3546_v32, 5  ;;  %v3553_v33 = vrot.slane %v3551_v11, 4  ;;  %v3521_v51 = vsel %vm11755_vm2, %v3516_v31, %v3520_v54  ;;  %v3556_v59 = vrot.slane %v3554_v41, 5 }
  0xfe   : > { %10256 = vmatprep.subr.bf16.mxu1 %v11360_v8  ;;  %10226 = vmatprep.subr.bf16.mxu0 %v11362_v28  ;;  %v12402_v2 = vrot.slane %v3560_v45, 5  ;;  %v3535_v20 = vsel %vm11755_vm2, %v3530_v50, %v12374_v13  ;;  %v3543_v23 = vor.u32 %v3542_v46, %v3539_v24  ;;  %v3568_v54 = vshll.u32 %v8758_v9, 16  ;;  %v11365_v50 = vld [vmem:[%s11664_s17 + $0xe0] ss:$8 sps:$4 sm:$0xff]   ;;  %v11366_v9 = vld [vmem:[%s14392_s1 + $0x118] sm:$0xff]  }
  0xff   : > { %v3557_v30 = vor.u32 %v3556_v59, %v3553_v33  ;;  %v3574_v32 = vshll.u32 %v8759_v37, 16  ;;  %v3579_v11 = vshrl.u32 %v8760_v44, 16  ;;  %v3582_v31 = vshll.u32 %v8760_v44, 16  ;;  %v8763_v44 = vld [vmem:[%s11664_s17 + $0x10c] sm:$0x1] }
 0x100   : > { %10209 = vmatmul.mubr.bf16.gmra.mxu1 %v8767_v16  ;;  %10227 = vmatpush3.bf16.msra.mxu0 %v11362_v28  ;;  %v8768_v16 = vcombine.low %v3507_v22, %v3521_v51  ;;  %v11364_v28 = vld [vmem:[%s14392_s1 + $0xd8] sm:$0xff]   ;;  %v3544_v13 = vrot.slane %v3543_v23, 4  ;;  %v3570_v24 = vrot.slane %v3568_v54, 5  ;;  %v3588_v41 = vshll.u32 %v8761_v42, 16 }
 0x101   : > { %10257 = vmatpush3.bf16.msra.mxu1 %v11360_v8  ;;  %v3567_v8 = vrot.slane %v3565_v43, 4  ;;  %10228 = vmatprep.subr.bf16.mxu0 %v11364_v28  ;;  %v3593_v45 = vshrl.u32 %v8762_v10, 16  ;;  %v3558_v37 = vrot.slane %v3557_v30, 4  ;;  %v3576_v46 = vrot.slane %v3574_v32, 5  ;;  %v11367_v42 = vld [vmem:[%s11664_s17 + $0xf0] ss:$8 sps:$4 sm:$0xff]  }
 0x102   : > { %10258 = vmatprep.subr.bf16.mxu1 %v11363_v63  ;;  %10212 = vmatprep.mubr.bf16.mxu1 %v8768_v16  ;;  %v3581_v33 = vrot.slane %v3579_v11, 4  ;;  %v3584_v51 = vrot.slane %v3582_v31, 5  ;;  %v3549_v59 = vsel %vm11755_vm2, %v3544_v13, %v3548_v52  ;;  %v12425_v23 = vrot.slane %v3588_v41, 5  ;;  %v11368_v30 = vld [vmem:[%s14392_s1 + $0xd0] sm:$0xff]  }
 0x103   : > { %10181 = vmatmul.mubr.bf16.gmra.mxu0 %v11365_v50  ;;  %v3571_v16 = vor.u32 %v3570_v24, %v3567_v8  ;;  %v3595_v54 = vrot.slane %v3593_v45, 4  ;;  %v8769_v36 = vcombine.low %v3535_v20, %v3549_v59  ;;  %v3563_v32 = vsel %vm11755_vm2, %v3558_v37, %v12402_v2  ;;  %v11369_v2 = vld [vmem:[%s14392_s1 + $0x110] sm:$0xff]   ;;  %v11370_v37 = vld [vmem:[%s14392_s1 + $0xc8] sm:$0xff]  }
 0x104   : > { %10229 = vmatpush3.bf16.msra.mxu0 %v11364_v28  ;;  %10184 = vmatprep.mubr.bf16.mxu0 %v11367_v42  ;;  %v3585_v11 = vor.u32 %v3584_v51, %v3581_v33  ;;  %v3596_v52 = vshll.u32 %v8762_v10, 16  ;;  %v3602_v8 = vshll.u32 %v8763_v44, 16 }
 0x105   : > { %v12308_v38 = vpop.f32.mrf.mxu0  ;;  %10259 = vmatpush3.bf16.msra.mxu1 %v11363_v63  ;;  %10230 = vmatprep.subr.bf16.mxu0 %v11368_v30  ;;  %v3572_v31 = vrot.slane %v3571_v16, 4 }
 0x106   : > { %v12311_v4 = vpop.f32.mrf.mxu1  ;;  %10260 = vmatprep.subr.bf16.mxu1 %v11366_v9  ;;  %v3586_v10 = vrot.slane %v3585_v11, 4  ;;  %v3598_v41 = vrot.slane %v3596_v52, 5 }
 0x107   : > { %v12319_v48 = vpop.f32.mrf.mxu0  ;;  %v12435_v13 = vadd.f32 %v12311_v4, %v12308_v38 }
 0x108   : > { %v12328_v56 = vpop.f32.mrf.mxu1  ;;  %10213 = vmatmul.mubr.bf16.gmra.mxu1 %v8769_v36  ;;  %10231 = vmatpush3.bf16.msra.mxu0 %v11368_v30  ;;  %v3577_v36 = vsel %vm11755_vm2, %v3572_v31, %v3576_v46  ;;  %v11373_v30 = vld [vmem:[%s14392_s1 + $0xc0] sm:$0xff]   ;;  %v8776_v31 = vld [vmem:[%s11664_s17 + $0xa8] sm:$0xf] }
 0x109   : > { %v12332_v5 = vpop.f32.mrf.mxu0  ;;  %10261 = vmatpush3.bf16.msra.mxu1 %v11366_v9  ;;  %v12439_v20 = vadd.f32 %v12328_v56, %v12319_v48  ;;  %v3604_v48 = vrot.slane %v3602_v8, 5  ;;  %v8770_v9 = vcombine.low %v3563_v32, %v3577_v36  ;;  %10232 = vmatprep.subr.bf16.mxu0 %v11370_v37  ;;  %v11374_v32 = vld [vmem:[%s11664_s17 + $0x98] ss:$8 sps:$4 sm:$0xff]   ;;  %v8777_v8 = vld [vmem:[%s11664_s17 + $0xac] sm:$0x1] }
 0x10a   : > { %v12338_v21 = vpop.f32.mrf.mxu1  ;;  %10262 = vmatprep.subr.bf16.mxu1 %v11369_v2  ;;  %v8778_v36 = vld [vmem:[%s11664_s17 + $0xb0] sm:$0xf] }
 0x10b   : > { %v12343_v7 = vpop.f32.mrf.mxu0  ;;  %v12446_v45 = vadd.f32 %v12338_v21, %v12332_v5  ;;  %10216 = vmatprep.mubr.bf16.mxu1 %v8770_v9 }
 0x10c   : > { %v12354_v35 = vpop.f32.mrf.mxu1  ;;  %10233 = vmatpush3.bf16.msra.mxu0 %v11370_v37 }
 0x10d   : > { %v12357_v18 = vpop.f32.mrf.mxu0  ;;  %v12450_v38 = vadd.f32 %v12354_v35, %v12343_v7  ;;  %v3591_v7 = vsel %vm11755_vm2, %v3586_v10, %v12425_v23  ;;  %v3599_v35 = vor.u32 %v3598_v41, %v3595_v54  ;;  %10263 = vmatpush3.bf16.msra.mxu1 %v11369_v2  ;;  %10234 = vmatprep.subr.bf16.mxu0 %v11373_v30 }
 0x10e   : > { %v12363_v53 = vpop.f32.mrf.mxu1 }
 0x10f   : > { %v12366_v60 = vpop.f32.mrf.mxu0  ;;  %v12456_v56 = vadd.f32 %v12363_v53, %v12357_v18  ;;  %v3600_v59 = vrot.slane %v3599_v35, 4 }
 0x110   : > { %v12377_v14 = vpop.f32.mrf.mxu1  ;;  %10235 = vmatpush3.bf16.msra.mxu0 %v11373_v30  ;;  %v11377_v30 = vld [vmem:[%s11664_s17 + $0xa8] ss:$8 sps:$4 sm:$0xff]  }
 0x111   : > { %v12383_v25 = vpop.f32.mrf.mxu0  ;;  %v12460_v5 = vadd.f32 %v12377_v14, %v12366_v60  ;;  %v8772_v60 = vld [vmem:[%s11664_s17 + $0x98] sm:$0xf]  ;;  %v8774_v14 = vld [vmem:[%s11664_s17 + $0xa0] sm:$0xf] }
 0x112   : > { %v12389_v39 = vpop.f32.mrf.mxu1  ;;  %v4010_v16 = vshrl.u32 %v8772_v60, 16  ;;  %v4013_v23 = vshll.u32 %v8772_v60, 16  ;;  %v4024_v54 = vshrl.u32 %v8774_v14, 16 }
 0x113   : > { %v12392_v26 = vpop.f32.mrf.mxu0  ;;  %v12470_v18 = vadd.f32 %v12389_v39, %v12383_v25  ;;  %v11371_v39 = vld [vmem:[%s11664_s17 + $0x100] ss:$8 sps:$4 sm:$0xff]  }
 0x114   : > { %v12395_v58 = vpop.f32.mrf.mxu1  ;;  %10185 = vmatmul.mubr.bf16.gmra.mxu0 %v11371_v39  ;;  %v4012_v10 = vrot.slane %v4010_v16, 4  ;;  %v4015_v41 = vrot.slane %v4013_v23, 5  ;;  %v11376_v39 = vld [vmem:[%s14392_s1 + $0x178] sm:$0xff]  }
 0x115   : > { %v12405_v12 = vpop.f32.mrf.mxu0  ;;  %v12476_v46 = vadd.f32 %v12395_v58, %v12392_v26  ;;  %10236 = vmatprep.mubr.bf16.mxu0 %v11374_v32  ;;  %10284 = vmatprep.subr.bf16.mxu0 %v11376_v39  ;;  %v11378_v32 = vld [vmem:[%s14392_s1 + $0x1b8] sm:$0xff]  }
 0x116   : > { %v12413_v29 = vpop.f32.mrf.mxu1 }
 0x117   : > { %v12415_v22 = vpop.f32.mrf.mxu0  ;;  %v12480_v44 = vadd.f32 %v12413_v29, %v12405_v12  ;;  %v8773_v29 = vld [vmem:[%s11664_s17 + $0x9c] sm:$0x1] }
 0x118   : > { %v713_v43 = vpop.f32.mrf.mxu1 }
 0x119   : > { %v9863_v63 = vpop.f32.mrf.mxu0  ;;  %v12483_v33 = vadd.f32 %v713_v43, %v12415_v22  ;;  %v11372_v22 = vld [vmem:[%s14392_s1 + $0x108] sm:$0xff]  }
 0x11a   : > { %v9895_v50 = vpop.f32.mrf.mxu1  ;;  %10264 = vmatprep.subr.bf16.mxu1 %v11372_v22 }
 0x11b   : > { %v523_v28 = vpop.f32.mrf.mxu0  ;;  %v12485_v51 = vadd.f32 %v9895_v50, %v9863_v63  ;;  %v8775_v63 = vld [vmem:[%s11664_s17 + $0xa4] sm:$0x1]  ;;  %v3605_v50 = vsel %vm11755_vm2, %v3600_v59, %v3604_v48  ;;  %10265 = vmatpush3.bf16.msra.mxu1 %v11372_v22  ;;  %v4052_v22 = vshrl.u32 %v8778_v36, 16 }
 0x11c   : > { %v716_v24 = vpop.f32.mrf.mxu1  ;;  %v11375_v48 = vld [vmem:[%s14392_s1 + $0x100] sm:$0xff]   ;;  %v4033_v35 = vshll.u32 %v8775_v63, 16  ;;  %10237 = vmatmul.mubr.bf16.vlgmr.msra.gmra.mxu0 %v11377_v30  ;;  %v12565_v30 = vld [vmem:[%s11664_s17 + $0xcc] sm:$0x1] }
 0x11d   : > { %v9866_v4 = vpop.f32.mrf.mxu0  ;;  %v12488_v42 = vadd.f32 %v716_v24, %v523_v28  ;;  %v4027_v28 = vshll.u32 %v8774_v14, 16  ;;  %v8771_v24 = vcombine.low %v3591_v7, %v3605_v50  ;;  %10266 = vmatprep.subr.bf16.mxu1 %v11375_v48  ;;  %v4038_v14 = vshrl.u32 %v8776_v31, 16  ;;  %v8780_v50 = vld [vmem:[%s11664_s17 + $0xb8] sm:$0xf]  ;;  %10285 = vmatpush3.bf16.msra.mxu0 %v11376_v39 }
 0x11e   : > { %v9898_v21 = vpop.f32.mrf.mxu1  ;;  %v4066_v39 = vshrl.u32 %v8780_v50, 16 }
 0x11f   : > { %v536_v53 = vpop.f32.mrf.mxu0  ;;  %v12490_v26 = vadd.f32 %v9898_v21, %v9866_v4  ;;  %v4019_v4 = vshll.u32 %v8773_v29, 16  ;;  %v4026_v21 = vrot.slane %v4024_v54, 4  ;;  %v4029_v9 = vrot.slane %v4027_v28, 5  ;;  %10217 = vmatmul.mubr.bf16.gmra.mxu1 %v8771_v24 }
 0x120   : > { %v729_v25 = vpop.f32.mrf.mxu1  ;;  %10268 = vmatprep.mubr.bf16.mxu1 %v11927_v62  ;;  %v4047_v29 = vshll.u32 %v8777_v8, 16  ;;  %10267 = vmatpush3.bf16.msra.mxu1 %v11375_v48  ;;  %v4040_v23 = vrot.slane %v4038_v14, 4  ;;  %v4054_v8 = vrot.slane %v4052_v22, 4  ;;  %v12545_v14 = vld [vmem:[%s11664_s17 + $0xbc] sm:$0x1] }
 0x121   : > { %v12492_v58 = vadd.f32 %v729_v25, %v536_v53  ;;  %v9867_v12 = vpop.f32.mrf.mxu0  ;;  %v4016_v53 = vor.u32 %v4015_v41, %v4012_v10  ;;  %v4041_v25 = vshll.u32 %v8776_v31, 16  ;;  %v4030_v59 = vor.u32 %v4029_v9, %v4026_v21  ;;  %10316 = vmatprep.subr.bf16.mxu1 %v11378_v32  ;;  %v11379_v41 = vld [vmem:[%s11664_s17 + $0xb8] ss:$8 sps:$4 sm:$0xff]  }
 0x122   : > { %v9899_v43 = vpop.f32.mrf.mxu1  ;;  %v12532_v31 = vrot.slane %v4033_v35, 5  ;;  %10240 = vmatprep.mubr.bf16.mxu0 %v11379_v41  ;;  %v11380_v35 = vld [vmem:[%s14392_s1 + $0x170] sm:$0xff]  }
 0x123   : > { %v12505_v11 = vadd.f32 %v9899_v43, %v9867_v12  ;;  %v12507_v52 = vpop.f32.mrf.mxu0  ;;  %v8779_v12 = vld [vmem:[%s11664_s17 + $0xb4] sm:$0x1]  ;;  %v4055_v43 = vshll.u32 %v8778_v36, 16  ;;  %v4043_v62 = vrot.slane %v4041_v25, 5  ;;  %v12530_v28 = vrot.slane %v4016_v53, 4  ;;  %10286 = vmatprep.subr.bf16.mxu0 %v11380_v35 }
 0x124   : > { %v732_v2 = vpop.f32.mrf.mxu1  ;;  %v4061_v48 = vshll.u32 %v8779_v12, 16  ;;  %v8782_v25 = vld [vmem:[%s11664_s17 + $0xc0] sm:$0xf]  ;;  %10287 = vmatpush3.bf16.msra.mxu0 %v11380_v35  ;;  %v11383_v35 = vld [vmem:[%s11664_s17 + $0xc8] ss:$8 sps:$4 sm:$0xff]  }
 0x125   : > { %v9918_v37 = vpop.f32.mrf.mxu0  ;;  %v4057_v24 = vrot.slane %v4055_v43, 5  ;;  %v4044_v36 = vor.u32 %v4043_v62, %v4040_v23  ;;  %v8784_v43 = vld [vmem:[%s11664_s17 + $0xc8] sm:$0xf]  ;;  %10241 = vmatmul.mubr.bf16.gmra.mxu0 %v11383_v35 }
 0x126   : > { %v1199_v7 = vadd.f32 %v9918_v37, %v12435_v13  ;;  %v9950_v60 = vpop.f32.mrf.mxu1  ;;  %v12521_v13 = vrot.slane %v4019_v4, 5  ;;  %v12535_v4 = vrot.slane %v4030_v59, 4  ;;  %v12541_v37 = vrot.slane %v4047_v29, 5  ;;  %v8783_v29 = vld [vmem:[%s11664_s17 + $0xc4] sm:$0x1] }
 0x127   : > { %v1134_v63 = vpop.f32.mrf.mxu0  ;;  %v4058_v53 = vor.u32 %v4057_v24, %v4054_v8  ;;  %v12551_v59 = vrot.slane %v4044_v36, 4  ;;  %v12559_v23 = vrot.slane %v4061_v48, 5  ;;  %v8786_v8 = vld [vmem:[%s11664_s17 + $0xd0] sm:$0xf]  ;;  %10269 = vmatmul.mubr.bf16.vlgmr.msra.gmra.mxu1 %v11943_v17  ;;  %v4080_v24 = vshrl.u32 %v8782_v25, 16 }
 0x128   : > { %v12523_v16 = vadd.f32 %v9950_v60, %v1199_v7  ;;  %v1377_v54 = vpop.f32.mrf.mxu1  ;;  %v1197_v21 = vadd.f32 %v1134_v63, %v12439_v20  ;;  %v12549_v20 = vadd.f32 %v732_v2, %v12507_v52  ;;  %v4068_v2 = vrot.slane %v4066_v39, 4  ;;  %10317 = vmatpush3.bf16.msra.mxu1 %v11378_v32  ;;  %10272 = vmatprep.mubr.bf16.mxu1 %v11971_v61  ;;  %v11381_v32 = vld [vmem:[%s14392_s1 + $0x1b0] sm:$0xff]   ;;  %v11382_v61 = vld [vmem:[%s14392_s1 + $0x168] sm:$0xff]   ;;  %v12598_v39 = vld [vmem:[%s11664_s17 + $0xd8] sm:$0xf] }
 0x129   : > { %v9919_v10 = vpop.f32.mrf.mxu0  ;;  %v12557_v63 = vrot.slane %v4058_v53, 4  ;;  %v4036_v17 = vsel %vm11755_vm2, %v12535_v4, %v12532_v31  ;;  %10318 = vmatprep.subr.bf16.mxu1 %v11381_v32  ;;  %10288 = vmatprep.subr.bf16.mxu0 %v11382_v61  ;;  %v4075_v4 = vshll.u32 %v12545_v14, 16  ;;  %v4082_v36 = vrot.slane %v4080_v24, 4  ;;  %v12626_v52 = vld [vmem:[%s11664_s17 + $0xe4] sm:$0x1] }
 0x12a   : > { %v9951_v9 = vpop.f32.mrf.mxu1  ;;  %v1200_v7 = vadd.f32 %v9919_v10, %v12446_v45  ;;  %v12553_v12 = vadd.f32 %v1377_v54, %v1197_v21  ;;  %v4069_v54 = vshll.u32 %v8780_v50, 16  ;;  %v4083_v50 = vshll.u32 %v8782_v25, 16  ;;  %v8787_v21 = vld [vmem:[%s11664_s17 + $0xd4] sm:$0x1]  ;;  %10289 = vmatpush3.bf16.msra.mxu0 %v11382_v61 }
 0x12b   : > { %v1137_v60 = vpop.f32.mrf.mxu0  ;;  %v4089_v48 = vshll.u32 %v8783_v29, 16  ;;  %v4064_v53 = vsel %vm11755_vm2, %v12557_v63, %v12559_v23  ;;  %v4097_v25 = vshll.u32 %v8784_v43, 16  ;;  %v4103_v29 = vshll.u32 %v12565_v30, 16  ;;  %v11385_v63 = vld [vmem:[%s14392_s1 + $0x160] sm:$0xff]   ;;  %v11386_v30 = vld [vmem:[%s14392_s1 + $0x1a8] sm:$0xff]  }
 0x12c   : > { %v1380_v22 = vpop.f32.mrf.mxu1  ;;  %v12561_v45 = vadd.f32 %v9951_v9, %v1200_v7  ;;  %v1198_v62 = vadd.f32 %v1137_v60, %v12450_v38  ;;  %v4071_v31 = vrot.slane %v4069_v54, 5  ;;  %v4085_v7 = vrot.slane %v4083_v50, 5  ;;  %10319 = vmatpush3.bf16.msra.mxu1 %v11381_v32  ;;  %10290 = vmatprep.subr.bf16.mxu0 %v11385_v63  ;;  %v8790_v38 = vld [vmem:[%s11664_s17 + $0xe0] sm:$0xf] }
 0x12d   : > { %v4094_v60 = vshrl.u32 %v8784_v43, 16  ;;  %v4108_v54 = vshrl.u32 %v8786_v8, 16  ;;  %v4111_v24 = vshll.u32 %v8786_v8, 16  ;;  %v4099_v61 = vrot.slane %v4097_v25, 5  ;;  %10320 = vmatprep.subr.bf16.mxu1 %v11386_v30 }
 0x12e   : > { %v9954_v10 = vpop.f32.mrf.mxu1  ;;  %v12582_v41 = vadd.f32 %v1380_v22, %v1198_v62  ;;  %v11384_v22 = vld [vmem:[%s11664_s17 + $0xd8] ss:$8 sps:$4 sm:$0xff]   ;;  %v4072_v14 = vor.u32 %v4071_v31, %v4068_v2  ;;  %v9922_v62 = vpop.f32.mrf.mxu0  ;;  %v4086_v23 = vor.u32 %v4085_v7, %v4082_v36  ;;  %v12609_v8 = vrot.slane %v4075_v4, 5  ;;  %10291 = vmatpush3.bf16.msra.mxu0 %v11385_v63  ;;  %v8792_v63 = vld [vmem:[%s11664_s17 + $0xe8] sm:$0xf] }
 0x12f   : > { %10244 = vmatprep.mubr.bf16.mxu0 %v11384_v22  ;;  %v1203_v43 = vadd.f32 %v9922_v62, %v12456_v56  ;;  %v4096_v50 = vrot.slane %v4094_v60, 4  ;;  %v12611_v2 = vrot.slane %v4089_v48, 5  ;;  %v4110_v32 = vrot.slane %v4108_v54, 4  ;;  %v12618_v62 = vld [vmem:[%s11664_s17 + $0xdc] sm:$0x1]  ;;  %10273 = vmatmul.mubr.bf16.gmra.mxu1 %v11986_v15 }
 0x130   : > { %v1393_v9 = vpop.f32.mrf.mxu1  ;;  %v4113_v31 = vrot.slane %v4111_v24, 5  ;;  %v1150_v22 = vpop.f32.mrf.mxu0  ;;  %v12613_v7 = vrot.slane %v4072_v14, 4  ;;  %v4117_v25 = vshll.u32 %v8787_v21, 16  ;;  %v12622_v4 = vrot.slane %v4103_v29, 5  ;;  %10321 = vmatpush3.bf16.msra.mxu1 %v11386_v30  ;;  %10276 = vmatprep.mubr.bf16.mxu1 %v12013_v0  ;;  %v11387_v0 = vld [vmem:[%s14392_s1 + $0x1a0] sm:$0xff]  }
 0x131   : > { %v12615_v56 = vadd.f32 %v9954_v10, %v1203_v43  ;;  %v4100_v60 = vor.u32 %v4099_v61, %v4096_v50  ;;  %v1201_v54 = vadd.f32 %v1150_v22, %v12460_v5  ;;  %v4122_v10 = vshrl.u32 %v12598_v39, 16  ;;  %10322 = vmatprep.subr.bf16.mxu1 %v11387_v0  ;;  %v12665_v30 = vld [vmem:[%s11664_s17 + $0xec] sm:$0x1]  ;;  %v8794_v22 = vld [vmem:[%s11664_s17 + $0xf0] sm:$0xf] }
 0x132   : > { %v9955_v35 = vpop.f32.mrf.mxu1  ;;  %v4114_v48 = vor.u32 %v4113_v31, %v4110_v32  ;;  %v9923_v24 = vpop.f32.mrf.mxu0  ;;  %v14412_v21 = vsel %vm11755_vm2, %v12530_v28, %v12521_v13  ;;  %v12637_v14 = vrot.slane %v4086_v23, 4  ;;  %v11388_v13 = vld [vmem:[%s14392_s1 + $0x158] sm:$0xff]   ;;  %v14413_v28 = vsel %vm11755_vm2, %v12551_v59, %v12541_v37  ;;  %v11389_v32 = vld [vmem:[%s11664_s17 + $0xe8] ss:$8 sps:$4 sm:$0xff]  }
 0x133   : > { %v12635_v15 = vcombine.low %v14412_v21, %v4036_v17  ;;  %v12639_v5 = vrot.slane %v4100_v60, 4  ;;  %v1204_v29 = vadd.f32 %v9923_v24, %v12470_v18  ;;  %10292 = vmatprep.subr.bf16.mxu0 %v11388_v13  ;;  %v12654_v17 = vcombine.low %v14413_v28, %v4064_v53  ;;  %10245 = vmatmul.mubr.bf16.gmra.mxu0 %v11389_v32  ;;  %v11390_v60 = vld [vmem:[%s11664_s17 + $0xf8] ss:$8 sps:$4 sm:$0xff]  }
 0x134   : > { %v1396_v36 = vpop.f32.mrf.mxu1  ;;  %v12656_v18 = vrot.slane %v4114_v48, 4  ;;  %v12658_v23 = vrot.slane %v4117_v25, 5  ;;  %v12660_v43 = vadd.f32 %v1393_v9, %v1201_v54  ;;  %v1153_v50 = vpop.f32.mrf.mxu0  ;;  %v4124_v59 = vrot.slane %v4122_v10, 4  ;;  %10293 = vmatpush3.bf16.msra.mxu0 %v11388_v13  ;;  %10248 = vmatprep.mubr.bf16.mxu0 %v11390_v60  ;;  %v8796_v13 = vld [vmem:[%s11664_s17 + $0xf8] sm:$0xf] }
 0x135   : > { %v12668_v31 = vadd.f32 %v9955_v35, %v1204_v29  ;;  %v1202_v37 = vadd.f32 %v1153_v50, %v12476_v46  ;;  %v4125_v53 = vshll.u32 %v12598_v39, 16  ;;  %v4078_v9 = vsel %vm11755_vm2, %v12613_v7, %v12609_v8  ;;  %v8795_v35 = vld [vmem:[%s11664_s17 + $0xf4] sm:$0x1]  ;;  %10323 = vmatpush3.bf16.msra.mxu1 %v11387_v0 }
 0x136   : > { %v12662_v61 = vpop.f32.mrf.mxu1  ;;  %v4131_v25 = vshll.u32 %v12618_v62, 16  ;;  %v4136_v48 = vshrl.u32 %v8790_v38, 16  ;;  %v4139_v54 = vshll.u32 %v8790_v38, 16  ;;  %v11391_v46 = vld [vmem:[%s14392_s1 + $0x150] sm:$0xff]   ;;  %v4092_v39 = vsel %vm11755_vm2, %v12637_v14, %v12611_v2  ;;  %v11392_v38 = vld [vmem:[%s14392_s1 + $0x198] sm:$0xff]  }
 0x137   : > { %10294 = vmatprep.subr.bf16.mxu0 %v11391_v46  ;;  %v12687_v24 = vadd.f32 %v1396_v36, %v1202_v37  ;;  %v4127_v8 = vrot.slane %v4125_v53, 5  ;;  %v4145_v7 = vshll.u32 %v12626_v52, 16  ;;  %10324 = vmatprep.subr.bf16.mxu1 %v11392_v38  ;;  %v4106_v62 = vsel %vm11755_vm2, %v12639_v5, %v12622_v4  ;;  %v8797_v37 = vld [vmem:[%s11664_s17 + $0xfc] sm:$0x1] }
 0x138   : > { %v4138_v10 = vrot.slane %v4136_v48, 4  ;;  %v4141_v21 = vrot.slane %v4139_v54, 5  ;;  %v4150_v29 = vshrl.u32 %v8792_v63, 16  ;;  %v12697_v0 = vpop.f32.mrf.mxu1  ;;  %v4120_v52 = vsel %vm11755_vm2, %v12656_v18, %v12658_v23  ;;  %10277 = vmatmul.mubr.bf16.gmra.mxu1 %v12033_v27  ;;  %10295 = vmatpush3.bf16.msra.mxu0 %v11391_v46  ;;  %v11393_v27 = vld [vmem:[%s14392_s1 + $0x190] sm:$0xff]   ;;  %v8798_v48 = vld [vmem:[%s11664_s17 + $0x100] sm:$0xf] }
 0x139   : > { %v4128_v2 = vor.u32 %v4127_v8, %v4124_v59  ;;  %v4153_v36 = vshll.u32 %v8792_v63, 16  ;;  %v4159_v14 = vshll.u32 %v12665_v30, 16  ;;  %v4164_v28 = vshrl.u32 %v8794_v22, 16  ;;  %10325 = vmatpush3.bf16.msra.mxu1 %v11392_v38  ;;  %10280 = vmatprep.mubr.bf16.mxu1 %v12049_v1  ;;  %v9926_v63 = vpop.f32.mrf.mxu0  ;;  %v11394_v59 = vld [vmem:[%s14392_s1 + $0x148] sm:$0xff]  }
 0x13a   : > { %v4142_v4 = vor.u32 %v4141_v21, %v4138_v10  ;;  %v4152_v5 = vrot.slane %v4150_v29, 4  ;;  %v4167_v50 = vshll.u32 %v8794_v22, 16  ;;  %v12707_v32 = vrot.slane %v4131_v25, 5  ;;  %10326 = vmatprep.subr.bf16.mxu1 %v11393_v27  ;;  %10296 = vmatprep.subr.bf16.mxu0 %v11394_v59  ;;  %v9959_v25 = vpop.f32.mrf.mxu1  ;;  %v11395_v54 = vld [vmem:[%s11664_s17 + $0x108] ss:$8 sps:$4 sm:$0xff]  }
 0x13b   : > { %v12709_v18 = vrot.slane %v4145_v7, 5  ;;  %v4155_v23 = vrot.slane %v4153_v36, 5  ;;  %v4173_v30 = vshll.u32 %v8795_v35, 16  ;;  %v12718_v1 = vrot.slane %v4128_v2, 4  ;;  %10249 = vmatmul.mubr.bf16.gmra.mxu0 %v11395_v54  ;;  %v1166_v7 = vpop.f32.mrf.mxu0  ;;  %v11398_v54 = vld [vmem:[%s11664_s17 + $0xa0] ss:$8 sps:$4 sm:$0xff]  }
 0x13c   : > { %v1207_v53 = vadd.f32 %v9926_v63, %v12480_v44  ;;  %v4166_v22 = vrot.slane %v4164_v28, 4  ;;  %v4169_v60 = vrot.slane %v4167_v50, 5  ;;  %v12723_v35 = vcombine.low %v4078_v9, %v4092_v39  ;;  %10297 = vmatpush3.bf16.msra.mxu0 %v11394_v59  ;;  %10300 = vmatprep.mubr.bf16.mxu0 %v12635_v15  ;;  %v11396_v9 = vld [vmem:[%s14392_s1 + $0x140] sm:$0xff]   ;;  %v1412_v50 = vpop.f32.mrf.mxu1  ;;  %v8801_v63 = vld [vmem:[%s11664_s17 + $0x10c] sm:$0x1] }
 0x13d   : > { %v4156_v46 = vor.u32 %v4155_v23, %v4152_v5  ;;  %v12725_v8 = vrot.slane %v4159_v14, 5  ;;  %v4178_v38 = vshrl.u32 %v8796_v13, 16  ;;  %v12728_v10 = vrot.slane %v4142_v4, 4  ;;  %10327 = vmatpush3.bf16.msra.mxu1 %v11393_v27  ;;  %10298 = vmatprep.subr.bf16.mxu0 %v11396_v9  ;;  %v9927_v36 = vpop.f32.mrf.mxu0  ;;  %v8799_v14 = vld [vmem:[%s11664_s17 + $0x104] sm:$0x1] }
 0x13e   : > { %v12731_v44 = vadd.f32 %v12662_v61, %v1207_v53  ;;  %v4170_v21 = vor.u32 %v4169_v60, %v4166_v22  ;;  %v4181_v29 = vshll.u32 %v8796_v13, 16  ;;  %v12736_v39 = vcombine.low %v4106_v62, %v4120_v52  ;;  %v8800_v4 = vld [vmem:[%s11664_s17 + $0x108] sm:$0xf]  ;;  %v8802_v23 = vld [vmem:[%s11664_s17 + $0x110] sm:$0xf] }
 0x13f   : > { %v12738_v2 = vrot.slane %v4173_v30, 5  ;;  %v1205_v15 = vadd.f32 %v1166_v7, %v12483_v33  ;;  %v4180_v61 = vrot.slane %v4178_v38, 4  ;;  %v11397_v13 = vld [vmem:[%s14392_s1 + $0x188] sm:$0xff]   ;;  %v12746_v5 = vrot.slane %v4156_v46, 4  ;;  %v1169_v27 = vpop.f32.mrf.mxu0  ;;  %v8812_v7 = vld [vmem:[%s11664_s17 + $0xa0] sm:$0xf] }
 0x140   : > { %10328 = vmatprep.subr.bf16.mxu1 %v11397_v13  ;;  %v1208_v28 = vadd.f32 %v9927_v36, %v12485_v51  ;;  %v4183_v62 = vrot.slane %v4181_v29, 5  ;;  %v4187_v52 = vshll.u32 %v8797_v37, 16  ;;  %v4134_v33 = vsel %vm11755_vm2, %v12718_v1, %v12707_v32  ;;  %10281 = vmatmul.mubr.bf16.gmra.mxu1 %v12062_v47  ;;  %v9962_v29 = vpop.f32.mrf.mxu1  ;;  %v12782_v36 = vld [vmem:[%s11664_s17 + $0x114] sm:$0x1]  ;;  %v11406_v1 = vld [vmem:[%s14392_s1 + $0x1e8] sm:$0xff]  }
 0x141   : > { %v12756_v30 = vadd.f32 %v12697_v0, %v1205_v15  ;;  %v4192_v59 = vshrl.u32 %v8798_v48, 16  ;;  %v4195_v53 = vshll.u32 %v8798_v48, 16  ;;  %10299 = vmatpush3.bf16.msra.mxu0 %v11396_v9  ;;  %v12759_v51 = vrot.slane %v4170_v21, 4  ;;  %10329 = vmatpush3.bf16.msra.mxu1 %v11397_v13  ;;  %v11405_v32 = vld [vmem:[%s14392_s1 + $0x230] sm:$0xff]  }
 0x142   : > { %v12761_v37 = vadd.f32 %v9959_v25, %v1208_v28  ;;  %v1206_v22 = vadd.f32 %v1169_v27, %v12488_v42  ;;  %v12764_v60 = vrot.slane %v4187_v52, 5  ;;  %10332 = vmatprep.mubr.bf16.mxu1 %v11398_v54  ;;  %v4148_v0 = vsel %vm11755_vm2, %v12728_v10, %v12709_v18  ;;  %v11399_v25 = vld [vmem:[%s14392_s1 + $0x180] sm:$0xff]   ;;  %v11400_v42 = vld [vmem:[%s14392_s1 + $0x1f8] sm:$0xff]  }
 0x143   : > { %v4184_v48 = vor.u32 %v4183_v62, %v4180_v61  ;;  %v4194_v47 = vrot.slane %v4192_v59, 4  ;;  %v4197_v46 = vrot.slane %v4195_v53, 5  ;;  %10330 = vmatprep.subr.bf16.mxu1 %v11399_v25  ;;  %10348 = vmatprep.subr.bf16.mxu0 %v11400_v42  ;;  %v4201_v21 = vshll.u32 %v8799_v14, 16  ;;  %v11402_v27 = vld [vmem:[%s14392_s1 + $0x238] sm:$0xff]  }
 0x144   : > { %v12778_v38 = vadd.f32 %v1412_v50, %v1206_v22  ;;  %v4206_v18 = vshrl.u32 %v8800_v4, 16  ;;  %v4209_v10 = vshll.u32 %v8800_v4, 16  ;;  %10301 = vmatmul.mubr.bf16.vlgmr.msra.gmra.mxu0 %v12654_v17  ;;  %v4215_v61 = vshll.u32 %v8801_v63, 16  ;;  %v11401_v17 = vld [vmem:[%s14392_s1 + $0x1f0] sm:$0xff]   ;;  %v1425_v22 = vpop.f32.mrf.mxu1 }
 0x145   : > { %v4185_v9 = vrot.slane %v4184_v48, 4  ;;  %v4198_v15 = vor.u32 %v4197_v46, %v4194_v47  ;;  %v4220_v13 = vshrl.u32 %v8802_v23, 16  ;;  %10349 = vmatpush3.bf16.msra.mxu0 %v11400_v42  ;;  %10304 = vmatprep.mubr.bf16.mxu0 %v12723_v35  ;;  %v4203_v28 = vrot.slane %v4201_v21, 5  ;;  %v11403_v42 = vld [vmem:[%s11664_s17 + $0xb0] ss:$8 sps:$4 sm:$0xff]  }
 0x146   : > { %v4208_v62 = vrot.slane %v4206_v18, 4  ;;  %v4211_v50 = vrot.slane %v4209_v10, 5  ;;  %v4223_v52 = vshll.u32 %v8802_v23, 16  ;;  %10331 = vmatpush3.bf16.msra.mxu1 %v11399_v25  ;;  %10350 = vmatprep.subr.bf16.mxu0 %v11401_v17  ;;  %v4162_v14 = vsel %vm11755_vm2, %v12746_v5, %v12725_v8  ;;  %v12797_v23 = vld [vmem:[%s11664_s17 + $0xa4] sm:$0x1]  ;;  %v9930_v5 = vpop.f32.mrf.mxu0 }
 0x147   : > { %v4176_v35 = vsel %vm11755_vm2, %v12759_v51, %v12738_v2  ;;  %v4199_v4 = vrot.slane %v4198_v15, 4  ;;  %v4222_v63 = vrot.slane %v4220_v13, 4  ;;  %10380 = vmatprep.subr.bf16.mxu1 %v11402_v27  ;;  %v4190_v8 = vsel %vm11755_vm2, %v4185_v9, %v12764_v60  ;;  %v8814_v2 = vld [vmem:[%s11664_s17 + $0xa8] sm:$0xf]  ;;  %v12812_v25 = vld [vmem:[%s11664_s17 + $0xb0] sm:$0xf] }
 0x148   : > { %v4212_v59 = vor.u32 %v4211_v50, %v4208_v62  ;;  %v4225_v53 = vrot.slane %v4223_v52, 5  ;;  %v4637_v51 = vshrl.u32 %v8812_v7, 16  ;;  %v1211_v48 = vadd.f32 %v9930_v5, %v12490_v26  ;;  %v1182_v26 = vpop.f32.mrf.mxu0  ;;  %v12824_v9 = vld [vmem:[%s11664_s17 + $0xac] sm:$0x1]  ;;  %v12842_v50 = vld [vmem:[%s11664_s17 + $0xb4] sm:$0x1] }
 0x149   : > { %v4204_v54 = vsel %vm11755_vm2, %v4199_v4, %v4203_v28  ;;  %v12809_v47 = vrot.slane %v4215_v61, 5  ;;  %v4640_v46 = vshll.u32 %v8812_v7, 16  ;;  %10333 = vmatmul.mubr.bf16.vlgmr.msra.gmra.mxu1 %v11403_v42  ;;  %10351 = vmatpush3.bf16.msra.mxu0 %v11401_v17  ;;  %v8808_v60 = vcombine.low %v4134_v33, %v4148_v0  ;;  %v11404_v7 = vld [vmem:[%s11664_s17 + $0xc0] ss:$8 sps:$4 sm:$0xff]   ;;  %v12856_v5 = vld [vmem:[%s11664_s17 + $0xbc] sm:$0x1] }
 0x14a   : > { %v12820_v21 = vrot.slane %v4212_v59, 4  ;;  %v4226_v18 = vor.u32 %v4225_v53, %v4222_v63  ;;  %v4229_v10 = vshll.u32 %v12782_v36, 16  ;;  %10381 = vmatpush3.bf16.msra.mxu1 %v11402_v27  ;;  %10336 = vmatprep.mubr.bf16.mxu1 %v11404_v7  ;;  %v12827_v15 = vadd.f32 %v9962_v29, %v1211_v48  ;;  %v9931_v29 = vpop.f32.mrf.mxu0  ;;  %v9963_v36 = vpop.f32.mrf.mxu1  ;;  %v12860_v59 = vld [vmem:[%s11664_s17 + $0xc0] sm:$0xf] }
 0x14b   : > { %v1209_v61 = vadd.f32 %v1182_v26, %v12492_v58  ;;  %v4639_v13 = vrot.slane %v4637_v51, 4  ;;  %v4642_v28 = vrot.slane %v4640_v46, 5  ;;  %10382 = vmatprep.subr.bf16.mxu1 %v11405_v32  ;;  %10352 = vmatprep.subr.bf16.mxu0 %v11406_v1  ;;  %v12836_v33 = vcombine.low %v4162_v14, %v4176_v35  ;;  %v8818_v35 = vld [vmem:[%s11664_s17 + $0xb8] sm:$0xf] }
 0x14c   : > { %v12838_v0 = vcombine.low %v4190_v8, %v4204_v54  ;;  %v4646_v58 = vshll.u32 %v12797_v23, 16  ;;  %v4651_v62 = vshrl.u32 %v8814_v2, 16  ;;  %10305 = vmatmul.mubr.bf16.gmra.mxu0 %v12736_v39  ;;  %v1212_v17 = vadd.f32 %v9931_v29, %v12505_v11  ;;  %v1185_v27 = vpop.f32.mrf.mxu0  ;;  %v11407_v11 = vld [vmem:[%s14392_s1 + $0x1e0] sm:$0xff]   ;;  %v11408_v54 = vld [vmem:[%s14392_s1 + $0x228] sm:$0xff]   ;;  %v1428_v48 = vpop.f32.mrf.mxu1 }
 0x14d   : > { %v12845_v52 = vadd.f32 %v1425_v22, %v1209_v61  ;;  %v4643_v4 = vor.u32 %v4642_v28, %v4639_v13  ;;  %v4654_v14 = vshll.u32 %v8814_v2, 16  ;;  %10353 = vmatpush3.bf16.msra.mxu0 %v11406_v1  ;;  %10308 = vmatprep.mubr.bf16.mxu0 %v8808_v60  ;;  %v4218_v63 = vsel %vm11755_vm2, %v12820_v21, %v12809_v47  ;;  %v11409_v61 = vld [vmem:[%s11664_s17 + $0xd0] ss:$8 sps:$4 sm:$0xff]  }
 0x14e   : > { %v12853_v23 = vrot.slane %v4229_v10, 5  ;;  %v4653_v8 = vrot.slane %v4651_v62, 4  ;;  %v4665_v39 = vshrl.u32 %v12812_v25, 16  ;;  %10383 = vmatpush3.bf16.msra.mxu1 %v11405_v32  ;;  %10354 = vmatprep.subr.bf16.mxu0 %v11407_v11  ;;  %v12865_v53 = vrot.slane %v4226_v18, 4  ;;  %v9982_v60 = vpop.f32.mrf.mxu0  ;;  %v11415_v47 = vld [vmem:[%s11664_s17 + $0xf0] ss:$8 sps:$4 sm:$0xff]  }
 0x14f   : > { %v12867_v22 = vadd.f32 %v9963_v36, %v1212_v17  ;;  %v1210_v2 = vadd.f32 %v1185_v27, %v12549_v20  ;;  %v4660_v51 = vshll.u32 %v12824_v9, 16  ;;  %10384 = vmatprep.subr.bf16.mxu1 %v11408_v54  ;;  %v12874_v46 = vrot.slane %v4646_v58, 5  ;;  %v12885_v36 = vld [vmem:[%s11664_s17 + $0xc4] sm:$0x1] }
 0x150   : > { %v4656_v42 = vrot.slane %v4654_v14, 5  ;;  %v4667_v18 = vrot.slane %v4665_v39, 4  ;;  %v4668_v10 = vshll.u32 %v12812_v25, 16  ;;  %v12879_v20 = vrot.slane %v4643_v4, 4  ;;  %v1620_v29 = vpop.f32.mrf.mxu0  ;;  %v11410_v25 = vld [vmem:[%s11664_s17 + $0xe0] ss:$8 sps:$4 sm:$0xff]  }
 0x151   : > { %v12877_v26 = vadd.f32 %v1428_v48, %v1210_v2  ;;  %v1685_v9 = vadd.f32 %v9982_v60, %v12523_v16  ;;  %v4674_v7 = vshll.u32 %v12842_v50, 16  ;;  %10337 = vmatmul.mubr.bf16.gmra.mxu1 %v11409_v61  ;;  %10355 = vmatpush3.bf16.msra.mxu0 %v11407_v11  ;;  %v4679_v32 = vshrl.u32 %v8818_v35, 16  ;;  %v12891_v50 = vld [vmem:[%s11664_s17 + $0xc8] sm:$0xf]  ;;  %v11411_v4 = vld [vmem:[%s14392_s1 + $0x220] sm:$0xff]   ;;  %v11412_v14 = vld [vmem:[%s14392_s1 + $0x1d8] sm:$0xff]  }
 0x152   : > { %v4657_v13 = vor.u32 %v4656_v42, %v4653_v8  ;;  %v4670_v28 = vrot.slane %v4668_v10, 5  ;;  %v4682_v1 = vshll.u32 %v8818_v35, 16  ;;  %10385 = vmatpush3.bf16.msra.mxu1 %v11408_v54  ;;  %10340 = vmatprep.mubr.bf16.mxu1 %v11410_v25  ;;  %v4662_v58 = vrot.slane %v4660_v51, 5  ;;  %v12901_v39 = vld [vmem:[%s11664_s17 + $0xcc] sm:$0x1]  ;;  %v10014_v42 = vpop.f32.mrf.mxu1 }
 0x153   : > { %v4688_v16 = vshll.u32 %v12856_v5, 16  ;;  %v1683_v62 = vadd.f32 %v1620_v29, %v12553_v12  ;;  %v4693_v17 = vshrl.u32 %v12860_v59, 16  ;;  %10386 = vmatprep.subr.bf16.mxu1 %v11411_v4  ;;  %10356 = vmatprep.subr.bf16.mxu0 %v11412_v14  ;;  %v4681_v8 = vrot.slane %v4679_v32, 4  ;;  %v9983_v12 = vpop.f32.mrf.mxu0  ;;  %v12911_v48 = vld [vmem:[%s11664_s17 + $0xd0] sm:$0xf] }
 0x154   : > { %v4658_v35 = vrot.slane %v4657_v13, 4  ;;  %v4671_v27 = vor.u32 %v4670_v28, %v4667_v18  ;;  %v4684_v5 = vrot.slane %v4682_v1, 5  ;;  %10309 = vmatmul.mubr.bf16.gmra.mxu0 %v12836_v33  ;;  %v4232_v11 = vsel %vm11755_vm2, %v12865_v53, %v12853_v23  ;;  %v2086_v28 = vpop.f32.mrf.mxu1  ;;  %v8826_v29 = vld [vmem:[%s11664_s17 + $0xd8] sm:$0xf] }
 0x155   : > { %v1686_v2 = vadd.f32 %v9983_v12, %v12561_v45  ;;  %v4695_v51 = vrot.slane %v4693_v17, 4  ;;  %v4696_v54 = vshll.u32 %v12860_v59, 16  ;;  %10357 = vmatpush3.bf16.msra.mxu0 %v11412_v14  ;;  %10312 = vmatprep.mubr.bf16.mxu0 %v12838_v0  ;;  %v4649_v33 = vsel %vm11755_vm2, %v12879_v20, %v12874_v46  ;;  %v12922_v53 = vpop.f32.mrf.mxu0  ;;  %v11413_v59 = vld [vmem:[%s14392_s1 + $0x1d0] sm:$0xff]  }
 0x156   : > { %v12918_v60 = vrot.slane %v4671_v27, 4  ;;  %v12920_v23 = vrot.slane %v4674_v7, 5  ;;  %v4685_v45 = vor.u32 %v4684_v5, %v4681_v8  ;;  %10387 = vmatpush3.bf16.msra.mxu1 %v11411_v4  ;;  %10358 = vmatprep.subr.bf16.mxu0 %v11413_v59  ;;  %v4663_v0 = vsel %vm11755_vm2, %v4658_v35, %v4662_v58  ;;  %v8825_v20 = vld [vmem:[%s11664_s17 + $0xd4] sm:$0x1]  ;;  %v11414_v7 = vld [vmem:[%s14392_s1 + $0x218] sm:$0xff]  }
 0x157   : > { %v12929_v18 = vadd.f32 %v10014_v42, %v1685_v9  ;;  %v4698_v46 = vrot.slane %v4696_v54, 5  ;;  %v4702_v10 = vshll.u32 %v12885_v36, 16  ;;  %10388 = vmatprep.subr.bf16.mxu1 %v11414_v7  ;;  %v8811_v61 = vcombine.low %v4218_v63, %v4232_v11  ;;  %v9986_v1 = vpop.f32.mrf.mxu0  ;;  %v8827_v4 = vld [vmem:[%s11664_s17 + $0xdc] sm:$0x1]  ;;  %v10015_v63 = vpop.f32.mrf.mxu1  ;;  %v11416_v27 = vld [vmem:[%s11664_s17 + $0x100] ss:$8 sps:$4 sm:$0xff]  }
 0x158   : > { %v12941_v13 = vrot.slane %v4685_v45, 4  ;;  %v12943_v9 = vrot.slane %v4688_v16, 5  ;;  %v4707_v32 = vshrl.u32 %v12891_v50, 16  ;;  %v12947_v36 = vadd.f32 %v2086_v28, %v1683_v62  ;;  %v8828_v42 = vld [vmem:[%s11664_s17 + $0xe0] sm:$0xf] }
 0x159   : > { %v4699_v25 = vor.u32 %v4698_v46, %v4695_v51  ;;  %v4710_v58 = vshll.u32 %v12891_v50, 16  ;;  %v4716_v17 = vshll.u32 %v12901_v39, 16  ;;  %10341 = vmatmul.mubr.bf16.gmra.mxu1 %v11415_v47  ;;  %10359 = vmatpush3.bf16.msra.mxu0 %v11413_v59  ;;  %v12953_v21 = vcombine.low %v4649_v33, %v4663_v0  ;;  %v1636_v62 = vpop.f32.mrf.mxu0  ;;  %v11418_v39 = vld [vmem:[%s14392_s1 + $0x1c8] sm:$0xff]  }
 0x15a   : > { %v4709_v16 = vrot.slane %v4707_v32, 4  ;;  %v12956_v14 = vadd.f32 %v9986_v1, %v12615_v56  ;;  %v4721_v35 = vshrl.u32 %v12911_v48, 16  ;;  %10389 = vmatpush3.bf16.msra.mxu1 %v11414_v7  ;;  %10344 = vmatprep.mubr.bf16.mxu1 %v11416_v27  ;;  %v4677_v50 = vsel %vm11755_vm2, %v12918_v60, %v12920_v23  ;;  %v11417_v56 = vld [vmem:[%s14392_s1 + $0x210] sm:$0xff]   ;;  %v8829_v60 = vld [vmem:[%s11664_s17 + $0xe4] sm:$0x1]  ;;  %v11420_v1 = vld [vmem:[%s14392_s1 + $0x208] sm:$0xff]  }
 0x15b   : > { %v12964_v8 = vadd.f32 %v10015_v63, %v1686_v2  ;;  %v12966_v5 = vrot.slane %v4702_v10, 5  ;;  %v4712_v12 = vrot.slane %v4710_v58, 5  ;;  %10390 = vmatprep.subr.bf16.mxu1 %v11417_v56  ;;  %10360 = vmatprep.subr.bf16.mxu0 %v11418_v39  ;;  %v4700_v11 = vrot.slane %v4699_v25, 4  ;;  %v9987_v33 = vpop.f32.mrf.mxu0  ;;  %v8830_v46 = vld [vmem:[%s11664_s17 + $0xe8] sm:$0xf] }
 0x15c   : > { %v4723_v51 = vrot.slane %v4721_v35, 4  ;;  %v4724_v54 = vshll.u32 %v12911_v48, 16  ;;  %v4730_v2 = vshll.u32 %v8825_v20, 16  ;;  %10313 = vmatmul.mubr.bf16.gmra.mxu0 %v8811_v61  ;;  %v4691_v23 = vsel %vm11755_vm2, %v12941_v13, %v12943_v9  ;;  %v11419_v61 = vld [vmem:[%s14392_s1 + $0x1c0] sm:$0xff]   ;;  %v12988_v13 = vpop.f32.mrf.mxu1  ;;  %v8831_v47 = vld [vmem:[%s11664_s17 + $0xec] sm:$0x1] }
 0x15d   : > { %v4713_v45 = vor.u32 %v4712_v12, %v4709_v16  ;;  %v4718_v59 = vrot.slane %v4716_v17, 5  ;;  %v4735_v0 = vshrl.u32 %v8826_v29, 16  ;;  %10361 = vmatpush3.bf16.msra.mxu0 %v11418_v39  ;;  %10364 = vmatprep.mubr.bf16.mxu0 %v12128_v49  ;;  %v4738_v48 = vshll.u32 %v8826_v29, 16  ;;  %v8832_v35 = vld [vmem:[%s11664_s17 + $0xf0] sm:$0xf] }
 0x15e   : > { %v4726_v10 = vrot.slane %v4724_v54, 5  ;;  %v12983_v7 = vrot.slane %v4730_v2, 5  ;;  %v4744_v20 = vshll.u32 %v8827_v4, 16  ;;  %10391 = vmatpush3.bf16.msra.mxu1 %v11417_v56  ;;  %10362 = vmatprep.subr.bf16.mxu0 %v11419_v61  ;;  %v1687_v49 = vadd.f32 %v1636_v62, %v12660_v43  ;;  %v13000_v4 = vpop.f32.mrf.mxu0  ;;  %v11421_v62 = vld [vmem:[%s11664_s17 + $0x110] ss:$8 sps:$4 sm:$0xff]   ;;  %v10018_v39 = vpop.f32.mrf.mxu1 }
 0x15f   : > { %v4714_v9 = vrot.slane %v4713_v45, 4  ;;  %v4737_v28 = vrot.slane %v4735_v0, 4  ;;  %v1690_v32 = vadd.f32 %v9987_v33, %v12668_v31  ;;  %10392 = vmatprep.subr.bf16.mxu1 %v11420_v1  ;;  %v4705_v29 = vsel %vm11755_vm2, %v4700_v11, %v12966_v5  ;;  %v11422_v33 = vld [vmem:[%s14392_s1 + $0x200] sm:$0xff]  }
 0x160   : > { %v4727_v25 = vor.u32 %v4726_v10, %v4723_v51  ;;  %v4740_v58 = vrot.slane %v4738_v48, 5  ;;  %v12998_v17 = vrot.slane %v4744_v20, 5  ;;  %v4749_v31 = vshrl.u32 %v8828_v42, 16  ;;  %v2102_v0 = vpop.f32.mrf.mxu1 }
 0x161   : > { %v4719_v43 = vsel %vm11755_vm2, %v4714_v9, %v4718_v59  ;;  %v4752_v63 = vshll.u32 %v8828_v42, 16  ;;  %v4758_v16 = vshll.u32 %v8829_v60, 16  ;;  %10345 = vmatmul.mubr.bf16.gmra.mxu1 %v11421_v62  ;;  %10363 = vmatpush3.bf16.msra.mxu0 %v11419_v61  ;;  %v8845_v27 = vcombine.low %v4677_v50, %v4691_v23  ;;  %v9990_v23 = vpop.f32.mrf.mxu0  ;;  %v8833_v59 = vld [vmem:[%s11664_s17 + $0xf4] sm:$0x1]  ;;  %v8835_v61 = vld [vmem:[%s11664_s17 + $0xfc] sm:$0x1] }
 0x162   : > { %v4728_v12 = vrot.slane %v4727_v25, 4  ;;  %v4741_v5 = vor.u32 %v4740_v58, %v4737_v28  ;;  %v4763_v56 = vshrl.u32 %v8830_v46, 16  ;;  %10393 = vmatpush3.bf16.msra.mxu1 %v11420_v1  ;;  %10396 = vmatprep.mubr.bf16.mxu1 %v12953_v21  ;;  %v4751_v11 = vrot.slane %v4749_v31, 4  ;;  %v8834_v21 = vld [vmem:[%s11664_s17 + $0xf8] sm:$0xf] }
 0x163   : > { %v4754_v51 = vrot.slane %v4752_v63, 5  ;;  %v4760_v54 = vrot.slane %v4758_v16, 5  ;;  %v4766_v2 = vshll.u32 %v8830_v46, 16  ;;  %10394 = vmatprep.subr.bf16.mxu1 %v11422_v33  ;;  %v8846_v50 = vcombine.low %v4705_v29, %v4719_v43  ;;  %v1652_v28 = vpop.f32.mrf.mxu0  ;;  %v10019_v29 = vpop.f32.mrf.mxu1  ;;  %v8836_v63 = vld [vmem:[%s11664_s17 + $0x100] sm:$0xf] }
 0x164   : > { %v13012_v42 = vadd.f32 %v10018_v39, %v12956_v14  ;;  %v4742_v60 = vrot.slane %v4741_v5, 4  ;;  %v4765_v45 = vrot.slane %v4763_v56, 4  ;;  %10365 = vmatmul.mubr.bf16.vlgmr.msra.gmra.mxu0 %v12146_v19  ;;  %v13018_v46 = vadd.f32 %v9990_v23, %v12731_v44  ;;  %v8837_v16 = vld [vmem:[%s11664_s17 + $0x104] sm:$0x1]  ;;  %v8838_v5 = vld [vmem:[%s11664_s17 + $0x108] sm:$0xf] }
 0x165   : > { %v4755_v10 = vor.u32 %v4754_v51, %v4751_v11  ;;  %v4768_v48 = vrot.slane %v4766_v2, 5  ;;  %v4772_v20 = vshll.u32 %v8831_v47, 16  ;;  %10368 = vmatprep.mubr.bf16.mxu0 %v12166_v55  ;;  %v4733_v14 = vsel %vm11755_vm2, %v4728_v12, %v12983_v7  ;;  %v9991_v31 = vpop.f32.mrf.mxu0 }
 0x166   : > { %v13025_v9 = vadd.f32 %v2102_v0, %v1687_v49  ;;  %v4777_v19 = vshrl.u32 %v8832_v35, 16  ;;  %v4780_v1 = vshll.u32 %v8832_v35, 16  ;;  %10395 = vmatpush3.bf16.msra.mxu1 %v11422_v33  ;;  %v4747_v44 = vsel %vm11755_vm2, %v4742_v60, %v12998_v17  ;;  %v8840_v60 = vld [vmem:[%s11664_s17 + $0x110] sm:$0xf]  ;;  %v8841_v0 = vld [vmem:[%s11664_s17 + $0x114] sm:$0x1] }
 0x167   : > { %v4756_v25 = vrot.slane %v4755_v10, 4  ;;  %v4769_v55 = vor.u32 %v4768_v48, %v4765_v45  ;;  %v4774_v58 = vrot.slane %v4772_v20, 5  ;;  %v13030_v47 = vadd.f32 %v10019_v29, %v1690_v32  ;;  %v8842_v29 = vld [vmem:[%s11664_s17 + $0x118] sm:$0xf] }
 0x168   : > { %v13033_v7 = vadd.f32 %v1652_v28, %v12756_v30  ;;  %v4779_v49 = vrot.slane %v4777_v19, 4  ;;  %v4782_v43 = vrot.slane %v4780_v1, 5  ;;  %v4786_v62 = vshll.u32 %v8833_v59, 16  ;;  %v8839_v30 = vld [vmem:[%s11664_s17 + $0x10c] sm:$0x1] }
 0x169   : > { %v4761_v17 = vsel %vm11755_vm2, %v4756_v25, %v4760_v54  ;;  %v4770_v35 = vrot.slane %v4769_v55, 4  ;;  %v4791_v12 = vshrl.u32 %v8834_v21, 16  ;;  %10397 = vmatmul.mubr.bf16.vlgmr.msra.gmra.mxu1 %v8845_v27  ;;  %v4794_v56 = vshll.u32 %v8834_v21, 16  ;;  %v13047_v27 = vpop.f32.mrf.mxu1 }
 0x16a   : > { %v4783_v32 = vor.u32 %v4782_v43, %v4779_v49  ;;  %v4800_v39 = vshll.u32 %v8835_v61, 16  ;;  %10400 = vmatprep.mubr.bf16.mxu1 %v8846_v50  ;;  %v4788_v51 = vrot.slane %v4786_v62, 5  ;;  %v1694_v33 = vadd.f32 %v9991_v31, %v12761_v37  ;;  %v13052_v61 = vpop.f32.mrf.mxu0 }
 0x16b   : > { %v4775_v11 = vsel %vm11755_vm2, %v4770_v35, %v4774_v58  ;;  %v4793_v2 = vrot.slane %v4791_v12, 4  ;;  %v8847_v54 = vcombine.low %v4733_v14, %v4747_v44  ;;  %v4796_v59 = vrot.slane %v4794_v56, 5  ;;  %v10022_v43 = vpop.f32.mrf.mxu1 }
 0x16c   : > { %v8848_v23 = vcombine.low %v4761_v17, %v4775_v11  ;;  %v4784_v45 = vrot.slane %v4783_v32, 4  ;;  %10369 = vmatmul.mubr.bf16.gmra.mxu0 %v12188_v34  ;;  %v4802_v21 = vrot.slane %v4800_v39, 5  ;;  %v4805_v50 = vshrl.u32 %v8836_v63, 16  ;;  %v9994_v12 = vpop.f32.mrf.mxu0 }
 0x16d   : > { %v4808_v10 = vshll.u32 %v8836_v63, 16  ;;  %v4814_v48 = vshll.u32 %v8837_v16, 16  ;;  %10372 = vmatprep.mubr.bf16.mxu0 %v12206_v57  ;;  %v4797_v20 = vor.u32 %v4796_v59, %v4793_v2  ;;  %v4819_v14 = vshrl.u32 %v8838_v5, 16  ;;  %v8843_v63 = vld [vmem:[%s11664_s17 + $0x11c] sm:$0x1]  ;;  %v2118_v56 = vpop.f32.mrf.mxu1 }
 0x16e   : > { %v4789_v37 = vsel %vm11755_vm2, %v4784_v45, %v4788_v51  ;;  %v4822_v28 = vshll.u32 %v8838_v5, 16  ;;  %v4807_v19 = vrot.slane %v4805_v50, 4  ;;  %v4828_v44 = vshll.u32 %v8839_v30, 16 }
 0x16f   : > { %v4810_v34 = vrot.slane %v4808_v10, 5  ;;  %v4816_v1 = vrot.slane %v4814_v48, 5  ;;  %v4798_v25 = vrot.slane %v4797_v20, 4  ;;  %v4821_v55 = vrot.slane %v4819_v14, 4  ;;  %v10023_v59 = vpop.f32.mrf.mxu1 }
 0x170   : > { %v4824_v58 = vrot.slane %v4822_v28, 5  ;;  %v4833_v49 = vshrl.u32 %v8840_v60, 16  ;;  %v4830_v31 = vrot.slane %v4828_v44, 5  ;;  %v4836_v16 = vshll.u32 %v8840_v60, 16 }
 0x171   : > { %v4811_v57 = vor.u32 %v4810_v34, %v4807_v19  ;;  %v4842_v17 = vshll.u32 %v8841_v0, 16  ;;  %10401 = vmatmul.mubr.bf16.gmra.mxu1 %v8847_v54  ;;  %v13057_v35 = vadd.f32 %v10022_v43, %v13018_v46  ;;  %v4803_v62 = vsel %vm11755_vm2, %v4798_v25, %v4802_v21  ;;  %v1668_v54 = vpop.f32.mrf.mxu0 }
 0x172   : > { %v4825_v5 = vor.u32 %v4824_v58, %v4821_v55  ;;  %v4835_v32 = vrot.slane %v4833_v49, 4  ;;  %10404 = vmatprep.mubr.bf16.mxu1 %v8848_v23  ;;  %v8849_v39 = vcombine.low %v4789_v37, %v4803_v62  ;;  %v1697_v30 = vadd.f32 %v9994_v12, %v12827_v15 }
 0x173   : > { %v4812_v11 = vrot.slane %v4811_v57, 4  ;;  %v4838_v51 = vrot.slane %v4836_v16, 5  ;;  %v13063_v2 = vadd.f32 %v2118_v56, %v13033_v7  ;;  %v4844_v46 = vrot.slane %v4842_v17, 5  ;;  %v9995_v37 = vpop.f32.mrf.mxu0 }
 0x174   : > { %v4826_v60 = vrot.slane %v4825_v5, 4  ;;  %v4847_v45 = vshrl.u32 %v8842_v29, 16  ;;  %10373 = vmatmul.mubr.bf16.gmra.mxu0 %v12234_v40  ;;  %v1695_v23 = vadd.f32 %v1668_v54, %v12845_v52  ;;  %v4850_v50 = vshll.u32 %v8842_v29, 16  ;;  %v14414_v29 = vld [vmem:[#allocation9_spill] sm:$0xff] }
 0x175   : > { %v4817_v0 = vsel %vm11755_vm2, %v4812_v11, %v4816_v1  ;;  %v4839_v21 = vor.u32 %v4838_v51, %v4835_v32  ;;  %v2160_v15 = vadd.f32 %v10023_v59, %v1694_v33  ;;  %10376 = vmatprep.mubr.bf16.mxu0 %v12251_v3  ;;  %v4856_v48 = vshll.u32 %v8843_v63, 16  ;;  %v13073_v34 = vpop.f32.mrf.mxu0  ;;  %v13075_v1 = vpop.f32.mrf.mxu1 }
 0x176   : > { %v4831_v7 = vsel %vm11755_vm2, %v4826_v60, %v4830_v31  ;;  %v4849_v10 = vrot.slane %v4847_v45, 4  ;;  %v4852_v40 = vrot.slane %v4850_v50, 5  ;;  %v1698_v28 = vadd.f32 %v9995_v37, %v12867_v22 }
 0x177   : > { %v8850_v20 = vcombine.low %v4817_v0, %v4831_v7  ;;  %v4840_v14 = vrot.slane %v4839_v21, 4  ;;  %v4858_v19 = vrot.slane %v4856_v48, 5  ;;  %v10046_v44 = vpop.f32.mrf.mxu0  ;;  %v10026_v55 = vpop.f32.mrf.mxu1 }
 0x178   : > { %v4853_v52 = vor.u32 %v4852_v40, %v4849_v10  ;;  %v2394_v22 = vadd.f32 %v10046_v44, %v12929_v18  ;;  %v2163_v43 = vadd.f32 %v10026_v55, %v1697_v30 }
 0x179   : > { %10405 = vmatmul.mubr.bf16.gmra.mxu1 %v8849_v39  ;;  %v4845_v3 = vsel %vm11755_vm2, %v4840_v14, %v4844_v46  ;;  %v2329_v49 = vpop.f32.mrf.mxu0  ;;  %v2134_v31 = vpop.f32.mrf.mxu1 }
 0x17a   : > { %10408 = vmatprep.mubr.bf16.mxu1 %v8850_v20  ;;  %v4854_v33 = vrot.slane %v4853_v52, 4  ;;  %v2392_v57 = vadd.f32 %v2329_v49, %v12947_v36  ;;  %v2161_v16 = vadd.f32 %v2134_v31, %v1695_v23 }
 0x17b   : > { %v10047_v63 = vpop.f32.mrf.mxu0  ;;  %v10027_v62 = vpop.f32.mrf.mxu1 }
 0x17c   : > { %10377 = vmatmul.mubr.bf16.gmra.mxu0 %v14414_v29  ;;  %v4859_v25 = vsel %vm11755_vm2, %v4854_v33, %v4858_v19  ;;  %v2395_v17 = vadd.f32 %v10047_v63, %v12964_v8  ;;  %v2164_v5 = vadd.f32 %v10027_v62, %v1698_v28 }
 0x17d   : > { %v8851_v58 = vcombine.low %v4845_v3, %v4859_v25  ;;  %v13085_v12 = vpop.f32.mrf.mxu0  ;;  %v13087_v6 = vpop.f32.mrf.mxu1 }
 0x17f   : > { %v10050_v32 = vpop.f32.mrf.mxu0  ;;  %v10078_v56 = vpop.f32.mrf.mxu1 }
 0x180   : > { %v2398_v18 = vadd.f32 %v10050_v32, %v13012_v42  ;;  %v2637_v30 = vadd.f32 %v10078_v56, %v2394_v22 }
 0x181   : > { %10409 = vmatmul.mubr.bf16.gmra.mxu1 %v8851_v58  ;;  %v2345_v39 = vpop.f32.mrf.mxu0  ;;  %v2572_v11 = vpop.f32.mrf.mxu1 }
 0x182   : > { %v2396_v36 = vadd.f32 %v2345_v39, %v13025_v9  ;;  %v2635_v60 = vadd.f32 %v2572_v11, %v2392_v57 }
 0x183   : > { %v10051_v51 = vpop.f32.mrf.mxu0  ;;  %v10079_v54 = vpop.f32.mrf.mxu1 }
 0x184   : > { %v2399_v8 = vadd.f32 %v10051_v51, %v13030_v47  ;;  %v2638_v45 = vadd.f32 %v10079_v54, %v2395_v17 }
 0x185   : > { %v13092_v46 = vpop.f32.mrf.mxu0  ;;  %v13094_v59 = vpop.f32.mrf.mxu1 }
 0x187   : > { %v10054_v0 = vpop.f32.mrf.mxu0  ;;  %v10082_v42 = vpop.f32.mrf.mxu1 }
 0x188   : > { %v2402_v23 = vadd.f32 %v10054_v0, %v13057_v35  ;;  %v2641_v50 = vadd.f32 %v10082_v42, %v2398_v18 }
 0x189   : > { %v2361_v21 = vpop.f32.mrf.mxu0  ;;  %v2588_v9 = vpop.f32.mrf.mxu1 }
 0x18a   : > { %v2400_v7 = vadd.f32 %v2361_v21, %v13063_v2  ;;  %v2639_v48 = vadd.f32 %v2588_v9, %v2396_v36  ;;  %v11123_v36 = vld [vmem:[#allocation3 + $0x78] sm:$0xff]  }
 0x18b   : > { %v10055_v10 = vpop.f32.mrf.mxu0  ;;  %v10083_v20 = vpop.f32.mrf.mxu1  ;;  %10412 = vmatprep.subr.bf16.mxu0 %v11123_v36  ;;  %v11124_v21 = vld [vmem:[#allocation3 + $0x38] sm:$0xff]  }
 0x18c   : > { %v2403_v37 = vadd.f32 %v10055_v10, %v2160_v15  ;;  %v2642_v14 = vadd.f32 %v10083_v20, %v2399_v8  ;;  %10413 = vmatpush3.bf16.msra.mxu0 %v11123_v36  ;;  %v11125_v8 = vld [vmem:[#allocation3 + $0x70] sm:$0xff]   ;;  %10436 = vmatprep.subr.bf16.mxu1 %v11124_v21 }
 0x18d   : > { %v13098_v47 = vpop.f32.mrf.mxu0  ;;  %v13100_v40 = vpop.f32.mrf.mxu1  ;;  %10414 = vmatprep.subr.bf16.mxu0 %v11125_v8  ;;  %10437 = vmatpush3.bf16.msra.mxu1 %v11124_v21 }
 0x18f   : > { %v10058_v28 = vpop.f32.mrf.mxu0  ;;  %v10086_v52 = vpop.f32.mrf.mxu1 }
 0x190   : > { %v2406_v19 = vadd.f32 %v10058_v28, %v2163_v43  ;;  %v2645_v35 = vadd.f32 %v10086_v52, %v2402_v23  ;;  %10415 = vmatpush3.bf16.msra.mxu0 %v11125_v8  ;;  %v11126_v28 = vld [vmem:[#allocation3 + $0x30] sm:$0xff]  }
 0x191   : > { %v2377_v3 = vpop.f32.mrf.mxu0  ;;  %v2604_v44 = vpop.f32.mrf.mxu1  ;;  %10438 = vmatprep.subr.bf16.mxu1 %v11126_v28 }
 0x192   : > { %v2404_v33 = vadd.f32 %v2377_v3, %v2161_v16  ;;  %v13102_v25 = vadd.f32 %v2604_v44, %v2400_v7  ;;  %v11127_v7 = vld [vmem:[#allocation3 + $0x68] sm:$0xff]   ;;  %10439 = vmatpush3.bf16.msra.mxu1 %v11126_v28  ;;  %v11131_v44 = vld [vmem:[#allocation3 + $0x58] sm:$0xff]  }
 0x193   : > { %v10059_v29 = vpop.f32.mrf.mxu0  ;;  %v10087_v22 = vpop.f32.mrf.mxu1  ;;  %10416 = vmatprep.subr.bf16.mxu0 %v11127_v7 }
 0x194   : > { %v2407_v2 = vadd.f32 %v10059_v29, %v2164_v5  ;;  %v13106_v15 = vadd.f32 %v10087_v22, %v2403_v37  ;;  %10417 = vmatpush3.bf16.msra.mxu0 %v11127_v7 }
 0x195   : > { %v13104_v55 = vpop.f32.mrf.mxu0  ;;  %v13108_v58 = vpop.f32.mrf.mxu1 }
 0x197   : > { %v10090_v49 = vpop.f32.mrf.mxu1  ;;  %v10110_v57 = vpop.f32.mrf.mxu0 }
 0x198   : > { %v13110_v31 = vadd.f32 %v10090_v49, %v2406_v19  ;;  %v13112_v43 = vadd.f32 %v10110_v57, %v2637_v30  ;;  %v11129_v19 = vld [vmem:[#allocation3 + $0x60] sm:$0xff]  }
 0x199   : > { %v2620_v63 = vpop.f32.mrf.mxu1  ;;  %v3038_v16 = vpop.f32.mrf.mxu0  ;;  %10418 = vmatprep.subr.bf16.mxu0 %v11129_v19 }
 0x19a   : > { %v13114_v17 = vadd.f32 %v2620_v63, %v2404_v33  ;;  %v13116_v62 = vadd.f32 %v3038_v16, %v2635_v60  ;;  %10419 = vmatpush3.bf16.msra.mxu0 %v11129_v19  ;;  %v11128_v33 = vld [vmem:[#allocation3 + $0x28] sm:$0xff]   ;;  %v11130_v16 = vld [vmem:[#allocation3 + $0x20] sm:$0xff]  }
 0x19b   : > { %v10091_v5 = vpop.f32.mrf.mxu1  ;;  %v10111_v32 = vpop.f32.mrf.mxu0  ;;  %10440 = vmatprep.subr.bf16.mxu1 %v11128_v33  ;;  %10420 = vmatprep.subr.bf16.mxu0 %v11131_v44 }
 0x19c   : > { %v13118_v18 = vadd.f32 %v10091_v5, %v2407_v2  ;;  %v13120_v56 = vadd.f32 %v10111_v32, %v2638_v45  ;;  %v11520_v2 = vmov 0.0   ;;  %10441 = vmatpush3.bf16.msra.mxu1 %v11128_v33  ;;  %v11133_v5 = vld [vmem:[#allocation3 + $0x50] sm:$0xff]   ;;  %v11137_v33 = vld [vmem:[#allocation3 + $0x40] sm:$0xff]  }
 0x19d   : > { %v13122_v39 = vpop.f32.mrf.mxu1  ;;  %v13124_v11 = vpop.f32.mrf.mxu0  ;;  %5065 = vst [vmem:[#allocation2 + $0x20] sm:$0xff] %v11520_v2  ;;  %5066 = vst [vmem:[#allocation2 + $0x28] sm:$0x3] %v11520_v2  ;;  %10442 = vmatprep.subr.bf16.mxu1 %v11130_v16 }
 0x19e   : > { %5061 = vst [vmem:[#allocation2] sm:$0xff] %v11520_v2  ;;  %5062 = vst [vmem:[#allocation2 + $0x8] sm:$0x3] %v11520_v2  ;;  %10421 = vmatpush3.bf16.msra.mxu0 %v11131_v44 }
 0x19f   : > { %v13126_v51 = vpop.f32.mrf.mxu1  ;;  %v10114_v60 = vpop.f32.mrf.mxu0  ;;  %5063 = vst [vmem:[#allocation2 + $0x10] sm:$0xff] %v11520_v2  ;;  %5064 = vst [vmem:[#allocation2 + $0x18] sm:$0x3] %v11520_v2  ;;  %10422 = vmatprep.subr.bf16.mxu0 %v11133_v5 }
 0x1a0   : > { %v13132_v0 = vadd.f32 %v10114_v60, %v2641_v50  ;;  %5067 = vst [vmem:[#allocation2 + $0x30] sm:$0xff] %v11520_v2  ;;  %5068 = vst [vmem:[#allocation2 + $0x38] sm:$0x3] %v11520_v2  ;;  %10443 = vmatpush3.bf16.msra.mxu1 %v11130_v16  ;;  %v11132_v60 = vld [vmem:[#allocation3 + $0x18] sm:$0xff]  }
 0x1a1   : > { %v13128_v30 = vpop.f32.mrf.mxu1  ;;  %v3054_v45 = vpop.f32.mrf.mxu0  ;;  %5069 = vst [vmem:[#allocation2 + $0x40] sm:$0xff] %v11520_v2  ;;  %5070 = vst [vmem:[#allocation2 + $0x48] sm:$0x3] %v11520_v2  ;;  %10444 = vmatprep.subr.bf16.mxu1 %v11132_v60  ;;  %v13187_v16 = vld [vmem:[#allocation3 + $0xb8] sm:$0xff]  }
 0x1a2   : > { %v13136_v42 = vadd.f32 %v3054_v45, %v2639_v48  ;;  %5071 = vst [vmem:[#allocation2 + $0x50] sm:$0xff] %v11520_v2  ;;  %5072 = vst [vmem:[#allocation2 + $0x58] sm:$0x3] %v11520_v2  ;;  %10423 = vmatpush3.bf16.msra.mxu0 %v11133_v5  ;;  %v11135_v45 = vld [vmem:[#allocation3 + $0x48] sm:$0xff]  }
 0x1a3   : > { %v13130_v54 = vpop.f32.mrf.mxu1  ;;  %v10115_v9 = vpop.f32.mrf.mxu0  ;;  %5073 = vst [vmem:[#allocation2 + $0x60] sm:$0xff] %v11520_v2  ;;  %5074 = vst [vmem:[#allocation2 + $0x68] sm:$0x3] %v11520_v2  ;;  %10424 = vmatprep.subr.bf16.mxu0 %v11135_v45 }
 0x1a4   : > { %v13140_v37 = vadd.f32 %v10115_v9, %v2642_v14  ;;  %5075 = vst [vmem:[#allocation2 + $0x70] sm:$0xff] %v11520_v2  ;;  %5076 = vst [vmem:[#allocation2 + $0x78] sm:$0x3] %v11520_v2  ;;  %10445 = vmatpush3.bf16.msra.mxu1 %v11132_v60 }
 0x1a5   : > { %v13134_v23 = vpop.f32.mrf.mxu1  ;;  %v13142_v20 = vpop.f32.mrf.mxu0  ;;  %5077 = vst [vmem:[#allocation2 + $0x80] sm:$0xff] %v11520_v2  ;;  %5078 = vst [vmem:[#allocation2 + $0x88] sm:$0x3] %v11520_v2 }
 0x1a6   : > { %5079 = vst [vmem:[#allocation2 + $0x90] sm:$0xff] %v11520_v2  ;;  %5080 = vst [vmem:[#allocation2 + $0x98] sm:$0x3] %v11520_v2  ;;  %10425 = vmatpush3.bf16.msra.mxu0 %v11135_v45 }
 0x1a7   : > { %v13138_v10 = vpop.f32.mrf.mxu1  ;;  %v10118_v48 = vpop.f32.mrf.mxu0  ;;  %10426 = vmatprep.subr.bf16.mxu0 %v11137_v33  ;;  %14420 = vst [vmem:[#allocation14_spill] sm:$0xff] %v13187_v16 }
 0x1a8   : > { %v13150_v14 = vadd.f32 %v10118_v48, %v2645_v35  ;;  %v11134_v48 = vld [vmem:[#allocation3 + $0x10] sm:$0xff]  }
 0x1a9   : > { %v13144_v50 = vpop.f32.mrf.mxu1  ;;  %v3070_v29 = vpop.f32.mrf.mxu0  ;;  %10446 = vmatprep.subr.bf16.mxu1 %v11134_v48 }
 0x1aa   : > { %v13155_v22 = vadd.f32 %v3070_v29, %v13102_v25  ;;  %10447 = vmatpush3.bf16.msra.mxu1 %v11134_v48  ;;  %10427 = vmatpush3.bf16.msra.mxu0 %v11137_v33  ;;  %v11138_v48 = vld [vmem:[#allocation3] sm:$0xff]  }
 0x1ab   : > { %v13146_v52 = vpop.f32.mrf.mxu1  ;;  %v10119_v49 = vpop.f32.mrf.mxu0  ;;  %10460 = vmatprep.subr.bf16.mxu0 %v13187_v16 }
 0x1ac   : > { %v13160_v63 = vadd.f32 %v10119_v49, %v13106_v15  ;;  %v11136_v49 = vld [vmem:[#allocation3 + $0x8] sm:$0xff]  }
 0x1ad   : > { %v13148_v3 = vpop.f32.mrf.mxu1  ;;  %v13162_v32 = vpop.f32.mrf.mxu0  ;;  %10448 = vmatprep.subr.bf16.mxu1 %v11136_v49 }
 0x1ae   : > { %10449 = vmatpush3.bf16.msra.mxu1 %v11136_v49 }
 0x1af   : > { %v13152_v35 = vpop.f32.mrf.mxu1  ;;  %v10122_v8 = vpop.f32.mrf.mxu0  ;;  %10450 = vmatprep.subr.bf16.mxu1 %v11138_v48 }
 0x1b0   : > { %v13169_v21 = vadd.f32 %v10122_v8, %v13110_v31 }
 0x1b1   : > { %v13157_v57 = vpop.f32.mrf.mxu1  ;;  %v3086_v7 = vpop.f32.mrf.mxu0 }
 0x1b2   : > { %14415 = vst [vmem:[#allocation9_spill] sm:$0xff] %v13169_v21  ;;  %v13174_v9 = vadd.f32 %v3086_v7, %v13114_v17  ;;  %10451 = vmatpush3.bf16.msra.mxu1 %v11138_v48 }
 0x1b3   : > { %v13164_v36 = vpop.f32.mrf.mxu1  ;;  %v10123_v19 = vpop.f32.mrf.mxu0 }
 0x1b4   : > { %14416 = vst [vmem:[#allocation10_spill] sm:$0xff] %v13174_v9  ;;  %v13179_v44 = vadd.f32 %v10123_v19, %v13118_v18 }
 0x1b5   : > { %v13166_v25 = vpop.f32.mrf.mxu1  ;;  %v13183_v29 = vpop.f32.mrf.mxu0 }
 0x1b6   : > { %14417 = vst [vmem:[#allocation11_spill] sm:$0xff] %v13179_v44  ;;  %14418 = vst [vmem:[#allocation12_spill] sm:$0xff] %v13183_v29 }
 0x1b7   : > { %v13171_v15 = vpop.f32.mrf.mxu1  ;;  %v10174_v2 = vpop.f32.mrf.mxu0 }
 0x1b8   : > { %v3296_v5 = vadd.f32 %v10174_v2, %v13126_v51 }
 0x1b9   : > { %v13176_v28 = vpop.f32.mrf.mxu1  ;;  %v3287_v60 = vpop.f32.mrf.mxu0 }
 0x1ba   : > { %v3288_v45 = vadd.f32 %v3287_v60, %v13128_v30 }
 0x1bb   : > { %v13181_v31 = vpop.f32.mrf.mxu1  ;;  %v10175_v19 = vpop.f32.mrf.mxu0 }
 0x1bc   : > { %v3299_v44 = vadd.f32 %v10175_v19, %v13130_v54 }
 0x1bd   : > { %v13185_v17 = vpop.f32.mrf.mxu1  ;;  %v13197_v9 = vpop.f32.mrf.mxu0 }
 0x1be   : > { %14419 = vst [vmem:[#allocation13_spill] sm:$0xff] %v13185_v17 }
 0x1bf   : > { %v10206_v8 = vpop.f32.mrf.mxu1 }
 0x1c0   : > { %v13191_v18 = vadd.f32 %v10206_v8, %v3296_v5  ;;  %v10178_v5 = vpop.f32.mrf.mxu0  ;;  %v13203_v8 = vld [vmem:[#allocation3 + $0xf8] sm:$0xff]  }
 0x1c1   : > { %v3672_v7 = vpop.f32.mrf.mxu1  ;;  %14421 = vst [vmem:[#allocation15_spill] sm:$0xff] %v13203_v8  ;;  %v3312_v30 = vadd.f32 %v10178_v5, %v13138_v10  ;;  %10484 = vmatprep.subr.bf16.mxu1 %v13203_v8 }
 0x1c2   : > { %v13194_v33 = vadd.f32 %v3672_v7, %v3288_v45  ;;  %v3303_v49 = vpop.f32.mrf.mxu0 }
 0x1c3   : > { %v10207_v29 = vpop.f32.mrf.mxu1  ;;  %v3304_v54 = vadd.f32 %v3303_v49, %v13144_v50 }
 0x1c4   : > { %v13199_v51 = vadd.f32 %v10207_v29, %v3299_v44  ;;  %v10179_v7 = vpop.f32.mrf.mxu0 }
 0x1c5   : > { %v13201_v2 = vpop.f32.mrf.mxu1  ;;  %v3315_v44 = vadd.f32 %v10179_v7, %v13146_v52 }
 0x1c6   : > { %v13213_v48 = vpop.f32.mrf.mxu0 }
 0x1c7   : > { %v10210_v60 = vpop.f32.mrf.mxu1 }
 0x1c8   : > { %v13208_v45 = vadd.f32 %v10210_v60, %v3312_v30  ;;  %v10182_v5 = vpop.f32.mrf.mxu0 }
 0x1c9   : > { %v3688_v19 = vpop.f32.mrf.mxu1  ;;  %v3328_v8 = vadd.f32 %v10182_v5, %v13152_v35 }
 0x1ca   : > { %v13211_v29 = vadd.f32 %v3688_v19, %v3304_v54  ;;  %v3319_v17 = vpop.f32.mrf.mxu0 }
 0x1cb   : > { %v10211_v16 = vpop.f32.mrf.mxu1  ;;  %v3320_v50 = vadd.f32 %v3319_v17, %v13157_v57 }
 0x1cc   : > { %14422 = vst [vmem:[#allocation16_spill] sm:$0xff] %v13211_v29  ;;  %v13215_v21 = vadd.f32 %v10211_v16, %v3315_v44  ;;  %v10183_v49 = vpop.f32.mrf.mxu0 }
 0x1cd   : > { %v13217_v10 = vpop.f32.mrf.mxu1  ;;  %v3331_v52 = vadd.f32 %v10183_v49, %v13164_v36 }
 0x1ce   : > { %14423 = vst [vmem:[#allocation17_spill] sm:$0xff] %v13215_v21  ;;  %v13224_v7 = vpop.f32.mrf.mxu0 }
 0x1cf   : > { %v10214_v30 = vpop.f32.mrf.mxu1 }
 0x1d0   : > { %v13221_v60 = vadd.f32 %v10214_v30, %v3328_v8 }
 0x1d1   : > { %v3704_v54 = vpop.f32.mrf.mxu1 }
 0x1d2   : > { %14424 = vst [vmem:[#allocation18_spill] sm:$0xff] %v13221_v60  ;;  %v13226_v19 = vadd.f32 %v3704_v54, %v3320_v50 }
 0x1d3   : > { %v10215_v16 = vpop.f32.mrf.mxu1 }
 0x1d4   : > { %14425 = vst [vmem:[#allocation19_spill] sm:$0xff] %v13226_v19  ;;  %v10186_v44 = vpop.f32.mrf.mxu0  ;;  %v13228_v21 = vadd.f32 %v10215_v16, %v3331_v52 }
 0x1d5   : > { %v3344_v35 = vadd.f32 %v10186_v44, %v13171_v15  ;;  %v13231_v5 = vpop.f32.mrf.mxu1 }
 0x1d6   : > { %14426 = vst [vmem:[#allocation20_spill] sm:$0xff] %v13228_v21  ;;  %14427 = vst [vmem:[#allocation21_spill] sm:$0xff] %v13231_v5  ;;  %v3335_v57 = vpop.f32.mrf.mxu0 }
 0x1d7   : > { %v3336_v17 = vadd.f32 %v3335_v57, %v13176_v28 }
 0x1d8   : > { %v10187_v8 = vpop.f32.mrf.mxu0 }
 0x1d9   : > { %v3347_v36 = vadd.f32 %v10187_v8, %v13181_v31 }
 0x1da   : > { %v13237_v60 = vpop.f32.mrf.mxu0 }
 0x1db   : > { %14429 = vst [vmem:[#allocation23_spill] sm:$0xff] %v13237_v60 }
 0x1dc   : > { %v13241_v52 = vpop.f32.mrf.mxu0 }
 0x1de   : > { %v13245_v44 = vpop.f32.mrf.mxu0 }
 0x1df   : > { %v10218_v30 = vpop.f32.mrf.mxu1 }
 0x1e0   : > { %v13235_v49 = vadd.f32 %v10218_v30, %v3344_v35  ;;  %v13249_v28 = vpop.f32.mrf.mxu0 }
 0x1e1   : > { %v3720_v50 = vpop.f32.mrf.mxu1 }
 0x1e2   : > { %14428 = vst [vmem:[#allocation22_spill] sm:$0xff] %v13235_v49  ;;  %v13239_v54 = vadd.f32 %v3720_v50, %v3336_v17  ;;  %v13253_v31 = vpop.f32.mrf.mxu0 }
 0x1e3   : > { %v10219_v16 = vpop.f32.mrf.mxu1 }
 0x1e4   : > { %14430 = vst [vmem:[#allocation24_spill] sm:$0xff] %v13239_v54  ;;  %v13243_v15 = vadd.f32 %v10219_v16, %v3347_v36 }
 0x1e5   : > { %v13247_v21 = vpop.f32.mrf.mxu1  ;;  %v13257_v8 = vpop.f32.mrf.mxu0 }
 0x1e6   : > { %14431 = vst [vmem:[#allocation25_spill] sm:$0xff] %v13243_v15  ;;  %14432 = vst [vmem:[#allocation26_spill] sm:$0xff] %v13247_v21 }
 0x1e7   : > { %v13251_v57 = vpop.f32.mrf.mxu1  ;;  %v13261_v30 = vpop.f32.mrf.mxu0 }
 0x1e8   : > { %14433 = vst [vmem:[#allocation27_spill] sm:$0xff] %v13261_v30 }
 0x1e9   : > { %v13255_v35 = vpop.f32.mrf.mxu1  ;;  %v13265_v50 = vpop.f32.mrf.mxu0 }
 0x1ea   : > { %14435 = vst [vmem:[#allocation29_spill] sm:$0xff] %v13265_v50 }
 0x1eb   : > { %v13259_v17 = vpop.f32.mrf.mxu1  ;;  %v13269_v15 = vpop.f32.mrf.mxu0 }
 0x1ec   : > { %14437 = vst [vmem:[#allocation31_spill] sm:$0xff] %v13269_v15 }
 0x1ed   : > { %v13263_v36 = vpop.f32.mrf.mxu1 }
 0x1ee   : > { %14434 = vst [vmem:[#allocation28_spill] sm:$0xff] %v13263_v36 }
 0x1ef   : > { %v13267_v16 = vpop.f32.mrf.mxu1 }
 0x1f0   : > { %14436 = vst [vmem:[#allocation30_spill] sm:$0xff] %v13267_v16 }
 0x1f1   : > { %v13271_v54 = vpop.f32.mrf.mxu1 }
 0x1f2   : > { %14438 = vst [vmem:[#allocation32_spill] sm:$0xff] %v13271_v54 }
 0x1f3   : > { %v13273_v49 = vpop.f32.mrf.mxu0  ;;  %v13275_v21 = vpop.f32.mrf.mxu1 }
 0x1f4   : > { %14439 = vst [vmem:[#allocation33_spill] sm:$0xff] %v13273_v49  ;;  %14440 = vst [vmem:[#allocation34_spill] sm:$0xff] %v13275_v21 }
 0x1f5   : > { %v13277_v19 = vpop.f32.mrf.mxu0  ;;  %v13279_v5 = vpop.f32.mrf.mxu1 }
 0x1f6   : > { %14441 = vst [vmem:[#allocation35_spill] sm:$0xff] %v13277_v19  ;;  %14442 = vst [vmem:[#allocation36_spill] sm:$0xff] %v13279_v5 }
 0x1f7   : > { %v13281_v29 = vpop.f32.mrf.mxu0 }
 0x1f8   : > { %14443 = vst [vmem:[#allocation37_spill] sm:$0xff] %v13281_v29  ;;  %v13283_v30 = vpop.f32.mrf.mxu1 }
 0x1f9   : > { %14444 = vst [vmem:[#allocation38_spill] sm:$0xff] %v13283_v30  ;;  %v13285_v36 = vpop.f32.mrf.mxu0 }
 0x1fa   : > { %14445 = vst [vmem:[#allocation39_spill] sm:$0xff] %v13285_v36  ;;  %v13287_v50 = vpop.f32.mrf.mxu1 }
 0x1fb   : > { %14446 = vst [vmem:[#allocation40_spill] sm:$0xff] %v13287_v50  ;;  %v13289_v16 = vpop.f32.mrf.mxu0 }
 0x1fc   : > { %14447 = vst [vmem:[#allocation41_spill] sm:$0xff] %v13289_v16  ;;  %v13291_v15 = vpop.f32.mrf.mxu1 }
 0x1fd   : > { %14448 = vst [vmem:[#allocation42_spill] sm:$0xff] %v13291_v15  ;;  %v13293_v54 = vpop.f32.mrf.mxu0 }
 0x1fe   : > { %14449 = vst [vmem:[#allocation43_spill] sm:$0xff] %v13293_v54  ;;  %v13295_v49 = vpop.f32.mrf.mxu1  ;;  %v1684_v54 = vadd.f32 %v12922_v53, %v12582_v41  ;;  %v1692_v53 = vadd.f32 %v13052_v61, %v12778_v38  ;;  %v13354_v38 = vld [vmem:[%s14393_s2] ss:$0 sm:$0xff] }
 0x1ff   : > { %14450 = vst [vmem:[#allocation44_spill] sm:$0xff] %v13295_v49  ;;  %v13297_v21 = vpop.f32.mrf.mxu0 }
 0x200   : > { %14451 = vst [vmem:[#allocation45_spill] sm:$0xff] %v13297_v21  ;;  %v13299_v19 = vpop.f32.mrf.mxu1  ;;  %v2150_v49 = vadd.f32 %v12988_v13, %v1684_v54  ;;  %v1696_v13 = vadd.f32 %v13073_v34, %v12877_v26 }
 0x201   : > { %14452 = vst [vmem:[#allocation46_spill] sm:$0xff] %v13299_v19  ;;  %v13301_v5 = vpop.f32.mrf.mxu0 }
 0x202   : > { %14453 = vst [vmem:[#allocation47_spill] sm:$0xff] %v13301_v5  ;;  %v13303_v29 = vpop.f32.mrf.mxu1  ;;  %v2162_v26 = vadd.f32 %v13087_v6, %v1696_v13  ;;  %v13375_v6 = vadd.f32 %v13354_v38, %v13116_v62  ;;  %v3850_v62 = vadd.f32 %v13241_v52, %v13191_v18  ;;  %v3848_v18 = vadd.f32 %v13245_v44, %v13194_v33 }
 0x203   : > { %14454 = vst [vmem:[#allocation48_spill] sm:$0xff] %v13303_v29  ;;  %v13436_v33 = vadd.f32 %v13354_v38, %v13160_v63 }
 0x204   : > { %v13305_v30 = vpop.f32.mrf.mxu0  ;;  %v13307_v36 = vpop.f32.mrf.mxu1 }
 0x205   : > { %14455 = vst [vmem:[#allocation49_spill] sm:$0xff] %v13307_v36  ;;  %v1688_v36 = vadd.f32 %v13000_v4, %v12687_v24  ;;  %14465 = vst [vmem:[#allocation59_spill] sm:$0xff] %v13436_v33  ;;  %v14478_v33 = vld [vmem:[#allocation18_spill] sm:$0xff] }
 0x206   : > { %v13309_v50 = vpop.f32.mrf.mxu0  ;;  %v13311_v16 = vpop.f32.mrf.mxu1 }
 0x207   : > { %14456 = vst [vmem:[#allocation50_spill] sm:$0xff] %v13311_v16 }
 0x208   : > { %v13313_v15 = vpop.f32.mrf.mxu0 }
 0x209   : > { %14457 = vst [vmem:[#allocation51_spill] sm:$0xff] %v13313_v15  ;;  %v13317_v21 = vpop.f32.mrf.mxu1  ;;  %v2393_v15 = vadd.f32 %v13085_v12, %v2150_v49 }
 0x20a   : > { %v13319_v19 = vpop.f32.mrf.mxu0 }
 0x20b   : > { %14458 = vst [vmem:[#allocation52_spill] sm:$0xff] %v13319_v19  ;;  %v13321_v5 = vpop.f32.mrf.mxu1  ;;  %v2636_v4 = vadd.f32 %v13094_v59, %v2393_v15  ;;  %v13369_v15 = vadd.f32 %v13354_v38, %v13112_v43 }
 0x20c   : > { %v13323_v29 = vpop.f32.mrf.mxu0 }
 0x20d   : > { %14459 = vst [vmem:[#allocation53_spill] sm:$0xff] %v13323_v29  ;;  %v13328_v60 = vpop.f32.mrf.mxu1  ;;  %v2154_v29 = vadd.f32 %v13047_v27, %v1688_v36  ;;  %v3102_v61 = vadd.f32 %v13124_v11, %v2636_v4  ;;  %v13379_v11 = vadd.f32 %v13354_v38, %v13120_v56 }
 0x20e   : > { %v13330_v16 = vpop.f32.mrf.mxu0 }
 0x20f   : > { %v13333_v41 = vpop.f32.mrf.mxu1  ;;  %v2397_v12 = vadd.f32 %v13092_v46, %v2154_v29 }
 0x210   : > { %14460 = vst [vmem:[#allocation54_spill] sm:$0xff] %v13333_v41  ;;  %v13337_v19 = vpop.f32.mrf.mxu0  ;;  %v2158_v41 = vadd.f32 %v13075_v1, %v1692_v53  ;;  %v2405_v1 = vadd.f32 %v13104_v55, %v2162_v26  ;;  %v3291_v53 = vadd.f32 %v13197_v9, %v13134_v23  ;;  %v13426_v26 = vadd.f32 %v13354_v38, %v13150_v14  ;;  %v14474_v14 = vld [vmem:[#allocation51_spill] sm:$0xff]  ;;  %v14475_v23 = vld [vmem:[#allocation21_spill] sm:$0xff] }
 0x211   : > { %v13342_v54 = vpop.f32.mrf.mxu1  ;;  %v2640_v29 = vadd.f32 %v13100_v40, %v2397_v12  ;;  %v13384_v40 = vadd.f32 %v13354_v38, %v3102_v61  ;;  %v13430_v61 = vadd.f32 %v13354_v38, %v13155_v22  ;;  %v14470_v22 = vld [vmem:[#allocation27_spill] sm:$0xff] }
 0x212   : > { %v13344_v24 = vpop.f32.mrf.mxu0  ;;  %v2401_v59 = vadd.f32 %v13098_v47, %v2158_v41  ;;  %v13397_v56 = vadd.f32 %v13122_v39, %v2405_v1  ;;  %v13414_v39 = vadd.f32 %v13354_v38, %v13140_v37  ;;  %14463 = vst [vmem:[#allocation57_spill] sm:$0xff] %v13426_v26  ;;  %v3736_v44 = vadd.f32 %v13201_v2, %v3291_v53  ;;  %v14488_v26 = vld [vmem:[#allocation39_spill] sm:$0xff] }
 0x213   : > { %v13348_v49 = vpop.f32.mrf.mxu1  ;;  %v3106_v55 = vadd.f32 %v13142_v20, %v2640_v29  ;;  %v13402_v20 = vadd.f32 %v13354_v38, %v13132_v0  ;;  %14464 = vst [vmem:[#allocation58_spill] sm:$0xff] %v13430_v61  ;;  %v3851_v29 = vadd.f32 %v13249_v28, %v13199_v51  ;;  %v3307_v0 = vadd.f32 %v13213_v48, %v13148_v3 }
 0x214   : > { %v13356_v27 = vpop.f32.mrf.mxu0  ;;  %v2644_v43 = vadd.f32 %v13108_v58, %v2401_v59  ;;  %14461 = vst [vmem:[#allocation55_spill] sm:$0xff] %v13397_v56  ;;  %v13406_v58 = vadd.f32 %v13354_v38, %v13136_v42  ;;  %v3963_v59 = vadd.f32 %v13251_v57, %v3850_v62  ;;  %v3961_v57 = vadd.f32 %v13255_v35, %v3848_v18 }
 0x215   : > { %v13360_v34 = vpop.f32.mrf.mxu1  ;;  %v13422_v42 = vadd.f32 %v13354_v38, %v3106_v55  ;;  %v3849_v53 = vadd.f32 %v13253_v31, %v3736_v44  ;;  %v3854_v3 = vadd.f32 %v13257_v8, %v13208_v45  ;;  %v14469_v8 = vld [vmem:[#allocation16_spill] sm:$0xff] }
 0x216   : > { %v13363_v46 = vpop.f32.mrf.mxu0  ;;  %v3110_v55 = vadd.f32 %v13162_v32, %v2644_v43  ;;  %v4364_v51 = vadd.f32 %v13305_v30, %v3963_v59  ;;  %v3323_v32 = vadd.f32 %v13224_v7, %v13166_v25  ;;  %v3964_v30 = vadd.f32 %v13259_v17, %v3851_v29  ;;  %v14467_v7 = vld [vmem:[#allocation13_spill] sm:$0xff]  ;;  %v14468_v59 = vld [vmem:[#allocation23_spill] sm:$0xff]  ;;  %v14471_v31 = vld [vmem:[#allocation28_spill] sm:$0xff] }
 0x217   : > { %v13371_v36 = vpop.f32.mrf.mxu1  ;;  %14462 = vst [vmem:[#allocation56_spill] sm:$0xff] %v13422_v42  ;;  %v4362_v43 = vadd.f32 %v13309_v50, %v3961_v57  ;;  %v3740_v25 = vadd.f32 %v13217_v10, %v3307_v0  ;;  %v3339_v45 = vadd.f32 %v14468_v59, %v14467_v7  ;;  %v3852_v62 = vadd.f32 %v14470_v22, %v14469_v8  ;;  %v14472_v17 = vld [vmem:[#allocation17_spill] sm:$0xff]  ;;  %v14476_v0 = vld [vmem:[#allocation30_spill] sm:$0xff]  ;;  %v14477_v7 = vld [vmem:[#allocation31_spill] sm:$0xff] }
 0x218   : > { %v13381_v47 = vpop.f32.mrf.mxu0  ;;  %v13472_v44 = vadd.f32 %v13354_v38, %v3110_v55  ;;  %v3962_v2 = vadd.f32 %v14471_v31, %v3849_v53  ;;  %v14473_v29 = vld [vmem:[#allocation29_spill] sm:$0xff]  ;;  %v4477_v57 = vadd.f32 %v13317_v21, %v4364_v51  ;;  %v4365_v55 = vadd.f32 %v14474_v14, %v3964_v30  ;;  %v14481_v53 = vld [vmem:[#allocation19_spill] sm:$0xff]  ;;  %v14483_v21 = vld [vmem:[#allocation52_spill] sm:$0xff] }
 0x219   : > { %v13387_v41 = vpop.f32.mrf.mxu1  ;;  %v3855_v50 = vadd.f32 %v14473_v29, %v14472_v17  ;;  %v3744_v10 = vadd.f32 %v14475_v23, %v3323_v32  ;;  %v3967_v4 = vadd.f32 %v14476_v0, %v3854_v3  ;;  %v3853_v59 = vadd.f32 %v14477_v7, %v3740_v25  ;;  %v14479_v22 = vld [vmem:[#allocation33_spill] sm:$0xff]  ;;  %v14482_v31 = vld [vmem:[#allocation35_spill] sm:$0xff]  ;;  %v14484_v29 = vld [vmem:[#allocation26_spill] sm:$0xff] }
 0x21a   : > { %v13394_v13 = vpop.f32.mrf.mxu0  ;;  %14466 = vst [vmem:[#allocation60_spill] sm:$0xff] %v13472_v44  ;;  %v3858_v8 = vadd.f32 %v14479_v22, %v14478_v33  ;;  %v3856_v61 = vadd.f32 %v14482_v31, %v14481_v53  ;;  %v4475_v17 = vadd.f32 %v13321_v5, %v4362_v43  ;;  %v4363_v51 = vadd.f32 %v14483_v21, %v3962_v2  ;;  %v14485_v32 = vld [vmem:[#allocation32_spill] sm:$0xff]  ;;  %v14487_v25 = vld [vmem:[#allocation37_spill] sm:$0xff] }
 0x21b   : > { %v13408_v12 = vpop.f32.mrf.mxu1  ;;  %v3748_v23 = vadd.f32 %v14484_v29, %v3339_v45  ;;  %v3965_v3 = vadd.f32 %v14485_v32, %v3852_v62  ;;  %v14486_v0 = vld [vmem:[#allocation20_spill] sm:$0xff]  ;;  %v3857_v33 = vadd.f32 %v14488_v26, %v3744_v10  ;;  %v4478_v53 = vadd.f32 %v13328_v60, %v4365_v55  ;;  %v14491_v5 = vld [vmem:[#allocation53_spill] sm:$0xff]  ;;  %v14493_v45 = vld [vmem:[#allocation38_spill] sm:$0xff] }
 0x21c   : > { %v13418_v52 = vpop.f32.mrf.mxu0  ;;  %v3859_v7 = vadd.f32 %v14487_v25, %v14486_v0  ;;  %v4368_v43 = vadd.f32 %v14491_v5, %v3967_v4  ;;  %v3971_v21 = vadd.f32 %v14493_v45, %v3858_v8  ;;  %v14494_v62 = vld [vmem:[#allocation22_spill] sm:$0xff]  ;;  %v14495_v29 = vld [vmem:[#allocation41_spill] sm:$0xff]  ;;  %v14496_v10 = vld [vmem:[#allocation40_spill] sm:$0xff] }
 0x21d   : > { %v13432_v37 = vpop.f32.mrf.mxu1  ;;  %v3862_v32 = vadd.f32 %v14495_v29, %v14494_v62  ;;  %v4366_v0 = vadd.f32 %v13330_v16, %v3965_v3  ;;  %v3969_v25 = vadd.f32 %v14496_v10, %v3856_v61  ;;  %v14498_v4 = vld [vmem:[#allocation42_spill] sm:$0xff]  ;;  %v14502_v45 = vld [vmem:[#allocation25_spill] sm:$0xff] }
 0x21e   : > { %v13442_v1 = vpop.f32.mrf.mxu0  ;;  %v14503_v42 = vld [vmem:[#allocation45_spill] sm:$0xff]  ;;  %v4481_v16 = vadd.f32 %v13342_v54, %v4368_v43  ;;  %v14505_v43 = vld [vmem:[#allocation48_spill] sm:$0xff] }
 0x21f   : > { %v13449_v63 = vpop.f32.mrf.mxu1  ;;  %v3863_v62 = vadd.f32 %v14503_v42, %v14502_v45 }
 0x220   : > { %v13455_v28 = vpop.f32.mrf.mxu0 }
 0x221   : > { %v13463_v48 = vpop.f32.mrf.mxu1 }
 0x222   : > { %v13469_v18 = vpop.f32.mrf.mxu0 }
 0x223   : > { %v13479_v35 = vpop.f32.mrf.mxu1 }
 0x224   : > { %v10366_v9 = vpop.f32.mrf.mxu0 }
 0x225   : > { %v13491_v56 = vpop.f32.mrf.mxu1  ;;  %v4590_v14 = vadd.f32 %v10366_v9, %v4477_v57  ;;  %v14492_v57 = vld [vmem:[#allocation36_spill] sm:$0xff] }
 0x226   : > { %14480 = vst [vmem:[#allocation13_spill] sm:$0xff] %v13491_v56  ;;  %v4525_v30 = vpop.f32.mrf.mxu0  ;;  %v14490_v56 = vld [vmem:[#allocation34_spill] sm:$0xff]  ;;  %v3966_v31 = vadd.f32 %v14492_v57, %v3853_v59  ;;  %v14500_v59 = vld [vmem:[#allocation24_spill] sm:$0xff]  ;;  %v14501_v57 = vld [vmem:[#allocation43_spill] sm:$0xff] }
 0x227   : > { %v13502_v22 = vpop.f32.mrf.mxu1  ;;  %v3968_v44 = vadd.f32 %v14490_v56, %v3855_v50  ;;  %v4588_v2 = vadd.f32 %v4525_v30, %v4475_v17  ;;  %v3972_v17 = vadd.f32 %v14498_v4, %v3859_v7  ;;  %v14499_v30 = vld [vmem:[#allocation44_spill] sm:$0xff]  ;;  %v3860_v8 = vadd.f32 %v14501_v57, %v14500_v59  ;;  %v14508_v57 = vld [vmem:[#allocation49_spill] sm:$0xff] }
 0x228   : > { %14489 = vst [vmem:[#allocation23_spill] sm:$0xff] %v13502_v22  ;;  %v10367_v9 = vpop.f32.mrf.mxu0  ;;  %v14497_v22 = vld [vmem:[#allocation54_spill] sm:$0xff]  ;;  %v3970_v5 = vadd.f32 %v14499_v30, %v3857_v33  ;;  %v4479_v7 = vadd.f32 %v13348_v49, %v4366_v0  ;;  %v14507_v49 = vmax.f32 %v13369_v15, 0.0 }
 0x229   : > { %v10398_v26 = vpop.f32.mrf.mxu1  ;;  %v4476_v56 = vadd.f32 %v14497_v22, %v4363_v51  ;;  %v4591_v60 = vadd.f32 %v10367_v9, %v4478_v53  ;;  %v14504_v22 = vld [vmem:[#allocation46_spill] sm:$0xff]  ;;  %v4369_v33 = vadd.f32 %v13337_v19, %v3968_v44  ;;  %v4367_v9 = vadd.f32 %v13344_v24, %v3966_v31 }
 0x22a   : > { %v4991_v50 = vadd.f32 %v10398_v26, %v4590_v14  ;;  %v4528_v55 = vpop.f32.mrf.mxu0  ;;  %v3975_v53 = vadd.f32 %v14504_v22, %v3862_v32 }
 0x22b   : > { %v4926_v29 = vpop.f32.mrf.mxu1  ;;  %v4589_v51 = vadd.f32 %v4528_v55, %v4476_v56  ;;  %v4372_v55 = vadd.f32 %v13356_v27, %v3971_v21  ;;  %v4482_v45 = vadd.f32 %v13360_v34, %v4369_v33  ;;  %v14509_v27 = vmax.f32 %v13375_v6, 0.0 }
 0x22c   : > { %v5007_v61 = vadd.f32 %v13354_v38, %v4991_v50  ;;  %v4989_v3 = vadd.f32 %v4926_v29, %v4588_v2  ;;  %v10370_v14 = vpop.f32.mrf.mxu0  ;;  %v3973_v50 = vadd.f32 %v14505_v43, %v3860_v8  ;;  %v14506_v2 = vld [vmem:[#allocation47_spill] sm:$0xff]  ;;  %v4480_v8 = vadd.f32 %v13371_v36, %v4367_v9  ;;  %v14511_v9 = vld [vmem:[#allocation50_spill] sm:$0xff] }
 0x22d   : > { %v10399_v26 = vpop.f32.mrf.mxu1  ;;  %v4594_v30 = vadd.f32 %v10370_v14, %v4481_v16  ;;  %v3861_v56 = vadd.f32 %v14506_v2, %v3748_v23  ;;  %v4370_v23 = vadd.f32 %v13363_v46, %v3969_v25  ;;  %v4373_v14 = vadd.f32 %v13381_v47, %v3972_v17 }
 0x22e   : > { %v5023_v10 = vmax.f32 %v5007_v61, 0.0  ;;  %v5005_v42 = vadd.f32 %v13354_v38, %v4989_v3  ;;  %v4992_v4 = vadd.f32 %v10399_v26, %v4591_v60  ;;  %v4541_v54 = vpop.f32.mrf.mxu0  ;;  %v3976_v60 = vadd.f32 %v14508_v57, %v3863_v62 }
 0x22f   : > { %v4929_v32 = vpop.f32.mrf.mxu1  ;;  %v4592_v59 = vadd.f32 %v4541_v54, %v4479_v7  ;;  %v14510_v36 = vmax.f32 %v13379_v11, 0.0  ;;  %v3974_v26 = vadd.f32 %v14511_v9, %v3861_v56  ;;  %v14512_v17 = vmax.f32 %v13384_v40, 0.0 }
 0x230   : > { %v5039_v19 = vmax.f32 %v14507_v49, %v5023_v10  ;;  %v5021_v44 = vmax.f32 %v5005_v42, 0.0  ;;  %v5008_v24 = vadd.f32 %v13354_v38, %v4992_v4  ;;  %v4990_v31 = vadd.f32 %v4929_v32, %v4589_v51  ;;  %v10371_v0 = vpop.f32.mrf.mxu0 }
 0x231   : > { %v10402_v29 = vpop.f32.mrf.mxu1  ;;  %v4485_v51 = vadd.f32 %v13387_v41, %v4372_v55  ;;  %v4595_v22 = vadd.f32 %v10371_v0, %v4482_v45  ;;  %v4483_v10 = vadd.f32 %v13408_v12, %v4370_v23  ;;  %v4371_v42 = vadd.f32 %v13394_v13, %v3970_v5 }
 0x232   : > { %v5037_v21 = vmax.f32 %v14509_v27, %v5021_v44  ;;  %v5024_v16 = vmax.f32 %v5008_v24, 0.0  ;;  %v5006_v15 = vadd.f32 %v13354_v38, %v4990_v31  ;;  %v4995_v61 = vadd.f32 %v10402_v29, %v4594_v30  ;;  %v4544_v3 = vpop.f32.mrf.mxu0 }
 0x233   : > { %v4942_v62 = vpop.f32.mrf.mxu1  ;;  %v4593_v34 = vadd.f32 %v4544_v3, %v4480_v8  ;;  %v4486_v2 = vadd.f32 %v13432_v37, %v4373_v14  ;;  %v4376_v55 = vadd.f32 %v13418_v52, %v3975_v53  ;;  %v14513_v5 = vmax.f32 %v13402_v20, 0.0 }
 0x234   : > { %v5040_v7 = vmax.f32 %v14510_v36, %v5024_v16  ;;  %v5022_v46 = vmax.f32 %v5006_v15, 0.0  ;;  %v5011_v25 = vadd.f32 %v13354_v38, %v4995_v61  ;;  %v4993_v6 = vadd.f32 %v4942_v62, %v4592_v59  ;;  %v10374_v33 = vpop.f32.mrf.mxu0  ;;  %v5118_v59 = vld [vmem:[#allocation2 + $0x1] sm:$0xff] }
 0x235   : > { %v10403_v41 = vpop.f32.mrf.mxu1  ;;  %v4598_v4 = vadd.f32 %v10374_v33, %v4485_v51  ;;  %v4484_v24 = vadd.f32 %v13449_v63, %v4371_v42  ;;  %v4374_v37 = vadd.f32 %v13442_v1, %v3973_v50  ;;  %v14514_v0 = vmax.f32 %v13406_v58, 0.0  ;;  %v14516_v62 = vld [vmem:[#allocation56_spill] sm:$0xff]  ;;  %v14519_v33 = vld [vmem:[#allocation13_spill] sm:$0xff] }
 0x236   : > { %v13548_v47 = vmax.f32 %v5039_v19, %v5040_v7  ;;  %v5038_v30 = vmax.f32 %v14512_v17, %v5022_v46  ;;  %v5027_v11 = vmax.f32 %v5011_v25, 0.0  ;;  %v5009_v54 = vadd.f32 %v13354_v38, %v4993_v6  ;;  %v4557_v43 = vpop.f32.mrf.mxu0  ;;  %v14518_v25 = vld [vmem:[#allocation60_spill] sm:$0xff]  ;;  %v14520_v42 = vld [vmem:[#allocation57_spill] sm:$0xff] }
 0x237   : > { %v4996_v56 = vadd.f32 %v10403_v41, %v4595_v22  ;;  %v4945_v32 = vpop.f32.mrf.mxu1  ;;  %v4596_v12 = vadd.f32 %v4557_v43, %v4483_v10  ;;  %v4489_v29 = vadd.f32 %v13463_v48, %v4376_v55  ;;  %v4377_v63 = vadd.f32 %v13455_v28, %v3976_v60 }
 0x238   : > { %5083 = vst [vmem:[#allocation2 + $0x21] sm:$0xff] %v13548_v47  ;;  %v13556_v13 = vmax.f32 %v5037_v21, %v5038_v30  ;;  %v5043_v40 = vmax.f32 %v14513_v5, %v5027_v11  ;;  %v5025_v49 = vmax.f32 %v5009_v54, 0.0  ;;  %v4994_v19 = vadd.f32 %v4945_v32, %v4593_v34  ;;  %v10375_v44 = vpop.f32.mrf.mxu0  ;;  %v14522_v54 = vld [vmem:[#allocation9_spill] sm:$0xff]  ;;  %v14524_v5 = vld [vmem:[#allocation58_spill] sm:$0xff] }
 0x239   : > { %v5012_v52 = vadd.f32 %v13354_v38, %v4996_v56  ;;  %v10406_v53 = vpop.f32.mrf.mxu1  ;;  %v4599_v31 = vadd.f32 %v10375_v44, %v4486_v2  ;;  %v4375_v21 = vadd.f32 %v13469_v18, %v3974_v26  ;;  %v4487_v3 = vadd.f32 %v13479_v35, %v4374_v37  ;;  %v14523_v2 = vld [vmem:[#allocation23_spill] sm:$0xff] }
 0x23a   : > { %5082 = vst [vmem:[#allocation2 + $0x11] sm:$0xff] %v13556_v13  ;;  %v5041_v57 = vmax.f32 %v14514_v0, %v5025_v49  ;;  %v5010_v45 = vadd.f32 %v13354_v38, %v4994_v19  ;;  %v4999_v20 = vadd.f32 %v10406_v53, %v4598_v4  ;;  %v4560_v8 = vpop.f32.mrf.mxu0  ;;  %v5126_v23 = vpack.c.bf16 %v13556_v13, %v5118_v59  ;;  %v14526_v53 = vld [vmem:[#allocation10_spill] sm:$0xff]  ;;  %v14527_v0 = vld [vmem:[#allocation55_spill] sm:$0xff] }
 0x23b   : > { %v5028_v1 = vmax.f32 %v5012_v52, 0.0  ;;  %v4958_v50 = vpop.f32.mrf.mxu1  ;;  %v5681_v27 = vpack.c.bf16 %v13548_v47, %v13556_v13  ;;  %v14515_v51 = vmax.f32 %v13414_v39, 0.0  ;;  %v4597_v14 = vadd.f32 %v4560_v8, %v4484_v24  ;;  %v13598_v24 = vld [vmem:[#allocation2] sm:$0xff]  ;;  %v11167_v13 = vld [vmem:[#allocation3 + $0x108] sm:$0xff]  }
 0x23c   : > { %v5026_v16 = vmax.f32 %v5010_v45, 0.0  ;;  %v5015_v58 = vadd.f32 %v13354_v38, %v4999_v20  ;;  %v4997_v15 = vadd.f32 %v4958_v50, %v4596_v12  ;;  %v10378_v61 = vpop.f32.mrf.mxu0  ;;  %10428 = vmatprep.mubr.bf16.mxu0 %v5126_v23  ;;  %v14517_v22 = vmax.f32 %v14516_v62, 0.0 }
 0x23d   : > { %v5044_v48 = vmax.f32 %v14515_v51, %v5028_v1  ;;  %v10407_v28 = vpop.f32.mrf.mxu1  ;;  %v4602_v60 = vadd.f32 %v10378_v61, %v4489_v29  ;;  %v3149_v6 = vmax.f32 %v14518_v25, 0.0  ;;  %v4490_v9 = vadd.f32 %v14519_v33, %v4377_v63  ;;  %v11141_v29 = vld [vmem:[#allocation3 + $0xb0] sm:$0xff]   ;;  %v11143_v25 = vld [vmem:[#allocation3 + $0xa8] sm:$0xff]  }
 0x23e   : > { %v5042_v34 = vmax.f32 %v14517_v22, %v5026_v16  ;;  %v5031_v36 = vmax.f32 %v5015_v58, 0.0  ;;  %v5013_v18 = vadd.f32 %v13354_v38, %v4997_v15  ;;  %v5000_v7 = vadd.f32 %v10407_v28, %v4599_v31  ;;  %v4573_v46 = vpop.f32.mrf.mxu0  ;;  %v14529_v63 = vld [vmem:[#allocation59_spill] sm:$0xff] }
 0x23f   : > { %v13582_v26 = vmax.f32 %v5043_v40, %v5044_v48  ;;  %v4961_v35 = vpop.f32.mrf.mxu1  ;;  %v4600_v39 = vadd.f32 %v4573_v46, %v4487_v3  ;;  %v14521_v41 = vmax.f32 %v14520_v42, 0.0  ;;  %v3138_v43 = vadd.f32 %v13354_v38, %v14522_v54  ;;  %v14531_v61 = vld [vmem:[#allocation11_spill] sm:$0xff] }
 0x240   : > { %v13584_v10 = vmax.f32 %v5041_v57, %v5042_v34  ;;  %v5029_v17 = vmax.f32 %v5013_v18, 0.0  ;;  %v5016_v30 = vadd.f32 %v13354_v38, %v5000_v7  ;;  %v10379_v11 = vpop.f32.mrf.mxu0  ;;  %v4488_v55 = vadd.f32 %v14523_v2, %v4375_v21  ;;  %v14528_v57 = vld [vmem:[#allocation12_spill] sm:$0xff]  ;;  %v14532_v34 = vld [vmem:[#allocation14_spill] sm:$0xff] }
 0x241   : > { %v5047_v4 = vmax.f32 %v14521_v41, %v5031_v36  ;;  %5085 = vst [vmem:[#allocation2 + $0x41] sm:$0xff] %v13582_v26  ;;  %v4998_v56 = vadd.f32 %v4961_v35, %v4597_v14  ;;  %v10410_v32 = vpop.f32.mrf.mxu1  ;;  %v4603_v12 = vadd.f32 %v10379_v11, %v4490_v9  ;;  %v13593_v59 = vld [vmem:[#allocation2 + $0x10] sm:$0xff]  ;;  %v14525_v40 = vmax.f32 %v14524_v5, 0.0 }
 0x242   : > { %5084 = vst [vmem:[#allocation2 + $0x31] sm:$0xff] %v13584_v10  ;;  %v5032_v19 = vmax.f32 %v5016_v30, 0.0  ;;  %v5003_v44 = vadd.f32 %v10410_v32, %v4602_v60  ;;  %v5098_v37 = vpack.c.bf16 %v13593_v59, %v13598_v24  ;;  %v4576_v52 = vpop.f32.mrf.mxu0  ;;  %v3136_v31 = vadd.f32 %v13354_v38, %v14526_v53  ;;  %v14533_v5 = vld [vmem:[#allocation15_spill] sm:$0xff]  ;;  %v5373_v53 = vld [vmem:[#allocation2 + $0x2] sm:$0xff] }
 0x243   : > { %v5045_v49 = vmax.f32 %v14525_v40, %v5029_v17  ;;  %v3114_v45 = vadd.f32 %v14528_v57, %v14527_v0  ;;  %v5014_v20 = vadd.f32 %v13354_v38, %v4998_v56  ;;  %v4974_v8 = vpop.f32.mrf.mxu1  ;;  %v13609_v23 = vpack.c.bf16 %v13584_v10, %v13548_v47  ;;  %v11164_v47 = vld [vmem:[#allocation3 + $0x158] sm:$0xff]  }
 0x244   : > { %v14530_v1 = vmax.f32 %v14529_v63, 0.0  ;;  %v5019_v21 = vadd.f32 %v13354_v38, %v5003_v44  ;;  %v5001_v16 = vadd.f32 %v4974_v8, %v4600_v39  ;;  %10452 = vmatprep.mubr.bf16.mxu1 %v5098_v37  ;;  %v4601_v58 = vadd.f32 %v4576_v52, %v4488_v55  ;;  %v11145_v55 = vld [vmem:[#allocation3 + $0xa0] sm:$0xff]   ;;  %v11147_v44 = vld [vmem:[#allocation3 + $0x98] sm:$0xff]  }
 0x245   : > { %v3154_v15 = vmax.f32 %v3138_v43, 0.0  ;;  %v3139_v3 = vadd.f32 %v13354_v38, %v14531_v61  ;;  %v5030_v51 = vmax.f32 %v5014_v20, 0.0  ;;  %v10411_v48 = vpop.f32.mrf.mxu1  ;;  %10429 = vmatmul.mubr.bf16.vlgmr.msra.gmra.mxu0 %v13609_v23  ;;  %v5682_v14 = vpack.c.bf16 %v13582_v26, %v13584_v10  ;;  %v11142_v43 = vld [vmem:[#allocation3 + $0xf0] sm:$0xff]   ;;  %v11146_v52 = vld [vmem:[#allocation3 + $0xe0] sm:$0xff]   ;;  %v11176_v10 = vld [vmem:[#allocation3 + $0x1e8] sm:$0xff]  }
 0x246   : > { %v5048_v50 = vmax.f32 %v14530_v1, %v5032_v19  ;;  %v5035_v60 = vmax.f32 %v5019_v21, 0.0  ;;  %v5017_v62 = vadd.f32 %v13354_v38, %v5001_v16  ;;  %v5004_v22 = vadd.f32 %v10411_v48, %v4603_v12  ;;  %10461 = vmatpush3.bf16.msra.mxu0 %v14532_v34  ;;  %v11144_v19 = vld [vmem:[#allocation3 + $0xe8] sm:$0xff]   ;;  %v11148_v1 = vld [vmem:[#allocation3 + $0xd8] sm:$0xff]  }
 0x247   : > { %v3152_v36 = vmax.f32 %v3136_v31, 0.0  ;;  %v3137_v18 = vadd.f32 %v13354_v38, %v3114_v45  ;;  %v5046_v7 = vmax.f32 %v3149_v6, %v5030_v51  ;;  %v4977_v46 = vpop.f32.mrf.mxu1  ;;  %10462 = vmatprep.subr.bf16.mxu0 %v11141_v29  ;;  %v3155_v42 = vmax.f32 %v3139_v3, 0.0  ;;  %v13661_v45 = vld [vmem:[#allocation2 + $0x12] sm:$0xff]  ;;  %v11153_v3 = vld [vmem:[#allocation3 + $0x80] sm:$0xff]   ;;  %v11152_v51 = vld [vmem:[#allocation3 + $0xc8] sm:$0xff]  }
 0x248   : > { %v13619_v28 = vmax.f32 %v5047_v4, %v5048_v50  ;;  %v5051_v33 = vmax.f32 %v3154_v15, %v5035_v60  ;;  %v5033_v9 = vmax.f32 %v5017_v62, 0.0  ;;  %v5020_v35 = vadd.f32 %v13354_v38, %v5004_v22  ;;  %v13628_v4 = vld [vmem:[#allocation2 + $0x20] sm:$0xff]  ;;  %v11151_v50 = vld [vmem:[#allocation3 + $0x88] sm:$0xff]   ;;  %v11150_v15 = vld [vmem:[#allocation3 + $0xd0] sm:$0xff]  }
 0x249   : > { %v5002_v39 = vadd.f32 %v4977_v46, %v4601_v58  ;;  %v13626_v41 = vmax.f32 %v5045_v49, %v5046_v7  ;;  %v13630_v17 = vld [vmem:[#allocation2 + $0x30] sm:$0xff]  ;;  %v3153_v56 = vmax.f32 %v3137_v18, 0.0  ;;  %v13653_v31 = vld [vmem:[#allocation2 + $0x40] sm:$0xff]  ;;  %v5381_v63 = vpack.c.bf16 %v13661_v45, %v5373_v53  ;;  %v11155_v48 = vld [vmem:[#allocation3 + $0x138] sm:$0xff]  }
 0x24a   : > { %5087 = vst [vmem:[#allocation2 + $0x61] sm:$0xff] %v13619_v28  ;;  %v5049_v30 = vmax.f32 %v3152_v36, %v5033_v9  ;;  %v5036_v11 = vmax.f32 %v5020_v35, 0.0  ;;  %v13635_v54 = vpack.c.bf16 %v13630_v17, %v13628_v4  ;;  %10463 = vmatpush3.bf16.msra.mxu0 %v11141_v29  ;;  %v11149_v29 = vld [vmem:[#allocation3 + $0x90] sm:$0xff]   ;;  %v5531_v61 = vpack.c.bf16 %v13628_v4, %v13593_v59  ;;  %v11154_v22 = vld [vmem:[#allocation3 + $0xc0] sm:$0xff]   ;;  %v11156_v46 = vld [vmem:[#allocation3 + $0x178] sm:$0xff]  }
 0x24b   : > { %v5018_v6 = vadd.f32 %v13354_v38, %v5002_v39  ;;  %5086 = vst [vmem:[#allocation2 + $0x51] sm:$0xff] %v13626_v41  ;;  %10464 = vmatprep.subr.bf16.mxu0 %v11143_v25  ;;  %v13640_v2 = vpack.c.bf16 %v13626_v41, %v13582_v26  ;;  %v5683_v38 = vpack.c.bf16 %v13619_v28, %v13626_v41  ;;  %v13680_v60 = vld [vmem:[#allocation2 + $0x32] sm:$0xff]  ;;  %v5375_v59 = vld [vmem:[#allocation2 + $0x22] sm:$0xff] }
 0x24c   : > { %v5052_v32 = vmax.f32 %v3155_v42, %v5036_v11  ;;  %10453 = vmatmul.mubr.bf16.vlgmr.msra.gmra.mxu1 %v13635_v54  ;;  %v13685_v34 = vpack.c.bf16 %v13680_v60, %v5375_v59  ;;  %v13687_v36 = vld [vmem:[#allocation2 + $0x42] sm:$0xff]  ;;  %v11157_v7 = vld [vmem:[#allocation3 + $0x130] sm:$0xff]   ;;  %v5532_v9 = vpack.c.bf16 %v13653_v31, %v13630_v17  ;;  %v11163_v11 = vld [vmem:[#allocation3 + $0x118] sm:$0xff]  }
 0x24d   : > { %v5034_v12 = vmax.f32 %v5018_v6, 0.0  ;;  %10485 = vmatpush3.bf16.msra.mxu1 %v14533_v5  ;;  %10432 = vmatprep.mubr.bf16.mxu0 %v13640_v2  ;;  %v11158_v35 = vld [vmem:[#allocation3 + $0x170] sm:$0xff]   ;;  %v11160_v17 = vld [vmem:[#allocation3 + $0x168] sm:$0xff]   ;;  %v11177_v26 = vld [vmem:[#allocation3 + $0x1a0] sm:$0xff]  }
 0x24e   : > { %v13647_v40 = vmax.f32 %v5051_v33, %v5052_v32  ;;  %10486 = vmatprep.subr.bf16.mxu1 %v11142_v43  ;;  %10465 = vmatpush3.bf16.msra.mxu0 %v11143_v25  ;;  %v11159_v25 = vld [vmem:[#allocation3 + $0x128] sm:$0xff]   ;;  %v11165_v32 = vld [vmem:[#allocation3 + $0x110] sm:$0xff]  }
 0x24f   : > { %v5050_v49 = vmax.f32 %v3153_v56, %v5034_v12  ;;  %10466 = vmatprep.subr.bf16.mxu0 %v11145_v55  ;;  %v5831_v56 = vpack.c.bf16 %v5375_v59, %v13661_v45  ;;  %v11169_v12 = vld [vmem:[#allocation3 + $0x100] sm:$0xff]   ;;  %v11168_v5 = vld [vmem:[#allocation3 + $0x148] sm:$0xff]   ;;  %v11198_v59 = vld [vmem:[%s14396_s5 + $0x70] sm:$0xff]  }
 0x250   : > { %5089 = vst [vmem:[#allocation2 + $0x81] sm:$0xff] %v13647_v40  ;;  %v11175_v53 = vld [vmem:[#allocation3 + $0x1a8] sm:$0xff]  }
 0x251   : > { %v13650_v37 = vmax.f32 %v5049_v30, %v5050_v49  ;;  %10487 = vmatpush3.bf16.msra.mxu1 %v11142_v43  ;;  %v5096_v21 = vld [vmem:[#allocation2 + $0x60] sm:$0xff]  ;;  %v11171_v49 = vld [vmem:[#allocation3 + $0x1b8] sm:$0xff]  }
 0x252   : > { %10488 = vmatprep.subr.bf16.mxu1 %v11144_v19  ;;  %v13655_v0 = vld [vmem:[#allocation2 + $0x50] sm:$0xff]  ;;  %10467 = vmatpush3.bf16.msra.mxu0 %v11145_v55  ;;  %v13700_v42 = vld [vmem:[#allocation2 + $0x62] sm:$0xff] }
 0x253   : > { %5088 = vst [vmem:[#allocation2 + $0x71] sm:$0xff] %v13650_v37  ;;  %v13659_v57 = vpack.c.bf16 %v13650_v37, %v13619_v28  ;;  %v5684_v20 = vpack.c.bf16 %v13647_v40, %v13650_v37  ;;  %v13667_v8 = vpack.c.bf16 %v13655_v0, %v13653_v31  ;;  %10468 = vmatprep.subr.bf16.mxu0 %v11147_v44  ;;  %v13682_v62 = vld [vmem:[#allocation2 + $0x52] sm:$0xff]  ;;  %v11161_v30 = vld [vmem:[#allocation3 + $0x120] sm:$0xff]  }
 0x254   : > { %v13691_v18 = vpack.c.bf16 %v13682_v62, %v13687_v36  ;;  %v5533_v39 = vpack.c.bf16 %v5096_v21, %v13655_v0  ;;  %v11162_v55 = vld [vmem:[#allocation3 + $0x160] sm:$0xff]   ;;  %v5832_v31 = vpack.c.bf16 %v13687_v36, %v13680_v60  ;;  %v11174_v0 = vld [vmem:[#allocation3 + $0x1f0] sm:$0xff]   ;;  %v5833_v45 = vpack.c.bf16 %v13700_v42, %v13682_v62  ;;  %v11180_v37 = vld [vmem:[#allocation3 + $0x1d8] sm:$0xff]  }
 0x255   : > { %10433 = vmatmul.mubr.bf16.gmra.mxu0 %v13659_v57  ;;  %10456 = vmatprep.mubr.bf16.mxu1 %v13667_v8  ;;  %v11195_v60 = vld [vmem:[%s14396_s5 + $0x38] sm:$0xff]   ;;  %v11200_v36 = vld [vmem:[%s14396_s5 + $0x68] sm:$0xff]  }
 0x256   : > { %10489 = vmatpush3.bf16.msra.mxu1 %v11144_v19  ;;  %10469 = vmatpush3.bf16.msra.mxu0 %v11147_v44  ;;  %v11170_v19 = vld [vmem:[#allocation3 + $0x140] sm:$0xff]   ;;  %v11173_v44 = vld [vmem:[#allocation3 + $0x1b0] sm:$0xff]   ;;  %v11196_v62 = vld [vmem:[%s14396_s5 + $0x78] sm:$0xff]  }
 0x257   : > { %10490 = vmatprep.subr.bf16.mxu1 %v11146_v52  ;;  %10476 = vmatprep.mubr.bf16.mxu0 %v5381_v63  ;;  %v13710_v6 = vld [vmem:[#allocation2 + $0x80] sm:$0xff] }
 0x258   : > { %10470 = vmatprep.subr.bf16.mxu0 %v11149_v29  ;;  %v13729_v28 = vld [vmem:[#allocation2 + $0x82] sm:$0xff] }
 0x259   : > { %v11185_v63 = vld [vmem:[#allocation3 + $0x180] sm:$0xff]  }
 0x25a   : > { %10491 = vmatpush3.bf16.msra.mxu1 %v11146_v52  ;;  %v13672_v16 = vld [vmem:[#allocation2 + $0x70] sm:$0xff]  ;;  %10471 = vmatpush3.bf16.msra.mxu0 %v11149_v29  ;;  %v11172_v52 = vld [vmem:[#allocation3 + $0x1f8] sm:$0xff]  }
 0x25b   : > { %10492 = vmatprep.subr.bf16.mxu1 %v11148_v1  ;;  %v13675_v58 = vpack.c.bf16 %v13672_v16, %v5096_v21  ;;  %10472 = vmatprep.subr.bf16.mxu0 %v11151_v50  ;;  %v13695_v33 = vld [vmem:[#allocation2 + $0x72] sm:$0xff]  ;;  %v5534_v43 = vpack.c.bf16 %v13710_v6, %v13672_v16  ;;  %v11189_v16 = vld [vmem:[#allocation3 + $0x228] sm:$0xff]  }
 0x25c   : > { %v13704_v4 = vpack.c.bf16 %v13695_v33, %v13700_v42  ;;  %v5834_v41 = vpack.c.bf16 %v13729_v28, %v13695_v33  ;;  %v11181_v29 = vld [vmem:[#allocation3 + $0x190] sm:$0xff]   ;;  %v11204_v33 = vld [vmem:[%s14396_s5 + $0x58] sm:$0xff]  }
 0x25d   : > { %10457 = vmatmul.mubr.bf16.gmra.mxu1 %v13675_v58  ;;  %v11188_v21 = vld [vmem:[#allocation3 + $0x230] sm:$0xff]  }
 0x25e   : > { %10493 = vmatpush3.bf16.msra.mxu1 %v11148_v1  ;;  %10500 = vmatprep.mubr.bf16.mxu1 %v5531_v61  ;;  %v11184_v1 = vld [vmem:[#allocation3 + $0x1c8] sm:$0xff]   ;;  %v11190_v61 = vld [vmem:[#allocation3 + $0x220] sm:$0xff]  }
 0x25f   : > { %10494 = vmatprep.subr.bf16.mxu1 %v11150_v15  ;;  %10473 = vmatpush3.bf16.msra.mxu0 %v11151_v50  ;;  %v11187_v50 = vld [vmem:[#allocation3 + $0x238] sm:$0xff]  }
 0x260   : > { %10474 = vmatprep.subr.bf16.mxu0 %v11153_v3 }
 0x262   : > { %10495 = vmatpush3.bf16.msra.mxu1 %v11150_v15  ;;  %v5985_v15 = vpack.c.bf16 %v13598_v24, %v13710_v6 }
 0x263   : > { %10496 = vmatprep.subr.bf16.mxu1 %v11152_v51  ;;  %10475 = vmatpush3.bf16.msra.mxu0 %v11153_v3 }
 0x264   : > { %10508 = vmatprep.subr.bf16.mxu0 %v11155_v48 }
 0x266   : > { %10497 = vmatpush3.bf16.msra.mxu1 %v11152_v51  ;;  %10477 = vmatmul.mubr.bf16.vlgmr.msra.gmra.mxu0 %v13685_v34  ;;  %v11193_v51 = vld [vmem:[#allocation3 + $0x208] sm:$0xff]  }
 0x267   : > { %10498 = vmatprep.subr.bf16.mxu1 %v11154_v22  ;;  %10480 = vmatprep.mubr.bf16.mxu0 %v13691_v18 }
 0x268   : > { %10509 = vmatpush3.bf16.msra.mxu0 %v11155_v48  ;;  %v11194_v48 = vld [vmem:[#allocation3 + $0x200] sm:$0xff]  }
 0x269   : > { %10510 = vmatprep.subr.bf16.mxu0 %v11157_v7 }
 0x26a   : > { %10499 = vmatpush3.bf16.msra.mxu1 %v11154_v22  ;;  %v11197_v22 = vld [vmem:[%s14396_s5 + $0x30] sm:$0xff]  }
 0x26b   : > { %10532 = vmatprep.subr.bf16.mxu1 %v11156_v46 }
 0x26c   : > { %10511 = vmatpush3.bf16.msra.mxu0 %v11157_v7  ;;  %v11202_v7 = vld [vmem:[%s14396_s5 + $0x60] sm:$0xff]  }
 0x26d   : > { %10501 = vmatmul.mubr.bf16.vlgmr.msra.gmra.mxu1 %v5532_v9  ;;  %10512 = vmatprep.subr.bf16.mxu0 %v11159_v25 }
 0x26e   : > { %10504 = vmatprep.mubr.bf16.mxu1 %v5533_v39  ;;  %10533 = vmatpush3.bf16.msra.mxu1 %v11156_v46 }
 0x26f   : > { %10534 = vmatprep.subr.bf16.mxu1 %v11158_v35  ;;  %10481 = vmatmul.mubr.bf16.gmra.mxu0 %v13704_v4 }
 0x270   : > { %10513 = vmatpush3.bf16.msra.mxu0 %v11159_v25  ;;  %10524 = vmatprep.mubr.bf16.mxu0 %v5681_v27  ;;  %v11166_v27 = vld [vmem:[#allocation3 + $0x150] sm:$0xff]   ;;  %v11203_v25 = vld [vmem:[%s14396_s5 + $0x18] sm:$0xff]  }
 0x271   : > { %10514 = vmatprep.subr.bf16.mxu0 %v11161_v30 }
 0x272   : > { %10535 = vmatpush3.bf16.msra.mxu1 %v11158_v35 }
 0x273   : > { %10536 = vmatprep.subr.bf16.mxu1 %v11160_v17 }
 0x274   : > { %10515 = vmatpush3.bf16.msra.mxu0 %v11161_v30 }
 0x275   : > { %10505 = vmatmul.mubr.bf16.gmra.mxu1 %v5534_v43  ;;  %10516 = vmatprep.subr.bf16.mxu0 %v11163_v11  ;;  %v11207_v43 = vld [vmem:[%s14396_s5 + $0x8] sm:$0xff]  }
 0x276   : > { %10537 = vmatpush3.bf16.msra.mxu1 %v11160_v17  ;;  %10548 = vmatprep.mubr.bf16.mxu1 %v5831_v56  ;;  %v11208_v56 = vld [vmem:[%s14396_s5 + $0x48] sm:$0xff]  }
 0x277   : > { %10538 = vmatprep.subr.bf16.mxu1 %v11162_v55 }
 0x278   : > { %10517 = vmatpush3.bf16.msra.mxu0 %v11163_v11  ;;  %v11206_v11 = vld [vmem:[%s14396_s5 + $0x50] sm:$0xff]  }
 0x279   : > { %10518 = vmatprep.subr.bf16.mxu0 %v11165_v32 }
 0x27a   : > { %10539 = vmatpush3.bf16.msra.mxu1 %v11162_v55 }
 0x27b   : > { %10540 = vmatprep.subr.bf16.mxu1 %v11164_v47 }
 0x27c   : > { %10519 = vmatpush3.bf16.msra.mxu0 %v11165_v32 }
 0x27d   : > { %10520 = vmatprep.subr.bf16.mxu0 %v11167_v13 }
 0x27e   : > { %10541 = vmatpush3.bf16.msra.mxu1 %v11164_v47  ;;  %v11209_v47 = vld [vmem:[%s14396_s5] sm:$0xff]  }
 0x27f   : > { %10542 = vmatprep.subr.bf16.mxu1 %v11166_v27 }
 0x280   : > { %10521 = vmatpush3.bf16.msra.mxu0 %v11167_v13  ;;  %v11210_v13 = vld [vmem:[%s14396_s5 + $0x40] sm:$0xff]  }
 0x281   : > { %10522 = vmatprep.subr.bf16.mxu0 %v11169_v12 }
 0x282   : > { %10543 = vmatpush3.bf16.msra.mxu1 %v11166_v27 }
 0x283   : > { %10544 = vmatprep.subr.bf16.mxu1 %v11168_v5 }
 0x284   : > { %10523 = vmatpush3.bf16.msra.mxu0 %v11169_v12 }
 0x285   : > { %10556 = vmatprep.subr.bf16.mxu0 %v11171_v49 }
 0x286   : > { %10545 = vmatpush3.bf16.msra.mxu1 %v11168_v5 }
 0x287   : > { %10546 = vmatprep.subr.bf16.mxu1 %v11170_v19  ;;  %10525 = vmatmul.mubr.bf16.vlgmr.msra.gmra.mxu0 %v5682_v14  ;;  %v11179_v14 = vld [vmem:[#allocation3 + $0x198] sm:$0xff]  }
 0x288   : > { %10528 = vmatprep.mubr.bf16.mxu0 %v5683_v38  ;;  %10557 = vmatpush3.bf16.msra.mxu0 %v11171_v49  ;;  %v11178_v38 = vld [vmem:[#allocation3 + $0x1e0] sm:$0xff]  }
 0x289   : > { %10558 = vmatprep.subr.bf16.mxu0 %v11173_v44 }
 0x28a   : > { %10547 = vmatpush3.bf16.msra.mxu1 %v11170_v19 }
 0x28b   : > { %10580 = vmatprep.subr.bf16.mxu1 %v11172_v52 }
 0x28c   : > { %10559 = vmatpush3.bf16.msra.mxu0 %v11173_v44 }
 0x28d   : > { %10549 = vmatmul.mubr.bf16.vlgmr.msra.gmra.mxu1 %v5832_v31  ;;  %10560 = vmatprep.subr.bf16.mxu0 %v11175_v53 }
 0x28e   : > { %10552 = vmatprep.mubr.bf16.mxu1 %v5833_v45  ;;  %10581 = vmatpush3.bf16.msra.mxu1 %v11172_v52 }
 0x28f   : > { %10582 = vmatprep.subr.bf16.mxu1 %v11174_v0  ;;  %10529 = vmatmul.mubr.bf16.gmra.mxu0 %v5684_v20  ;;  %v11182_v20 = vld [vmem:[#allocation3 + $0x1d0] sm:$0xff]  }
 0x290   : > { %10561 = vmatpush3.bf16.msra.mxu0 %v11175_v53  ;;  %10572 = vmatprep.mubr.bf16.mxu0 %v13635_v54  ;;  %v11183_v54 = vld [vmem:[#allocation3 + $0x188] sm:$0xff]  }
 0x291   : > { %10562 = vmatprep.subr.bf16.mxu0 %v11177_v26 }
 0x292   : > { %10583 = vmatpush3.bf16.msra.mxu1 %v11174_v0 }
 0x293   : > { %10584 = vmatprep.subr.bf16.mxu1 %v11176_v10 }
 0x294   : > { %10563 = vmatpush3.bf16.msra.mxu0 %v11177_v26 }
 0x295   : > { %10553 = vmatmul.mubr.bf16.gmra.mxu1 %v5834_v41  ;;  %10564 = vmatprep.subr.bf16.mxu0 %v11179_v14 }
 0x296   : > { %10585 = vmatpush3.bf16.msra.mxu1 %v11176_v10  ;;  %10596 = vmatprep.mubr.bf16.mxu1 %v13609_v23  ;;  %v11186_v23 = vld [vmem:[#allocation3 + $0x1c0] sm:$0xff]  }
 0x297   : > { %10586 = vmatprep.subr.bf16.mxu1 %v11178_v38 }
 0x298   : > { %10565 = vmatpush3.bf16.msra.mxu0 %v11179_v14 }
 0x299   : > { %10566 = vmatprep.subr.bf16.mxu0 %v11181_v29 }
 0x29a   : > { %10587 = vmatpush3.bf16.msra.mxu1 %v11178_v38 }
 0x29b   : > { %10588 = vmatprep.subr.bf16.mxu1 %v11180_v37 }
 0x29c   : > { %10567 = vmatpush3.bf16.msra.mxu0 %v11181_v29 }
 0x29d   : > { %10568 = vmatprep.subr.bf16.mxu0 %v11183_v54 }
 0x29e   : > { %10589 = vmatpush3.bf16.msra.mxu1 %v11180_v37 }
 0x29f   : > { %10590 = vmatprep.subr.bf16.mxu1 %v11182_v20 }
 0x2a0   : > { %10569 = vmatpush3.bf16.msra.mxu0 %v11183_v54 }
 0x2a1   : > { %10570 = vmatprep.subr.bf16.mxu0 %v11185_v63 }
 0x2a2   : > { %10591 = vmatpush3.bf16.msra.mxu1 %v11182_v20 }
 0x2a3   : > { %10592 = vmatprep.subr.bf16.mxu1 %v11184_v1 }
 0x2a4   : > { %10571 = vmatpush3.bf16.msra.mxu0 %v11185_v63 }
 0x2a5   : > { %10604 = vmatprep.subr.bf16.mxu0 %v11187_v50 }
 0x2a6   : > { %10593 = vmatpush3.bf16.msra.mxu1 %v11184_v1 }
 0x2a7   : > { %10594 = vmatprep.subr.bf16.mxu1 %v11186_v23  ;;  %10573 = vmatmul.mubr.bf16.vlgmr.msra.gmra.mxu0 %v13667_v8  ;;  %v6131_v8 = vld [vmem:[#allocation2 + $0x91] sm:$0xff] }
 0x2a8   : > { %10576 = vmatprep.mubr.bf16.mxu0 %v13675_v58  ;;  %10605 = vmatpush3.bf16.msra.mxu0 %v11187_v50  ;;  %v11191_v58 = vld [vmem:[#allocation3 + $0x218] sm:$0xff]   ;;  %v6135_v3 = vpack.c.bf16 %v6131_v8, %v13647_v40 }
 0x2a9   : > { %10606 = vmatprep.subr.bf16.mxu0 %v11188_v21  ;;  %v6281_v40 = vld [vmem:[#allocation2 + $0x92] sm:$0xff] }
 0x2aa   : > { %10595 = vmatpush3.bf16.msra.mxu1 %v11186_v23 }
 0x2ab   : > { %10628 = vmatprep.subr.bf16.mxu1 %v13598_v24 }
 0x2ac   : > { %10607 = vmatpush3.bf16.msra.mxu0 %v11188_v21 }
 0x2ad   : > { %10597 = vmatmul.mubr.bf16.vlgmr.msra.gmra.mxu1 %v13640_v2  ;;  %10608 = vmatprep.subr.bf16.mxu0 %v11189_v16  ;;  %v11192_v2 = vld [vmem:[#allocation3 + $0x210] sm:$0xff]  }
 0x2ae   : > { %10600 = vmatprep.mubr.bf16.mxu1 %v13659_v57  ;;  %v6285_v57 = vpack.c.bf16 %v6281_v40, %v13729_v28  ;;  %10629 = vmatpush3.bf16.msra.mxu1 %v11195_v60 }
 0x2af   : > { %10577 = vmatmul.mubr.bf16.gmra.mxu0 %v5985_v15  ;;  %10630 = vmatprep.subr.bf16.mxu1 %v13598_v24 }
 0x2b0   : > { %10609 = vmatpush3.bf16.msra.mxu0 %v11189_v16  ;;  %10620 = vmatprep.mubr.bf16.mxu0 %v13685_v34  ;;  %v11199_v34 = vld [vmem:[%s14396_s5 + $0x28] sm:$0xff]  }
 0x2b1   : > { %10610 = vmatprep.subr.bf16.mxu0 %v11190_v61 }
 0x2b2   : > { %10631 = vmatpush3.bf16.msra.mxu1 %v11197_v22 }
 0x2b3   : > { %10632 = vmatprep.subr.bf16.mxu1 %v13598_v24 }
 0x2b4   : > { %10611 = vmatpush3.bf16.msra.mxu0 %v11190_v61 }
 0x2b5   : > { %10601 = vmatmul.mubr.bf16.gmra.mxu1 %v6135_v3  ;;  %10612 = vmatprep.subr.bf16.mxu0 %v11191_v58 }
 0x2b6   : > { %10633 = vmatpush3.bf16.msra.mxu1 %v11199_v34  ;;  %10644 = vmatprep.mubr.msk.bf16.mxu1 %vm11521_vm3, %v13598_v24 }
 0x2b7   : > { %10634 = vmatprep.subr.bf16.mxu1 %v13598_v24 }
 0x2b8   : > { %10613 = vmatpush3.bf16.msra.mxu0 %v11191_v58 }
 0x2b9   : > { %10614 = vmatprep.subr.bf16.mxu0 %v11192_v2 }
 0x2bc   : > { %10615 = vmatpush3.bf16.msra.mxu0 %v11192_v2 }
 0x2bd   : > { %10616 = vmatprep.subr.bf16.mxu0 %v11193_v51 }
 0x2c0   : > { %10617 = vmatpush3.bf16.msra.mxu0 %v11193_v51 }
 0x2c1   : > { %10618 = vmatprep.subr.bf16.mxu0 %v11194_v48 }
 0x2c4   : > { %10619 = vmatpush3.bf16.msra.mxu0 %v11194_v48 }
 0x2c5   : > { %10648 = vmatprep.subr.bf16.mxu0 %v13598_v24 }
 0x2c7   : > { %10621 = vmatmul.mubr.bf16.vlgmr.msra.gmra.mxu0 %v13691_v18  ;;  %v11201_v18 = vld [vmem:[%s14396_s5 + $0x20] sm:$0xff]  }
 0x2c8   : > { %10624 = vmatprep.mubr.bf16.mxu0 %v13704_v4  ;;  %10649 = vmatpush3.bf16.msra.mxu0 %v11196_v62  ;;  %v11205_v4 = vld [vmem:[%s14396_s5 + $0x10] sm:$0xff]  }
 0x2c9   : > { %10650 = vmatprep.subr.bf16.mxu0 %v13598_v24  ;;  %10635 = vmatpush3.bf16.msra.mxu1 %v11201_v18 }
 0x2ca   : > { %10636 = vmatprep.subr.bf16.mxu1 %v13598_v24 }
 0x2cc   : > { %10651 = vmatpush3.bf16.msra.mxu0 %v11198_v59 }
 0x2cd   : > { %10652 = vmatprep.subr.bf16.mxu0 %v13598_v24  ;;  %10637 = vmatpush3.bf16.msra.mxu1 %v11203_v25 }
 0x2ce   : > { %10638 = vmatprep.subr.bf16.mxu1 %v13598_v24 }
 0x2cf   : > { %10625 = vmatmul.mubr.bf16.gmra.mxu0 %v6285_v57 }
 0x2d0   : > { %10653 = vmatpush3.bf16.msra.mxu0 %v11200_v36  ;;  %10664 = vmatprep.mubr.msk.bf16.mxu0 %vm11521_vm3, %v13598_v24 }
 0x2d1   : > { %10654 = vmatprep.subr.bf16.mxu0 %v13598_v24  ;;  %10639 = vmatpush3.bf16.msra.mxu1 %v11205_v4 }
 0x2d2   : > { %10640 = vmatprep.subr.bf16.mxu1 %v13598_v24 }
 0x2d4   : > { %10655 = vmatpush3.bf16.msra.mxu0 %v11202_v7 }
 0x2d5   : > { %10656 = vmatprep.subr.bf16.mxu0 %v13598_v24  ;;  %10641 = vmatpush3.bf16.msra.mxu1 %v11207_v43 }
 0x2d6   : > { %10642 = vmatprep.subr.bf16.mxu1 %v13598_v24 }
 0x2d8   : > { %10657 = vmatpush3.bf16.msra.mxu0 %v11204_v33 }
 0x2d9   : > { %10658 = vmatprep.subr.bf16.mxu0 %v13598_v24  ;;  %10643 = vmatpush3.bf16.msra.mxu1 %v11209_v47 }
 0x2da   : > { %10668 = vmatprep.subr.bf16.mxu1 %v13598_v24 }
 0x2dc   : > { %10659 = vmatpush3.bf16.msra.mxu0 %v11206_v11 }
 0x2dd   : > { %10660 = vmatprep.subr.bf16.mxu0 %v13598_v24 }
 0x2e0   : > { %10661 = vmatpush3.bf16.msra.mxu0 %v11208_v56 }
 0x2e1   : > { %10662 = vmatprep.subr.bf16.mxu0 %v13598_v24 }
 0x2e4   : > { %10663 = vmatpush3.bf16.msra.mxu0 %v11210_v13 }
 0x2e5   : > { %10688 = vmatprep.subr.bf16.mxu0 %v13598_v24 }
 0x305   : > { %v10430_v46 = vpop.f32.mrf.mxu0 }
 0x307   : > { %v13785_v35 = vpop.f32.mrf.mxu0 }
 0x309   : > { %v10431_v30 = vpop.f32.mrf.mxu0 }
 0x30b   : > { %v13802_v55 = vpop.f32.mrf.mxu0 }
 0x30c   : > { %v10454_v9 = vpop.f32.mrf.mxu1 }
 0x30d   : > { %v5351_v39 = vadd.f32 %v10454_v9, %v10430_v46 }
 0x30e   : > { %v13788_v42 = vpop.f32.mrf.mxu1 }
 0x310   : > { %v10455_v17 = vpop.f32.mrf.mxu1 }
 0x311   : > { %v5354_v6 = vadd.f32 %v10455_v17, %v10431_v30 }
 0x312   : > { %v13816_v27 = vpop.f32.mrf.mxu1 }
 0x315   : > { %v10434_v32 = vpop.f32.mrf.mxu0 }
 0x317   : > { %v5245_v12 = vpop.f32.mrf.mxu0 }
 0x319   : > { %v10435_v44 = vpop.f32.mrf.mxu0 }
 0x31b   : > { %v5248_v0 = vpop.f32.mrf.mxu0 }
 0x31d   : > { %v10458_v5 = vpop.f32.mrf.mxu1 }
 0x31e   : > { %v5367_v49 = vadd.f32 %v10458_v5, %v10434_v32 }
 0x31f   : > { %v5358_v19 = vpop.f32.mrf.mxu1 }
 0x320   : > { %v5359_v52 = vadd.f32 %v5358_v19, %v5245_v12 }
 0x321   : > { %v10459_v53 = vpop.f32.mrf.mxu1 }
 0x322   : > { %v5370_v31 = vadd.f32 %v10459_v53, %v10435_v44 }
 0x323   : > { %v5361_v45 = vpop.f32.mrf.mxu1 }
 0x324   : > { %v5362_v26 = vadd.f32 %v5361_v45, %v5248_v0 }
 0x326   : > { %v10478_v10 = vpop.f32.mrf.mxu0 }
 0x327   : > { %v5517_v14 = vadd.f32 %v10478_v10, %v5351_v39 }
 0x328   : > { %v13823_v28 = vpop.f32.mrf.mxu0 }
 0x32a   : > { %v10479_v41 = vpop.f32.mrf.mxu0 }
 0x32b   : > { %v5518_v38 = vadd.f32 %v10479_v41, %v5354_v6 }
 0x32c   : > { %v13825_v29 = vpop.f32.mrf.mxu0 }
 0x32d   : > { %v10502_v37 = vpop.f32.mrf.mxu1 }
 0x32e   : > { %v5667_v54 = vadd.f32 %v10502_v37, %v5517_v14 }
 0x32f   : > { %v13827_v20 = vpop.f32.mrf.mxu1  ;;  %v10482_v63 = vpop.f32.mrf.mxu0 }
 0x330   : > { %v5521_v1 = vadd.f32 %v10482_v63, %v5367_v49 }
 0x331   : > { %v10503_v50 = vpop.f32.mrf.mxu1  ;;  %v5500_v23 = vpop.f32.mrf.mxu0 }
 0x332   : > { %v5668_v21 = vadd.f32 %v10503_v50, %v5518_v38  ;;  %v5519_v16 = vadd.f32 %v5500_v23, %v5359_v52 }
 0x333   : > { %v13829_v15 = vpop.f32.mrf.mxu1  ;;  %v10483_v61 = vpop.f32.mrf.mxu0 }
 0x334   : > { %v5522_v8 = vadd.f32 %v10483_v61, %v5370_v31 }
 0x335   : > { %v10506_v58 = vpop.f32.mrf.mxu1  ;;  %v5503_v3 = vpop.f32.mrf.mxu0 }
 0x336   : > { %v5671_v2 = vadd.f32 %v10506_v58, %v5521_v1  ;;  %v5520_v51 = vadd.f32 %v5503_v3, %v5362_v26 }
 0x337   : > { %v5650_v48 = vpop.f32.mrf.mxu1 }
 0x338   : > { %v5669_v40 = vadd.f32 %v5650_v48, %v5519_v16 }
 0x339   : > { %v10507_v57 = vpop.f32.mrf.mxu1 }
 0x33a   : > { %v5672_v60 = vadd.f32 %v10507_v57, %v5522_v8 }
 0x33b   : > { %v5653_v62 = vpop.f32.mrf.mxu1 }
 0x33c   : > { %v5670_v22 = vadd.f32 %v5653_v62, %v5520_v51  ;;  %v5343_v62 = vadd.f32 %v13788_v42, %v13785_v35  ;;  %v8924_v35 = vld [vmem:[%s14395_s4] ss:$0 sm:$0xff] }
 0x347   : > { %v10526_v59 = vpop.f32.mrf.mxu0 }
 0x348   : > { %v5817_v34 = vadd.f32 %v10526_v59, %v5667_v54  ;;  %v5346_v59 = vadd.f32 %v13816_v27, %v13802_v55 }
 0x349   : > { %v5784_v36 = vpop.f32.mrf.mxu0 }
 0x34b   : > { %v10527_v18 = vpop.f32.mrf.mxu0 }
 0x34c   : > { %v5818_v7 = vadd.f32 %v10527_v18, %v5668_v21  ;;  %v5516_v18 = vadd.f32 %v13825_v29, %v5346_v59  ;;  %v11212_v59 = vld [vmem:[%s14396_s5 + $0xf8] sm:$0xff]  }
 0x34d   : > { %v10550_v46 = vpop.f32.mrf.mxu1  ;;  %v5787_v25 = vpop.f32.mrf.mxu0 }
 0x34e   : > { %v5967_v33 = vadd.f32 %v10550_v46, %v5817_v34  ;;  %v5666_v46 = vadd.f32 %v13829_v15, %v5516_v18 }
 0x34f   : > { %v5934_v9 = vpop.f32.mrf.mxu1  ;;  %v10530_v39 = vpop.f32.mrf.mxu0 }
 0x350   : > { %v5821_v4 = vadd.f32 %v10530_v39, %v5671_v2  ;;  %v5816_v39 = vadd.f32 %v5787_v25, %v5666_v46 }
 0x351   : > { %v10551_v30 = vpop.f32.mrf.mxu1  ;;  %v5800_v17 = vpop.f32.mrf.mxu0 }
 0x352   : > { %v5968_v11 = vadd.f32 %v10551_v30, %v5818_v7  ;;  %v5819_v6 = vadd.f32 %v5800_v17, %v5669_v40 }
 0x353   : > { %v5937_v43 = vpop.f32.mrf.mxu1  ;;  %v10531_v56 = vpop.f32.mrf.mxu0 }
 0x354   : > { %v5822_v32 = vadd.f32 %v10531_v56, %v5672_v60  ;;  %v5966_v42 = vadd.f32 %v5937_v43, %v5816_v39 }
 0x355   : > { %v10554_v47 = vpop.f32.mrf.mxu1  ;;  %v5803_v13 = vpop.f32.mrf.mxu0 }
 0x356   : > { %v5971_v12 = vadd.f32 %v10554_v47, %v5821_v4  ;;  %v5820_v5 = vadd.f32 %v5803_v13, %v5670_v22  ;;  %v5515_v22 = vadd.f32 %v13823_v28, %v5343_v62 }
 0x357   : > { %v5950_v49 = vpop.f32.mrf.mxu1 }
 0x358   : > { %v5969_v19 = vadd.f32 %v5950_v49, %v5819_v6  ;;  %v5665_v34 = vadd.f32 %v13827_v20, %v5515_v22 }
 0x359   : > { %v10555_v44 = vpop.f32.mrf.mxu1 }
 0x35a   : > { %v5972_v52 = vadd.f32 %v10555_v44, %v5822_v32  ;;  %v5815_v7 = vadd.f32 %v5784_v36, %v5665_v34 }
 0x35b   : > { %v5953_v53 = vpop.f32.mrf.mxu1 }
 0x35c   : > { %v5970_v31 = vadd.f32 %v5953_v53, %v5820_v5 }
 0x367   : > { %v10574_v0 = vpop.f32.mrf.mxu0 }
 0x368   : > { %v6118_v45 = vadd.f32 %v10574_v0, %v5967_v33  ;;  %v5965_v33 = vadd.f32 %v5934_v9, %v5815_v7 }
 0x369   : > { %v6085_v26 = vpop.f32.mrf.mxu0 }
 0x36a   : > { %v6116_v4 = vadd.f32 %v6085_v26, %v5965_v33  ;;  %v11213_v33 = vld [vmem:[%s14396_s5 + $0xb0] sm:$0xff]  }
 0x36b   : > { %v10575_v10 = vpop.f32.mrf.mxu0 }
 0x36c   : > { %v6119_v14 = vadd.f32 %v10575_v10, %v5968_v11 }
 0x36d   : > { %v10598_v41 = vpop.f32.mrf.mxu1  ;;  %v6088_v38 = vpop.f32.mrf.mxu0 }
 0x36e   : > { %v6268_v37 = vadd.f32 %v10598_v41, %v6118_v45  ;;  %v6117_v55 = vadd.f32 %v6088_v38, %v5966_v42  ;;  %v11214_v42 = vld [vmem:[%s14396_s5 + $0xf0] sm:$0xff]  }
 0x36f   : > { %v6235_v54 = vpop.f32.mrf.mxu1  ;;  %v10578_v63 = vpop.f32.mrf.mxu0 }
 0x370   : > { %v6122_v1 = vadd.f32 %v10578_v63, %v5971_v12  ;;  %v6266_v28 = vadd.f32 %v6235_v54, %v6116_v4  ;;  %v13861_v4 = vld [vmem:[#allocation2] sm:$0xff] }
 0x371   : > { %v10599_v50 = vpop.f32.mrf.mxu1  ;;  %v6101_v23 = vpop.f32.mrf.mxu0 }
 0x372   : > { %v6269_v21 = vadd.f32 %v10599_v50, %v6119_v14  ;;  %v6120_v16 = vadd.f32 %v6101_v23, %v5969_v19 }
 0x373   : > { %v6238_v61 = vpop.f32.mrf.mxu1  ;;  %v10579_v8 = vpop.f32.mrf.mxu0 }
 0x374   : > { %v6123_v58 = vadd.f32 %v10579_v8, %v5972_v52  ;;  %v6267_v29 = vadd.f32 %v6238_v61, %v6117_v55  ;;  %v11218_v55 = vld [vmem:[%s14396_s5 + $0xe0] sm:$0xff]  }
 0x375   : > { %v10602_v3 = vpop.f32.mrf.mxu1  ;;  %v6104_v2 = vpop.f32.mrf.mxu0 }
 0x376   : > { %v6272_v51 = vadd.f32 %v10602_v3, %v6122_v1  ;;  %v6121_v48 = vadd.f32 %v6104_v2, %v5970_v31 }
 0x377   : > { %v6251_v40 = vpop.f32.mrf.mxu1 }
 0x378   : > { %v6270_v5 = vadd.f32 %v6251_v40, %v6120_v16 }
 0x379   : > { %v10603_v57 = vpop.f32.mrf.mxu1 }
 0x37a   : > { %v6273_v60 = vadd.f32 %v10603_v57, %v6123_v58  ;;  %v11211_v57 = vld [vmem:[%s14396_s5 + $0xb8] sm:$0xff]  }
 0x37b   : > { %v6254_v52 = vpop.f32.mrf.mxu1 }
 0x37c   : > { %v6271_v63 = vadd.f32 %v6254_v52, %v6121_v48  ;;  %v11235_v52 = vld [vmem:[%s14396_s5 + $0x118] sm:$0xff]  }
 0x387   : > { %v10622_v30 = vpop.f32.mrf.mxu0 }
 0x388   : > { %v6418_v17 = vadd.f32 %v10622_v30, %v6268_v37 }
 0x389   : > { %v6385_v11 = vpop.f32.mrf.mxu0 }
 0x38a   : > { %v6433_v27 = vadd.f32 %v8924_v35, %v6418_v17  ;;  %v6416_v20 = vadd.f32 %v6385_v11, %v6266_v28  ;;  %v11215_v28 = vld [vmem:[%s14396_s5 + $0xa8] sm:$0xff]   ;;  %v11217_v11 = vld [vmem:[%s14396_s5 + $0xa0] sm:$0xff]  }
 0x38b   : > { %v10623_v6 = vpop.f32.mrf.mxu0  ;;  %v11216_v17 = vld [vmem:[%s14396_s5 + $0xe8] sm:$0xff]  }
 0x38c   : > { %v6441_v36 = vmax.f32 %v6433_v27, 0.0  ;;  %v6431_v56 = vadd.f32 %v8924_v35, %v6416_v20  ;;  %v6419_v15 = vadd.f32 %v10623_v6, %v6269_v21  ;;  %v11219_v27 = vld [vmem:[%s14396_s5 + $0x98] sm:$0xff]   ;;  %v11221_v6 = vld [vmem:[%s14396_s5 + $0x90] sm:$0xff]  }
 0x38d   : > { %v6388_v9 = vpop.f32.mrf.mxu0  ;;  %v11220_v20 = vld [vmem:[%s14396_s5 + $0xd8] sm:$0xff]  }
 0x38e   : > { %v6439_v25 = vmax.f32 %v6431_v56, 0.0  ;;  %v6434_v32 = vadd.f32 %v8924_v35, %v6419_v15  ;;  %v6417_v47 = vadd.f32 %v6388_v9, %v6267_v29  ;;  %v6889_v13 = vrot.slane %v6441_v36, 1  ;;  %v11222_v29 = vld [vmem:[%s14396_s5 + $0xd0] sm:$0xff]   ;;  %v11224_v56 = vld [vmem:[%s14396_s5 + $0xc8] sm:$0xff]   ;;  %v11225_v15 = vld [vmem:[%s14396_s5 + $0x80] sm:$0xff]  }
 0x38f   : > { %v10626_v12 = vpop.f32.mrf.mxu0  ;;  %v11226_v9 = vld [vmem:[%s14396_s5 + $0xc0] sm:$0xff]  }
 0x390   : > { %v6442_v49 = vmax.f32 %v6434_v32, 0.0  ;;  %v6432_v43 = vadd.f32 %v8924_v35, %v6417_v47  ;;  %v6422_v19 = vadd.f32 %v10626_v12, %v6272_v51  ;;  %v6449_v53 = vrot.slane %v6439_v25, 1  ;;  %v11228_v47 = vld [vmem:[%s14396_s5 + $0x178] sm:$0xff]   ;;  %v11229_v12 = vld [vmem:[%s14396_s5 + $0x130] sm:$0xff]  }
 0x391   : > { %v6401_v44 = vpop.f32.mrf.mxu0  ;;  %v6891_v26 = vmax.f32 %v6441_v36, %v6889_v13  ;;  %v11223_v36 = vld [vmem:[%s14396_s5 + $0x88] sm:$0xff]  }
 0x392   : > { %v6893_v31 = vrot.slane %v6442_v49, 1  ;;  %v6440_v0 = vmax.f32 %v6432_v43, 0.0  ;;  %v6420_v45 = vadd.f32 %v6401_v44, %v6270_v5  ;;  %v6437_v10 = vadd.f32 %v8924_v35, %v6422_v19  ;;  %v11230_v5 = vld [vmem:[%s14396_s5 + $0x170] sm:$0xff]   ;;  %v11232_v43 = vld [vmem:[%s14396_s5 + $0x168] sm:$0xff]   ;;  %v11233_v19 = vld [vmem:[%s14396_s5 + $0x120] sm:$0xff]  }
 0x393   : > { %v10627_v14 = vpop.f32.mrf.mxu0  ;;  %v6451_v23 = vmax.f32 %v6439_v25, %v6449_v53  ;;  %v11227_v25 = vld [vmem:[%s14396_s5 + $0x138] sm:$0xff]   ;;  %v11234_v44 = vld [vmem:[%s14396_s5 + $0x160] sm:$0xff]  }
 0x394   : > { %v6895_v41 = vmax.f32 %v6442_v49, %v6893_v31  ;;  %v6453_v38 = vrot.slane %v6440_v0, 1  ;;  %v6435_v37 = vadd.f32 %v8924_v35, %v6420_v45  ;;  %v6423_v54 = vadd.f32 %v10627_v14, %v6273_v60  ;;  %v11231_v49 = vld [vmem:[%s14396_s5 + $0x128] sm:$0xff]   ;;  %v11236_v53 = vld [vmem:[%s14396_s5 + $0x158] sm:$0xff]   ;;  %v11237_v31 = vld [vmem:[%s14396_s5 + $0x110] sm:$0xff]  }
 0x395   : > { %v6445_v1 = vmax.f32 %v6437_v10, 0.0  ;;  %v6404_v50 = vpop.f32.mrf.mxu0  ;;  %v11239_v45 = vld [vmem:[%s14396_s5 + $0x108] sm:$0xff]   ;;  %v11241_v10 = vld [vmem:[%s14396_s5 + $0x100] sm:$0xff]  }
 0x396   : > { %v13842_v21 = vmax.f32 %v6891_v26, %v6895_v41  ;;  %v6455_v16 = vmax.f32 %v6440_v0, %v6453_v38  ;;  %v6438_v61 = vadd.f32 %v8924_v35, %v6423_v54  ;;  %v6443_v8 = vmax.f32 %v6435_v37, 0.0  ;;  %v11238_v0 = vld [vmem:[%s14396_s5 + $0x150] sm:$0xff]   ;;  %v11240_v26 = vld [vmem:[%s14396_s5 + $0x148] sm:$0xff]   ;;  %v11242_v14 = vld [vmem:[%s14396_s5 + $0x140] sm:$0xff]  }
 0x397   : > { %v6421_v58 = vadd.f32 %v6404_v50, %v6271_v63  ;;  %v7771_v2 = vrot.slane %v6445_v1, 1  ;;  %v11243_v38 = vld [vmem:[%s14396_s5 + $0x1b8] sm:$0xff]   ;;  %v11245_v63 = vld [vmem:[%s14396_s5 + $0x1b0] sm:$0xff]   ;;  %v11247_v50 = vld [vmem:[%s14396_s5 + $0x1a8] sm:$0xff]  }
 0x398   : > { %v6456_v3 = vmax.f32 %v6451_v23, %v6455_v16  ;;  %v6446_v51 = vmax.f32 %v6438_v61, 0.0  ;;  %v7330_v60 = vrot.slane %v6443_v8, 1  ;;  %v13991_v41 = vpack.c.bf16 %v13842_v21, %v13842_v21  ;;  %v11244_v37 = vld [vmem:[%s14396_s5 + $0x1f8] sm:$0xff]   ;;  %v11248_v23 = vld [vmem:[%s14396_s5 + $0x1e8] sm:$0xff]   ;;  %v11249_v21 = vld [vmem:[%s14396_s5 + $0x1a0] sm:$0xff]  }
 0x399   : > { %v6436_v40 = vadd.f32 %v8924_v35, %v6421_v58  ;;  %v7773_v18 = vmax.f32 %v6445_v1, %v7771_v2  ;;  %v11246_v1 = vld [vmem:[%s14396_s5 + $0x1f0] sm:$0xff]   ;;  %v11250_v16 = vld [vmem:[%s14396_s5 + $0x1e0] sm:$0xff]   ;;  %v11251_v61 = vld [vmem:[%s14396_s5 + $0x198] sm:$0xff]  }
 0x39a   : > { %v13847_v62 = vpack.c.bf16 %v6456_v3, %v6456_v3  ;;  %v7775_v48 = vrot.slane %v6446_v51, 1  ;;  %v7332_v30 = vmax.f32 %v6443_v8, %v7330_v60  ;;  %v7022_v54 = vrot.slane %v13991_v41, 1  ;;  %v11252_v8 = vld [vmem:[%s14396_s5 + $0x1d8] sm:$0xff]   ;;  %v11253_v58 = vld [vmem:[%s14396_s5 + $0x190] sm:$0xff]   ;;  %v11255_v2 = vld [vmem:[%s14396_s5 + $0x188] sm:$0xff]  }
 0x39b   : > { %v6444_v22 = vmax.f32 %v6436_v40, 0.0  ;;  %v11254_v3 = vld [vmem:[%s14396_s5 + $0x1d0] sm:$0xff]   ;;  %v11257_v40 = vld [vmem:[%s14396_s5 + $0x180] sm:$0xff]   ;;  %v11260_v60 = vld [vmem:[%s14396_s5 + $0x278] sm:$0xff]  }
 0x39c   : > { %v6581_v34 = vrot.slane %v13847_v62, 1  ;;  %v7777_v7 = vmax.f32 %v6446_v51, %v7775_v48  ;;  %10645 = vmatmul.mubr.bf16.vlgmr.msra.gmra.mxu1 %v13847_v62  ;;  %v6689_v32 = vrot.slane %v13847_v62, 2  ;;  %v6797_v13 = vrot.slane %v13847_v62, 3  ;;  %v11256_v51 = vld [vmem:[%s14396_s5 + $0x1c8] sm:$0xff]   ;;  %v11259_v62 = vld [vmem:[%s14396_s5 + $0x238] sm:$0xff]  }
 0x39d   : > { %v7334_v46 = vrot.slane %v6444_v22, 1  ;;  %10669 = vmatpush3.bf16.msra.mxu1 %v11211_v57  ;;  %10684 = vmatprep.mubr.msk.bf16.mxu1 %vm11521_vm3, %v13598_v24  ;;  %v11258_v57 = vld [vmem:[%s14396_s5 + $0x1c0] sm:$0xff]   ;;  %v7130_v48 = vrot.slane %v13991_v41, 2 }
 0x39e   : > { %v13859_v39 = vmax.f32 %v7773_v18, %v7777_v7  ;;  %10665 = vmatmul.mubr.bf16.vlgmr.msra.gmra.mxu0 %v6581_v34  ;;  %10670 = vmatprep.subr.bf16.mxu1 %v13861_v4  ;;  %v11262_v34 = vld [vmem:[%s14396_s5 + $0x270] sm:$0xff]   ;;  %v11263_v18 = vld [vmem:[%s14396_s5 + $0x228] sm:$0xff]  }
 0x39f   : > { %v7336_v35 = vmax.f32 %v6444_v22, %v7334_v46  ;;  %10689 = vmatpush3.bf16.msra.mxu0 %v11212_v59  ;;  %10704 = vmatprep.mubr.msk.bf16.mxu0 %vm11521_vm3, %v13861_v4  ;;  %v7238_v22 = vrot.slane %v13991_v41, 3  ;;  %v11261_v59 = vld [vmem:[%s14396_s5 + $0x230] sm:$0xff]   ;;  %v11264_v7 = vld [vmem:[%s14396_s5 + $0x268] sm:$0xff]   ;;  %v11265_v46 = vld [vmem:[%s14396_s5 + $0x220] sm:$0xff]  }
 0x3a0   : > { %10690 = vmatprep.subr.bf16.mxu0 %v13861_v4 }
 0x3a1   : > { %v13870_v24 = vmax.f32 %v7332_v30, %v7336_v35  ;;  %10671 = vmatpush3.bf16.msra.mxu1 %v11213_v33  ;;  %v11266_v33 = vld [vmem:[%s14396_s5 + $0x260] sm:$0xff]   ;;  %v11267_v30 = vld [vmem:[%s14396_s5 + $0x218] sm:$0xff]  }
 0x3a2   : > { %10672 = vmatprep.subr.bf16.mxu1 %v13861_v4  ;;  %v11268_v35 = vld [vmem:[%s14396_s5 + $0x258] sm:$0xff]  }
 0x3a3   : > { %10691 = vmatpush3.bf16.msra.mxu0 %v11214_v42  ;;  %v11269_v42 = vld [vmem:[%s14396_s5 + $0x210] sm:$0xff]  }
 0x3a4   : > { %10692 = vmatprep.subr.bf16.mxu0 %v13861_v4 }
 0x3a5   : > { %10673 = vmatpush3.bf16.msra.mxu1 %v11215_v28  ;;  %v11270_v28 = vld [vmem:[%s14396_s5 + $0x250] sm:$0xff]  }
 0x3a6   : > { %10674 = vmatprep.subr.bf16.mxu1 %v13861_v4 }
 0x3a7   : > { %10693 = vmatpush3.bf16.msra.mxu0 %v11216_v17  ;;  %v11271_v17 = vld [vmem:[%s14396_s5 + $0x208] sm:$0xff]  }
 0x3a8   : > { %10694 = vmatprep.subr.bf16.mxu0 %v13861_v4 }
 0x3a9   : > { %10675 = vmatpush3.bf16.msra.mxu1 %v11217_v11  ;;  %v11272_v11 = vld [vmem:[%s14396_s5 + $0x248] sm:$0xff]  }
 0x3aa   : > { %10676 = vmatprep.subr.bf16.mxu1 %v13861_v4 }
 0x3ab   : > { %10695 = vmatpush3.bf16.msra.mxu0 %v11218_v55  ;;  %v11273_v55 = vld [vmem:[%s14396_s5 + $0x200] sm:$0xff]  }
 0x3ac   : > { %10696 = vmatprep.subr.bf16.mxu0 %v13861_v4 }
 0x3ad   : > { %10677 = vmatpush3.bf16.msra.mxu1 %v11219_v27  ;;  %v11274_v27 = vld [vmem:[%s14396_s5 + $0x240] sm:$0xff]  }
 0x3ae   : > { %10678 = vmatprep.subr.bf16.mxu1 %v13861_v4 }
 0x3af   : > { %10697 = vmatpush3.bf16.msra.mxu0 %v11220_v20  ;;  %v14135_v20 = vpack.c.bf16 %v13870_v24, %v13870_v24  ;;  %v11277_v24 = vld [vmem:[%s14396_s5 + $0x2b0] sm:$0xff]  }
 0x3b0   : > { %10698 = vmatprep.subr.bf16.mxu0 %v13861_v4 }
 0x3b1   : > { %10679 = vmatpush3.bf16.msra.mxu1 %v11221_v6  ;;  %v11275_v6 = vld [vmem:[%s14396_s5 + $0x2b8] sm:$0xff]  }
 0x3b2   : > { %10680 = vmatprep.subr.bf16.mxu1 %v13861_v4 }
 0x3b3   : > { %10699 = vmatpush3.bf16.msra.mxu0 %v11222_v29  ;;  %v11276_v29 = vld [vmem:[%s14396_s5 + $0x2f8] sm:$0xff]  }
 0x3b4   : > { %10700 = vmatprep.subr.bf16.mxu0 %v13861_v4 }
 0x3b5   : > { %10681 = vmatpush3.bf16.msra.mxu1 %v11223_v36  ;;  %v7463_v36 = vrot.slane %v14135_v20, 1 }
 0x3b6   : > { %10682 = vmatprep.subr.bf16.mxu1 %v13861_v4 }
 0x3b7   : > { %10701 = vmatpush3.bf16.msra.mxu0 %v11224_v56  ;;  %v11278_v56 = vld [vmem:[%s14396_s5 + $0x2f0] sm:$0xff]  }
 0x3b8   : > { %10702 = vmatprep.subr.bf16.mxu0 %v13861_v4 }
 0x3b9   : > { %10683 = vmatpush3.bf16.msra.mxu1 %v11225_v15  ;;  %v11279_v15 = vld [vmem:[%s14396_s5 + $0x2a8] sm:$0xff]  }
 0x3ba   : > { %10708 = vmatprep.subr.bf16.mxu1 %v13861_v4 }
 0x3bb   : > { %10703 = vmatpush3.bf16.msra.mxu0 %v11226_v9  ;;  %v11280_v9 = vld [vmem:[%s14396_s5 + $0x2e8] sm:$0xff]  }
 0x3bc   : > { %10685 = vmatmul.mubr.bf16.vlgmr.msra.gmra.mxu1 %v6689_v32  ;;  %10728 = vmatprep.subr.bf16.mxu0 %v13861_v4  ;;  %v11282_v32 = vld [vmem:[%s14396_s5 + $0x2e0] sm:$0xff]  }
 0x3bd   : > { %10709 = vmatpush3.bf16.msra.mxu1 %v11227_v25  ;;  %10724 = vmatprep.mubr.msk.bf16.mxu1 %vm11521_vm3, %v13861_v4  ;;  %v11281_v25 = vld [vmem:[%s14396_s5 + $0x2a0] sm:$0xff]  }
 0x3be   : > { %10705 = vmatmul.mubr.bf16.vlgmr.msra.gmra.mxu0 %v6797_v13  ;;  %10710 = vmatprep.subr.bf16.mxu1 %v13861_v4  ;;  %v11284_v13 = vld [vmem:[%s14396_s5 + $0x2d8] sm:$0xff]  }
 0x3bf   : > { %10729 = vmatpush3.bf16.msra.mxu0 %v11228_v47  ;;  %10744 = vmatprep.mubr.msk.bf16.mxu0 %vm11521_vm3, %v13861_v4  ;;  %v11283_v47 = vld [vmem:[%s14396_s5 + $0x298] sm:$0xff]  }
 0x3c0   : > { %10730 = vmatprep.subr.bf16.mxu0 %v13861_v4 }
 0x3c1   : > { %10711 = vmatpush3.bf16.msra.mxu1 %v11229_v12  ;;  %v11285_v12 = vld [vmem:[%s14396_s5 + $0x290] sm:$0xff]  }
 0x3c2   : > { %10712 = vmatprep.subr.bf16.mxu1 %v13861_v4 }
 0x3c3   : > { %10731 = vmatpush3.bf16.msra.mxu0 %v11230_v5  ;;  %v11286_v5 = vld [vmem:[%s14396_s5 + $0x2d0] sm:$0xff]  }
 0x3c4   : > { %10732 = vmatprep.subr.bf16.mxu0 %v13861_v4 }
 0x3c5   : > { %10713 = vmatpush3.bf16.msra.mxu1 %v11231_v49  ;;  %v11287_v49 = vld [vmem:[%s14396_s5 + $0x288] sm:$0xff]  }
 0x3c6   : > { %10714 = vmatprep.subr.bf16.mxu1 %v13861_v4 }
 0x3c7   : > { %10733 = vmatpush3.bf16.msra.mxu0 %v11232_v43  ;;  %v11288_v43 = vld [vmem:[%s14396_s5 + $0x2c8] sm:$0xff]  }
 0x3c8   : > { %10734 = vmatprep.subr.bf16.mxu0 %v13861_v4 }
 0x3c9   : > { %10715 = vmatpush3.bf16.msra.mxu1 %v11233_v19  ;;  %v11289_v19 = vld [vmem:[%s14396_s5 + $0x280] sm:$0xff]  }
 0x3ca   : > { %10716 = vmatprep.subr.bf16.mxu1 %v13861_v4 }
 0x3cb   : > { %10735 = vmatpush3.bf16.msra.mxu0 %v11234_v44  ;;  %v11290_v44 = vld [vmem:[%s14396_s5 + $0x2c0] sm:$0xff]  }
 0x3cc   : > { %10736 = vmatprep.subr.bf16.mxu0 %v13861_v4 }
 0x3cd   : > { %10717 = vmatpush3.bf16.msra.mxu1 %v11235_v52  ;;  %v11291_v52 = vld [vmem:[%s14396_s5 + $0x338] sm:$0xff]  }
 0x3ce   : > { %10718 = vmatprep.subr.bf16.mxu1 %v13861_v4 }
 0x3cf   : > { %10737 = vmatpush3.bf16.msra.mxu0 %v11236_v53  ;;  %v7571_v53 = vrot.slane %v14135_v20, 2 }
 0x3d0   : > { %10738 = vmatprep.subr.bf16.mxu0 %v13861_v4 }
 0x3d1   : > { %10719 = vmatpush3.bf16.msra.mxu1 %v11237_v31  ;;  %v11292_v31 = vld [vmem:[%s14396_s5 + $0x378] sm:$0xff]  }
 0x3d2   : > { %10720 = vmatprep.subr.bf16.mxu1 %v13861_v4 }
 0x3d3   : > { %10739 = vmatpush3.bf16.msra.mxu0 %v11238_v0  ;;  %v7679_v0 = vrot.slane %v14135_v20, 3 }
 0x3d4   : > { %10740 = vmatprep.subr.bf16.mxu0 %v13861_v4 }
 0x3d5   : > { %10721 = vmatpush3.bf16.msra.mxu1 %v11239_v45  ;;  %v11293_v45 = vld [vmem:[%s14396_s5 + $0x330] sm:$0xff]  }
 0x3d6   : > { %10722 = vmatprep.subr.bf16.mxu1 %v13861_v4 }
 0x3d7   : > { %10741 = vmatpush3.bf16.msra.mxu0 %v11240_v26  ;;  %v11294_v26 = vld [vmem:[%s14396_s5 + $0x370] sm:$0xff]  }
 0x3d8   : > { %10742 = vmatprep.subr.bf16.mxu0 %v13861_v4 }
 0x3d9   : > { %10723 = vmatpush3.bf16.msra.mxu1 %v11241_v10  ;;  %v11295_v10 = vld [vmem:[%s14396_s5 + $0x328] sm:$0xff]  }
 0x3da   : > { %10748 = vmatprep.subr.bf16.mxu1 %v13861_v4 }
 0x3db   : > { %10743 = vmatpush3.bf16.msra.mxu0 %v11242_v14  ;;  %v11296_v14 = vld [vmem:[%s14396_s5 + $0x368] sm:$0xff]  }
 0x3dc   : > { %10725 = vmatmul.mubr.bf16.vlgmr.msra.gmra.mxu1 %v13991_v41  ;;  %10768 = vmatprep.subr.bf16.mxu0 %v13861_v4  ;;  %v11297_v41 = vld [vmem:[%s14396_s5 + $0x320] sm:$0xff]  }
 0x3dd   : > { %10749 = vmatpush3.bf16.msra.mxu1 %v11243_v38  ;;  %10764 = vmatprep.mubr.msk.bf16.mxu1 %vm11521_vm3, %v13861_v4  ;;  %v11298_v38 = vld [vmem:[%s14396_s5 + $0x360] sm:$0xff]  }
 0x3de   : > { %10745 = vmatmul.mubr.bf16.vlgmr.msra.gmra.mxu0 %v7022_v54  ;;  %10750 = vmatprep.subr.bf16.mxu1 %v13861_v4  ;;  %v11300_v54 = vld [vmem:[%s14396_s5 + $0x358] sm:$0xff]  }
 0x3df   : > { %10769 = vmatpush3.bf16.msra.mxu0 %v11244_v37  ;;  %10784 = vmatprep.mubr.msk.bf16.mxu0 %vm11521_vm3, %v13861_v4  ;;  %v11299_v37 = vld [vmem:[%s14396_s5 + $0x318] sm:$0xff]  }
 0x3e0   : > { %10770 = vmatprep.subr.bf16.mxu0 %v13861_v4 }
 0x3e1   : > { %10751 = vmatpush3.bf16.msra.mxu1 %v11245_v63  ;;  %v11301_v63 = vld [vmem:[%s14396_s5 + $0x310] sm:$0xff]  }
 0x3e2   : > { %10752 = vmatprep.subr.bf16.mxu1 %v13861_v4 }
 0x3e3   : > { %10771 = vmatpush3.bf16.msra.mxu0 %v11246_v1  ;;  %v11302_v1 = vld [vmem:[%s14396_s5 + $0x350] sm:$0xff]  }
 0x3e4   : > { %10772 = vmatprep.subr.bf16.mxu0 %v13861_v4 }
 0x3e5   : > { %10753 = vmatpush3.bf16.msra.mxu1 %v11247_v50  ;;  %v11303_v50 = vld [vmem:[%s14396_s5 + $0x308] sm:$0xff]  }
 0x3e6   : > { %10754 = vmatprep.subr.bf16.mxu1 %v13861_v4 }
 0x3e7   : > { %10773 = vmatpush3.bf16.msra.mxu0 %v11248_v23  ;;  %v11304_v23 = vld [vmem:[%s14396_s5 + $0x348] sm:$0xff]  }
 0x3e8   : > { %10774 = vmatprep.subr.bf16.mxu0 %v13861_v4 }
 0x3e9   : > { %10755 = vmatpush3.bf16.msra.mxu1 %v11249_v21  ;;  %v11305_v21 = vld [vmem:[%s14396_s5 + $0x300] sm:$0xff]  }
 0x3ea   : > { %10756 = vmatprep.subr.bf16.mxu1 %v13861_v4 }
 0x3eb   : > { %10775 = vmatpush3.bf16.msra.mxu0 %v11250_v16  ;;  %v11306_v16 = vld [vmem:[%s14396_s5 + $0x340] sm:$0xff]  }
 0x3ec   : > { %10776 = vmatprep.subr.bf16.mxu0 %v13861_v4 }
 0x3ed   : > { %10757 = vmatpush3.bf16.msra.mxu1 %v11251_v61  ;;  %v14279_v61 = vpack.c.bf16 %v13859_v39, %v13859_v39 }
 0x3ee   : > { %10758 = vmatprep.subr.bf16.mxu1 %v13861_v4 }
 0x3ef   : > { %10777 = vmatpush3.bf16.msra.mxu0 %v11252_v8  ;;  %v11307_v8 = vld [vmem:[%s14396_s5 + $0x3b8] sm:$0xff]  }
 0x3f0   : > { %10778 = vmatprep.subr.bf16.mxu0 %v13861_v4 }
 0x3f1   : > { %10759 = vmatpush3.bf16.msra.mxu1 %v11253_v58  ;;  %v6447_v58 = vld [vmem:[%s14397_s6] sm:$0x1] }
 0x3f2   : > { %10760 = vmatprep.subr.bf16.mxu1 %v13861_v4 }
 0x3f3   : > { %10779 = vmatpush3.bf16.msra.mxu0 %v11254_v3  ;;  %v11308_v3 = vld [vmem:[%s14396_s5 + $0x3f8] sm:$0xff]  }
 0x3f4   : > { %10780 = vmatprep.subr.bf16.mxu0 %v13861_v4 }
 0x3f5   : > { %10761 = vmatpush3.bf16.msra.mxu1 %v11255_v2  ;;  %v7904_v2 = vrot.slane %v14279_v61, 1 }
 0x3f6   : > { %10762 = vmatprep.subr.bf16.mxu1 %v13861_v4 }
 0x3f7   : > { %10781 = vmatpush3.bf16.msra.mxu0 %v11256_v51 }
 0x3f8   : > { %10782 = vmatprep.subr.bf16.mxu0 %v13861_v4 }
 0x3f9   : > { %10763 = vmatpush3.bf16.msra.mxu1 %v11257_v40  ;;  %v11309_v40 = vld [vmem:[%s14396_s5 + $0x3b0] sm:$0xff]  }
 0x3fa   : > { %10788 = vmatprep.subr.bf16.mxu1 %v13861_v4 }
 0x3fb   : > { %10783 = vmatpush3.bf16.msra.mxu0 %v11258_v57 }
 0x3fc   : > { %10765 = vmatmul.mubr.bf16.vlgmr.msra.gmra.mxu1 %v7130_v48  ;;  %10808 = vmatprep.subr.bf16.mxu0 %v13861_v4 }
 0x3fd   : > { %10789 = vmatpush3.bf16.msra.mxu1 %v11259_v62  ;;  %10804 = vmatprep.mubr.msk.bf16.mxu1 %vm11521_vm3, %v13861_v4 }
 0x3fe   : > { %10785 = vmatmul.mubr.bf16.vlgmr.msra.gmra.mxu0 %v7238_v22  ;;  %10790 = vmatprep.subr.bf16.mxu1 %v13861_v4 }
 0x3ff   : > { %10809 = vmatpush3.bf16.msra.mxu0 %v11260_v60  ;;  %10824 = vmatprep.mubr.msk.bf16.mxu0 %vm11521_vm3, %v13861_v4  ;;  %v11310_v60 = vld [vmem:[%s14396_s5 + $0x3f0] sm:$0xff]  }
 0x400   : > { %10810 = vmatprep.subr.bf16.mxu0 %v13861_v4 }
 0x401   : > { %10791 = vmatpush3.bf16.msra.mxu1 %v11261_v59 }
 0x402   : > { %10792 = vmatprep.subr.bf16.mxu1 %v13861_v4 }
 0x403   : > { %10811 = vmatpush3.bf16.msra.mxu0 %v11262_v34  ;;  %v11311_v34 = vld [vmem:[%s14396_s5 + $0x3a8] sm:$0xff]  }
 0x404   : > { %10812 = vmatprep.subr.bf16.mxu0 %v13861_v4 }
 0x405   : > { %10793 = vmatpush3.bf16.msra.mxu1 %v11263_v18 }
 0x406   : > { %10794 = vmatprep.subr.bf16.mxu1 %v13861_v4 }
 0x407   : > { %10813 = vmatpush3.bf16.msra.mxu0 %v11264_v7 }
 0x408   : > { %10814 = vmatprep.subr.bf16.mxu0 %v13861_v4 }
 0x409   : > { %10795 = vmatpush3.bf16.msra.mxu1 %v11265_v46  ;;  %v11312_v46 = vld [vmem:[%s14396_s5 + $0x3e8] sm:$0xff]  }
 0x40a   : > { %10796 = vmatprep.subr.bf16.mxu1 %v13861_v4 }
 0x40b   : > { %10815 = vmatpush3.bf16.msra.mxu0 %v11266_v33 }
 0x40c   : > { %10816 = vmatprep.subr.bf16.mxu0 %v13861_v4 }
 0x40d   : > { %10797 = vmatpush3.bf16.msra.mxu1 %v11267_v30  ;;  %v11313_v30 = vld [vmem:[%s14396_s5 + $0x3a0] sm:$0xff]  }
 0x40e   : > { %10798 = vmatprep.subr.bf16.mxu1 %v13861_v4 }
 0x40f   : > { %10817 = vmatpush3.bf16.msra.mxu0 %v11268_v35  ;;  %v11314_v35 = vld [vmem:[%s14396_s5 + $0x3e0] sm:$0xff]  }
 0x410   : > { %10818 = vmatprep.subr.bf16.mxu0 %v13861_v4 }
 0x411   : > { %10799 = vmatpush3.bf16.msra.mxu1 %v11269_v42  ;;  %v11315_v42 = vld [vmem:[%s14396_s5 + $0x398] sm:$0xff]  }
 0x412   : > { %10800 = vmatprep.subr.bf16.mxu1 %v13861_v4 }
 0x413   : > { %10819 = vmatpush3.bf16.msra.mxu0 %v11270_v28  ;;  %v11316_v28 = vld [vmem:[%s14396_s5 + $0x3d8] sm:$0xff]  }
 0x414   : > { %10820 = vmatprep.subr.bf16.mxu0 %v13861_v4 }
 0x415   : > { %10801 = vmatpush3.bf16.msra.mxu1 %v11271_v17  ;;  %v11317_v17 = vld [vmem:[%s14396_s5 + $0x390] sm:$0xff]  }
 0x416   : > { %10802 = vmatprep.subr.bf16.mxu1 %v13861_v4 }
 0x417   : > { %10821 = vmatpush3.bf16.msra.mxu0 %v11272_v11  ;;  %v11318_v11 = vld [vmem:[%s14396_s5 + $0x3d0] sm:$0xff]  }
 0x418   : > { %10822 = vmatprep.subr.bf16.mxu0 %v13861_v4 }
 0x419   : > { %10803 = vmatpush3.bf16.msra.mxu1 %v11273_v55  ;;  %v11319_v55 = vld [vmem:[%s14396_s5 + $0x388] sm:$0xff]  }
 0x41a   : > { %10828 = vmatprep.subr.bf16.mxu1 %v13861_v4 }
 0x41b   : > { %10823 = vmatpush3.bf16.msra.mxu0 %v11274_v27  ;;  %v11320_v27 = vld [vmem:[%s14396_s5 + $0x3c8] sm:$0xff]  }
 0x41c   : > { %10805 = vmatmul.mubr.bf16.vlgmr.msra.gmra.mxu1 %v14135_v20  ;;  %10848 = vmatprep.subr.bf16.mxu0 %v13861_v4  ;;  %v11321_v20 = vld [vmem:[%s14396_s5 + $0x380] sm:$0xff]  }
 0x41d   : > { %10829 = vmatpush3.bf16.msra.mxu1 %v11275_v6  ;;  %10844 = vmatprep.mubr.msk.bf16.mxu1 %vm11521_vm3, %v13861_v4  ;;  %v11322_v6 = vld [vmem:[%s14396_s5 + $0x3c0] sm:$0xff]  }
 0x41e   : > { %10825 = vmatmul.mubr.bf16.vlgmr.msra.gmra.mxu0 %v7463_v36  ;;  %10830 = vmatprep.subr.bf16.mxu1 %v13861_v4 }
 0x41f   : > { %10849 = vmatpush3.bf16.msra.mxu0 %v11276_v29  ;;  %10864 = vmatprep.mubr.msk.bf16.mxu0 %vm11521_vm3, %v13861_v4  ;;  %v8012_v29 = vrot.slane %v14279_v61, 2 }
 0x420   : > { %10850 = vmatprep.subr.bf16.mxu0 %v13861_v4 }
 0x421   : > { %10831 = vmatpush3.bf16.msra.mxu1 %v11277_v24  ;;  %v8120_v24 = vrot.slane %v14279_v61, 3 }
 0x422   : > { %10832 = vmatprep.subr.bf16.mxu1 %v13861_v4 }
 0x423   : > { %10851 = vmatpush3.bf16.msra.mxu0 %v11278_v56 }
 0x424   : > { %10852 = vmatprep.subr.bf16.mxu0 %v13861_v4 }
 0x425   : > { %10833 = vmatpush3.bf16.msra.mxu1 %v11279_v15 }
 0x426   : > { %10834 = vmatprep.subr.bf16.mxu1 %v13861_v4 }
 0x427   : > { %10853 = vmatpush3.bf16.msra.mxu0 %v11280_v9 }
 0x428   : > { %10854 = vmatprep.subr.bf16.mxu0 %v13861_v4 }
 0x429   : > { %10835 = vmatpush3.bf16.msra.mxu1 %v11281_v25 }
 0x42a   : > { %10836 = vmatprep.subr.bf16.mxu1 %v13861_v4 }
 0x42b   : > { %10855 = vmatpush3.bf16.msra.mxu0 %v11282_v32 }
 0x42c   : > { %10856 = vmatprep.subr.bf16.mxu0 %v13861_v4 }
 0x42d   : > { %10837 = vmatpush3.bf16.msra.mxu1 %v11283_v47 }
 0x42e   : > { %10838 = vmatprep.subr.bf16.mxu1 %v13861_v4 }
 0x42f   : > { %10857 = vmatpush3.bf16.msra.mxu0 %v11284_v13 }
 0x430   : > { %10858 = vmatprep.subr.bf16.mxu0 %v13861_v4 }
 0x431   : > { %10839 = vmatpush3.bf16.msra.mxu1 %v11285_v12 }
 0x432   : > { %10840 = vmatprep.subr.bf16.mxu1 %v13861_v4 }
 0x433   : > { %10859 = vmatpush3.bf16.msra.mxu0 %v11286_v5 }
 0x434   : > { %10860 = vmatprep.subr.bf16.mxu0 %v13861_v4 }
 0x435   : > { %10841 = vmatpush3.bf16.msra.mxu1 %v11287_v49 }
 0x436   : > { %10842 = vmatprep.subr.bf16.mxu1 %v13861_v4 }
 0x437   : > { %10861 = vmatpush3.bf16.msra.mxu0 %v11288_v43 }
 0x438   : > { %10862 = vmatprep.subr.bf16.mxu0 %v13861_v4 }
 0x439   : > { %10843 = vmatpush3.bf16.msra.mxu1 %v11289_v19 }
 0x43a   : > { %10868 = vmatprep.subr.bf16.mxu1 %v13861_v4 }
 0x43b   : > { %10863 = vmatpush3.bf16.msra.mxu0 %v11290_v44 }
 0x43c   : > { %10845 = vmatmul.mubr.bf16.vlgmr.msra.gmra.mxu1 %v7571_v53  ;;  %10888 = vmatprep.subr.bf16.mxu0 %v13861_v4 }
 0x43d   : > { %10869 = vmatpush3.bf16.msra.mxu1 %v11291_v52  ;;  %10884 = vmatprep.mubr.msk.bf16.mxu1 %vm11521_vm3, %v13861_v4 }
 0x43e   : > { %10865 = vmatmul.mubr.bf16.vlgmr.msra.gmra.mxu0 %v7679_v0  ;;  %10870 = vmatprep.subr.bf16.mxu1 %v13861_v4 }
 0x43f   : > { %10889 = vmatpush3.bf16.msra.mxu0 %v11292_v31  ;;  %10904 = vmatprep.mubr.msk.bf16.mxu0 %vm11521_vm3, %v13861_v4 }
 0x440   : > { %10890 = vmatprep.subr.bf16.mxu0 %v13861_v4 }
 0x441   : > { %10871 = vmatpush3.bf16.msra.mxu1 %v11293_v45 }
 0x442   : > { %10872 = vmatprep.subr.bf16.mxu1 %v13861_v4 }
 0x443   : > { %10891 = vmatpush3.bf16.msra.mxu0 %v11294_v26 }
 0x444   : > { %10892 = vmatprep.subr.bf16.mxu0 %v13861_v4 }
 0x445   : > { %10873 = vmatpush3.bf16.msra.mxu1 %v11295_v10 }
 0x446   : > { %10874 = vmatprep.subr.bf16.mxu1 %v13861_v4 }
 0x447   : > { %10893 = vmatpush3.bf16.msra.mxu0 %v11296_v14 }
 0x448   : > { %10894 = vmatprep.subr.bf16.mxu0 %v13861_v4 }
 0x449   : > { %10875 = vmatpush3.bf16.msra.mxu1 %v11297_v41 }
 0x44a   : > { %10876 = vmatprep.subr.bf16.mxu1 %v13861_v4 }
 0x44b   : > { %10895 = vmatpush3.bf16.msra.mxu0 %v11298_v38 }
 0x44c   : > { %10896 = vmatprep.subr.bf16.mxu0 %v13861_v4 }
 0x44d   : > { %10877 = vmatpush3.bf16.msra.mxu1 %v11299_v37 }
 0x44e   : > { %10878 = vmatprep.subr.bf16.mxu1 %v13861_v4 }
 0x44f   : > { %10897 = vmatpush3.bf16.msra.mxu0 %v11300_v54 }
 0x450   : > { %10898 = vmatprep.subr.bf16.mxu0 %v13861_v4 }
 0x451   : > { %10879 = vmatpush3.bf16.msra.mxu1 %v11301_v63 }
 0x452   : > { %10880 = vmatprep.subr.bf16.mxu1 %v13861_v4 }
 0x453   : > { %10899 = vmatpush3.bf16.msra.mxu0 %v11302_v1 }
 0x454   : > { %10900 = vmatprep.subr.bf16.mxu0 %v13861_v4 }
 0x455   : > { %10881 = vmatpush3.bf16.msra.mxu1 %v11303_v50 }
 0x456   : > { %10882 = vmatprep.subr.bf16.mxu1 %v13861_v4 }
 0x457   : > { %10901 = vmatpush3.bf16.msra.mxu0 %v11304_v23 }
 0x458   : > { %10902 = vmatprep.subr.bf16.mxu0 %v13861_v4 }
 0x459   : > { %10883 = vmatpush3.bf16.msra.mxu1 %v11305_v21 }
 0x45a   : > { %10908 = vmatprep.subr.bf16.mxu1 %v13861_v4 }
 0x45b   : > { %10903 = vmatpush3.bf16.msra.mxu0 %v11306_v16 }
 0x45c   : > { %10885 = vmatmul.mubr.bf16.vlgmr.msra.gmra.mxu1 %v14279_v61  ;;  %v6556_v39 = vpop.f32.mrf.mxu1  ;;  %10928 = vmatprep.subr.bf16.mxu0 %v13861_v4 }
 0x45d   : > { %v6562_v51 = vadd.f32 %v6556_v39, %v6447_v58  ;;  %10909 = vmatpush3.bf16.msra.mxu1 %v11307_v8  ;;  %10924 = vmatprep.mubr.msk.bf16.mxu1 %vm11521_vm3, %v13861_v4 }
 0x45e   : > { %10905 = vmatmul.mubr.bf16.vlgmr.msra.gmra.mxu0 %v7904_v2  ;;  %v10646_v57 = vpop.f32.mrf.mxu1  ;;  %v6665_v62 = vpop.f32.mrf.mxu0  ;;  %10910 = vmatprep.subr.bf16.mxu1 %v13861_v4 }
 0x45f   : > { %v6671_v48 = vadd.f32 %v6665_v62, %v6562_v51  ;;  %10929 = vmatpush3.bf16.msra.mxu0 %v11308_v3  ;;  %10944 = vmatprep.mubr.msk.bf16.mxu0 %vm11521_vm3, %v13861_v4 }
 0x460   : > { %v6559_v22 = vpop.f32.mrf.mxu1  ;;  %v10666_v59 = vpop.f32.mrf.mxu0  ;;  %10930 = vmatprep.subr.bf16.mxu0 %v13861_v4 }
 0x461   : > { %10911 = vmatpush3.bf16.msra.mxu1 %v11309_v40 }
 0x462   : > { %v10647_v18 = vpop.f32.mrf.mxu1  ;;  %v6668_v7 = vpop.f32.mrf.mxu0  ;;  %10912 = vmatprep.subr.bf16.mxu1 %v13861_v4 }
 0x463   : > { %10931 = vmatpush3.bf16.msra.mxu0 %v11310_v60 }
 0x464   : > { %v10667_v33 = vpop.f32.mrf.mxu0  ;;  %10932 = vmatprep.subr.bf16.mxu0 %v13861_v4 }
 0x465   : > { %10913 = vmatpush3.bf16.msra.mxu1 %v11311_v34 }
 0x466   : > { %10914 = vmatprep.subr.bf16.mxu1 %v13861_v4 }
 0x467   : > { %10933 = vmatpush3.bf16.msra.mxu0 %v11312_v46 }
 0x468   : > { %10934 = vmatprep.subr.bf16.mxu0 %v13861_v4 }
 0x469   : > { %10915 = vmatpush3.bf16.msra.mxu1 %v11313_v30 }
 0x46a   : > { %10916 = vmatprep.subr.bf16.mxu1 %v13861_v4 }
 0x46b   : > { %10935 = vmatpush3.bf16.msra.mxu0 %v11314_v35 }
 0x46c   : > { %10936 = vmatprep.subr.bf16.mxu0 %v13861_v4 }
 0x46d   : > { %10917 = vmatpush3.bf16.msra.mxu1 %v11315_v42 }
 0x46e   : > { %10918 = vmatprep.subr.bf16.mxu1 %v13861_v4 }
 0x46f   : > { %10937 = vmatpush3.bf16.msra.mxu0 %v11316_v28 }
 0x470   : > { %10938 = vmatprep.subr.bf16.mxu0 %v13861_v4 }
 0x471   : > { %10919 = vmatpush3.bf16.msra.mxu1 %v11317_v17 }
 0x472   : > { %10920 = vmatprep.subr.bf16.mxu1 %v13861_v4 }
 0x473   : > { %10939 = vmatpush3.bf16.msra.mxu0 %v11318_v11 }
 0x474   : > { %10940 = vmatprep.subr.bf16.mxu0 %v13861_v4 }
 0x475   : > { %10921 = vmatpush3.bf16.msra.mxu1 %v11319_v55  ;;  %v8211_v55 = vlaneseq }
 0x476   : > { %10922 = vmatprep.subr.bf16.mxu1 %v13861_v4 }
 0x477   : > { %10941 = vmatpush3.bf16.msra.mxu0 %v11320_v27 }
 0x478   : > { %10942 = vmatprep.subr.bf16.mxu0 %v13861_v4 }
 0x479   : > { %10923 = vmatpush3.bf16.msra.mxu1 %v11321_v20  ;;  %v8212_v20 = vand.u32 127, %v8211_v55 }
 0x47b   : > { %10943 = vmatpush3.bf16.msra.mxu0 %v11322_v6  ;;  %vm8213_vm4 = vcmp.lt.s32.totalorder %v8212_v20, 10 }
 0x47c   : > { %v6773_v36 = vpop.f32.mrf.mxu1  ;;  %10925 = vmatmul.mubr.bf16.vlgmr.msra.gmra.mxu1 %v8012_v29 }
 0x47d   : > { %v6779_v56 = vadd.f32 %v6773_v36, %v6671_v48 }
 0x47e   : > { %v10686_v15 = vpop.f32.mrf.mxu1  ;;  %v6881_v9 = vpop.f32.mrf.mxu0  ;;  %10945 = vmatmul.mubr.bf16.vlgmr.msra.gmra.mxu0 %v8120_v24 }
 0x47f   : > { %v6887_v25 = vadd.f32 %v6881_v9, %v6779_v56 }
 0x480   : > { %v6776_v32 = vpop.f32.mrf.mxu1  ;;  %v10706_v47 = vpop.f32.mrf.mxu0 }
 0x482   : > { %v10687_v13 = vpop.f32.mrf.mxu1  ;;  %v6884_v12 = vpop.f32.mrf.mxu0 }
 0x484   : > { %v10707_v5 = vpop.f32.mrf.mxu0 }
 0x49c   : > { %v6997_v49 = vpop.f32.mrf.mxu1 }
 0x49d   : > { %v7003_v4 = vadd.f32 %v6997_v49, %v6887_v25 }
 0x49e   : > { %v10726_v43 = vpop.f32.mrf.mxu1  ;;  %v7106_v19 = vpop.f32.mrf.mxu0 }
 0x49f   : > { %v7112_v44 = vadd.f32 %v7106_v19, %v7003_v4 }
 0x4a0   : > { %v7000_v52 = vpop.f32.mrf.mxu1  ;;  %v10746_v53 = vpop.f32.mrf.mxu0 }
 0x4a2   : > { %v10727_v31 = vpop.f32.mrf.mxu1  ;;  %v7109_v0 = vpop.f32.mrf.mxu0 }
 0x4a4   : > { %v10747_v45 = vpop.f32.mrf.mxu0 }
 0x4bc   : > { %v7214_v26 = vpop.f32.mrf.mxu1 }
 0x4bd   : > { %v7220_v10 = vadd.f32 %v7214_v26, %v7112_v44 }
 0x4be   : > { %v10766_v14 = vpop.f32.mrf.mxu1  ;;  %v7322_v41 = vpop.f32.mrf.mxu0 }
 0x4bf   : > { %v7328_v38 = vadd.f32 %v7322_v41, %v7220_v10 }
 0x4c0   : > { %v7217_v37 = vpop.f32.mrf.mxu1  ;;  %v10786_v54 = vpop.f32.mrf.mxu0 }
 0x4c2   : > { %v10767_v63 = vpop.f32.mrf.mxu1  ;;  %v7325_v1 = vpop.f32.mrf.mxu0 }
 0x4c4   : > { %v10787_v50 = vpop.f32.mrf.mxu0 }
 0x4dc   : > { %v7438_v23 = vpop.f32.mrf.mxu1 }
 0x4dd   : > { %v7444_v21 = vadd.f32 %v7438_v23, %v7328_v38 }
 0x4de   : > { %v10806_v16 = vpop.f32.mrf.mxu1  ;;  %v7547_v61 = vpop.f32.mrf.mxu0 }
 0x4df   : > { %v7553_v8 = vadd.f32 %v7547_v61, %v7444_v21 }
 0x4e0   : > { %v7441_v58 = vpop.f32.mrf.mxu1  ;;  %v10826_v3 = vpop.f32.mrf.mxu0 }
 0x4e2   : > { %v10807_v39 = vpop.f32.mrf.mxu1  ;;  %v7550_v2 = vpop.f32.mrf.mxu0 }
 0x4e4   : > { %v10827_v51 = vpop.f32.mrf.mxu0 }
 0x4fc   : > { %v7655_v40 = vpop.f32.mrf.mxu1 }
 0x4fd   : > { %v7661_v17 = vadd.f32 %v7655_v40, %v7553_v8 }
 0x4fe   : > { %v10846_v57 = vpop.f32.mrf.mxu1  ;;  %v7763_v62 = vpop.f32.mrf.mxu0 }
 0x4ff   : > { %v7769_v11 = vadd.f32 %v7763_v62, %v7661_v17 }
 0x500   : > { %v7658_v48 = vpop.f32.mrf.mxu1  ;;  %v10866_v60 = vpop.f32.mrf.mxu0 }
 0x502   : > { %v10847_v22 = vpop.f32.mrf.mxu1  ;;  %v7766_v59 = vpop.f32.mrf.mxu0 }
 0x504   : > { %v10867_v34 = vpop.f32.mrf.mxu0 }
 0x51c   : > { %v7879_v18 = vpop.f32.mrf.mxu1 }
 0x51d   : > { %v7885_v27 = vadd.f32 %v7879_v18, %v7769_v11 }
 0x51e   : > { %v10886_v7 = vpop.f32.mrf.mxu1  ;;  %v7988_v46 = vpop.f32.mrf.mxu0 }
 0x51f   : > { %v7994_v6 = vadd.f32 %v7988_v46, %v7885_v27 }
 0x520   : > { %v7882_v33 = vpop.f32.mrf.mxu1  ;;  %v10906_v30 = vpop.f32.mrf.mxu0 }
 0x522   : > { %v10887_v35 = vpop.f32.mrf.mxu1  ;;  %v7991_v42 = vpop.f32.mrf.mxu0 }
 0x524   : > { %v10907_v28 = vpop.f32.mrf.mxu0 }
 0x53c   : > { %v8096_v29 = vpop.f32.mrf.mxu1 }
 0x53d   : > { %v8102_v36 = vadd.f32 %v8096_v29, %v7994_v6 }
 0x53e   : > { %v10926_v24 = vpop.f32.mrf.mxu1  ;;  %v8204_v56 = vpop.f32.mrf.mxu0 }
 0x53f   : > { %v8210_v15 = vadd.f32 %v8204_v56, %v8102_v36 }
 0x540   : > { %v8099_v9 = vpop.f32.mrf.mxu1  ;;  %v10946_v25 = vpop.f32.mrf.mxu0 }
 0x541   : > { %v8214_v32 = vsel %vm8213_vm4, %v8210_v15, -1e+30 }
 0x542   : > { %v10927_v47 = vpop.f32.mrf.mxu1  ;;  %v8207_v13 = vpop.f32.mrf.mxu0  ;;  %v8216_v12 = vsel %vm8215_vm5, %v8214_v32, -inf }
 0x543   : > { %8217 = vmax.xlane.f32.xlu0 %v8216_v12 }
 0x544   : > { %v10947_v5 = vpop.f32.mrf.mxu0 }
 0x5cc   : > { %v8218_v49 = vpop.xlane.xlu0 %8217 }
 0x5cd   : > { %v8219_v4 = vsub.f32 %v8214_v32, %v8218_v49 }
 0x5cf   : > { %v8220_v43 = vmul.f32 1.442695, %v8219_v4 }
 0x5d1   : > { %11323 = vpow2.f32 %v8220_v43 }
 0x5de   : > { %v11324_v19 = vpop.eup %11323 }
 0x5df   : > { %v8222_v44 = vsel %vm8215_vm5, %v11324_v19, 0.0 }
 0x5e0   : > { %8223 = vadd.xlane.f32.xlu0 %v8222_v44 }
 0x669   : > { %v8224_v52 = vpop.xlane.xlu0 %8223 }
 0x66a   : > { %11325 = vrcp.f32 %v8224_v52 }
 0x677   : > { %v11326_v53 = vpop.eup %11325 }
 0x678   : > { %v8226_v31 = vmul.f32 %v11326_v53, %v11324_v19 }
 0x67a   : > { %8227 = vst [vmem:[%s285_s29] sm:$0x1] %v8226_v31 }
 0x67b   : > { %11464 = shalt.err (!%p11461_p0)
}
 0x67c   : > { %s11465_s20 = scalar_lea.hbm %s8239_s13, 16  ;;  %s11469_s22 = scalar_lea.hbm %s14398_s7, 32 }
 0x67d   : > { %p11466_p1 = scmp.ne.s32.totalorder %s8239_s13, %s11465_s20  ;;  %p11470_p4 = scmp.lt.s32.totalorder %s8239_s13, %s14398_s7 }
 0x67e   : > { %p11471_p7 = scmp.lt.s32.totalorder %s11469_s22, %s11465_s20 }
 0x67f   : > { %p11467_p2 = pnand %p11466_p1, %p11601_p5 }
 0x680   : > { %p11472_p6 = por %p11471_p7, %p11470_p4 }
 0x681   : > { %p11468_p3 = pneg %p11467_p2 }
 0x683   : > { %p11473_p8 = pnand %p11472_p6, %p11468_p3 }
 0x685   : > { %11476 = shalt.err (!%p11473_p8)
}
 0x686   : > { %10953 = dma.vmem_to_hbm [thread:$0]  (%p11601_p5), %s8242_s8, 16, %s8239_s13, %s8229_s14  }
 0x687 PF: > { %p10965_p9 = scmp.ge.s32.totalorder %s11515_s27, 2  ;;  %s8253_s17 = sand.u32 1, %s11503_s24  }
 0x688   : > { %p14534_p10 = scmp.ne.s32.totalorder %s14407_s12, 0  ;;  %s8254_s9 = scalar_lea.sflag [#allocation5], %s8253_s17 }
 0x68a   : > { %p10960_p11 = pnand %p10965_p9, %p14534_p10 }
 0x68c   : > { %p10961_p12 = pneg %p10960_p11 }
 0x68e   : > { %11498 = dma.done.wait (%p10961_p12), %s8254_s9, 16  }
 0x68f   : > { %11500 = vsyncadd (%p10961_p12), %s8254_s9, 4294967280  ;;  %p18_p13 = scmp.ge.s32.totalorder %s11588_s30, 4   ;;  %s14535_s24 = smov %s11507_s25 }
 0x690   : > { %s14536_s25 = smov %s11511_s26  ;;  %s14537_s26 = smov %s11599_s10 }
 0x691   : > { %s14538_s27 = smov %s11588_s30  ;;  %20 = sbr.rel (!%p18_p13) target bundleno = 4 (0x4), region = 126 }
 0x696   :  { %8258 = vsyncpa [#allocation4], 1 }
 0x697   :  { %8260 = vsyncpa [#allocation4 + $0x1], 1 }
 0x698   :  { %8261 = vsyncpa [#allocation5], 1 }
 0x699   :  { %8263 = vsyncpa [#allocation5 + $0x1], 1 }

</bundles_post_ra>
